<compile_context>
chip_gen: v7x
topology: tpu7x:2x2x1
jax: 0.10.0
libtpu: 0.0.40
codegen_flags: <defaults>
</compile_context>

<pallas_src>
import functools

import jax
import jax.numpy as jnp
from jax.experimental import pallas as pl
from jax.experimental.pallas import tpu as pltpu


def _drenc_kernel(ot_ref, ut_ref, score_ref,
                  w1cw_ref, w1u_ref, w2_ref, wqkv_ref, wo_ref, vec_ref,
                  o_ref,
                  *, num_heads: int, head_dim: int, eps: float):
    bb, L, D = ot_ref.shape
    N = bb * L
    f32 = jnp.float32
    cdt = wqkv_ref.dtype                      # MXU operand dtype (f32 or bf16)

    def mm(x, w):                             # matmul, always accumulate in f32
        return jnp.dot(x.astype(w.dtype), w, preferred_element_type=f32)

    # Packed per-feature vectors: biases, LayerNorm params, branch selector (all rows length D).
    V = vec_ref[...]                          # (12, D) f32
    b1_cw, b1_u = V[0:1], V[1:2]
    b2_c, b2_w, b2_u_neg = V[2:3], V[3:4], V[4:5]
    b_q, b_k, b_v, b_o = V[5:6], V[6:7], V[7:8], V[8:9]
    ln_w, ln_b, sel_c = V[9:10], V[10:11], V[11:12]

    ot = ot_ref[...].reshape(N, D)            # stays in compute dtype (bf16 or f32)
    ut = ut_ref[...].reshape(N, D)
    sc = score_ref[...].reshape(N, 1).astype(f32)
    cm = (sc == 1.0).astype(f32)              # correct mask  (score == 1)
    wm = (sc == 0.0).astype(f32)              # wrong mask    (score == 0)

    # ---- fused correct|wrong encoder, first layer + hidden-level branch select ------------------
    h_cw = jnp.maximum(mm(ot, w1cw_ref[...]) + b1_cw, 0.0)          # (N, D) = (N, 2*Dh)
    h_cw = h_cw * (sel_c * cm + (1.0 - sel_c) * wm)                 # row mask * constant selector
    # ---- unchosen encoder, first layer (hidden zero-padded Dh -> D so fused K below is 2*D) -----
    h_u = jnp.maximum(mm(ut, w1u_ref[...]) + b1_u, 0.0)             # (N, D), cols Dh.. are zero
    # ---- fused second layer: d = ot_prime - ut_prime in ONE (N,2D)x(2D,D) matmul ---------------
    h_all = jnp.concatenate([h_cw, h_u], axis=-1)                   # (N, 2*D), lane-aligned concat
    d = mm(h_all, w2_ref[...]) + cm * b2_c + wm * b2_w + b2_u_neg   # (N, D)

    # ---- fused QKV projection (1/sqrt(Dh) pre-folded into the Q columns) ------------------------
    qkv = mm(d, wqkv_ref[...])                                      # (N, 3*D)
    q3 = (qkv[:, :D] + b_q).reshape(bb, L, D)
    k3 = (qkv[:, D:2 * D] + b_k).reshape(bb, L, D)
    v3 = (qkv[:, 2 * D:] + b_v).reshape(bb, L, D)

    # ---- per-head attention (static unroll, H small), outputs gathered into one (N, D) slab -----
    a_heads = []
    for hd in range(num_heads):
        lo = hd * head_dim
        qh = q3[:, :, lo:lo + head_dim].astype(cdt)                 # (bb, L, Dh)
        kh = k3[:, :, lo:lo + head_dim].astype(cdt)
        vh = v3[:, :, lo:lo + head_dim].astype(cdt)
        s = jnp.einsum('bqd,bkd->bqk', qh, kh, preferred_element_type=f32)   # (bb, L, L)
        s = s - jnp.max(s, axis=-1, keepdims=True)
        p = jnp.exp(s)
        p = p / jnp.sum(p, axis=-1, keepdims=True)                  # exact divide (parity)
        a_heads.append(jnp.einsum('bqk,bkd->bqd', p.astype(cdt), vh,
                                  preferred_element_type=f32))      # (bb, L, Dh)
    a_all = jnp.concatenate(a_heads, axis=-1).reshape(N, D)         # (N, D)

    # ---- single full-K output projection + residual ---------------------------------------------
    x = d + mm(a_all, wo_ref[...]) + b_o

    # ---- LayerNorm (fp32) ------------------------------------------------------------------------
    mu = jnp.mean(x, axis=-1, keepdims=True)
    xc = x - mu
    var = jnp.mean(xc * xc, axis=-1, keepdims=True)
    y = xc * jax.lax.rsqrt(var + eps) * ln_w + ln_b

    o_ref[...] = y.reshape(bb, L, D).astype(o_ref.dtype)


def disentangled_response_encoder(ot, ut, score, params, *, num_heads: int = 2,
                                  eps: float = 1e-5, block_b: int | None = None,
                                  use_bf16: bool = True, target_rows: int = 256):
    """Pallas implementation of DisentangledResponseEncoder.forward (eval mode)."""
    B, L, D = ot.shape
    assert D % num_heads == 0 and D % 2 == 0
    head_dim = D // num_heads
    dim_h = D // 2
    assert params["c_w1"].shape == (dim_h, D)

    # Batch rows per grid step: smallest divisor of B with bb*L >= target_rows (fills the MXU M
    # dim and amortizes the per-step cost) while keeping the grid as long as possible (v7x cores /
    # pipelining).  Falls back to the whole batch in one step if no divisor reaches the target.
    if block_b is not None and B % block_b == 0:
        bb = block_b
    else:
        bb = B
        for cand in range(1, B + 1):
            if B % cand == 0 and cand * L >= target_rows:
                bb = cand
                break

    wdt = jnp.bfloat16 if use_bf16 else jnp.float32   # MXU operand dtype (weights + ot/ut)
    f32 = jnp.float32
    scale = 1.0 / (head_dim ** 0.5)

    # ---- one-time weight preprocessing (pre-transpose + fuse), outside the kernel ---------------
    # correct|wrong first layer, fused along output features: (D, 2*Dh) == (D, D)
    w1_cw = jnp.concatenate([params["c_w1"].T, params["w_w1"].T], axis=1).astype(wdt)
    # unchosen first layer, zero-padded to D output features: (D, D)
    w1_u = jnp.concatenate([params["u_w1"].T,
                            jnp.zeros((D, D - dim_h), f32)], axis=1).astype(wdt)
    # fused second layer with the d = ot' - ut' subtraction folded in: (2*D, D)
    w2_all = jnp.concatenate([params["c_w2"].T, params["w_w2"].T, -params["u_w2"].T,
                              jnp.zeros((D - dim_h, D), f32)], axis=0).astype(wdt)
    # fused QKV projection, 1/sqrt(Dh) folded into Q columns: (D, 3*D)
    wq, wk, wv = jnp.split(params["in_proj_w"], 3, axis=0)
    bq, bk, bv = jnp.split(params["in_proj_b"], 3)
    w_qkv = jnp.concatenate([wq.T * scale, wk.T, wv.T], axis=1).astype(wdt)
    w_o = params["out_proj_w"].T.astype(wdt)                                   # (D, D)

    # Packed bias / LayerNorm / selector rows (all length D), one input instead of ~10.
    sel_c = (jnp.arange(D) < dim_h).astype(f32)
    vecs = jnp.stack([
        jnp.concatenate([params["c_b1"], params["w_b1"]]),                     # 0: b1 correct|wrong
        jnp.concatenate([params["u_b1"], jnp.zeros((D - dim_h,), f32)]),       # 1: b1 unchosen (pad)
        params["c_b2"], params["w_b2"], -params["u_b2"],                       # 2,3,4
        bq * scale, bk, bv,                                                    # 5,6,7
        params["out_proj_b"],                                                  # 8
        params["ln_w"], params["ln_b"],                                        # 9,10
        sel_c,                                                                 # 11
    ]).astype(f32)                                                             # (12, D)

    ot_in = ot.astype(wdt)                    # halve grid-varying DMA bytes when bf16
    ut_in = ut.astype(wdt)
    score_f = score.astype(f32).reshape(B, L, 1)

    kernel = functools.partial(_drenc_kernel, num_heads=num_heads, head_dim=head_dim, eps=eps)

    seq_spec = pl.BlockSpec((bb, L, D), lambda i: (i, 0, 0))
    score_spec = pl.BlockSpec((bb, L, 1), lambda i: (i, 0, 0))

    def full(x):
        nd = x.ndim
        return pl.BlockSpec(x.shape, lambda i: (0,) * nd)

    weights = [w1_cw, w1_u, w2_all, w_qkv, w_o, vecs]

    return pl.pallas_call(
        kernel,
        out_shape=jax.ShapeDtypeStruct((B, L, D), ot.dtype),
        grid_spec=pltpu.PrefetchScalarGridSpec(
            num_scalar_prefetch=0,
            grid=(B // bb,),
            in_specs=[seq_spec, seq_spec, score_spec] + [full(w) for w in weights],
            out_specs=seq_spec,
        ),
        compiler_params=pltpu.CompilerParams(dimension_semantics=("parallel",)),
    )(ot_in, ut_in, score_f, *weights)


# --------------------------- pure-JAX reference ---------------------------------------
def _reference(ot, ut, score, params, *, num_heads: int, eps: float = 1e-5):
    def mlp(x, w1, b1, w2, b2):
        h = jnp.maximum(x @ w1.T + b1, 0.0)
        return h @ w2.T + b2

    enc_c = mlp(ot, params["c_w1"], params["c_b1"], params["c_w2"], params["c_b2"])
    enc_w = mlp(ot, params["w_w1"], params["w_b1"], params["w_w2"], params["w_b2"])
    cm = (score == 1)[..., None]
    wm = (score == 0)[..., None]
    ot_prime = jnp.where(cm, enc_c, jnp.where(wm, enc_w, 0.0))
    ut_prime = mlp(ut, params["u_w1"], params["u_b1"], params["u_w2"], params["u_b2"])
    d = ot_prime - ut_prime

    B, L, D = d.shape
    H = num_heads
    Dh = D // H
    wq, wk, wv = jnp.split(params["in_proj_w"], 3, axis=0)
    bq, bk, bv = jnp.split(params["in_proj_b"], 3, axis=0)
    qp = d @ wq.T + bq
    kp = d @ wk.T + bk
    vp = d @ wv.T + bv

    def split(x):
        return x.reshape(B, L, H, Dh).transpose(0, 2, 1, 3)

    qh, kh, vh = split(qp), split(kp), split(vp)
    s = jnp.einsum('bhqd,bhkd->bhqk', qh, kh) / (Dh ** 0.5)
    p = jax.nn.softmax(s, axis=-1)
    a = jnp.einsum('bhqk,bhkd->bhqd', p, vh).transpose(0, 2, 1, 3).reshape(B, L, D)
    out = a @ params["out_proj_w"].T + params["out_proj_b"]
    x = d + out
    mu = jnp.mean(x, axis=-1, keepdims=True)
    var = jnp.mean((x - mu) ** 2, axis=-1, keepdims=True)
    return (x - mu) / jnp.sqrt(var + eps) * params["ln_w"] + params["ln_b"]


def init_params(key, dim):
    dim_h = dim // 2
    ks = jax.random.split(key, 16)

    def lin(k, out_d, in_d):
        return jax.random.normal(k, (out_d, in_d), jnp.float32) / jnp.sqrt(in_d)

    def bias(k, n):
        return jax.random.normal(k, (n,), jnp.float32) * 0.02

    return {
        "c_w1": lin(ks[0], dim_h, dim), "c_b1": bias(ks[1], dim_h),
        "c_w2": lin(ks[2], dim, dim_h), "c_b2": bias(ks[3], dim),
        "w_w1": lin(ks[4], dim_h, dim), "w_b1": bias(ks[5], dim_h),
        "w_w2": lin(ks[6], dim, dim_h), "w_b2": bias(ks[7], dim),
        "u_w1": lin(ks[8], dim_h, dim), "u_b1": bias(ks[9], dim_h),
        "u_w2": lin(ks[10], dim, dim_h), "u_b2": bias(ks[11], dim),
        "in_proj_w": lin(ks[12], 3 * dim, dim), "in_proj_b": bias(ks[13], 3 * dim),
        "out_proj_w": lin(ks[14], dim, dim), "out_proj_b": bias(ks[15], dim),
        "ln_w": jnp.ones((dim,), jnp.float32), "ln_b": jnp.zeros((dim,), jnp.float32),
    }


if __name__ == "__main__":
    # dim_q=128 (lane-dense), 2 heads as in the module; B chosen so the auto-picked block gives
    # 256 tokens per grid step (fills the MXU M dim) and an even 2-step grid (v7x megacore).
    B, L, D, H = 64, 8, 128, 2

    root = jax.random.PRNGKey(0)
    k_ot, k_ut, k_sc, k_p = jax.random.split(root, 4)
    ot = jax.random.normal(k_ot, (B, L, D), jnp.float32)
    ut = jax.random.normal(k_ut, (B, L, D), jnp.float32)
    score = jax.random.randint(k_sc, (B, L), -1, 2)     # {-1, 0, 1}: neither / wrong / correct
    params = init_params(k_p, D)

    with jax.default_matmul_precision("highest"):       # exact-f32 reference for comparison
        ref = _reference(ot, ut, score, params, num_heads=H)

    # Default path: bf16 MXU operands / bf16 input DMA (recommended on all generations).
    out = jax.block_until_ready(disentangled_response_encoder(ot, ut, score, params, num_heads=H))
    assert out.shape == (B, L, D)
    assert bool(jnp.all(jnp.isfinite(out)))
    assert jnp.allclose(out, ref, atol=2.5e-1, rtol=0.0), float(jnp.max(jnp.abs(out - ref)))

    # Full-fp32 path for strict numerical parity with the module.
    out_fp32 = jax.block_until_ready(
        disentangled_response_encoder(ot, ut, score, params, num_heads=H, use_bf16=False))
    assert jnp.allclose(out_fp32, ref, atol=1e-2, rtol=1e-2), float(jnp.max(jnp.abs(out_fp32 - ref)))

    print("KERNEL_OK")
</pallas_src>

<mosaic_0001>
module attributes {stable_mosaic.version = 11 : i64} {
  func.func @_drenc_kernel(%arg0: i32, %arg1: memref<32x8x128xbf16, #tpu.memory_space<vmem>>, %arg2: memref<32x8x128xbf16, #tpu.memory_space<vmem>>, %arg3: memref<32x8x1xf32, #tpu.memory_space<vmem>>, %arg4: memref<128x128xbf16, #tpu.memory_space<vmem>>, %arg5: memref<128x128xbf16, #tpu.memory_space<vmem>>, %arg6: memref<256x128xbf16, #tpu.memory_space<vmem>>, %arg7: memref<128x384xbf16, #tpu.memory_space<vmem>>, %arg8: memref<128x128xbf16, #tpu.memory_space<vmem>>, %arg9: memref<12x128xf32, #tpu.memory_space<vmem>>, %arg10: memref<32x8x128xf32, #tpu.memory_space<vmem>>) attributes {dimension_semantics = [#tpu.dimension_semantics<parallel>], iteration_bounds = array<i64: 2>, scalar_prefetch = 0 : i64, scratch_operands = 0 : i64, tpu.core_type = #tpu.core_type<tc>, window_params = [{transform_indices = @transform_0, window_bounds = array<i64: 32, 8, 128>}, {transform_indices = @transform_1, window_bounds = array<i64: 32, 8, 128>}, {transform_indices = @transform_2, window_bounds = array<i64: 32, 8, 1>}, {pipeline_mode = #tpu.pipeline_mode<synchronous>, transform_indices = @transform_3, window_bounds = array<i64: 128, 128>}, {pipeline_mode = #tpu.pipeline_mode<synchronous>, transform_indices = @transform_4, window_bounds = array<i64: 128, 128>}, {pipeline_mode = #tpu.pipeline_mode<synchronous>, transform_indices = @transform_5, window_bounds = array<i64: 256, 128>}, {pipeline_mode = #tpu.pipeline_mode<synchronous>, transform_indices = @transform_6, window_bounds = array<i64: 128, 384>}, {pipeline_mode = #tpu.pipeline_mode<synchronous>, transform_indices = @transform_7, window_bounds = array<i64: 128, 128>}, {pipeline_mode = #tpu.pipeline_mode<synchronous>, transform_indices = @transform_8, window_bounds = array<i64: 12, 128>}, {transform_indices = @transform_9, window_bounds = array<i64: 32, 8, 128>}]} {
    %c0 = arith.constant 0 : index
    %c0_0 = arith.constant 0 : index
    %0 = vector.load %arg9[%c0, %c0_0] : memref<12x128xf32, #tpu.memory_space<vmem>>, vector<12x128xf32>
    %1 = vector.extract_strided_slice %0 {offsets = [0, 0], sizes = [1, 128], strides = [1, 1]} : vector<12x128xf32> to vector<1x128xf32>
    %2 = vector.extract_strided_slice %0 {offsets = [1, 0], sizes = [1, 128], strides = [1, 1]} : vector<12x128xf32> to vector<1x128xf32>
    %3 = vector.extract_strided_slice %0 {offsets = [2, 0], sizes = [1, 128], strides = [1, 1]} : vector<12x128xf32> to vector<1x128xf32>
    %4 = vector.extract_strided_slice %0 {offsets = [3, 0], sizes = [1, 128], strides = [1, 1]} : vector<12x128xf32> to vector<1x128xf32>
    %5 = vector.extract_strided_slice %0 {offsets = [4, 0], sizes = [1, 128], strides = [1, 1]} : vector<12x128xf32> to vector<1x128xf32>
    %6 = vector.extract_strided_slice %0 {offsets = [5, 0], sizes = [1, 128], strides = [1, 1]} : vector<12x128xf32> to vector<1x128xf32>
    %7 = vector.extract_strided_slice %0 {offsets = [6, 0], sizes = [1, 128], strides = [1, 1]} : vector<12x128xf32> to vector<1x128xf32>
    %8 = vector.extract_strided_slice %0 {offsets = [7, 0], sizes = [1, 128], strides = [1, 1]} : vector<12x128xf32> to vector<1x128xf32>
    %9 = vector.extract_strided_slice %0 {offsets = [8, 0], sizes = [1, 128], strides = [1, 1]} : vector<12x128xf32> to vector<1x128xf32>
    %10 = vector.extract_strided_slice %0 {offsets = [9, 0], sizes = [1, 128], strides = [1, 1]} : vector<12x128xf32> to vector<1x128xf32>
    %11 = vector.extract_strided_slice %0 {offsets = [10, 0], sizes = [1, 128], strides = [1, 1]} : vector<12x128xf32> to vector<1x128xf32>
    %12 = vector.extract_strided_slice %0 {offsets = [11, 0], sizes = [1, 128], strides = [1, 1]} : vector<12x128xf32> to vector<1x128xf32>
    %c0_1 = arith.constant 0 : index
    %c0_2 = arith.constant 0 : index
    %c0_3 = arith.constant 0 : index
    %13 = vector.load %arg1[%c0_1, %c0_2, %c0_3] : memref<32x8x128xbf16, #tpu.memory_space<vmem>>, vector<32x8x128xbf16>
    %14 = vector.shape_cast %13 : vector<32x8x128xbf16> to vector<256x128xbf16>
    %c0_4 = arith.constant 0 : index
    %c0_5 = arith.constant 0 : index
    %c0_6 = arith.constant 0 : index
    %15 = vector.load %arg2[%c0_4, %c0_5, %c0_6] : memref<32x8x128xbf16, #tpu.memory_space<vmem>>, vector<32x8x128xbf16>
    %16 = vector.shape_cast %15 : vector<32x8x128xbf16> to vector<256x128xbf16>
    %c0_7 = arith.constant 0 : index
    %c0_8 = arith.constant 0 : index
    %c0_9 = arith.constant 0 : index
    %17 = vector.load %arg3[%c0_7, %c0_8, %c0_9] : memref<32x8x1xf32, #tpu.memory_space<vmem>>, vector<32x8x1xf32>
    %18 = vector.shape_cast %17 : vector<32x8x1xf32> to vector<256x1xf32>
    %cst = arith.constant 1.000000e+00 : f32
    %19 = vector.broadcast %cst : f32 to vector<256x1xf32>
    %20 = arith.cmpf oeq, %18, %19 : vector<256x1xf32>
    %21 = arith.extui %20 : vector<256x1xi1> to vector<256x1xi32>
    %22 = arith.sitofp %21 : vector<256x1xi32> to vector<256x1xf32>
    %cst_10 = arith.constant 0.000000e+00 : f32
    %23 = vector.broadcast %cst_10 : f32 to vector<256x1xf32>
    %24 = arith.cmpf oeq, %18, %23 : vector<256x1xf32>
    %25 = arith.extui %24 : vector<256x1xi1> to vector<256x1xi32>
    %26 = arith.sitofp %25 : vector<256x1xi32> to vector<256x1xf32>
    %c0_11 = arith.constant 0 : index
    %c0_12 = arith.constant 0 : index
    %27 = vector.load %arg4[%c0_11, %c0_12] : memref<128x128xbf16, #tpu.memory_space<vmem>>, vector<128x128xbf16>
    %cst_13 = arith.constant dense<0.000000e+00> : vector<256x128xf32>
    %28 = tpu.matmul %14, %27, %cst_13 {dimension_numbers = #tpu.dot_dimension_numbers<[1], [0], [0], [1], [0, 0, 1, 1], [], []>} : vector<256x128xbf16>, vector<128x128xbf16>, vector<256x128xf32> -> vector<256x128xf32>
    %29 = vector.broadcast %1 : vector<1x128xf32> to vector<256x128xf32>
    %30 = arith.addf %28, %29 : vector<256x128xf32>
    %cst_14 = arith.constant 0.000000e+00 : f32
    %31 = vector.broadcast %cst_14 : f32 to vector<256x128xf32>
    %32 = arith.maximumf %30, %31 : vector<256x128xf32>
    %33 = vector.broadcast %12 : vector<1x128xf32> to vector<256x128xf32>
    %34 = vector.broadcast %22 : vector<256x1xf32> to vector<256x128xf32>
    %35 = arith.mulf %33, %34 : vector<256x128xf32>
    %cst_15 = arith.constant 1.000000e+00 : f32
    %36 = vector.broadcast %cst_15 : f32 to vector<1x128xf32>
    %37 = arith.subf %36, %12 : vector<1x128xf32>
    %38 = vector.broadcast %37 : vector<1x128xf32> to vector<256x128xf32>
    %39 = vector.broadcast %26 : vector<256x1xf32> to vector<256x128xf32>
    %40 = arith.mulf %38, %39 : vector<256x128xf32>
    %41 = arith.addf %35, %40 : vector<256x128xf32>
    %42 = arith.mulf %32, %41 : vector<256x128xf32>
    %c0_16 = arith.constant 0 : index
    %c0_17 = arith.constant 0 : index
    %43 = vector.load %arg5[%c0_16, %c0_17] : memref<128x128xbf16, #tpu.memory_space<vmem>>, vector<128x128xbf16>
    %cst_18 = arith.constant dense<0.000000e+00> : vector<256x128xf32>
    %44 = tpu.matmul %16, %43, %cst_18 {dimension_numbers = #tpu.dot_dimension_numbers<[1], [0], [0], [1], [0, 0, 1, 1], [], []>} : vector<256x128xbf16>, vector<128x128xbf16>, vector<256x128xf32> -> vector<256x128xf32>
    %45 = vector.broadcast %2 : vector<1x128xf32> to vector<256x128xf32>
    %46 = arith.addf %44, %45 : vector<256x128xf32>
    %cst_19 = arith.constant 0.000000e+00 : f32
    %47 = vector.broadcast %cst_19 : f32 to vector<256x128xf32>
    %48 = arith.maximumf %46, %47 : vector<256x128xf32>
    %49 = tpu.concatenate %42, %48 in 1 : vector<256x128xf32>, vector<256x128xf32> -> vector<256x256xf32>
    %c0_20 = arith.constant 0 : index
    %c0_21 = arith.constant 0 : index
    %50 = vector.load %arg6[%c0_20, %c0_21] : memref<256x128xbf16, #tpu.memory_space<vmem>>, vector<256x128xbf16>
    %51 = arith.truncf %49 : vector<256x256xf32> to vector<256x256xbf16>
    %cst_22 = arith.constant dense<0.000000e+00> : vector<256x128xf32>
    %52 = tpu.matmul %51, %50, %cst_22 {dimension_numbers = #tpu.dot_dimension_numbers<[1], [0], [0], [1], [0, 0, 1, 1], [], []>} : vector<256x256xbf16>, vector<256x128xbf16>, vector<256x128xf32> -> vector<256x128xf32>
    %53 = vector.broadcast %22 : vector<256x1xf32> to vector<256x128xf32>
    %54 = vector.broadcast %3 : vector<1x128xf32> to vector<256x128xf32>
    %55 = arith.mulf %53, %54 : vector<256x128xf32>
    %56 = arith.addf %52, %55 : vector<256x128xf32>
    %57 = vector.broadcast %26 : vector<256x1xf32> to vector<256x128xf32>
    %58 = vector.broadcast %4 : vector<1x128xf32> to vector<256x128xf32>
    %59 = arith.mulf %57, %58 : vector<256x128xf32>
    %60 = arith.addf %56, %59 : vector<256x128xf32>
    %61 = vector.broadcast %5 : vector<1x128xf32> to vector<256x128xf32>
    %62 = arith.addf %60, %61 : vector<256x128xf32>
    %c0_23 = arith.constant 0 : index
    %c0_24 = arith.constant 0 : index
    %63 = vector.load %arg7[%c0_23, %c0_24] : memref<128x384xbf16, #tpu.memory_space<vmem>>, vector<128x384xbf16>
    %64 = arith.truncf %62 : vector<256x128xf32> to vector<256x128xbf16>
    %cst_25 = arith.constant dense<0.000000e+00> : vector<256x384xf32>
    %65 = tpu.matmul %64, %63, %cst_25 {dimension_numbers = #tpu.dot_dimension_numbers<[1], [0], [0], [1], [0, 0, 1, 1], [], []>} : vector<256x128xbf16>, vector<128x384xbf16>, vector<256x384xf32> -> vector<256x384xf32>
    %66 = vector.extract_strided_slice %65 {offsets = [0, 0], sizes = [256, 128], strides = [1, 1]} : vector<256x384xf32> to vector<256x128xf32>
    %67 = vector.broadcast %6 : vector<1x128xf32> to vector<256x128xf32>
    %68 = arith.addf %66, %67 : vector<256x128xf32>
    %69 = vector.shape_cast %68 : vector<256x128xf32> to vector<32x8x128xf32>
    %70 = vector.extract_strided_slice %65 {offsets = [0, 128], sizes = [256, 128], strides = [1, 1]} : vector<256x384xf32> to vector<256x128xf32>
    %71 = vector.broadcast %7 : vector<1x128xf32> to vector<256x128xf32>
    %72 = arith.addf %70, %71 : vector<256x128xf32>
    %73 = vector.shape_cast %72 : vector<256x128xf32> to vector<32x8x128xf32>
    %74 = vector.extract_strided_slice %65 {offsets = [0, 256], sizes = [256, 128], strides = [1, 1]} : vector<256x384xf32> to vector<256x128xf32>
    %75 = vector.broadcast %8 : vector<1x128xf32> to vector<256x128xf32>
    %76 = arith.addf %74, %75 : vector<256x128xf32>
    %77 = vector.shape_cast %76 : vector<256x128xf32> to vector<32x8x128xf32>
    %78 = vector.extract_strided_slice %69 {offsets = [0, 0, 0], sizes = [32, 8, 64], strides = [1, 1, 1]} : vector<32x8x128xf32> to vector<32x8x64xf32>
    %79 = arith.truncf %78 : vector<32x8x64xf32> to vector<32x8x64xbf16>
    %80 = vector.extract_strided_slice %73 {offsets = [0, 0, 0], sizes = [32, 8, 64], strides = [1, 1, 1]} : vector<32x8x128xf32> to vector<32x8x64xf32>
    %81 = arith.truncf %80 : vector<32x8x64xf32> to vector<32x8x64xbf16>
    %82 = vector.extract_strided_slice %77 {offsets = [0, 0, 0], sizes = [32, 8, 64], strides = [1, 1, 1]} : vector<32x8x128xf32> to vector<32x8x64xf32>
    %83 = arith.truncf %82 : vector<32x8x64xf32> to vector<32x8x64xbf16>
    "tpu.trace_start"() <{level = 10 : i32, message = "bqd,bkd->bqk"}> : () -> ()
    %cst_26 = arith.constant dense<0.000000e+00> : vector<32x8x8xf32>
    %84 = tpu.matmul %79, %81, %cst_26 {dimension_numbers = #tpu.dot_dimension_numbers<[2], [2], [1], [1], [0, 0, 0, 1, 1, 1], [0], [0]>} : vector<32x8x64xbf16>, vector<32x8x64xbf16>, vector<32x8x8xf32> -> vector<32x8x8xf32>
    "tpu.trace_stop"() : () -> ()
    %cst_27 = arith.constant dense<0xFF800000> : vector<32x8xf32>
    %85 = vector.multi_reduction <maximumf>, %84, %cst_27 [2] : vector<32x8x8xf32> to vector<32x8xf32>
    %86 = vector.shape_cast %85 : vector<32x8xf32> to vector<32x8x1xf32>
    %87 = vector.broadcast %86 : vector<32x8x1xf32> to vector<32x8x8xf32>
    %88 = arith.subf %84, %87 : vector<32x8x8xf32>
    %89 = math.exp %88 : vector<32x8x8xf32>
    %cst_28 = arith.constant dense<0.000000e+00> : vector<32x8xf32>
    %90 = vector.multi_reduction <add>, %89, %cst_28 [2] : vector<32x8x8xf32> to vector<32x8xf32>
    %91 = vector.shape_cast %90 : vector<32x8xf32> to vector<32x8x1xf32>
    %92 = vector.broadcast %91 : vector<32x8x1xf32> to vector<32x8x8xf32>
    %93 = arith.divf %89, %92 : vector<32x8x8xf32>
    %94 = arith.truncf %93 : vector<32x8x8xf32> to vector<32x8x8xbf16>
    "tpu.trace_start"() <{level = 10 : i32, message = "bqk,bkd->bqd"}> : () -> ()
    %cst_29 = arith.constant dense<0.000000e+00> : vector<32x8x64xf32>
    %95 = tpu.matmul %94, %83, %cst_29 {dimension_numbers = #tpu.dot_dimension_numbers<[2], [1], [1], [2], [0, 0, 0, 1, 1, 2], [0], [0]>} : vector<32x8x8xbf16>, vector<32x8x64xbf16>, vector<32x8x64xf32> -> vector<32x8x64xf32>
    "tpu.trace_stop"() : () -> ()
    %96 = vector.extract_strided_slice %69 {offsets = [0, 0, 64], sizes = [32, 8, 64], strides = [1, 1, 1]} : vector<32x8x128xf32> to vector<32x8x64xf32>
    %97 = arith.truncf %96 : vector<32x8x64xf32> to vector<32x8x64xbf16>
    %98 = vector.extract_strided_slice %73 {offsets = [0, 0, 64], sizes = [32, 8, 64], strides = [1, 1, 1]} : vector<32x8x128xf32> to vector<32x8x64xf32>
    %99 = arith.truncf %98 : vector<32x8x64xf32> to vector<32x8x64xbf16>
    %100 = vector.extract_strided_slice %77 {offsets = [0, 0, 64], sizes = [32, 8, 64], strides = [1, 1, 1]} : vector<32x8x128xf32> to vector<32x8x64xf32>
    %101 = arith.truncf %100 : vector<32x8x64xf32> to vector<32x8x64xbf16>
    "tpu.trace_start"() <{level = 10 : i32, message = "bqd,bkd->bqk"}> : () -> ()
    %cst_30 = arith.constant dense<0.000000e+00> : vector<32x8x8xf32>
    %102 = tpu.matmul %97, %99, %cst_30 {dimension_numbers = #tpu.dot_dimension_numbers<[2], [2], [1], [1], [0, 0, 0, 1, 1, 1], [0], [0]>} : vector<32x8x64xbf16>, vector<32x8x64xbf16>, vector<32x8x8xf32> -> vector<32x8x8xf32>
    "tpu.trace_stop"() : () -> ()
    %cst_31 = arith.constant dense<0xFF800000> : vector<32x8xf32>
    %103 = vector.multi_reduction <maximumf>, %102, %cst_31 [2] : vector<32x8x8xf32> to vector<32x8xf32>
    %104 = vector.shape_cast %103 : vector<32x8xf32> to vector<32x8x1xf32>
    %105 = vector.broadcast %104 : vector<32x8x1xf32> to vector<32x8x8xf32>
    %106 = arith.subf %102, %105 : vector<32x8x8xf32>
    %107 = math.exp %106 : vector<32x8x8xf32>
    %cst_32 = arith.constant dense<0.000000e+00> : vector<32x8xf32>
    %108 = vector.multi_reduction <add>, %107, %cst_32 [2] : vector<32x8x8xf32> to vector<32x8xf32>
    %109 = vector.shape_cast %108 : vector<32x8xf32> to vector<32x8x1xf32>
    %110 = vector.broadcast %109 : vector<32x8x1xf32> to vector<32x8x8xf32>
    %111 = arith.divf %107, %110 : vector<32x8x8xf32>
    %112 = arith.truncf %111 : vector<32x8x8xf32> to vector<32x8x8xbf16>
    "tpu.trace_start"() <{level = 10 : i32, message = "bqk,bkd->bqd"}> : () -> ()
    %cst_33 = arith.constant dense<0.000000e+00> : vector<32x8x64xf32>
    %113 = tpu.matmul %112, %101, %cst_33 {dimension_numbers = #tpu.dot_dimension_numbers<[2], [1], [1], [2], [0, 0, 0, 1, 1, 2], [0], [0]>} : vector<32x8x8xbf16>, vector<32x8x64xbf16>, vector<32x8x64xf32> -> vector<32x8x64xf32>
    "tpu.trace_stop"() : () -> ()
    %114 = tpu.concatenate %95, %113 in 2 : vector<32x8x64xf32>, vector<32x8x64xf32> -> vector<32x8x128xf32>
    %115 = vector.shape_cast %114 : vector<32x8x128xf32> to vector<256x128xf32>
    %c0_34 = arith.constant 0 : index
    %c0_35 = arith.constant 0 : index
    %116 = vector.load %arg8[%c0_34, %c0_35] : memref<128x128xbf16, #tpu.memory_space<vmem>>, vector<128x128xbf16>
    %117 = arith.truncf %115 : vector<256x128xf32> to vector<256x128xbf16>
    %cst_36 = arith.constant dense<0.000000e+00> : vector<256x128xf32>
    %118 = tpu.matmul %117, %116, %cst_36 {dimension_numbers = #tpu.dot_dimension_numbers<[1], [0], [0], [1], [0, 0, 1, 1], [], []>} : vector<256x128xbf16>, vector<128x128xbf16>, vector<256x128xf32> -> vector<256x128xf32>
    %119 = arith.addf %62, %118 : vector<256x128xf32>
    %120 = vector.broadcast %9 : vector<1x128xf32> to vector<256x128xf32>
    %121 = arith.addf %119, %120 : vector<256x128xf32>
    %cst_37 = arith.constant dense<0.000000e+00> : vector<256xf32>
    %122 = vector.multi_reduction <add>, %121, %cst_37 [1] : vector<256x128xf32> to vector<256xf32>
    %123 = vector.shape_cast %122 : vector<256xf32> to vector<256x1xf32>
    %cst_38 = arith.constant 1.280000e+02 : f32
    %124 = vector.broadcast %cst_38 : f32 to vector<256x1xf32>
    %125 = arith.divf %123, %124 : vector<256x1xf32>
    %126 = vector.broadcast %125 : vector<256x1xf32> to vector<256x128xf32>
    %127 = arith.subf %121, %126 : vector<256x128xf32>
    %128 = arith.mulf %127, %127 : vector<256x128xf32>
    %cst_39 = arith.constant dense<0.000000e+00> : vector<256xf32>
    %129 = vector.multi_reduction <add>, %128, %cst_39 [1] : vector<256x128xf32> to vector<256xf32>
    %130 = vector.shape_cast %129 : vector<256xf32> to vector<256x1xf32>
    %cst_40 = arith.constant 1.280000e+02 : f32
    %131 = vector.broadcast %cst_40 : f32 to vector<256x1xf32>
    %132 = arith.divf %130, %131 : vector<256x1xf32>
    %cst_41 = arith.constant 9.99999974E-6 : f32
    %133 = vector.broadcast %cst_41 : f32 to vector<256x1xf32>
    %134 = arith.addf %132, %133 : vector<256x1xf32>
    %135 = math.rsqrt %134 : vector<256x1xf32>
    %136 = vector.broadcast %135 : vector<256x1xf32> to vector<256x128xf32>
    %137 = arith.mulf %127, %136 : vector<256x128xf32>
    %138 = vector.broadcast %10 : vector<1x128xf32> to vector<256x128xf32>
    %139 = arith.mulf %137, %138 : vector<256x128xf32>
    %140 = vector.broadcast %11 : vector<1x128xf32> to vector<256x128xf32>
    %141 = arith.addf %139, %140 : vector<256x128xf32>
    %142 = vector.shape_cast %141 : vector<256x128xf32> to vector<32x8x128xf32>
    %c0_42 = arith.constant 0 : index
    %c0_43 = arith.constant 0 : index
    %c0_44 = arith.constant 0 : index
    %143 = vector.load %arg10[%c0_42, %c0_43, %c0_44] : memref<32x8x128xf32, #tpu.memory_space<vmem>>, vector<32x8x128xf32>
    tpu.vector_store %arg10[%c0_42, %c0_43, %c0_44], %142 {strides = array<i32>} : memref<32x8x128xf32, #tpu.memory_space<vmem>>, vector<32x8x128xf32>,
    return
  }
  func.func @transform_0(%arg0: i32) -> (i32, i32, i32) {
    %c0_i32 = arith.constant 0 : i32
    %c0_i32_0 = arith.constant 0 : i32
    %c0_i32_1 = arith.constant 0 : i32
    return %arg0, %c0_i32, %c0_i32_0 : i32, i32, i32
  }
  func.func @transform_1(%arg0: i32) -> (i32, i32, i32) {
    %c0_i32 = arith.constant 0 : i32
    %c0_i32_0 = arith.constant 0 : i32
    %c0_i32_1 = arith.constant 0 : i32
    return %arg0, %c0_i32, %c0_i32_0 : i32, i32, i32
  }
  func.func @transform_2(%arg0: i32) -> (i32, i32, i32) {
    %c0_i32 = arith.constant 0 : i32
    %c0_i32_0 = arith.constant 0 : i32
    %c0_i32_1 = arith.constant 0 : i32
    return %arg0, %c0_i32, %c0_i32_0 : i32, i32, i32
  }
  func.func @transform_3(%arg0: i32) -> (i32, i32) {
    %c0_i32 = arith.constant 0 : i32
    %c0_i32_0 = arith.constant 0 : i32
    %c0_i32_1 = arith.constant 0 : i32
    return %c0_i32, %c0_i32_0 : i32, i32
  }
  func.func @transform_4(%arg0: i32) -> (i32, i32) {
    %c0_i32 = arith.constant 0 : i32
    %c0_i32_0 = arith.constant 0 : i32
    %c0_i32_1 = arith.constant 0 : i32
    return %c0_i32, %c0_i32_0 : i32, i32
  }
  func.func @transform_5(%arg0: i32) -> (i32, i32) {
    %c0_i32 = arith.constant 0 : i32
    %c0_i32_0 = arith.constant 0 : i32
    %c0_i32_1 = arith.constant 0 : i32
    return %c0_i32, %c0_i32_0 : i32, i32
  }
  func.func @transform_6(%arg0: i32) -> (i32, i32) {
    %c0_i32 = arith.constant 0 : i32
    %c0_i32_0 = arith.constant 0 : i32
    %c0_i32_1 = arith.constant 0 : i32
    return %c0_i32, %c0_i32_0 : i32, i32
  }
  func.func @transform_7(%arg0: i32) -> (i32, i32) {
    %c0_i32 = arith.constant 0 : i32
    %c0_i32_0 = arith.constant 0 : i32
    %c0_i32_1 = arith.constant 0 : i32
    return %c0_i32, %c0_i32_0 : i32, i32
  }
  func.func @transform_8(%arg0: i32) -> (i32, i32) {
    %c0_i32 = arith.constant 0 : i32
    %c0_i32_0 = arith.constant 0 : i32
    %c0_i32_1 = arith.constant 0 : i32
    return %c0_i32, %c0_i32_0 : i32, i32
  }
  func.func @transform_9(%arg0: i32) -> (i32, i32, i32) {
    %c0_i32 = arith.constant 0 : i32
    %c0_i32_0 = arith.constant 0 : i32
    %c0_i32_1 = arith.constant 0 : i32
    return %arg0, %c0_i32, %c0_i32_0 : i32, i32, i32
  }
}

</mosaic_0001>

<bundles_post_ra>
// kernel: tpu_custom_call.1
= control target key start
LH: loop header
LB: loop body
LE: loop exit
PB: predicated region body
PF: predicated region fallthrough
CT: control target
= control target key end

     0   :  { %s18069_s0 = inlined_call_operand.vmem [shape: bf16[64,8,128], index: 0, kind: input, shape index: {}]   ;;  %s18070_s1 = inlined_call_operand.vmem [shape: bf16[64,8,128], index: 1, kind: input, shape index: {}]   ;;  %s18071_s2 = inlined_call_operand.vmem [shape: f32[64,8,1], index: 2, kind: input, shape index: {}]   ;;  %s18072_s3 = inlined_call_operand.hbm [shape: bf16[128,128], index: 3, kind: input, shape index: {}]   ;;  %s18073_s4 = inlined_call_operand.hbm [shape: bf16[128,128], index: 4, kind: input, shape index: {}]   ;;  %s18074_s5 = inlined_call_operand.hbm [shape: bf16[256,128], index: 5, kind: input, shape index: {}]   ;;  %s18075_s6 = inlined_call_operand.hbm [shape: bf16[128,384], index: 6, kind: input, shape index: {}]   ;;  %s18076_s7 = inlined_call_operand.hbm [shape: bf16[128,128], index: 7, kind: input, shape index: {}]   ;;  %s18077_s8 = inlined_call_operand.vmem [shape: f32[12,128], index: 8, kind: input, shape index: {}]   ;;  %s18078_s9 = inlined_call_operand.hbm [shape: f32[64,8,128], index: 9, kind: output, shape index: {}]  }
   0x1   :  { %18241 = sst [smem:[#allocation132_spill]] %s18073_s4 }
   0x2   :  { %14 = vsyncpa [#allocation3], 0 }
   0x3   :  { %15 = vsyncpa [#allocation6], 0 }
   0x4   :  { %16 = vsyncpa [#allocation9], 0 }
   0x5   :  { %17 = vsyncpa [#allocation4], 0 }
   0x6   :  { %19 = vsyncpa [#allocation4 + $0x1], 0  ;;  %s13937_s30 = smov 0   ;;  %s13939_s10 = smov 0  }
   0x7   :  { %s13941_s11 = smov 0   ;;  %s13943_s12 = smov 0  }
   0x8 LB: > { %18242 = sst [smem:[#allocation16_spill]] %s13865_s11  ;;  %s13958_s13 = sadd.s32 4294967295, %s13869_s12   ;;  %s13869_s12 = sphi %s13943_s12, %s18736_s12   ;;  %s13865_s11 = sphi %s13941_s11, %s18738_s11   ;;  %s13861_s10 = sphi %s13939_s10, %s18740_s10   ;;  %s13857_s30 = sphi %s13937_s30, %s18739_s30  }
   0x9   : > { %s11131_s14 = sadd.s32 4294967294, %s13869_s12   ;;  %s13962_s15 = sadd.s32 1, %s13869_s12  }
   0xa   : > { %18243 = sst [smem:[#allocation17_spill]] %s13962_s15  ;;  %s236_s16 = sadd.s32 1, %s13865_s11 }
   0xb   : > { %s233_s17 = ssub.s32 %s13869_s12, %s13962_s15  ;;  %p246_p0 = scmp.ne.s32.totalorder %s13865_s11, %s13861_s10 }
   0xc   : > { %p234_p1 = scmp.eq.s32.totalorder %s233_s17, 0  ;;  %p247_p2 = scmp.eq.s32.totalorder %s13958_s13, 1 }
   0xd   : > { %p252_p3 = scmp.ne.s32.totalorder %s13861_s10, %s13857_s30  ;;  %p253_p4 = scmp.eq.s32.totalorder %s11131_s14, 1 }
   0xe   : > { %s13973_s18 = scalar_select %p234_p1, %s13865_s11, %s236_s16  }
   0xf   : > { %p13975_p5 = por %p247_p2, %p246_p0  ;;  %p13979_p6 = por %p253_p4, %p252_p3 }
  0x10   : > { %18244 = sst [smem:[#allocation18_spill]] %s13973_s18  ;;  %p11132_p7 = scmp.ge.s32.totalorder %s13869_s12, 1 }
  0x11   : > { %s18245_s19 = scalar_select %p13975_p5, 1, 0 }
  0x12   : > { %s18246_s20 = scalar_select %p13979_p6, 1, 0 }
  0x13   : > { %p260_p8 = scmp.lt.s32.totalorder %s13869_s12, 3  ;;  %p18079_p9 = scmp.eq.s32.totalorder %s13958_s13, 0 }
  0x14   : > { %18247 = sst [smem:[#allocation19_spill]] %s18246_s20  ;;  %s13871_s22 = smov [#allocation5]  }
  0x15   : > { %p13986_p10 = pnand %p11132_p7, %p260_p8  ;;  %s285_s23 = sshll.u32 %s13871_s22, 4  ;;  %s286_s23 = int_to_ptr.vmem [resolvable:$true] %s285_s23 }
  0x16   : > { %s13872_s25 = smov [#allocation8]   ;;  %s18250_s4 = sld [smem:[#allocation132_spill]] }
  0x17   : > { %s18248_s21 = scalar_select %p13986_p10, 1, 0 }
  0x18   : > { %p12908_p11 = pneg %p13986_p10  ;;  %s311_s26 = sshll.u32 %s13872_s25, 4  ;;  %s13998_s26 = int_to_ptr.vmem [resolvable:$true] %s311_s26 }
  0x1a   : > { %p13994_p12 = pnand %p18079_p9, %p12908_p11 }
  0x1c   : > { %s13655_s29 = scalar_lea.hbm %s18250_s4, 1024  ;;  %p14008_p0 = pneg %p13994_p12 }
  0x1d   : > { %p13656_p13 = scmp.ne.s32.totalorder %s18250_s4, %s13655_s29  ;;  %p13662_p3 = scmp.lt.u32.totalorder %s13655_s29, %s18250_s4 }
  0x1f   : > { %p13658_p1 = pnand %p14008_p0, %p13656_p13 }
  0x21   : > { %p13659_p2 = pneg %p13658_p1 }
  0x23   : > { %p13664_p4 = pnand %p13662_p3, %p13659_p2 }
  0x25   : > { %13667 = shalt.err (!%p13664_p4)
}
  0x26   : > { %s13668_s27 = scalar_lea.vmem %s286_s23, 1024  ;;  %p13676_p9 = scmp.lt.s32.totalorder %s286_s23, %s286_s23 }
  0x27   : > { %p13669_p7 = scmp.ne.s32.totalorder %s286_s23, %s13668_s27  ;;  %p13677_p6 = scmp.lt.s32.totalorder %s13668_s27, %s13668_s27 }
  0x29   : > { %p13671_p8 = pnand %p13669_p7, %p14008_p0  ;;  %p13678_p5 = por %p13677_p6, %p13676_p9 }
  0x2b   : > { %p13672_p11 = pneg %p13671_p8 }
  0x2d   : > { %p13679_p10 = pnand %p13678_p5, %p13672_p11 }
  0x2f   : > { %13682 = shalt.err (!%p13679_p10)
}
  0x30   : > { %s18086_s28 = smov 64   ;;  %s18088_s14 = smov 4  }
  0x31   : > { %12914 = dma.hbm_to_vmem [thread:$0]  (!%p13994_p12), %s18250_s4, 1024, %s286_s23, [#allocation6], %s18086_s28, %s18086_s28, %s18088_s14  }
  0x32   : > { %s13683_s18 = scalar_lea.hbm %s18075_s6, 3072 }
  0x33   : > { %p13684_p5 = scmp.ne.s32.totalorder %s18075_s6, %s13683_s18  ;;  %p13690_p10 = scmp.lt.u32.totalorder %s13683_s18, %s18075_s6 }
  0x35   : > { %p13686_p6 = pnand %p13684_p5, %p14008_p0 }
  0x37   : > { %p13687_p9 = pneg %p13686_p6 }
  0x39   : > { %p13692_p13 = pnand %p13690_p10, %p13687_p9 }
  0x3b   : > { %13695 = shalt.err (!%p13692_p13)
}
  0x3c   : > { %s13696_s23 = scalar_lea.vmem %s13998_s26, 3072  ;;  %p13704_p4 = scmp.lt.s32.totalorder %s13998_s26, %s13998_s26 }
  0x3d   : > { %p13697_p1 = scmp.ne.s32.totalorder %s13998_s26, %s13696_s23  ;;  %p13705_p7 = scmp.lt.s32.totalorder %s13696_s23, %s13696_s23 }
  0x3f   : > { %p13699_p2 = pnand %p13697_p1, %p14008_p0  ;;  %p13706_p8 = por %p13705_p7, %p13704_p4 }
  0x41   : > { %p13700_p3 = pneg %p13699_p2 }
  0x43   : > { %p13707_p11 = pnand %p13706_p8, %p13700_p3 }
  0x45   : > { %13710 = shalt.err (!%p13707_p11)
}
  0x46   : > { %s13875_s11 = smov 192   ;;  %s13876_s15 = smov 12  }
  0x47   : > { %12920 = dma.hbm_to_vmem [thread:$0]  (!%p13994_p12), %s18075_s6, 3072, %s13998_s26, [#allocation9], %s13875_s11, %s13875_s11, %s13876_s15  }
  0x48   : > { %s13877_s29 = smov [#allocation2]   ;;  %s13878_s22 = smov [#allocation7]  }
  0x49   : > { %s272_s16 = sshll.u32 %s13877_s29, 4  ;;  %s298_s25 = sshll.u32 %s13878_s22, 4  ;;  %s273_s16 = int_to_ptr.vmem [resolvable:$true] %s272_s16  ;;  %s14050_s25 = int_to_ptr.vmem [resolvable:$true] %s298_s25 }
  0x4a   : > { %s13711_s28 = scalar_lea.hbm %s18072_s3, 1024 }
  0x4b   : > { %p13712_p5 = scmp.ne.s32.totalorder %s18072_s3, %s13711_s28  ;;  %p13718_p10 = scmp.lt.u32.totalorder %s13711_s28, %s18072_s3 }
  0x4d   : > { %p13714_p6 = pnand %p13712_p5, %p14008_p0 }
  0x4f   : > { %p13715_p9 = pneg %p13714_p6 }
  0x51   : > { %p13720_p13 = pnand %p13718_p10, %p13715_p9 }
  0x53   : > { %13723 = shalt.err (!%p13720_p13)
}
  0x54   : > { %s13724_s11 = scalar_lea.vmem %s273_s16, 1024  ;;  %p13732_p4 = scmp.lt.s32.totalorder %s273_s16, %s273_s16 }
  0x55   : > { %p13725_p1 = scmp.ne.s32.totalorder %s273_s16, %s13724_s11  ;;  %p13733_p7 = scmp.lt.s32.totalorder %s13724_s11, %s13724_s11 }
  0x57   : > { %p13727_p2 = pnand %p13725_p1, %p14008_p0  ;;  %p13734_p8 = por %p13733_p7, %p13732_p4 }
  0x59   : > { %p13728_p3 = pneg %p13727_p2 }
  0x5b   : > { %p13735_p11 = pnand %p13734_p8, %p13728_p3 }
  0x5d   : > { %13738 = shalt.err (!%p13735_p11)
}
  0x5e   : > { %s18252_s4 = smov 4   ;;  %s18253_s14 = smov 64  }
  0x5f   : > { %12911 = dma.hbm_to_vmem [thread:$0]  (!%p13994_p12), %s18072_s3, 1024, %s273_s16, [#allocation3], %s18253_s14, %s18253_s14, %s18252_s4  }
  0x60   : > { %s13739_s22 = scalar_lea.hbm %s18074_s5, 2048 }
  0x61   : > { %p13740_p5 = scmp.ne.s32.totalorder %s18074_s5, %s13739_s22  ;;  %p13746_p10 = scmp.lt.u32.totalorder %s13739_s22, %s18074_s5 }
  0x63   : > { %p13742_p6 = pnand %p13740_p5, %p14008_p0 }
  0x65   : > { %p13743_p9 = pneg %p13742_p6 }
  0x67   : > { %p13748_p13 = pnand %p13746_p10, %p13743_p9 }
  0x69   : > { %13751 = shalt.err (!%p13748_p13)
}
  0x6a   : > { %s13752_s16 = scalar_lea.vmem %s14050_s25, 2048  ;;  %p13760_p4 = scmp.lt.s32.totalorder %s14050_s25, %s14050_s25 }
  0x6b   : > { %p13753_p1 = scmp.ne.s32.totalorder %s14050_s25, %s13752_s16  ;;  %p13761_p7 = scmp.lt.s32.totalorder %s13752_s16, %s13752_s16 }
  0x6d   : > { %p13755_p2 = pnand %p13753_p1, %p14008_p0  ;;  %p13762_p8 = por %p13761_p7, %p13760_p4 }
  0x6f   : > { %p13756_p3 = pneg %p13755_p2 }
  0x71   : > { %p13763_p11 = pnand %p13762_p8, %p13756_p3 }
  0x73   : > { %13766 = shalt.err (!%p13763_p11)
}
  0x74   : > { %12917 = dma.hbm_to_vmem [thread:$0]  (!%p13994_p12), %s18074_s5, 2048, %s14050_s25, [#allocation6], %s18253_s14, %s18253_s14, %s18252_s4  }
  0x75   : > { %s13879_s28 = smov [#allocation10]   ;;  %s13767_s27 = scalar_lea.hbm %s18076_s7, 1024 }
  0x76   : > { %s324_s20 = sshll.u32 %s13879_s28, 4  ;;  %p13768_p5 = scmp.ne.s32.totalorder %s18076_s7, %s13767_s27  ;;  %s325_s20 = int_to_ptr.vmem [resolvable:$true] %s324_s20 }
  0x77   : > { %p13774_p10 = scmp.lt.u32.totalorder %s13767_s27, %s18076_s7 }
  0x78   : > { %p13770_p6 = pnand %p13768_p5, %p14008_p0 }
  0x7a   : > { %p13771_p9 = pneg %p13770_p6 }
  0x7c   : > { %p13776_p13 = pnand %p13774_p10, %p13771_p9 }
  0x7e   : > { %13779 = shalt.err (!%p13776_p13)
}
  0x7f   : > { %s13780_s25 = scalar_lea.vmem %s325_s20, 1024  ;;  %p13788_p4 = scmp.lt.s32.totalorder %s325_s20, %s325_s20 }
  0x80   : > { %p13781_p1 = scmp.ne.s32.totalorder %s325_s20, %s13780_s25  ;;  %p13789_p7 = scmp.lt.s32.totalorder %s13780_s25, %s13780_s25 }
  0x82   : > { %p13783_p2 = pnand %p13781_p1, %p14008_p0  ;;  %p13790_p8 = por %p13789_p7, %p13788_p4 }
  0x84   : > { %p13784_p3 = pneg %p13783_p2 }
  0x86   : > { %p13791_p11 = pnand %p13790_p8, %p13784_p3 }
  0x88   : > { %13794 = shalt.err (!%p13791_p11)
}
  0x89   : > { %12923 = dma.hbm_to_vmem [thread:$0]  (!%p13994_p12), %s18076_s7, 1024, %s325_s20, [#allocation9], %s18253_s14, %s18253_s14, %s18252_s4  }
  0x8a   : > { %p18254_p5 = scmp.ne.s32.totalorder %s18248_s21, 0 }
  0x8c   : > { %370 = sbr.rel (%p18254_p5) target bundleno = 3197 (0xc7d), region = 56 }
  0x93   : > { %p18255_p0 = scmp.eq.s32.totalorder %s13958_s13, 0 }
  0x95   : > { %13840 = dma.done.wait (%p18255_p0), [#allocation3], 1024   ;;  %p18256_p6 = pmov %p18255_p0 }
  0x96   : > { %p18257_p9 = pmov %p18255_p0 }
  0x97   : > { %13842 = vsyncadd (%p18256_p6), [#allocation3], 4294966272 }
  0x98   : > { %13844 = dma.done.wait (%p18257_p9), [#allocation6], 3072   ;;  %p18258_p10 = pmov %p18255_p0 }
  0x99   : > { %p18259_p13 = pmov %p18255_p0 }
  0x9a   : > { %13846 = vsyncadd (%p18258_p10), [#allocation6], 4294964224 }
  0x9b   : > { %13848 = dma.done.wait (%p18259_p13), [#allocation9], 4096   ;;  %p18260_p12 = pmov %p18255_p0 }
  0x9c   : > { %v18092_v0 = vmov 0   ;;  %s11146_s21 = sshll.u32 %s13958_s13, 5  ;;  %v13228_v1 = vld [vmem:[#allocation2] sm:$0xff]   ;;  %v13230_v3 = vld [vmem:[#allocation2 + $0x8] sm:$0xff]   ;;  %v13232_v5 = vld [vmem:[#allocation2 + $0x10] sm:$0xff]   ;;  %v18090_v25 = vmov 0.0  }
  0x9d   : > { %13850 = vsyncadd (%p18260_p12), [#allocation9], 4294963200  ;;  %12997 = vset.pattern.permute.xlu1 %v18092_v0  ;;  %12986 = vset.pattern.permute.xlu0 %v18092_v0  ;;  %v13229_v2 = vld [vmem:[#allocation5] sm:$0xff]   ;;  %p433_p1 = scmp.lt.s32.totalorder %s11146_s21, 63  ;;  %v13231_v4 = vld [vmem:[#allocation5 + $0x8] sm:$0xff]   ;;  %s13883_s4 = smov 64  }
  0x9e   : > { %11910 = vmatprep.subr.bf16.mxu0 %v13228_v1  ;;  %11958 = vmatprep.subr.bf16.mxu1 %v13229_v2  ;;  %v13233_v6 = vld [vmem:[#allocation5 + $0x10] sm:$0xff]   ;;  %v13234_v7 = vld [vmem:[#allocation2 + $0x18] sm:$0xff]   ;;  %v13236_v9 = vld [vmem:[#allocation2 + $0x20] sm:$0xff]   ;;  %s429_s20 = sand.u32 1, %s13861_s10   ;;  %s11445_s27 = sshll.u32 %s13958_s13, 12 }
  0x9f   : > { %11911 = vmatpush3.bf16.msra.mxu0 %v13228_v1  ;;  %11959 = vmatpush3.bf16.msra.mxu1 %v13229_v2  ;;  %s18742_s21 = smov (!%p433_p1, %s11146_s21), 63  ;;  %v13235_v8 = vld [vmem:[#allocation5 + $0x18] sm:$0xff]   ;;  %v13237_v10 = vld [vmem:[#allocation5 + $0x20] sm:$0xff]   ;;  %v13238_v11 = vld [vmem:[#allocation2 + $0x28] sm:$0xff]   ;;  %s18019_s16 = scalar_lea.hbm %s18078_s9, %s11445_s27 }
  0xa0   : > { %11912 = vmatprep.subr.bf16.mxu0 %v13230_v3  ;;  %11960 = vmatprep.subr.bf16.mxu1 %v13231_v4  ;;  %s11147_s24 = sshll.u32 %s18742_s21, 2  ;;  %v13239_v12 = vld [vmem:[#allocation5 + $0x28] sm:$0xff]   ;;  %v13240_v15 = vld [vmem:[#allocation2 + $0x30] sm:$0xff]   ;;  %s11151_s22 = sshll.u32 %s18742_s21, 3  ;;  %v13242_v17 = vld [vmem:[#allocation2 + $0x38] sm:$0xff]  }
  0xa1   : > { %s14143_s14 = scalar_lea.vmem %s18069_s0, %s11147_s24  ;;  %s14148_s29 = scalar_lea.vmem %s18070_s1, %s11147_s24  ;;  %v13241_v16 = vld [vmem:[#allocation5 + $0x30] sm:$0xff]   ;;  %v13243_v18 = vld [vmem:[#allocation5 + $0x38] sm:$0xff]  }
  0xa2   : > { %v13244_v13 = vld [vmem:[%s14143_s14] sm:$0xff]   ;;  %s14156_s18 = scalar_lea.vmem %s18071_s2, %s11151_s22  ;;  %v13246_v19 = vld [vmem:[%s14143_s14 + $0x8] sm:$0xff]   ;;  %v13248_v28 = vld [vmem:[%s14143_s14 + $0x10] sm:$0xff]   ;;  %s18028_s13 = scalar_lea.sflag [#allocation4], %s429_s20 }
  0xa3   : > { %11913 = vmatpush3.bf16.msra.mxu0 %v13230_v3  ;;  %11961 = vmatpush3.bf16.msra.mxu1 %v13231_v4  ;;  %v13245_v14 = vld [vmem:[%s14148_s29] sm:$0xff]   ;;  %v520_v20 = vld [vmem:[%s14156_s18 + $0x10] sm:$0xff]  ;;  %v521_v21 = vld [vmem:[%s14156_s18 + $0x18] sm:$0xff]  ;;  %p18733_p3 = scmp.ne.s32.totalorder %s18245_s19, 0  ;;  %s13884_s11 = smov [#allocation11]  }
  0xa4   : > { %11914 = vmatprep.subr.bf16.mxu0 %v13232_v5  ;;  %11962 = vmatprep.subr.bf16.mxu1 %v13233_v6  ;;  %v518_v22 = vld [vmem:[%s14156_s18] sm:$0xff]  ;;  %v13247_v23 = vld [vmem:[%s14148_s29 + $0x8] sm:$0xff]   ;;  %vm552_vm0 = vcmp.eq.f32.partialorder %v520_v20, 1.0  ;;  %vm553_vm1 = vcmp.eq.f32.partialorder %v521_v21, 1.0  ;;  %vm648_vm2 = vcmp.eq.f32.partialorder %v520_v20, 0.0  ;;  %vm649_vm3 = vcmp.eq.f32.partialorder %v521_v21, 0.0 }
  0xa5   : > { %11926 = vmatprep.mubr.bf16.mxu0 %v13244_v13  ;;  %11974 = vmatprep.mubr.bf16.mxu1 %v13245_v14  ;;  %v519_v24 = vld [vmem:[%s14156_s18 + $0x8] sm:$0xff]  ;;  %v11154_v26 = vsel %vm552_vm0, 1.0, %v18090_v25  ;;  %v11155_v27 = vsel %vm553_vm1, 1.0, %v18090_v25  ;;  %vm550_vm4 = vcmp.eq.f32.partialorder %v518_v22, 1.0  ;;  %vm646_vm6 = vcmp.eq.f32.partialorder %v518_v22, 0.0  ;;  %v13250_v32 = vld [vmem:[%s14148_s29 + $0x10] sm:$0xff]  }
  0xa6   : > { %vm551_vm5 = vcmp.eq.f32.partialorder %v519_v24, 1.0  ;;  %v12998_v29 = vpack.i.bf16 %v11155_v27, %v11154_v26  ;;  %v11152_v30 = vsel %vm550_vm4, 1.0, %v18090_v25  ;;  %vm647_vm7 = vcmp.eq.f32.partialorder %v519_v24, 0.0  ;;  %v522_v40 = vld [vmem:[%s14156_s18 + $0x20] sm:$0xff]  ;;  %v523_v41 = vld [vmem:[%s14156_s18 + $0x28] sm:$0xff]  ;;  %v13249_v42 = vld [vmem:[%s14143_s14 + $0x18] sm:$0xff]  }
  0xa7   : > { %11915 = vmatpush3.bf16.msra.mxu0 %v13232_v5  ;;  %11963 = vmatpush3.bf16.msra.mxu1 %v13233_v6  ;;  %v11153_v31 = vsel %vm551_vm5, 1.0, %v18090_v25  ;;  %v11186_v34 = vsel %vm648_vm2, 1.0, %v18090_v25  ;;  %v11187_v35 = vsel %vm649_vm3, 1.0, %v18090_v25  ;;  %v11184_v37 = vsel %vm646_vm6, 1.0, %v18090_v25  ;;  %v13251_v47 = vld [vmem:[%s14148_s29 + $0x18] sm:$0xff]   ;;  %v13252_v50 = vld [vmem:[%s14143_s14 + $0x20] sm:$0xff]  }
  0xa8   : > { %11916 = vmatprep.subr.bf16.mxu0 %v13234_v7  ;;  %11964 = vmatprep.subr.bf16.mxu1 %v13235_v8  ;;  %v12987_v33 = vpack.i.bf16 %v11153_v31, %v11152_v30  ;;  %v13003_v36 = vpack.i.bf16 %v11187_v35, %v11186_v34  ;;  %v11185_v38 = vsel %vm647_vm7, 1.0, %v18090_v25  ;;  %vm650_vm8 = vcmp.eq.f32.partialorder %v522_v40, 0.0  ;;  %v13254_v51 = vld [vmem:[%s14148_s29 + $0x20] sm:$0xff]   ;;  %v524_v52 = vld [vmem:[%s14156_s18 + $0x30] sm:$0xff]  ;;  %v525_v53 = vld [vmem:[%s14156_s18 + $0x38] sm:$0xff]  ;;  %s13799_s15 = sshll.u32 %s13884_s11, 4  ;;  %s13800_s15 = int_to_ptr.vmem [resolvable:$false] %s13799_s15 }
  0xa9   : > { %12999 = vperm.xlu1 %12997, %v12998_v29   ;;  %v12992_v39 = vpack.i.bf16 %v11185_v38, %v11184_v37  ;;  %vm651_vm9 = vcmp.eq.f32.partialorder %v523_v41, 0.0  ;;  %vm554_vm10 = vcmp.eq.f32.partialorder %v522_v40, 1.0  ;;  %vm555_vm11 = vcmp.eq.f32.partialorder %v523_v41, 1.0  ;;  %v526_v60 = vld [vmem:[%s14156_s18 + $0x40] sm:$0xff]  ;;  %v527_v61 = vld [vmem:[%s14156_s18 + $0x48] sm:$0xff]  ;;  %v13259_v24 = vld [vmem:[%s14148_s29 + $0x38] sm:$0xff]  }
  0xaa   : > { %12988 = vperm.xlu0 %12986, %v12987_v33   ;;  %v11188_v43 = vsel %vm650_vm8, 1.0, %v18090_v25  ;;  %v11189_v44 = vsel %vm651_vm9, 1.0, %v18090_v25  ;;  %v11156_v45 = vsel %vm554_vm10, 1.0, %v18090_v25  ;;  %v11157_v46 = vsel %vm555_vm11, 1.0, %v18090_v25  ;;  %v13253_v62 = vld [vmem:[%s14143_s14 + $0x28] sm:$0xff]   ;;  %v13262_v29 = vld [vmem:[%s14148_s29 + $0x40] sm:$0xff]  }
  0xab   : > { %11917 = vmatpush3.bf16.msra.mxu0 %v13234_v7  ;;  %11965 = vmatpush3.bf16.msra.mxu1 %v13235_v8  ;;  %v13013_v48 = vpack.i.bf16 %v11189_v44, %v11188_v43  ;;  %v13008_v49 = vpack.i.bf16 %v11157_v46, %v11156_v45  ;;  %vm652_vm12 = vcmp.eq.f32.partialorder %v524_v52, 0.0  ;;  %vm653_vm13 = vcmp.eq.f32.partialorder %v525_v53, 0.0  ;;  %v13255_v4 = vld [vmem:[%s14148_s29 + $0x28] sm:$0xff]   ;;  %v13256_v7 = vld [vmem:[%s14143_s14 + $0x30] sm:$0xff]   ;;  %v533_v31 = vld [vmem:[%s14156_s18 + $0x78] sm:$0xff]  ;;  %s13801_s21 = scalar_lea.vmem %s13800_s15, 8192 }
  0xac   : > { %11918 = vmatprep.subr.bf16.mxu0 %v13236_v9  ;;  %11966 = vmatprep.subr.bf16.mxu1 %v13237_v10  ;;  %vm556_vm14 = vcmp.eq.f32.partialorder %v524_v52, 1.0  ;;  %vm557_vm15 = vcmp.eq.f32.partialorder %v525_v53, 1.0  ;;  %v11190_v54 = vsel %vm652_vm12, 1.0, %v18090_v25  ;;  %v11191_v55 = vsel %vm653_vm13, 1.0, %v18090_v25  ;;  %v13258_v8 = vld [vmem:[%s14148_s29 + $0x30] sm:$0xff]   ;;  %v534_v38 = vld [vmem:[%s14156_s18 + $0x80] sm:$0xff] }
  0xad   : > { %13004 = vperm.xlu1 %12997, %v13003_v36   ;;  %v11158_v56 = vsel %vm556_vm14, 1.0, %v18090_v25  ;;  %v11159_v57 = vsel %vm557_vm15, 1.0, %v18090_v25  ;;  %v13023_v58 = vpack.i.bf16 %v11191_v55, %v11190_v54  ;;  %vm654_vm0 = vcmp.eq.f32.partialorder %v526_v60, 0.0  ;;  %v532_v30 = vld [vmem:[%s14156_s18 + $0x70] sm:$0xff]  ;;  %v13261_v40 = vld [vmem:[%s14143_s14 + $0x48] sm:$0xff]   ;;  %v538_v52 = vld [vmem:[%s14156_s18 + $0xa0] sm:$0xff] }
  0xae   : > { %12993 = vperm.xlu0 %12986, %v12992_v39   ;;  %v13018_v59 = vpack.i.bf16 %v11159_v57, %v11158_v56  ;;  %vm655_vm1 = vcmp.eq.f32.partialorder %v527_v61, 0.0  ;;  %vm558_vm2 = vcmp.eq.f32.partialorder %v526_v60, 1.0  ;;  %vm559_vm3 = vcmp.eq.f32.partialorder %v527_v61, 1.0  ;;  %v535_v39 = vld [vmem:[%s14156_s18 + $0x88] sm:$0xff]  ;;  %v13264_v46 = vld [vmem:[%s14143_s14 + $0x50] sm:$0xff]  }
  0xaf   : > { %11919 = vmatpush3.bf16.msra.mxu0 %v13236_v9  ;;  %11967 = vmatpush3.bf16.msra.mxu1 %v13237_v10  ;;  %v11192_v63 = vsel %vm654_vm0, 1.0, %v18090_v25  ;;  %v11193_v1 = vsel %vm655_vm1, 1.0, %v18090_v25  ;;  %v11160_v2 = vsel %vm558_vm2, 1.0, %v18090_v25  ;;  %v11161_v3 = vsel %vm559_vm3, 1.0, %v18090_v25  ;;  %v528_v9 = vld [vmem:[%s14156_s18 + $0x50] sm:$0xff]  ;;  %v529_v10 = vld [vmem:[%s14156_s18 + $0x58] sm:$0xff] }
  0xb0   : > { %11920 = vmatprep.subr.bf16.mxu0 %v13238_v11  ;;  %11968 = vmatprep.subr.bf16.mxu1 %v13239_v12  ;;  %v13033_v5 = vpack.i.bf16 %v11193_v1, %v11192_v63  ;;  %v13028_v6 = vpack.i.bf16 %v11161_v3, %v11160_v2  ;;  %vm656_vm4 = vcmp.eq.f32.partialorder %v528_v9, 0.0  ;;  %vm657_vm5 = vcmp.eq.f32.partialorder %v529_v10, 0.0  ;;  %v13263_v41 = vld [vmem:[%s14148_s29 + $0x48] sm:$0xff]   ;;  %v540_v60 = vld [vmem:[%s14156_s18 + $0xb0] sm:$0xff]  ;;  %v541_v63 = vld [vmem:[%s14156_s18 + $0xb8] sm:$0xff] }
  0xb1   : > { %13014 = vperm.xlu1 %12997, %v13013_v48   ;;  %vm560_vm6 = vcmp.eq.f32.partialorder %v528_v9, 1.0  ;;  %vm561_vm7 = vcmp.eq.f32.partialorder %v529_v10, 1.0  ;;  %vm660_vm12 = vcmp.eq.f32.partialorder %v532_v30, 0.0  ;;  %vm661_vm13 = vcmp.eq.f32.partialorder %v533_v31, 0.0  ;;  %v539_v53 = vld [vmem:[%s14156_s18 + $0xa8] sm:$0xff]  ;;  %v542_v3 = vld [vmem:[%s14156_s18 + $0xc0] sm:$0xff] }
  0xb2   : > { %13009 = vperm.xlu0 %12986, %v13008_v49   ;;  %v11162_v13 = vsel %vm560_vm6, 1.0, %v18090_v25  ;;  %v11163_v14 = vsel %vm561_vm7, 1.0, %v18090_v25  ;;  %vm564_vm14 = vcmp.eq.f32.partialorder %v532_v30, 1.0  ;;  %vm565_vm15 = vcmp.eq.f32.partialorder %v533_v31, 1.0  ;;  %v13266_v49 = vld [vmem:[%s14148_s29 + $0x50] sm:$0xff]   ;;  %v13271_v30 = vld [vmem:[%s14148_s29 + $0x68] sm:$0xff]  }
  0xb3   : > { %11921 = vmatpush3.bf16.msra.mxu0 %v13238_v11  ;;  %11969 = vmatpush3.bf16.msra.mxu1 %v13239_v12  ;;  %v11194_v11 = vsel %vm656_vm4, 1.0, %v18090_v25  ;;  %v11195_v12 = vsel %vm657_vm5, 1.0, %v18090_v25  ;;  %v11199_v33 = vsel %vm661_vm13, 1.0, %v18090_v25  ;;  %v11166_v34 = vsel %vm564_vm14, 1.0, %v18090_v25  ;;  %v13272_v31 = vld [vmem:[%s14143_s14 + $0x70] sm:$0xff]  }
  0xb4   : > { %11922 = vmatprep.subr.bf16.mxu0 %v13240_v15  ;;  %11970 = vmatprep.subr.bf16.mxu1 %v13241_v16  ;;  %v11167_v35 = vsel %vm565_vm15, 1.0, %v18090_v25  ;;  %vm662_vm0 = vcmp.eq.f32.partialorder %v534_v38, 0.0  ;;  %vm663_vm1 = vcmp.eq.f32.partialorder %v535_v39, 0.0  ;;  %vm566_vm2 = vcmp.eq.f32.partialorder %v534_v38, 1.0 }
  0xb5   : > { %13024 = vperm.xlu1 %12997, %v13023_v58   ;;  %v13058_v37 = vpack.i.bf16 %v11167_v35, %v11166_v34  ;;  %vm567_vm3 = vcmp.eq.f32.partialorder %v535_v39, 1.0  ;;  %v11201_v43 = vsel %vm663_vm1, 1.0, %v18090_v25  ;;  %v11168_v44 = vsel %vm566_vm2, 1.0, %v18090_v25 }
  0xb6   : > { %13019 = vperm.xlu0 %12986, %v13018_v59   ;;  %v11169_v45 = vsel %vm567_vm3, 1.0, %v18090_v25  ;;  %vm669_vm13 = vcmp.eq.f32.partialorder %v541_v63, 0.0  ;;  %vm572_vm14 = vcmp.eq.f32.partialorder %v540_v60, 1.0  ;;  %vm573_vm15 = vcmp.eq.f32.partialorder %v541_v63, 1.0  ;;  %v13285_v63 = vld [vmem:[#allocation7 + $0x20] sm:$0xff]  }
  0xb7   : > { %11923 = vmatpush3.bf16.msra.mxu0 %v13240_v15  ;;  %11971 = vmatpush3.bf16.msra.mxu1 %v13241_v16  ;;  %v13043_v15 = vpack.i.bf16 %v11195_v12, %v11194_v11  ;;  %v13038_v16 = vpack.i.bf16 %v11163_v14, %v11162_v13  ;;  %v13068_v48 = vpack.i.bf16 %v11169_v45, %v11168_v44  ;;  %v11207_v10 = vsel %vm669_vm13, 1.0, %v18090_v25  ;;  %v544_v11 = vld [vmem:[%s14156_s18 + $0xd0] sm:$0xff]  ;;  %v13268_v12 = vld [vmem:[%s14143_s14 + $0x60] sm:$0xff]  }
  0xb8   : > { %11924 = vmatprep.subr.bf16.mxu0 %v13242_v17  ;;  %11972 = vmatprep.subr.bf16.mxu1 %v13243_v18  ;;  %v13270_v13 = vld [vmem:[%s14148_s29 + $0x60] sm:$0xff]   ;;  %v11174_v14 = vsel %vm572_vm14, 1.0, %v18090_v25  ;;  %vm574_vm2 = vcmp.eq.f32.partialorder %v542_v3, 1.0 }
  0xb9   : > { %13034 = vperm.xlu1 %12997, %v13033_v5   ;;  %v543_v5 = vld [vmem:[%s14156_s18 + $0xc8] sm:$0xff] }
  0xba   : > { %13029 = vperm.xlu0 %12986, %v13028_v6   ;;  %v13265_v6 = vld [vmem:[%s14143_s14 + $0x58] sm:$0xff]   ;;  %vm671_vm1 = vcmp.eq.f32.partialorder %v543_v5, 0.0  ;;  %vm575_vm3 = vcmp.eq.f32.partialorder %v543_v5, 1.0 }
  0xbb   : > { %11925 = vmatpush3.bf16.msra.mxu0 %v13242_v17  ;;  %11973 = vmatpush3.bf16.msra.mxu1 %v13243_v18  ;;  %v530_v17 = vld [vmem:[%s14156_s18 + $0x60] sm:$0xff]  ;;  %v531_v18 = vld [vmem:[%s14156_s18 + $0x68] sm:$0xff]  ;;  %v13290_v5 = vld [vmem:[#allocation7 + $0x78] sm:$0xff]  }
  0xbc   : > { %vm658_vm8 = vcmp.eq.f32.partialorder %v530_v17, 0.0  ;;  %vm659_vm9 = vcmp.eq.f32.partialorder %v531_v18, 0.0  ;;  %vm562_vm10 = vcmp.eq.f32.partialorder %v530_v17, 1.0  ;;  %vm563_vm11 = vcmp.eq.f32.partialorder %v531_v18, 1.0  ;;  %v546_v17 = vld [vmem:[%s14156_s18 + $0xe0] sm:$0xff] }
  0xbd   : > { %13044 = vperm.xlu1 %12997, %v13043_v15   ;;  %v11196_v20 = vsel %vm658_vm8, 1.0, %v18090_v25  ;;  %v11197_v21 = vsel %vm659_vm9, 1.0, %v18090_v25  ;;  %v11164_v22 = vsel %vm562_vm10, 1.0, %v18090_v25  ;;  %vm666_vm8 = vcmp.eq.f32.partialorder %v538_v52, 0.0 }
  0xbe   : > { %11927 = vmatmul.mubr.bf16.vlgmr.msra.gmra.mrb[0].mxu0 %v13246_v19  ;;  %11975 = vmatmul.mubr.bf16.vlgmr.msra.gmra.mrb[0].mxu1 %v13247_v23  ;;  %v13257_v19 = vld [vmem:[%s14143_s14 + $0x38] sm:$0xff]   ;;  %v11165_v23 = vsel %vm563_vm11, 1.0, %v18090_v25  ;;  %v13053_v26 = vpack.i.bf16 %v11197_v21, %v11196_v20  ;;  %vm667_vm9 = vcmp.eq.f32.partialorder %v539_v53, 0.0  ;;  %v11204_v61 = vsel %vm666_vm8, 1.0, %v18090_v25  ;;  %v14263_v20 = vld [vmem:[%s14156_s18 + $0xf0] sm:$0xff] }
  0xbf   : > { %11930 = vmatprep.mubr.bf16.mxu0 %v13248_v28  ;;  %11978 = vmatprep.mubr.bf16.mxu1 %v13250_v32  ;;  %v13048_v27 = vpack.i.bf16 %v11165_v23, %v11164_v22  ;;  %v13260_v28 = vld [vmem:[%s14143_s14 + $0x40] sm:$0xff]   ;;  %v11198_v32 = vsel %vm660_vm12, 1.0, %v18090_v25  ;;  %vm570_vm10 = vcmp.eq.f32.partialorder %v538_v52, 1.0  ;;  %vm571_vm11 = vcmp.eq.f32.partialorder %v539_v53, 1.0 }
  0xc0   : > { %13039 = vperm.xlu0 %12986, %v13038_v16   ;;  %v13063_v36 = vpack.i.bf16 %v11199_v33, %v11198_v32  ;;  %v11172_v1 = vsel %vm570_vm10, 1.0, %v18090_v25  ;;  %v11173_v2 = vsel %vm571_vm11, 1.0, %v18090_v25  ;;  %vm668_vm12 = vcmp.eq.f32.partialorder %v540_v60, 0.0  ;;  %v545_v16 = vld [vmem:[%s14156_s18 + $0xd8] sm:$0xff]  ;;  %v13274_v33 = vld [vmem:[%s14148_s29 + $0x70] sm:$0xff]  }
  0xc1   : > { %13054 = vperm.xlu1 %12997, %v13053_v26   ;;  %v11206_v9 = vsel %vm668_vm12, 1.0, %v18090_v25  ;;  %v11175_v15 = vsel %vm573_vm15, 1.0, %v18090_v25  ;;  %v11209_v23 = vsel %vm671_vm1, 1.0, %v18090_v25  ;;  %v11176_v26 = vsel %vm574_vm2, 1.0, %v18090_v25  ;;  %v13282_v60 = vld [vmem:[#allocation7 + $0x58] sm:$0xff]  }
  0xc2   : > { %v13103_v18 = vpack.i.bf16 %v11207_v10, %v11206_v9  ;;  %v13098_v21 = vpack.i.bf16 %v11175_v15, %v11174_v14  ;;  %vm674_vm8 = vcmp.eq.f32.partialorder %v546_v17, 0.0  ;;  %vm578_vm10 = vcmp.eq.f32.partialorder %v546_v17, 1.0 }
  0xc3   : > { %vm676_vm12 = vcmp.eq.f32.partialorder %v14263_v20, 0.0  ;;  %v11212_v39 = vsel %vm674_vm8, 1.0, %v18090_v25  ;;  %vm580_vm14 = vcmp.eq.f32.partialorder %v14263_v20, 1.0  ;;  %vm3108_vm1 = vcmask 523264  }
  0xc4   : > { %13049 = vperm.xlu0 %12986, %v13048_v27   ;;  %v11177_v27 = vsel %vm575_vm3, 1.0, %v18090_v25  ;;  %v11214_v44 = vsel %vm676_vm12, 1.0, %v18090_v25  ;;  %v11182_v53 = vsel %vm580_vm14, 1.0, %v18090_v25  ;;  %vm4969_vm2 = vcmask 1043456  }
  0xc5   : > { %13064 = vperm.xlu1 %12997, %v13063_v36   ;;  %v13108_v34 = vpack.i.bf16 %v11177_v27, %v11176_v26  ;;  %vm4581_vm3 = vcmask 64512  }
  0xc6   : > { %11931 = vmatmul.mubr.bf16.gmra.mrb[4].mxu0 %v13249_v42  ;;  %11979 = vmatmul.mubr.bf16.gmra.mrb[4].mxu1 %v13251_v47  ;;  %v11200_v42 = vsel %vm662_vm0, 1.0, %v18090_v25  ;;  %vm670_vm0 = vcmp.eq.f32.partialorder %v542_v3, 0.0  ;;  %v13288_v3 = vld [vmem:[#allocation7 + $0x70] sm:$0xff]  }
  0xc7   : > { %11934 = vmatprep.mubr.bf16.mxu0 %v13252_v50  ;;  %11982 = vmatprep.mubr.bf16.mxu1 %v13254_v51  ;;  %v13073_v47 = vpack.i.bf16 %v11201_v43, %v11200_v42  ;;  %v536_v50 = vld [vmem:[%s14156_s18 + $0x90] sm:$0xff]  ;;  %v537_v51 = vld [vmem:[%s14156_s18 + $0x98] sm:$0xff]  ;;  %v11208_v22 = vsel %vm670_vm0, 1.0, %v18090_v25  ;;  %vm13882_vm0 = vmmov 0  }
  0xc8   : > { %13059 = vperm.xlu0 %12986, %v13058_v37   ;;  %vm664_vm4 = vcmp.eq.f32.partialorder %v536_v50, 0.0  ;;  %vm665_vm5 = vcmp.eq.f32.partialorder %v537_v51, 0.0  ;;  %vm568_vm6 = vcmp.eq.f32.partialorder %v536_v50, 1.0  ;;  %vm569_vm7 = vcmp.eq.f32.partialorder %v537_v51, 1.0  ;;  %v13276_v37 = vld [vmem:[#allocation7 + $0x40] sm:$0xff]   ;;  %v13275_v50 = vld [vmem:[%s14148_s29 + $0x78] sm:$0xff]  }
  0xc9   : > { %13074 = vperm.xlu1 %12997, %v13073_v47   ;;  %v11202_v54 = vsel %vm664_vm4, 1.0, %v18090_v25  ;;  %v11203_v55 = vsel %vm665_vm5, 1.0, %v18090_v25  ;;  %v11170_v56 = vsel %vm568_vm6, 1.0, %v18090_v25  ;;  %v11171_v57 = vsel %vm569_vm7, 1.0, %v18090_v25  ;;  %11494 = vmatprep.subr.bf16.mxu0 %v13276_v37  ;;  %v13277_v47 = vld [vmem:[#allocation7] sm:$0xff]  }
  0xca   : > { %v13083_v58 = vpack.i.bf16 %v11203_v55, %v11202_v54  ;;  %v13078_v59 = vpack.i.bf16 %v11171_v57, %v11170_v56  ;;  %vm672_vm4 = vcmp.eq.f32.partialorder %v544_v11, 0.0  ;;  %vm673_vm5 = vcmp.eq.f32.partialorder %v545_v16, 0.0  ;;  %12870 = vmatprep.subr.bf16.mxu1 %v13276_v37  ;;  %11495 = vmatpush3.bf16.msra.mxu0 %v13277_v47  ;;  %v13279_v55 = vld [vmem:[#allocation7 + $0x8] sm:$0xff]   ;;  %v13280_v56 = vld [vmem:[#allocation7 + $0x50] sm:$0xff]  }
  0xcb   : > { %vm576_vm6 = vcmp.eq.f32.partialorder %v544_v11, 1.0  ;;  %vm577_vm7 = vcmp.eq.f32.partialorder %v545_v16, 1.0  ;;  %v13113_v32 = vpack.i.bf16 %v11209_v23, %v11208_v22  ;;  %v11211_v35 = vsel %vm673_vm5, 1.0, %v18090_v25  ;;  %12878 = vmatpush3.bf16.msra.mxu1 %v13277_v47  ;;  %v14307_v11 = vld [vmem:[%s18077_s8] sm:$0xff] }
  0xcc   : > { %13069 = vperm.xlu0 %12986, %v13068_v48   ;;  %v11178_v36 = vsel %vm576_vm6, 1.0, %v18090_v25  ;;  %v11179_v38 = vsel %vm577_vm7, 1.0, %v18090_v25  ;;  %v13278_v48 = vld [vmem:[#allocation7 + $0x48] sm:$0xff]  }
  0xcd   : > { %13084 = vperm.xlu1 %12997, %v13083_v58   ;;  %v13118_v45 = vpack.i.bf16 %v11179_v38, %v11178_v36  ;;  %11496 = vmatprep.subr.bf16.mxu0 %v13278_v48 }
  0xce   : > { %11935 = vmatmul.mubr.bf16.gmra.mrb[8].mxu0 %v13253_v62  ;;  %11983 = vmatmul.mubr.bf16.gmra.mrb[8].mxu1 %v13255_v4  ;;  %v11205_v62 = vsel %vm667_vm9, 1.0, %v18090_v25 }
  0xcf   : > { %11938 = vmatprep.mubr.bf16.mxu0 %v13256_v7  ;;  %11986 = vmatprep.mubr.bf16.mxu1 %v13258_v8  ;;  %v13093_v4 = vpack.i.bf16 %v11205_v62, %v11204_v61  ;;  %v13267_v7 = vld [vmem:[%s14148_s29 + $0x58] sm:$0xff]   ;;  %v13088_v8 = vpack.i.bf16 %v11173_v2, %v11172_v1  ;;  %v13284_v62 = vld [vmem:[#allocation7 + $0x60] sm:$0xff]   ;;  %v13286_v1 = vld [vmem:[#allocation7 + $0x68] sm:$0xff]   ;;  %s11145_s29 = sshll.u32 %s429_s20, 8 }
  0xd0   : > { %13079 = vperm.xlu0 %12986, %v13078_v59   ;;  %12871 = vmatprep.subr.bf16.mxu1 %v13278_v48  ;;  %v13281_v59 = vld [vmem:[#allocation7 + $0x10] sm:$0xff]   ;;  %v13283_v61 = vld [vmem:[#allocation7 + $0x18] sm:$0xff]   ;;  %v13287_v2 = vld [vmem:[#allocation7 + $0x28] sm:$0xff]   ;;  %s17893_s22 = scalar_lea.vmem [#allocation11], %s11145_s29 }
  0xd1   : > { %13094 = vperm.xlu1 %12997, %v13093_v4   ;;  %11497 = vmatpush3.bf16.msra.mxu0 %v13279_v55  ;;  %v13289_v4 = vld [vmem:[#allocation7 + $0x30] sm:$0xff]   ;;  %s10995_s23 = sshll.u32 %s17893_s22, 4  ;;  %s18021_s23 = int_to_ptr.vmem [resolvable:$true] %s10995_s23 }
  0xd2   : > { %11498 = vmatprep.subr.bf16.mxu0 %v13280_v56  ;;  %12879 = vmatpush3.bf16.msra.mxu1 %v13279_v55  ;;  %s13795_s25 = scalar_lea.vmem %s18021_s23, 4096  ;;  %p13802_p8 = scmp.lt.s32.totalorder %s18021_s23, %s13800_s15 }
  0xd3   : > { %12872 = vmatprep.subr.bf16.mxu1 %v13280_v56  ;;  %p13796_p2 = scmp.ne.s32.totalorder %s18021_s23, %s13795_s25  ;;  %p13803_p11 = scmp.lt.s32.totalorder %s13801_s21, %s13795_s25 }
  0xd4   : > { %13089 = vperm.xlu0 %12986, %v13088_v8  }
  0xd5   : > { %13104 = vperm.xlu1 %12997, %v13103_v18   ;;  %11499 = vmatpush3.bf16.msra.mxu0 %v13281_v59  ;;  %p13797_p4 = pnand %p13796_p2, %p18733_p3  ;;  %p13804_p5 = por %p13803_p11, %p13802_p8 }
  0xd6   : > { %11939 = vmatmul.mubr.bf16.gmra.mrb[12].mxu0 %v13257_v19  ;;  %11987 = vmatmul.mubr.bf16.gmra.mrb[12].mxu1 %v13259_v24  ;;  %v547_v19 = vld [vmem:[%s14156_s18 + $0xe8] sm:$0xff]  ;;  %v549_v24 = vld [vmem:[%s14156_s18 + $0xf8] sm:$0xff] }
  0xd7   : > { %11942 = vmatprep.mubr.bf16.mxu0 %v13260_v28  ;;  %11990 = vmatprep.mubr.bf16.mxu1 %v13262_v29  ;;  %v13269_v28 = vld [vmem:[%s14143_s14 + $0x68] sm:$0xff]   ;;  %v11210_v29 = vsel %vm672_vm4, 1.0, %v18090_v25  ;;  %vm675_vm9 = vcmp.eq.f32.partialorder %v547_v19, 0.0  ;;  %vm579_vm11 = vcmp.eq.f32.partialorder %v547_v19, 1.0  ;;  %vm677_vm13 = vcmp.eq.f32.partialorder %v549_v24, 0.0  ;;  %p13798_p7 = pneg %p13797_p4 }
  0xd8   : > { %13099 = vperm.xlu0 %12986, %v13098_v21   ;;  %v11181_v42 = vsel %vm579_vm11, 1.0, %v18090_v25  ;;  %v13123_v43 = vpack.i.bf16 %v11211_v35, %v11210_v29  ;;  %vm581_vm15 = vcmp.eq.f32.partialorder %v549_v24, 1.0  ;;  %11500 = vmatprep.subr.bf16.mxu0 %v13282_v60 }
  0xd9   : > { %13114 = vperm.xlu1 %12997, %v13113_v32   ;;  %v11183_v54 = vsel %vm581_vm15, 1.0, %v18090_v25  ;;  %11501 = vmatpush3.bf16.msra.mxu0 %v13283_v61  ;;  %p13805_p0 = pnand %p13804_p5, %p13798_p7 }
  0xda   : > { %v13138_v58 = vpack.i.bf16 %v11183_v54, %v11182_v53  ;;  %12880 = vmatpush3.bf16.msra.mxu1 %v13281_v59  ;;  %11502 = vmatprep.subr.bf16.mxu0 %v13284_v62 }
  0xdb   : > { %12873 = vmatprep.subr.bf16.mxu1 %v13282_v60 }
  0xdc   : > { %13109 = vperm.xlu0 %12986, %v13108_v34  }
  0xdd   : > { %13124 = vperm.xlu1 %12997, %v13123_v43   ;;  %11503 = vmatpush3.bf16.msra.mxu0 %v13285_v63 }
  0xde   : > { %11943 = vmatmul.mubr.bf16.gmra.mrb[16].mxu0 %v13261_v40  ;;  %11991 = vmatmul.mubr.bf16.gmra.mrb[16].mxu1 %v13263_v41  ;;  %v11213_v40 = vsel %vm675_vm9, 1.0, %v18090_v25  ;;  %v11180_v41 = vsel %vm578_vm10, 1.0, %v18090_v25 }
  0xdf   : > { %11946 = vmatprep.mubr.bf16.mxu0 %v13264_v46  ;;  %11994 = vmatprep.mubr.bf16.mxu1 %v13266_v49  ;;  %v11215_v46 = vsel %vm677_vm13, 1.0, %v18090_v25  ;;  %v13273_v49 = vld [vmem:[%s14143_s14 + $0x78] sm:$0xff]   ;;  %v13133_v51 = vpack.i.bf16 %v11213_v40, %v11212_v39  ;;  %v13128_v52 = vpack.i.bf16 %v11181_v42, %v11180_v41 }
  0xe0   : > { %13119 = vperm.xlu0 %12986, %v13118_v45   ;;  %v13143_v57 = vpack.i.bf16 %v11215_v46, %v11214_v44  ;;  %12881 = vmatpush3.bf16.msra.mxu1 %v13283_v61 }
  0xe1   : > { %13134 = vperm.xlu1 %12997, %v13133_v51   ;;  %12874 = vmatprep.subr.bf16.mxu1 %v13284_v62 }
  0xe2   : > { %11504 = vmatprep.subr.bf16.mxu0 %v13286_v1 }
  0xe3   : > { %11505 = vmatpush3.bf16.msra.mxu0 %v13287_v2 }
  0xe4   : > { %13129 = vperm.xlu0 %12986, %v13128_v52   ;;  %12882 = vmatpush3.bf16.msra.mxu1 %v13285_v63 }
  0xe5   : > { %13144 = vperm.xlu1 %12997, %v13143_v57   ;;  %12875 = vmatprep.subr.bf16.mxu1 %v13286_v1 }
  0xe6   : > { %11947 = vmatmul.mubr.bf16.gmra.mrb[20].mxu0 %v13265_v6  ;;  %11995 = vmatmul.mubr.bf16.gmra.mrb[20].mxu1 %v13267_v7  ;;  %v13291_v6 = vld [vmem:[#allocation7 + $0x38] sm:$0xff]   ;;  %v758_v7 = vlaneseq }
  0xe7   : > { %11950 = vmatprep.mubr.bf16.mxu0 %v13268_v12  ;;  %11998 = vmatprep.mubr.bf16.mxu1 %v13270_v13 }
  0xe8   : > { %13139 = vperm.xlu0 %12986, %v13138_v58   ;;  %12883 = vmatpush3.bf16.msra.mxu1 %v13287_v2  ;;  %v14299_v8 = vshrl.u32 %v758_v7, 7 }
  0xe9   : > { %11506 = vmatprep.subr.bf16.mxu0 %v13288_v3  ;;  %12876 = vmatprep.subr.bf16.mxu1 %v13288_v3 }
  0xea   : > { %11507 = vmatpush3.bf16.msra.mxu0 %v13289_v4  ;;  %18261 = vst [vmem:[#allocation20_spill] sm:$0xff] %v14299_v8  ;;  %v1101_v9 = vsub.s32 3, %v14299_v8  ;;  %v18096_v57 = vsub.s32 2, %v14299_v8 }
  0xeb   : > { %11508 = vmatprep.subr.bf16.mxu0 %v13290_v5 }
  0xec   : > { %12884 = vmatpush3.bf16.msra.mxu1 %v13289_v4  ;;  %v14314_v14 = vrot.slane %v14307_v11, %v1101_v9  ;;  %v14449_v3 = vrot.slane %v14307_v11, %v18096_v57 }
  0xed   : > { %12877 = vmatprep.subr.bf16.mxu1 %v13290_v5 }
  0xee   : > { %11951 = vmatmul.mubr.bf16.gmra.mrb[24].mxu0 %v13269_v28  ;;  %11999 = vmatmul.mubr.bf16.gmra.mrb[24].mxu1 %v13271_v30 }
  0xef   : > { %11954 = vmatprep.mubr.bf16.mxu0 %v13272_v31  ;;  %12002 = vmatprep.mubr.bf16.mxu1 %v13274_v33 }
  0xf0   : > { %11509 = vmatpush3.bf16.msra.mxu0 %v13291_v6  ;;  %12885 = vmatpush3.bf16.msra.mxu1 %v13291_v6 }
  0xf6   : > { %11955 = vmatmul.mubr.bf16.gmra.mrb[28].mxu0 %v13273_v49  ;;  %12003 = vmatmul.mubr.bf16.gmra.mrb[28].mxu1 %v13275_v50  ;;  %v453_v49 = vld [vmem:[%s18077_s8 + $0x8] sm:$0xf] }
  0xf7   : > { %v1295_v54 = vsub.f32 1.0, %v453_v49  ;;  %v14444_v2 = vrot.slane %v453_v49, %v1101_v9 }
  0xf9   : > { %v14432_v62 = vrot.slane %v1295_v54, %v1101_v9 }
 0x128   : > { %v14302_v10 = vpop.permute.xlu1 %12999 }
 0x129   : > { %18262 = vst [vmem:[#allocation21_spill] sm:$0xff] %v14302_v10  ;;  %v14309_v12 = vpop.permute.xlu0 %12988 }
 0x12c   : > { %v14311_v13 = vpop.permute.xlu1 %13004 }
 0x12d   : > { %v18109_v15 = vunpack.i.h.bf16 %v14311_v13  ;;  %v18110_v16 = vunpack.i.l.bf16 %v14311_v13  ;;  %v14318_v17 = vpop.permute.xlu0 %12993 }
 0x12e   : > { %v18107_v18 = vunpack.i.h.bf16 %v14318_v17  ;;  %v18108_v19 = vunpack.i.l.bf16 %v14318_v17 }
 0x12f   : > { %v14325_v20 = vmul.f32 %v18110_v16, %v14314_v14  ;;  %v14330_v21 = vmul.f32 %v18109_v15, %v14314_v14 }
 0x130   : > { %v14335_v22 = vmul.f32 %v18108_v19, %v14314_v14  ;;  %v14340_v23 = vmul.f32 %v18107_v18, %v14314_v14  ;;  %v14342_v24 = vpop.permute.xlu1 %13014 }
 0x131   : > { %18263 = vst [vmem:[#allocation22_spill] sm:$0xff] %v14325_v20  ;;  %18264 = vst [vmem:[#allocation23_spill] sm:$0xff] %v14330_v21  ;;  %v18105_v26 = vunpack.i.h.bf16 %v14342_v24  ;;  %v18106_v27 = vunpack.i.l.bf16 %v14342_v24  ;;  %v14346_v28 = vpop.permute.xlu0 %13009 }
 0x132   : > { %18265 = vst [vmem:[#allocation24_spill] sm:$0xff] %v14335_v22  ;;  %18266 = vst [vmem:[#allocation25_spill] sm:$0xff] %v14340_v23 }
 0x133   : > { %18267 = vst [vmem:[#allocation26_spill] sm:$0xff] %v14346_v28  ;;  %v14351_v29 = vmul.f32 %v18106_v27, %v14314_v14  ;;  %v14356_v30 = vmul.f32 %v18105_v26, %v14314_v14 }
 0x134   : > { %v14358_v31 = vpop.permute.xlu1 %13024 }
 0x135   : > { %18268 = vst [vmem:[#allocation27_spill] sm:$0xff] %v14351_v29  ;;  %18269 = vst [vmem:[#allocation28_spill] sm:$0xff] %v14356_v30  ;;  %v18103_v32 = vunpack.i.h.bf16 %v14358_v31  ;;  %v18104_v33 = vunpack.i.l.bf16 %v14358_v31  ;;  %v14362_v34 = vpop.permute.xlu0 %13019 }
 0x136   : > { %18270 = vst [vmem:[#allocation29_spill] sm:$0xff] %v14362_v34 }
 0x137   : > { %v14367_v35 = vmul.f32 %v18104_v33, %v14314_v14  ;;  %v14372_v36 = vmul.f32 %v18103_v32, %v14314_v14 }
 0x138   : > { %v14374_v37 = vpop.permute.xlu1 %13034 }
 0x139   : > { %18271 = vst [vmem:[#allocation30_spill] sm:$0xff] %v14367_v35  ;;  %18272 = vst [vmem:[#allocation31_spill] sm:$0xff] %v14372_v36  ;;  %v18101_v38 = vunpack.i.h.bf16 %v14374_v37  ;;  %v18102_v39 = vunpack.i.l.bf16 %v14374_v37  ;;  %v14378_v40 = vpop.permute.xlu0 %13029  ;;  %v18325_v36 = vunpack.i.h.bf16 %v14362_v34  ;;  %v18326_v35 = vsub.s32 1, %v14299_v8 }
 0x13a   : > { %18273 = vst [vmem:[#allocation32_spill] sm:$0xff] %v14378_v40 }
 0x13b   : > { %v14383_v41 = vmul.f32 %v18102_v39, %v14314_v14  ;;  %v14388_v42 = vmul.f32 %v18101_v38, %v14314_v14 }
 0x13c   : > { %v14390_v43 = vpop.permute.xlu1 %13044 }
 0x13d   : > { %18274 = vst [vmem:[#allocation33_spill] sm:$0xff] %v14383_v41  ;;  %18275 = vst [vmem:[#allocation34_spill] sm:$0xff] %v14388_v42  ;;  %v18099_v44 = vunpack.i.h.bf16 %v14390_v43  ;;  %v18100_v45 = vunpack.i.l.bf16 %v14390_v43  ;;  %v18321_v42 = vunpack.i.h.bf16 %v14346_v28  ;;  %v18323_v41 = vunpack.i.h.bf16 %v14358_v31 }
 0x13f   : > { %v14394_v46 = vpop.permute.xlu0 %13039  ;;  %v14399_v47 = vmul.f32 %v18100_v45, %v14314_v14  ;;  %v14404_v48 = vmul.f32 %v18099_v44, %v14314_v14 }
 0x140   : > { %v14409_v50 = vpop.permute.xlu1 %13054 }
 0x141   : > { %18276 = vst [vmem:[#allocation35_spill] sm:$0xff] %v14399_v47  ;;  %18277 = vst [vmem:[#allocation36_spill] sm:$0xff] %v14404_v48  ;;  %v18097_v51 = vunpack.i.h.bf16 %v14409_v50  ;;  %v18098_v52 = vunpack.i.l.bf16 %v14409_v50 }
 0x143   : > { %v14413_v53 = vpop.permute.xlu0 %13049  ;;  %v14418_v55 = vmul.f32 %v18098_v52, %v14314_v14  ;;  %v14423_v56 = vmul.f32 %v18097_v51, %v14314_v14 }
 0x144   : > { %v14426_v58 = vpop.permute.xlu1 %13064 }
 0x145   : > { %18278 = vst [vmem:[#allocation37_spill] sm:$0xff] %v14418_v55  ;;  %18279 = vst [vmem:[#allocation38_spill] sm:$0xff] %v14423_v56  ;;  %v18095_v59 = vunpack.i.h.bf16 %v14426_v58  ;;  %v18094_v60 = vunpack.i.l.bf16 %v14426_v58 }
 0x147   : > { %v14430_v61 = vpop.permute.xlu0 %13059  ;;  %v14437_v63 = vmul.f32 %v18094_v60, %v14314_v14  ;;  %v14442_v1 = vmul.f32 %v18095_v59, %v14314_v14 }
 0x148   : > { %v13075_v4 = vpop.permute.xlu1 %13074 }
 0x149   : > { %18280 = vst [vmem:[#allocation39_spill] sm:$0xff] %v14437_v63  ;;  %18281 = vst [vmem:[#allocation40_spill] sm:$0xff] %v14442_v1  ;;  %v13077_v5 = vunpack.i.h.bf16 %v13075_v4  ;;  %v13076_v6 = vunpack.i.l.bf16 %v13075_v4 }
 0x14b   : > { %v13070_v7 = vpop.permute.xlu0 %13069  ;;  %v1476_v0 = vmul.f32 %v13076_v6, %v14432_v62  ;;  %v1477_v60 = vmul.f32 %v13077_v5, %v14432_v62  ;;  %v14454_v59 = vmul.f32 %v13076_v6, %v14314_v14  ;;  %v14457_v9 = vmul.f32 %v13077_v5, %v14314_v14 }
 0x14c   : > { %v13072_v54 = vunpack.i.h.bf16 %v13070_v7  ;;  %v13071_v25 = vunpack.i.l.bf16 %v13070_v7  ;;  %v13085_v7 = vpop.permute.xlu1 %13084 }
 0x14d   : > { %18282 = vst [vmem:[#allocation41_spill] sm:$0xff] %v14454_v59  ;;  %18283 = vst [vmem:[#allocation42_spill] sm:$0xff] %v14457_v9  ;;  %v13087_v52 = vunpack.i.h.bf16 %v13085_v7  ;;  %v13086_v44 = vunpack.i.l.bf16 %v13085_v7 }
 0x14e   : > { %v1279_v49 = vmul.f32 %v13071_v25, %v14444_v2  ;;  %v1280_v57 = vmul.f32 %v13072_v54, %v14444_v2  ;;  %v14462_v51 = vmul.f32 %v13071_v25, %v14449_v3  ;;  %v14465_v4 = vmul.f32 %v13072_v54, %v14449_v3 }
 0x14f   : > { %v13080_v45 = vpop.permute.xlu0 %13079  ;;  %v1478_v32 = vmul.f32 %v13086_v44, %v14432_v62  ;;  %v1479_v33 = vmul.f32 %v13087_v52, %v14432_v62  ;;  %v14474_v25 = vmul.f32 %v13086_v44, %v14314_v14  ;;  %v14477_v54 = vmul.f32 %v13087_v52, %v14314_v14 }
 0x150   : > { %18284 = vst [vmem:[#allocation43_spill] sm:$0xff] %v14462_v51  ;;  %18285 = vst [vmem:[#allocation44_spill] sm:$0xff] %v14465_v4  ;;  %v14467_v38 = vadd.f32 %v1476_v0, %v1279_v49  ;;  %v14469_v6 = vadd.f32 %v1477_v60, %v1280_v57  ;;  %v13082_v5 = vunpack.i.h.bf16 %v13080_v45  ;;  %v13081_v39 = vunpack.i.l.bf16 %v13080_v45  ;;  %v13095_v45 = vpop.permute.xlu1 %13094 }
 0x151   : > { %18286 = vst [vmem:[#allocation45_spill] sm:$0xff] %v14474_v25  ;;  %18287 = vst [vmem:[#allocation46_spill] sm:$0xff] %v14477_v54  ;;  %v13097_v60 = vunpack.i.h.bf16 %v13095_v45  ;;  %v13096_v49 = vunpack.i.l.bf16 %v13095_v45 }
 0x152   : > { %v1281_v26 = vmul.f32 %v13081_v39, %v14444_v2  ;;  %v1282_v7 = vmul.f32 %v13082_v5, %v14444_v2  ;;  %v14482_v0 = vmul.f32 %v13081_v39, %v14449_v3  ;;  %v14485_v57 = vmul.f32 %v13082_v5, %v14449_v3 }
 0x153   : > { %v13090_v27 = vpop.permute.xlu0 %13089  ;;  %v1480_v15 = vmul.f32 %v13096_v49, %v14432_v62  ;;  %v1481_v16 = vmul.f32 %v13097_v60, %v14432_v62  ;;  %v14494_v39 = vmul.f32 %v13096_v49, %v14314_v14  ;;  %v14497_v5 = vmul.f32 %v13097_v60, %v14314_v14 }
 0x154   : > { %18288 = vst [vmem:[#allocation47_spill] sm:$0xff] %v14482_v0  ;;  %18289 = vst [vmem:[#allocation48_spill] sm:$0xff] %v14485_v57  ;;  %v14487_v18 = vadd.f32 %v1478_v32, %v1281_v26  ;;  %v14489_v44 = vadd.f32 %v1479_v33, %v1282_v7  ;;  %v13092_v52 = vunpack.i.h.bf16 %v13090_v27  ;;  %v13091_v19 = vunpack.i.l.bf16 %v13090_v27  ;;  %v14507_v27 = vpop.permute.xlu1 %13104  ;;  %v14557_v0 = vld [vmem:[#allocation8 + $0x8] ss:$12 sps:$4 sm:$0xff]  }
 0x155   : > { %18290 = vst [vmem:[#allocation49_spill] sm:$0xff] %v14494_v39  ;;  %18291 = vst [vmem:[#allocation50_spill] sm:$0xff] %v14497_v5  ;;  %v18112_v33 = vunpack.i.h.bf16 %v14507_v27  ;;  %v18111_v7 = vunpack.i.l.bf16 %v14507_v27  ;;  %12006 = vmatprep.subr.bf16.mxu0 %v14557_v0 }
 0x156   : > { %v1283_v54 = vmul.f32 %v13091_v19, %v14444_v2  ;;  %v1284_v45 = vmul.f32 %v13092_v52, %v14444_v2  ;;  %v14502_v26 = vmul.f32 %v13091_v19, %v14449_v3  ;;  %v14505_v32 = vmul.f32 %v13092_v52, %v14449_v3 }
 0x157   : > { %v14511_v49 = vpop.permute.xlu0 %13099  ;;  %v14522_v52 = vmul.f32 %v18111_v7, %v14314_v14 }
 0x158   : > { %18292 = vst [vmem:[#allocation51_spill] sm:$0xff] %v14502_v26  ;;  %18293 = vst [vmem:[#allocation52_spill] sm:$0xff] %v14505_v32  ;;  %v14513_v60 = vadd.f32 %v1480_v15, %v1283_v54  ;;  %v14515_v5 = vadd.f32 %v1481_v16, %v1284_v45  ;;  %v18114_v39 = vunpack.i.h.bf16 %v14511_v49  ;;  %v18113_v19 = vunpack.i.l.bf16 %v14511_v49  ;;  %v14539_v54 = vpop.permute.xlu1 %13114 }
 0x159   : > { %18294 = vst [vmem:[#allocation53_spill] sm:$0xff] %v14522_v52  ;;  %v14527_v32 = vmul.f32 %v18112_v33, %v14314_v14  ;;  %v18116_v45 = vunpack.i.h.bf16 %v14539_v54  ;;  %v18115_v7 = vunpack.i.l.bf16 %v14539_v54  ;;  %v13294_v33 = vld [vmem:[#allocation8 + $0x4] ss:$12 sps:$4 sm:$0xff]  }
 0x15a   : > { %v14532_v15 = vmul.f32 %v18113_v19, %v14449_v3  ;;  %v14537_v16 = vmul.f32 %v18114_v39, %v14449_v3  ;;  %2550 = vmatprep.subr.bf16.mxu1 %v13294_v33 }
 0x15b   : > { %18295 = vst [vmem:[#allocation54_spill] sm:$0xff] %v14527_v32  ;;  %v14543_v26 = vpop.permute.xlu0 %13109  ;;  %v14550_v19 = vmul.f32 %v18115_v7, %v14314_v14  ;;  %v14555_v39 = vmul.f32 %v18116_v45, %v14314_v14 }
 0x15c   : > { %18296 = vst [vmem:[#allocation55_spill] sm:$0xff] %v14532_v15  ;;  %18297 = vst [vmem:[#allocation56_spill] sm:$0xff] %v14537_v16  ;;  %v18118_v57 = vunpack.i.h.bf16 %v14543_v26  ;;  %v18117_v25 = vunpack.i.l.bf16 %v14543_v26  ;;  %v14569_v7 = vpop.permute.xlu1 %13124  ;;  %v18319_v15 = vunpack.i.h.bf16 %v14342_v24 }
 0x15d   : > { %18298 = vst [vmem:[#allocation57_spill] sm:$0xff] %v14550_v19  ;;  %18299 = vst [vmem:[#allocation58_spill] sm:$0xff] %v14555_v39  ;;  %v18120_v59 = vunpack.i.h.bf16 %v14569_v7  ;;  %v18119_v45 = vunpack.i.l.bf16 %v14569_v7 }
 0x15e   : > { %v14562_v9 = vmul.f32 %v18117_v25, %v14449_v3  ;;  %v14567_v4 = vmul.f32 %v18118_v57, %v14449_v3 }
 0x15f   : > { %v14573_v51 = vpop.permute.xlu0 %13119  ;;  %v14581_v1 = vmul.f32 %v18119_v45, %v14314_v14  ;;  %v14586_v57 = vmul.f32 %v18120_v59, %v14314_v14 }
 0x160   : > { %18300 = vst [vmem:[#allocation59_spill] sm:$0xff] %v14562_v9  ;;  %18301 = vst [vmem:[#allocation60_spill] sm:$0xff] %v14567_v4  ;;  %v18122_v33 = vunpack.i.h.bf16 %v14573_v51  ;;  %v18121_v25 = vunpack.i.l.bf16 %v14573_v51  ;;  %v13135_v56 = vpop.permute.xlu1 %13134 }
 0x161   : > { %18302 = vst [vmem:[#allocation61_spill] sm:$0xff] %v14581_v1  ;;  %18303 = vst [vmem:[#allocation62_spill] sm:$0xff] %v14586_v57  ;;  %v13137_v4 = vunpack.i.h.bf16 %v13135_v56  ;;  %v13136_v19 = vunpack.i.l.bf16 %v13135_v56 }
 0x162   : > { %v14591_v63 = vmul.f32 %v18121_v25, %v14449_v3  ;;  %v14596_v39 = vmul.f32 %v18122_v33, %v14449_v3 }
 0x163   : > { %v13130_v45 = vpop.permute.xlu0 %13129  ;;  %v1488_v9 = vmul.f32 %v13136_v19, %v14432_v62  ;;  %v1489_v59 = vmul.f32 %v13137_v4, %v14432_v62  ;;  %v14601_v57 = vmul.f32 %v13136_v19, %v14314_v14  ;;  %v14604_v25 = vmul.f32 %v13137_v4, %v14314_v14 }
 0x164   : > { %18304 = vst [vmem:[#allocation63_spill] sm:$0xff] %v14591_v63  ;;  %18305 = vst [vmem:[#allocation64_spill] sm:$0xff] %v14596_v39  ;;  %v13132_v1 = vunpack.i.h.bf16 %v13130_v45  ;;  %v13131_v55 = vunpack.i.l.bf16 %v13130_v45  ;;  %v13145_v45 = vpop.permute.xlu1 %13144 }
 0x165   : > { %18306 = vst [vmem:[#allocation65_spill] sm:$0xff] %v14601_v57  ;;  %18307 = vst [vmem:[#allocation66_spill] sm:$0xff] %v14604_v25  ;;  %v13147_v48 = vunpack.i.h.bf16 %v13145_v45  ;;  %v13146_v32 = vunpack.i.l.bf16 %v13145_v45 }
 0x166   : > { %v1291_v63 = vmul.f32 %v13131_v55, %v14444_v2  ;;  %v1292_v33 = vmul.f32 %v13132_v1, %v14444_v2  ;;  %v14609_v39 = vmul.f32 %v13131_v55, %v14449_v3  ;;  %v14612_v56 = vmul.f32 %v13132_v1, %v14449_v3 }
 0x167   : > { %v13140_v47 = vpop.permute.xlu0 %13139  ;;  %v1490_v57 = vmul.f32 %v13146_v32, %v14432_v62  ;;  %v1491_v52 = vmul.f32 %v13147_v48, %v14432_v62  ;;  %v14621_v55 = vmul.f32 %v13146_v32, %v14314_v14  ;;  %v14624_v1 = vmul.f32 %v13147_v48, %v14314_v14 }
 0x168   : > { %18308 = vst [vmem:[#allocation67_spill] sm:$0xff] %v14609_v39  ;;  %18309 = vst [vmem:[#allocation68_spill] sm:$0xff] %v14612_v56  ;;  %v14614_v16 = vadd.f32 %v1488_v9, %v1291_v63  ;;  %v14616_v19 = vadd.f32 %v1489_v59, %v1292_v33  ;;  %v13142_v4 = vunpack.i.h.bf16 %v13140_v47  ;;  %v13141_v25 = vunpack.i.l.bf16 %v13140_v47 }
 0x169   : > { %18310 = vst [vmem:[#allocation69_spill] sm:$0xff] %v14621_v55  ;;  %18311 = vst [vmem:[#allocation70_spill] sm:$0xff] %v14624_v1  ;;  %v18123_v32 = vsub.s32 0, %v14299_v8  ;;  %v18125_v33 = vunpack.i.h.bf16 %v14302_v10  ;;  %v18124_v14 = vunpack.i.l.bf16 %v14302_v10  ;;  %v18127_v48 = vunpack.i.h.bf16 %v14309_v12 }
 0x16a   : > { %v1293_v56 = vmul.f32 %v13141_v25, %v14444_v2  ;;  %v1294_v45 = vmul.f32 %v13142_v4, %v14444_v2  ;;  %v14629_v63 = vmul.f32 %v13141_v25, %v14449_v3  ;;  %v14632_v59 = vmul.f32 %v13142_v4, %v14449_v3 }
 0x16b   : > { %v18126_v1 = vunpack.i.l.bf16 %v14309_v12  ;;  %v1266_v25 = vmul.f32 %v18125_v33, %v14444_v2  ;;  %v18315_v55 = vunpack.i.h.bf16 %v14311_v13  ;;  %v18318_v39 = vunpack.i.l.bf16 %v14342_v24 }
 0x16c   : > { %18312 = vst [vmem:[#allocation71_spill] sm:$0xff] %v14629_v63  ;;  %18313 = vst [vmem:[#allocation72_spill] sm:$0xff] %v14632_v59  ;;  %v14634_v47 = vadd.f32 %v1490_v57, %v1293_v56  ;;  %v14636_v9 = vadd.f32 %v1491_v52, %v1294_v45  ;;  %v14650_v52 = vrot.slane %v14307_v11, %v18123_v32  ;;  %v18314_v32 = vunpack.i.l.bf16 %v14311_v13 }
 0x16d   : > { %v1265_v45 = vmul.f32 %v18124_v14, %v14444_v2  ;;  %v1263_v4 = vmul.f32 %v18126_v1, %v14444_v2  ;;  %v1264_v57 = vmul.f32 %v18127_v48, %v14444_v2  ;;  %v1463_v14 = vmul.f32 %v18315_v55, %v14432_v62 }
 0x16e   : > { %v1462_v56 = vmul.f32 %v18314_v32, %v14432_v62  ;;  %v18316_v59 = vunpack.i.l.bf16 %v14318_v17  ;;  %v18317_v63 = vunpack.i.h.bf16 %v14318_v17  ;;  %v1464_v48 = vmul.f32 %v18318_v39, %v14432_v62 }
 0x16f   : > { %v1465_v32 = vmul.f32 %v18319_v15, %v14432_v62  ;;  %v18320_v13 = vunpack.i.l.bf16 %v14346_v28  ;;  %v18322_v17 = vunpack.i.l.bf16 %v14358_v31  ;;  %v1467_v39 = vmul.f32 %v18323_v41, %v14432_v62 }
 0x170   : > { %v1460_v33 = vmul.f32 %v18316_v59, %v14432_v62  ;;  %v1461_v1 = vmul.f32 %v18317_v63, %v14432_v62  ;;  %v1268_v59 = vmul.f32 %v18321_v42, %v14444_v2  ;;  %v18324_v24 = vunpack.i.l.bf16 %v14362_v34 }
 0x171   : > { %v1267_v55 = vmul.f32 %v18320_v13, %v14444_v2  ;;  %v1466_v63 = vmul.f32 %v18322_v17, %v14432_v62  ;;  %v1270_v13 = vmul.f32 %v18325_v36, %v14444_v2  ;;  %v14704_v42 = vrot.slane %v14307_v11, %v18326_v35 }
 0x172   : > { %v1269_v15 = vmul.f32 %v18324_v24, %v14444_v2  ;;  %v1494_v30 = vadd.f32 %v1462_v56, %v1265_v45  ;;  %v1495_v29 = vadd.f32 %v1463_v14, %v1266_v25  ;;  %v18132_v17 = vunpack.i.l.bf16 %v14378_v40 }
 0x173   : > { %v1492_v28 = vadd.f32 %v1460_v33, %v1263_v4  ;;  %v1493_v31 = vadd.f32 %v1461_v1, %v1264_v57  ;;  %v14707_v41 = vadd.f32 %v1464_v48, %v1267_v55  ;;  %v14709_v21 = vadd.f32 %v1465_v32, %v1268_v59 }
 0x174   : > { %v14711_v20 = vadd.f32 %v1466_v63, %v1269_v15  ;;  %v14713_v34 = vadd.f32 %v1467_v39, %v1270_v13  ;;  %v18135_v36 = vunpack.i.h.bf16 %v14378_v40  ;;  %v18327_v14 = vunpack.i.l.bf16 %v14374_v37 }
 0x175   : > { %v18328_v1 = vunpack.i.h.bf16 %v14374_v37  ;;  %v1271_v32 = vmul.f32 %v18132_v17, %v14444_v2 }
 0x176   : > { %v1468_v33 = vmul.f32 %v18327_v14, %v14432_v62  ;;  %v1272_v14 = vmul.f32 %v18135_v36, %v14444_v2  ;;  %v18330_v36 = vunpack.i.h.bf16 %v14390_v43 }
 0x177   : > { %v1469_v48 = vmul.f32 %v18328_v1, %v14432_v62 }
 0x191   : > { %v11928_v24 = vpop.f32.mrb[0].mxu0  ;;  %v11976_v35 = vpop.f32.mrb[0].mxu1 }
 0x192   : > { %v949_v11 = vadd.f32 %v11928_v24, %v14650_v52  ;;  %v940_v56 = vpop.f32.mrb[1].mxu0  ;;  %v1763_v25 = vadd.f32 %v11976_v35, %v14704_v42  ;;  %v1754_v57 = vpop.f32.mrb[1].mxu1 }
 0x193   : > { %v941_v4 = vadd.f32 %v940_v56, %v14650_v52  ;;  %v11929_v45 = vpop.f32.mrb[2].mxu0  ;;  %v1755_v59 = vadd.f32 %v1754_v57, %v14704_v42  ;;  %v11977_v39 = vpop.f32.mrb[2].mxu1 }
 0x194   : > { %v1069_v55 = vmax.f32 %v949_v11, 0.0  ;;  %v952_v63 = vadd.f32 %v11929_v45, %v14650_v52  ;;  %v943_v15 = vpop.f32.mrb[3].mxu0  ;;  %v1883_v13 = vmax.f32 %v1763_v25, 0.0  ;;  %v1766_v24 = vadd.f32 %v11977_v39, %v14704_v42  ;;  %v1757_v56 = vpop.f32.mrb[3].mxu1 }
 0x195   : > { %v1067_v37 = vmax.f32 %v941_v4, 0.0  ;;  %v944_v35 = vadd.f32 %v943_v15, %v14650_v52  ;;  %v1758_v57 = vadd.f32 %v1757_v56, %v14704_v42  ;;  %v18329_v45 = vunpack.i.l.bf16 %v14390_v43 }
 0x196   : > { %v1070_v11 = vmax.f32 %v952_v63, 0.0  ;;  %v1884_v4 = vmax.f32 %v1766_v24, 0.0  ;;  %v1881_v10 = vmax.f32 %v1755_v59, 0.0  ;;  %v14741_v23 = vmul.f32 %v1494_v30, %v1069_v55 }
 0x197   : > { %v1470_v17 = vmul.f32 %v18329_v45, %v14432_v62  ;;  %v1068_v39 = vmax.f32 %v944_v35, 0.0  ;;  %v1882_v15 = vmax.f32 %v1758_v57, 0.0  ;;  %v1471_v63 = vmul.f32 %v18330_v36, %v14432_v62 }
 0x198   : > { %v14743_v22 = vmul.f32 %v1495_v29, %v1070_v11  ;;  %v1524_v1 = vmul.f32 %v1492_v28, %v1067_v37  ;;  %v1948_v8 = vpack.c.bf16 %v1884_v4, %v1883_v13  ;;  %v18331_v45 = vunpack.i.l.bf16 %v14394_v46  ;;  %v13305_v11 = vld [vmem:[#allocation8 + $0x20] ss:$12 sps:$4 sm:$0xff]  }
 0x199   : > { %v1525_v56 = vmul.f32 %v1493_v31, %v1068_v39  ;;  %v11932_v40 = vpop.f32.mrb[4].mxu0  ;;  %v1946_v35 = vpack.c.bf16 %v1882_v15, %v1881_v10  ;;  %v11980_v30 = vpop.f32.mrb[4].mxu1  ;;  %v18332_v43 = vunpack.i.h.bf16 %v14394_v46  ;;  %v14759_v57 = vadd.f32 %v1468_v33, %v1271_v32 }
 0x19a   : > { %v1273_v25 = vmul.f32 %v18331_v45, %v14444_v2  ;;  %v965_v24 = vadd.f32 %v11932_v40, %v14650_v52  ;;  %v956_v59 = vpop.f32.mrb[5].mxu0  ;;  %v1947_v29 = vpack.c.bf16 %v14743_v22, %v14741_v23  ;;  %v1779_v13 = vadd.f32 %v11980_v30, %v14704_v42  ;;  %v1770_v37 = vpop.f32.mrb[5].mxu1 }
 0x19b   : > { %v1274_v36 = vmul.f32 %v18332_v43, %v14444_v2  ;;  %v1945_v28 = vpack.c.bf16 %v1525_v56, %v1524_v1  ;;  %v957_v31 = vadd.f32 %v956_v59, %v14650_v52  ;;  %v11933_v55 = vpop.f32.mrb[6].mxu0  ;;  %2141 = vmatprep.mubr.bf16.mxu0 %v1946_v35  ;;  %v1771_v39 = vadd.f32 %v1770_v37, %v14704_v42  ;;  %v11981_v15 = vpop.f32.mrb[6].mxu1 }
 0x19c   : > { %v1073_v40 = vmax.f32 %v965_v24, 0.0  ;;  %v968_v10 = vadd.f32 %v11933_v55, %v14650_v52  ;;  %v959_v4 = vpop.f32.mrb[7].mxu0  ;;  %v1887_v56 = vmax.f32 %v1779_v13, 0.0  ;;  %v1782_v59 = vadd.f32 %v11981_v15, %v14704_v42  ;;  %v1773_v30 = vpop.f32.mrb[7].mxu1 }
 0x19d   : > { %v1071_v45 = vmax.f32 %v957_v31, 0.0  ;;  %v960_v1 = vadd.f32 %v959_v4, %v14650_v52  ;;  %2142 = vmatmul.mubr.bf16.vlgmr.msra.gmra.mrb[32].mxu0 %v1945_v28  ;;  %v14765_v43 = vadd.f32 %v1469_v48, %v1272_v14  ;;  %v1885_v32 = vmax.f32 %v1771_v39, 0.0  ;;  %v13309_v4 = vld [vmem:[#allocation8 + $0x38] ss:$12 sps:$4 sm:$0xff]  }
 0x19e   : > { %v1074_v33 = vmax.f32 %v968_v10, 0.0  ;;  %2149 = vmatprep.mubr.bf16.mxu0 %v1948_v8  ;;  %v1774_v24 = vadd.f32 %v1773_v30, %v14704_v42  ;;  %12007 = vmatpush3.bf16.msra.mxu0 %v14557_v0  ;;  %v1502_v35 = vadd.f32 %v1470_v17, %v1273_v25  ;;  %v1503_v55 = vadd.f32 %v1471_v63, %v1274_v36 }
 0x19f   : > { %v1072_v37 = vmax.f32 %v960_v1, 0.0  ;;  %v1888_v31 = vmax.f32 %v1782_v59, 0.0  ;;  %12008 = vmatprep.subr.bf16.mxu0 %v13305_v11  ;;  %v18142_v28 = vunpack.i.h.bf16 %v14413_v53  ;;  %v14771_v15 = vmul.f32 %v14711_v20, %v1073_v40 }
 0x1a0   : > { %v1886_v13 = vmax.f32 %v1774_v24, 0.0  ;;  %v14774_v48 = vmul.f32 %v14713_v34, %v1074_v33  ;;  %v18143_v8 = vunpack.i.l.bf16 %v14413_v53  ;;  %v14778_v0 = vmul.f32 %v14707_v41, %v1071_v45 }
 0x1a1   : > { %v11936_v14 = vpop.f32.mrb[8].mxu0  ;;  %v14781_v17 = vmul.f32 %v14709_v21, %v1072_v37  ;;  %v14783_v25 = vpack.c.bf16 %v1888_v31, %v1887_v56  ;;  %v18333_v63 = vunpack.i.l.bf16 %v14409_v50  ;;  %v11984_v10 = vpop.f32.mrb[8].mxu1  ;;  %v18334_v21 = vunpack.i.h.bf16 %v14409_v50 }
 0x1a2   : > { %v981_v20 = vadd.f32 %v11936_v14, %v14650_v52  ;;  %v972_v34 = vpop.f32.mrb[9].mxu0  ;;  %v1950_v40 = vpack.c.bf16 %v1886_v13, %v1885_v32  ;;  %v1951_v39 = vpack.c.bf16 %v14774_v48, %v14771_v15  ;;  %12009 = vmatpush3.bf16.msra.mxu0 %v13305_v11  ;;  %v1795_v59 = vadd.f32 %v11984_v10, %v14704_v42  ;;  %v1786_v30 = vpop.f32.mrb[9].mxu1 }
 0x1a3   : > { %v14788_v36 = vmul.f32 %v18333_v63, %v14432_v62  ;;  %v14796_v41 = vmul.f32 %v18334_v21, %v14432_v62  ;;  %v973_v45 = vadd.f32 %v972_v34, %v14650_v52  ;;  %v11937_v1 = vpop.f32.mrb[10].mxu0  ;;  %v1949_v56 = vpack.c.bf16 %v14781_v17, %v14778_v0  ;;  %12010 = vmatprep.subr.bf16.mxu0 %v13309_v4  ;;  %v11985_v37 = vpop.f32.mrb[10].mxu1 }
 0x1a4   : > { %v18141_v33 = vunpack.i.l.bf16 %v14430_v61  ;;  %v1077_v32 = vmax.f32 %v981_v20, 0.0  ;;  %v984_v11 = vadd.f32 %v11937_v1, %v14650_v52  ;;  %v975_v24 = vpop.f32.mrb[11].mxu0  ;;  %v1787_v50 = vadd.f32 %v1786_v30, %v14704_v42  ;;  %v1789_v17 = vpop.f32.mrb[11].mxu1 }
 0x1a5   : > { %v1075_v31 = vmax.f32 %v973_v45, 0.0  ;;  %v976_v13 = vadd.f32 %v975_v24, %v14650_v52  ;;  %2150 = vmatmul.mubr.bf16.gmra.mrb[36].mxu0 %v1947_v29  ;;  %v1891_v14 = vmax.f32 %v1795_v59, 0.0  ;;  %v1798_v0 = vadd.f32 %v11985_v37, %v14704_v42 }
 0x1a6   : > { %v18140_v63 = vunpack.i.h.bf16 %v14430_v61  ;;  %v1078_v20 = vmax.f32 %v984_v11, 0.0  ;;  %2157 = vmatprep.mubr.bf16.mxu0 %v1950_v40  ;;  %v1889_v34 = vmax.f32 %v1787_v50, 0.0  ;;  %v1790_v10 = vadd.f32 %v1789_v17, %v14704_v42  ;;  %12011 = vmatpush3.bf16.msra.mxu0 %v13309_v4 }
 0x1a7   : > { %v1275_v21 = vmul.f32 %v18143_v8, %v14444_v2  ;;  %v18335_v22 = vunpack.i.l.bf16 %v14426_v58  ;;  %v1076_v29 = vmax.f32 %v976_v13, 0.0  ;;  %v1892_v45 = vmax.f32 %v1798_v0, 0.0 }
 0x1a8   : > { %v1277_v1 = vmul.f32 %v18141_v33, %v14444_v2  ;;  %v1890_v59 = vmax.f32 %v1790_v10, 0.0  ;;  %v14821_v40 = vmul.f32 %v1502_v35, %v1077_v32  ;;  %v14823_v30 = vmul.f32 %v1503_v55, %v1078_v20 }
 0x1a9   : > { %v1474_v23 = vmul.f32 %v18335_v22, %v14432_v62  ;;  %v18336_v4 = vunpack.i.h.bf16 %v14426_v58  ;;  %v11940_v24 = vpop.f32.mrb[12].mxu0  ;;  %v14829_v50 = vmul.f32 %v14759_v57, %v1075_v31  ;;  %v14832_v37 = vmul.f32 %v14765_v43, %v1076_v29  ;;  %v11988_v0 = vpop.f32.mrb[12].mxu1 }
 0x1aa   : > { %v14834_v13 = vpack.c.bf16 %v1892_v45, %v1891_v14  ;;  %v1278_v35 = vmul.f32 %v18140_v63, %v14444_v2  ;;  %v997_v55 = vadd.f32 %v11940_v24, %v14650_v52  ;;  %v988_v32 = vpop.f32.mrb[13].mxu0  ;;  %v14840_v17 = vpack.c.bf16 %v1890_v59, %v1889_v34  ;;  %v1802_v20 = vpop.f32.mrb[13].mxu1 }
 0x1ab   : > { %v1475_v11 = vmul.f32 %v18336_v4, %v14432_v62  ;;  %v1276_v57 = vmul.f32 %v18142_v28, %v14444_v2  ;;  %v989_v43 = vadd.f32 %v988_v32, %v14650_v52  ;;  %v11941_v31 = vpop.f32.mrb[14].mxu0  ;;  %v1811_v14 = vadd.f32 %v11988_v0, %v14704_v42  ;;  %v11989_v4 = vpop.f32.mrb[14].mxu1 }
 0x1ac   : > { %v1953_v10 = vpack.c.bf16 %v14832_v37, %v14829_v50  ;;  %v1506_v22 = vadd.f32 %v1474_v23, %v1277_v1  ;;  %v1081_v29 = vmax.f32 %v997_v55, 0.0  ;;  %v1000_v34 = vadd.f32 %v11941_v31, %v14650_v52  ;;  %v991_v45 = vpop.f32.mrb[15].mxu0  ;;  %v1805_v0 = vpop.f32.mrb[15].mxu1 }
 0x1ad   : > { %v1803_v59 = vadd.f32 %v1802_v20, %v14704_v42  ;;  %v1079_v24 = vmax.f32 %v989_v43, 0.0  ;;  %v992_v63 = vadd.f32 %v991_v45, %v14650_v52  ;;  %2158 = vmatmul.mubr.bf16.gmra.mrb[40].mxu0 %v1949_v56  ;;  %v1895_v32 = vmax.f32 %v1811_v14, 0.0 }
 0x1ae   : > { %v1814_v33 = vadd.f32 %v11989_v4, %v14704_v42  ;;  %v1507_v28 = vadd.f32 %v1475_v11, %v1278_v35  ;;  %v1082_v8 = vmax.f32 %v1000_v34, 0.0  ;;  %2165 = vmatprep.mubr.bf16.mxu0 %v14783_v25  ;;  %v1806_v23 = vadd.f32 %v1805_v0, %v14704_v42 }
 0x1af   : > { %v1893_v58 = vmax.f32 %v1803_v59, 0.0  ;;  %v1504_v1 = vadd.f32 %v14788_v36, %v1275_v21  ;;  %v1505_v55 = vadd.f32 %v14796_v41, %v1276_v57  ;;  %v1080_v31 = vmax.f32 %v992_v63, 0.0 }
 0x1b0   : > { %v1896_v43 = vmax.f32 %v1814_v33, 0.0  ;;  %v1894_v20 = vmax.f32 %v1806_v23, 0.0  ;;  %v14859_v45 = vmul.f32 %v1506_v22, %v1081_v29  ;;  %v14861_v56 = vmul.f32 %v1507_v28, %v1082_v8 }
 0x1b1   : > { %v11944_v14 = vpop.f32.mrb[16].mxu0  ;;  %v14863_v4 = vmul.f32 %v1504_v1, %v1079_v24  ;;  %v14865_v11 = vmul.f32 %v1505_v55, %v1080_v31  ;;  %v18337_v25 = vunpack.i.l.bf16 %v14507_v27  ;;  %v11992_v33 = vpop.f32.mrb[16].mxu1  ;;  %v18338_v8 = vunpack.i.h.bf16 %v14507_v27 }
 0x1b2   : > { %v14867_v35 = vpack.c.bf16 %v1896_v43, %v1895_v32  ;;  %v1013_v41 = vadd.f32 %v11944_v14, %v14650_v52  ;;  %v1004_v63 = vpop.f32.mrb[17].mxu0  ;;  %v14873_v21 = vpack.c.bf16 %v1894_v20, %v1893_v58  ;;  %v1959_v28 = vpack.c.bf16 %v14861_v56, %v14859_v45  ;;  %v1818_v59 = vpop.f32.mrb[17].mxu1  ;;  %v13316_v45 = vld [vmem:[#allocation8 + $0x94] ss:$12 sps:$4 sm:$0xff]  }
 0x1b3   : > { %v1482_v36 = vmul.f32 %v18337_v25, %v14432_v62  ;;  %v1483_v57 = vmul.f32 %v18338_v8, %v14432_v62  ;;  %v1005_v22 = vadd.f32 %v1004_v63, %v14650_v52  ;;  %v11945_v29 = vpop.f32.mrb[18].mxu0  ;;  %v1827_v34 = vadd.f32 %v11992_v33, %v14704_v42  ;;  %v11993_v55 = vpop.f32.mrb[18].mxu1  ;;  %v13317_v56 = vld [vmem:[#allocation8 + $0x68] ss:$12 sps:$4 sm:$0xff]  }
 0x1b4   : > { %v1957_v24 = vpack.c.bf16 %v14865_v11, %v14863_v4  ;;  %v18339_v58 = vunpack.i.l.bf16 %v14511_v49  ;;  %v1085_v0 = vmax.f32 %v1013_v41, 0.0  ;;  %v1016_v23 = vadd.f32 %v11945_v29, %v14650_v52  ;;  %v1007_v1 = vpop.f32.mrb[19].mxu0  ;;  %v1821_v25 = vpop.f32.mrb[19].mxu1  ;;  %v13302_v4 = vld [vmem:[#allocation8 + $0x48] ss:$12 sps:$4 sm:$0xff]  }
 0x1b5   : > { %v1819_v27 = vadd.f32 %v1818_v59, %v14704_v42  ;;  %v1083_v31 = vmax.f32 %v1005_v22, 0.0  ;;  %v1008_v43 = vadd.f32 %v1007_v1, %v14650_v52  ;;  %2166 = vmatmul.mubr.bf16.gmra.mrb[44].mxu0 %v1951_v39  ;;  %v1899_v20 = vmax.f32 %v1827_v34, 0.0 }
 0x1b6   : > { %v1285_v32 = vmul.f32 %v18339_v58, %v14444_v2  ;;  %v1830_v14 = vadd.f32 %v11993_v55, %v14704_v42  ;;  %v1086_v63 = vmax.f32 %v1016_v23, 0.0  ;;  %v1822_v41 = vadd.f32 %v1821_v25, %v14704_v42  ;;  %2173 = vmatprep.mubr.bf16.mxu0 %v14840_v17 }
 0x1b7   : > { %v1897_v33 = vmax.f32 %v1819_v27, 0.0  ;;  %v14897_v8 = vmul.f32 %v14487_v18, %v1085_v0  ;;  %v18340_v22 = vunpack.i.h.bf16 %v14511_v49  ;;  %v1084_v59 = vmax.f32 %v1008_v43, 0.0 }
 0x1b8   : > { %v1900_v15 = vmax.f32 %v1830_v14, 0.0  ;;  %v14903_v48 = vmul.f32 %v14467_v38, %v1083_v31  ;;  %v1898_v39 = vmax.f32 %v1822_v41, 0.0  ;;  %v14906_v34 = vmul.f32 %v14489_v44, %v1086_v63 }
 0x1b9   : > { %v1286_v29 = vmul.f32 %v18340_v22, %v14444_v2  ;;  %v11948_v58 = vpop.f32.mrb[20].mxu0  ;;  %v14909_v23 = vmul.f32 %v14469_v6, %v1084_v59  ;;  %v1514_v18 = vadd.f32 %v1482_v36, %v1285_v32  ;;  %v11996_v1 = vpop.f32.mrb[20].mxu1  ;;  %v18341_v36 = vunpack.i.l.bf16 %v14539_v54 }
 0x1ba   : > { %v14911_v17 = vpack.c.bf16 %v1900_v15, %v1899_v20  ;;  %v1029_v0 = vadd.f32 %v11948_v58, %v14650_v52  ;;  %v1020_v49 = vpop.f32.mrb[21].mxu0  ;;  %v14914_v27 = vpack.c.bf16 %v1898_v39, %v1897_v33  ;;  %v1963_v38 = vpack.c.bf16 %v14906_v34, %v14897_v8  ;;  %v1834_v6 = vpop.f32.mrb[21].mxu1  ;;  %v13320_v8 = vld [vmem:[#allocation8 + $0xac] ss:$12 sps:$4 sm:$0xff]   ;;  %v13318_v34 = vld [vmem:[#allocation8 + $0xa8] ss:$12 sps:$4 sm:$0xff]  }
 0x1bb   : > { %v1515_v55 = vadd.f32 %v1483_v57, %v1286_v29  ;;  %v1021_v44 = vadd.f32 %v1020_v49, %v14650_v52  ;;  %v1843_v31 = vadd.f32 %v11996_v1, %v14704_v42  ;;  %v11949_v43 = vpop.f32.mrb[22].mxu0  ;;  %v1961_v20 = vpack.c.bf16 %v14909_v23, %v14903_v48  ;;  %v11997_v33 = vpop.f32.mrb[22].mxu1  ;;  %v13321_v48 = vld [vmem:[#allocation8 + $0x80] ss:$12 sps:$4 sm:$0xff]   ;;  %v13322_v23 = vld [vmem:[#allocation8 + $0x98] ss:$12 sps:$4 sm:$0xff]  }
 0x1bc   : > { %v14925_v32 = vmul.f32 %v18341_v36, %v14432_v62  ;;  %v1089_v14 = vmax.f32 %v1029_v0, 0.0  ;;  %v1032_v25 = vadd.f32 %v11949_v43, %v14650_v52  ;;  %v1835_v63 = vadd.f32 %v1834_v6, %v14704_v42  ;;  %v1023_v57 = vpop.f32.mrb[23].mxu0  ;;  %v1837_v15 = vpop.f32.mrb[23].mxu1 }
 0x1bd   : > { %v1087_v41 = vmax.f32 %v1021_v44, 0.0  ;;  %v1903_v22 = vmax.f32 %v1843_v31, 0.0  ;;  %v1024_v29 = vadd.f32 %v1023_v57, %v14650_v52  ;;  %v1846_v59 = vadd.f32 %v11997_v33, %v14704_v42  ;;  %2174 = vmatmul.mubr.bf16.gmra.mrb[48].mxu0 %v1953_v10 }
 0x1be   : > { %v18342_v39 = vunpack.i.h.bf16 %v14539_v54  ;;  %v1090_v0 = vmax.f32 %v1032_v25, 0.0  ;;  %v1901_v49 = vmax.f32 %v1835_v63, 0.0  ;;  %v1838_v1 = vadd.f32 %v1837_v15, %v14704_v42  ;;  %2181 = vmatprep.mubr.bf16.mxu0 %v14834_v13 }
 0x1bf   : > { %v18343_v44 = vunpack.i.l.bf16 %v14569_v7  ;;  %v1088_v43 = vmax.f32 %v1024_v29, 0.0  ;;  %v1904_v6 = vmax.f32 %v1846_v59, 0.0  ;;  %v14943_v50 = vmul.f32 %v14513_v60, %v1087_v41  ;;  %v13292_v41 = vld [vmem:[#allocation8] ss:$12 sps:$4 sm:$0xff]  }
 0x1c0   : > { %v1485_v58 = vmul.f32 %v18342_v39, %v14432_v62  ;;  %v18344_v37 = vunpack.i.l.bf16 %v14573_v51  ;;  %v1546_v10 = vmul.f32 %v1514_v18, %v1089_v14  ;;  %v1547_v36 = vmul.f32 %v1515_v55, %v1090_v0 }
 0x1c1   : > { %v1486_v31 = vmul.f32 %v18343_v44, %v14432_v62  ;;  %v1902_v25 = vmax.f32 %v1838_v1, 0.0  ;;  %v18345_v63 = vunpack.i.l.bf16 %v14543_v26  ;;  %v18346_v57 = vunpack.i.h.bf16 %v14569_v7  ;;  %v11952_v29 = vpop.f32.mrb[24].mxu0  ;;  %v12000_v0 = vpop.f32.mrb[24].mxu1  ;;  %v13297_v44 = vld [vmem:[#allocation8 + $0x1c] ss:$12 sps:$4 sm:$0xff]  }
 0x1c2   : > { %v1289_v54 = vmul.f32 %v18344_v37, %v14444_v2  ;;  %v1968_v59 = vpack.c.bf16 %v1904_v6, %v1903_v22  ;;  %v14955_v60 = vmul.f32 %v14515_v5, %v1088_v43  ;;  %v18347_v15 = vunpack.i.h.bf16 %v14573_v51  ;;  %v1036_v39 = vpop.f32.mrb[25].mxu0  ;;  %v1850_v6 = vpop.f32.mrb[25].mxu1 }
 0x1c3   : > { %v1287_v13 = vmul.f32 %v18345_v63, %v14444_v2  ;;  %v1487_v33 = vmul.f32 %v18346_v57, %v14432_v62  ;;  %v1967_v55 = vpack.c.bf16 %v1547_v36, %v1546_v10  ;;  %v1045_v14 = vadd.f32 %v11952_v29, %v14650_v52  ;;  %v11953_v43 = vpop.f32.mrb[26].mxu0  ;;  %v12001_v63 = vpop.f32.mrb[26].mxu1 }
 0x1c4   : > { %v1290_v18 = vmul.f32 %v18347_v15, %v14444_v2  ;;  %v14961_v1 = vpack.c.bf16 %v1902_v25, %v1901_v49  ;;  %v18348_v62 = vunpack.i.h.bf16 %v14543_v26  ;;  %v1037_v5 = vadd.f32 %v1036_v39, %v14650_v52  ;;  %2229 = vmatprep.mubr.bf16.mxu1 %v1968_v59  ;;  %v1039_v25 = vpop.f32.mrb[27].mxu0  ;;  %v1853_v15 = vpop.f32.mrb[27].mxu1 }
 0x1c5   : > { %v1859_v22 = vadd.f32 %v12000_v0, %v14704_v42  ;;  %v1965_v51 = vpack.c.bf16 %v14955_v60, %v14943_v50  ;;  %v1518_v37 = vadd.f32 %v1486_v31, %v1289_v54  ;;  %v1093_v10 = vmax.f32 %v1045_v14, 0.0  ;;  %2230 = vmatmul.mubr.bf16.vlgmr.msra.gmra.mrb[32].mxu1 %v1967_v55  ;;  %v13295_v31 = vld [vmem:[#allocation8 + $0x18] ss:$12 sps:$4 sm:$0xff]   ;;  %v13300_v55 = vld [vmem:[#allocation8 + $0x34] ss:$12 sps:$4 sm:$0xff]  }
 0x1c6   : > { %v1288_v7 = vmul.f32 %v18348_v62, %v14444_v2  ;;  %v1048_v49 = vadd.f32 %v11953_v43, %v14650_v52  ;;  %v1851_v36 = vadd.f32 %v1850_v6, %v14704_v42  ;;  %v1091_v2 = vmax.f32 %v1037_v5, 0.0  ;;  %2551 = vmatpush1.bf16.msra.mxu1 %v13292_v41 }
 0x1c7   : > { %v1907_v26 = vmax.f32 %v1859_v22, 0.0  ;;  %v1040_v57 = vadd.f32 %v1039_v25, %v14650_v52  ;;  %v1862_v29 = vadd.f32 %v12001_v63, %v14704_v42  ;;  %v18349_v59 = vpack.c.bf16 %v14823_v30, %v14821_v40  ;;  %2552 = vmatprep.subr.bf16.mxu1 %v13297_v44 }
 0x1c8   : > { %v1519_v54 = vadd.f32 %v1487_v33, %v1290_v18  ;;  %v1094_v14 = vmax.f32 %v1048_v49, 0.0  ;;  %v1905_v39 = vmax.f32 %v1851_v36, 0.0  ;;  %v1854_v0 = vadd.f32 %v1853_v15, %v14704_v42 }
 0x1c9   : > { %2182 = vmatmul.mubr.bf16.gmra.mrb[52].mxu0 %v18349_v59  ;;  %v1516_v62 = vadd.f32 %v14925_v32, %v1287_v13  ;;  %v1517_v5 = vadd.f32 %v1485_v58, %v1288_v7  ;;  %v1092_v22 = vmax.f32 %v1040_v57, 0.0  ;;  %v1908_v43 = vmax.f32 %v1862_v29, 0.0  ;;  %v11956_v30 = vpop.f32.mrb[28].mxu0  ;;  %v13304_v59 = vld [vmem:[#allocation8 + $0x4c] ss:$12 sps:$4 sm:$0xff]  }
 0x1ca   : > { %2189 = vmatprep.mubr.bf16.mxu0 %v14873_v21  ;;  %v1906_v6 = vmax.f32 %v1854_v0, 0.0  ;;  %v1550_v25 = vmul.f32 %v1518_v37, %v1093_v10  ;;  %v1551_v40 = vmul.f32 %v1519_v54, %v1094_v14  ;;  %2553 = vmatpush1.bf16.msra.mxu1 %v13295_v31  ;;  %v1061_v18 = vadd.f32 %v11956_v30, %v14650_v52  ;;  %v1052_v49 = vpop.f32.mrb[29].mxu0  ;;  %v12004_v21 = vpop.f32.mrb[28].mxu1  ;;  %v13298_v10 = vld [vmem:[#allocation8 + $0x30] ss:$12 sps:$4 sm:$0xff]  }
 0x1cb   : > { %v1548_v41 = vmul.f32 %v1516_v62, %v1091_v2  ;;  %v1549_v63 = vmul.f32 %v1517_v5, %v1092_v22  ;;  %v1972_v33 = vpack.c.bf16 %v1908_v43, %v1907_v26  ;;  %2554 = vmatprep.subr.bf16.mxu1 %v13300_v55  ;;  %v1053_v32 = vadd.f32 %v1052_v49, %v14650_v52  ;;  %v11957_v58 = vpop.f32.mrb[30].mxu0  ;;  %v1866_v37 = vpop.f32.mrb[29].mxu1 }
 0x1cc   : > { %v1970_v36 = vpack.c.bf16 %v1906_v6, %v1905_v39  ;;  %v1971_v44 = vpack.c.bf16 %v1551_v40, %v1550_v25  ;;  %v1875_v7 = vadd.f32 %v12004_v21, %v14704_v42  ;;  %v1097_v57 = vmax.f32 %v1061_v18, 0.0  ;;  %v1055_v26 = vpop.f32.mrb[31].mxu0  ;;  %v12005_v15 = vpop.f32.mrb[30].mxu1  ;;  %v13308_v25 = vld [vmem:[#allocation8 + $0x64] ss:$12 sps:$4 sm:$0xff]  }
 0x1cd   : > { %v1969_v13 = vpack.c.bf16 %v1549_v63, %v1548_v41  ;;  %v1064_v2 = vadd.f32 %v11957_v58, %v14650_v52  ;;  %v1867_v29 = vadd.f32 %v1866_v37, %v14704_v42  ;;  %v1095_v31 = vmax.f32 %v1053_v32, 0.0  ;;  %v1869_v0 = vpop.f32.mrb[31].mxu1  ;;  %v18355_v58 = vld [vmem:[#allocation24_spill] sm:$0xff] }
 0x1ce   : > { %2237 = vmatprep.mubr.bf16.mxu1 %v1970_v36  ;;  %v1056_v54 = vadd.f32 %v1055_v26, %v14650_v52  ;;  %v1911_v14 = vmax.f32 %v1875_v7, 0.0  ;;  %v1878_v39 = vadd.f32 %v12005_v15, %v14704_v42  ;;  %v1870_v5 = vadd.f32 %v1869_v0, %v14704_v42  ;;  %2555 = vmatpush1.bf16.msra.mxu1 %v13298_v10  ;;  %v13306_v42 = vld [vmem:[#allocation8 + $0x60] ss:$12 sps:$4 sm:$0xff]  }
 0x1cf   : > { %2238 = vmatmul.mubr.bf16.gmra.mrb[36].mxu1 %v1969_v13  ;;  %v1098_v55 = vmax.f32 %v1064_v2, 0.0  ;;  %v1909_v62 = vmax.f32 %v1867_v29, 0.0  ;;  %v1554_v22 = vmul.f32 %v14634_v47, %v1097_v57  ;;  %v1552_v6 = vmul.f32 %v14614_v16, %v1095_v31  ;;  %2556 = vmatprep.subr.bf16.mxu1 %v13304_v59  ;;  %v13313_v47 = vld [vmem:[#allocation8 + $0x50] ss:$12 sps:$4 sm:$0xff]   ;;  %v15025_v7 = vld [vmem:[%s18077_s8] sm:$0xff]  ;;  %v18356_v57 = vld [vmem:[#allocation25_spill] sm:$0xff] }
 0x1d0   : > { %2245 = vmatprep.mubr.bf16.mxu1 %v1972_v33  ;;  %v1096_v43 = vmax.f32 %v1056_v54, 0.0  ;;  %v1912_v52 = vmax.f32 %v1878_v39, 0.0  ;;  %v1910_v11 = vmax.f32 %v1870_v5, 0.0  ;;  %v18350_v16 = vmov 0   ;;  %12012 = vmatprep.subr.bf16.mxu0 %v13313_v47 }
 0x1d1   : > { %2190 = vmatmul.mubr.bf16.gmra.mrb[56].mxu0 %v1957_v24  ;;  %v1555_v24 = vmul.f32 %v14636_v9, %v1098_v55  ;;  %v13310_v9 = vld [vmem:[#allocation8 + $0x78] ss:$12 sps:$4 sm:$0xff]   ;;  %v18352_v50 = vunpack.i.l.bf16 %v14309_v12  ;;  %v18354_v36 = vunpack.i.h.bf16 %v14309_v12  ;;  %v18357_v12 = vld [vmem:[#allocation21_spill] sm:$0xff] }
 0x1d2   : > { %2197 = vmatprep.mubr.bf16.mxu0 %v14867_v35  ;;  %v1553_v40 = vmul.f32 %v14616_v19, %v1096_v43  ;;  %v1976_v30 = vpack.c.bf16 %v1912_v52, %v1911_v14  ;;  %v1974_v35 = vpack.c.bf16 %v1910_v11, %v1909_v62  ;;  %2557 = vmatpush1.bf16.msra.mxu1 %v13302_v4  ;;  %v13312_v19 = vld [vmem:[#allocation8 + $0x7c] ss:$12 sps:$4 sm:$0xff]   ;;  %v18358_v15 = vunpack.i.l.bf16 %v18357_v12  ;;  %v18362_v52 = vld [vmem:[#allocation22_spill] sm:$0xff] }
 0x1d3   : > { %v1975_v41 = vpack.c.bf16 %v1555_v24, %v1554_v22  ;;  %2558 = vmatprep.subr.bf16.mxu1 %v13308_v25  ;;  %12013 = vmatpush3.bf16.msra.mxu0 %v13313_v47  ;;  %v1981_v60 = vmul.f32 %v18352_v50, %v14449_v3  ;;  %v1982_v21 = vmul.f32 %v18354_v36, %v14449_v3  ;;  %v18361_v55 = vunpack.i.h.bf16 %v18357_v12  ;;  %v18363_v11 = vld [vmem:[#allocation23_spill] sm:$0xff] }
 0x1d4   : > { %v1973_v63 = vpack.c.bf16 %v1553_v40, %v1552_v6  ;;  %12014 = vmatprep.subr.bf16.mxu0 %v13317_v56  ;;  %v1983_v59 = vmul.f32 %v18358_v15, %v14449_v3  ;;  %v18377_v15 = vld [vmem:[#allocation31_spill] sm:$0xff] }
 0x1d5   : > { %v1984_v62 = vmul.f32 %v18361_v55, %v14449_v3 }
 0x1d6   : > { %2559 = vmatpush1.bf16.msra.mxu1 %v13306_v42 }
 0x1d7   : > { %2246 = vmatmul.mubr.bf16.gmra.mrb[40].mxu1 %v1971_v44  ;;  %2560 = vmatprep.subr.bf16.mxu1 %v13312_v19 }
 0x1d8   : > { %2253 = vmatprep.mubr.bf16.mxu1 %v1974_v35  ;;  %12015 = vmatpush3.bf16.msra.mxu0 %v13317_v56 }
 0x1d9   : > { %2198 = vmatmul.mubr.bf16.gmra.mrb[60].mxu0 %v1959_v28  ;;  %v13314_v28 = vld [vmem:[#allocation8 + $0x90] ss:$12 sps:$4 sm:$0xff]   ;;  %12016 = vmatprep.subr.bf16.mxu0 %v13321_v48 }
 0x1da   : > { %2205 = vmatprep.mubr.bf16.mxu0 %v14914_v27  ;;  %2561 = vmatpush1.bf16.msra.mxu1 %v13310_v9  ;;  %v13323_v27 = vld [vmem:[#allocation8 + $0xb0] ss:$12 sps:$4 sm:$0xff]  }
 0x1db   : > { %2562 = vmatprep.subr.bf16.mxu1 %v13316_v45 }
 0x1dc   : > { %12017 = vmatpush3.bf16.msra.mxu0 %v13321_v48 }
 0x1dd   : > { %12018 = vmatprep.subr.bf16.mxu0 %v13322_v23 }
 0x1de   : > { %2563 = vmatpush1.bf16.msra.mxu1 %v13314_v28 }
 0x1df   : > { %2254 = vmatmul.mubr.bf16.gmra.mrb[44].mxu1 %v1973_v63  ;;  %2564 = vmatprep.subr.bf16.mxu1 %v13320_v8 }
 0x1e0   : > { %2261 = vmatprep.mubr.bf16.mxu1 %v1976_v30  ;;  %12019 = vmatpush3.bf16.msra.mxu0 %v13322_v23  ;;  %v18364_v30 = vld [vmem:[#allocation26_spill] sm:$0xff] }
 0x1e1   : > { %2206 = vmatmul.mubr.bf16.gmra.mrb[64].mxu0 %v1961_v20  ;;  %12020 = vmatprep.subr.bf16.mxu0 %v13323_v27  ;;  %v18365_v35 = vunpack.i.l.bf16 %v18364_v30  ;;  %v18368_v45 = vunpack.i.h.bf16 %v18364_v30  ;;  %v18383_v30 = vld [vmem:[#allocation33_spill] sm:$0xff] }
 0x1e2   : > { %2213 = vmatprep.mubr.bf16.mxu0 %v14911_v17  ;;  %2565 = vmatpush1.bf16.msra.mxu1 %v13318_v34  ;;  %v18351_v17 = vmov 0.0   ;;  %v18369_v34 = vld [vmem:[#allocation27_spill] sm:$0xff] }
 0x1e3   : > { %12054 = vmatprep.subr.bf16.mxu1 %v18351_v17  ;;  %v1986_v56 = vmul.f32 %v18368_v45, %v14449_v3 }
 0x1e4   : > { %12021 = vmatpush3.bf16.msra.mxu0 %v13323_v27 }
 0x1e5   : > { %12102 = vmatprep.subr.bf16.mxu0 %v18351_v17 }
 0x1e7   : > { %2262 = vmatmul.mubr.bf16.gmra.mrb[48].mxu1 %v1975_v41  ;;  %v1985_v41 = vmul.f32 %v18365_v35, %v14449_v3 }
 0x1e8   : > { %2582 = vmatprep.mubr.bf16.mxu1 %v18350_v16 }
 0x1e9   : > { %2214 = vmatmul.mubr.bf16.gmra.mrb[68].mxu0 %v1963_v38 }
 0x1ea   : > { %2221 = vmatprep.mubr.bf16.mxu0 %v14961_v1 }
 0x1f1   : > { %2222 = vmatmul.mubr.bf16.gmra.mrb[72].mxu0 %v1965_v51  ;;  %v18353_v51 = vld [vmem:[#allocation20_spill] sm:$0xff] }
 0x1f2   : > { %v2340_v33 = vsub.s32 4, %v18353_v51 }
 0x1f4   : > { %v15028_v37 = vrot.slane %v15025_v7, %v2340_v33 }
 0x270   : > { %v11510_v38 = vpop.f32.mrb[32].mxu0 }
 0x271   : > { %v11511_v20 = vpop.f32.mrb[33].mxu0 }
 0x272   : > { %v11512_v1 = vadd.f32 %v11511_v20, %v11510_v38  ;;  %v11513_v18 = vpop.f32.mrb[34].mxu0  ;;  %v18370_v38 = vld [vmem:[#allocation28_spill] sm:$0xff] }
 0x273   : > { %v11514_v49 = vpop.f32.mrb[35].mxu0 }
 0x274   : > { %v2144_v44 = vadd.f32 %v11512_v1, %v1981_v60  ;;  %v11515_v32 = vadd.f32 %v11514_v49, %v11513_v18  ;;  %v18371_v1 = vld [vmem:[#allocation29_spill] sm:$0xff] }
 0x275   : > { %v18372_v33 = vunpack.i.l.bf16 %v18371_v1 }
 0x276   : > { %v2306_v13 = vadd.f32 %v18355_v58, %v2144_v44  ;;  %v2147_v10 = vadd.f32 %v11515_v32, %v1982_v21  ;;  %v18375_v58 = vunpack.i.h.bf16 %v18371_v1  ;;  %v18388_v1 = vld [vmem:[#allocation55_spill] sm:$0xff] }
 0x277   : > { %v1987_v18 = vmul.f32 %v18372_v33, %v14449_v3 }
 0x278   : > { %v2307_v2 = vadd.f32 %v18356_v57, %v2147_v10  ;;  %v11516_v26 = vpop.f32.mrb[36].mxu0  ;;  %v15035_v31 = vadd.f32 %v15028_v37, %v2306_v13  ;;  %v1988_v13 = vmul.f32 %v18375_v58, %v14449_v3 }
 0x279   : > { %v11517_v29 = vpop.f32.mrb[37].mxu0 }
 0x27a   : > { %18359 = vst [vmem:[#allocation24_spill] sm:$0xff] %v15035_v31  ;;  %v15038_v54 = vadd.f32 %v15028_v37, %v2307_v2  ;;  %v11518_v14 = vadd.f32 %v11517_v29, %v11516_v26  ;;  %v11519_v39 = vpop.f32.mrb[38].mxu0  ;;  %v18376_v26 = vld [vmem:[#allocation30_spill] sm:$0xff] }
 0x27b   : > { %v11520_v0 = vpop.f32.mrb[39].mxu0 }
 0x27c   : > { %18360 = vst [vmem:[#allocation25_spill] sm:$0xff] %v15038_v54  ;;  %v2406_v5 = vpack.c.bf16 %v15038_v54, %v15035_v31  ;;  %v2152_v22 = vadd.f32 %v11518_v14, %v1983_v59  ;;  %v11521_v43 = vadd.f32 %v11520_v0, %v11519_v39  ;;  %v18378_v0 = vld [vmem:[#allocation32_spill] sm:$0xff] }
 0x27d   : > { %v18379_v55 = vunpack.i.l.bf16 %v18378_v0 }
 0x27e   : > { %v2308_v6 = vadd.f32 %v18362_v52, %v2152_v22  ;;  %v2155_v4 = vadd.f32 %v11521_v43, %v1984_v62  ;;  %2583 = vmatmul.mubr.bf16.vlgmr.msra.gmra.mrb[52].mxu1 %v2406_v5  ;;  %12022 = vmatprep.mubr.bf16.mxu0 %v2406_v5 }
 0x27f   : > { %2592 = vmatprep.mubr.bf16.mxu1 %v18350_v16  ;;  %v1989_v62 = vmul.f32 %v18379_v55, %v14449_v3 }
 0x280   : > { %v2309_v24 = vadd.f32 %v18363_v11, %v2155_v4  ;;  %v11522_v25 = vpop.f32.mrb[40].mxu0  ;;  %v15052_v19 = vadd.f32 %v15028_v37, %v2308_v6  ;;  %v18382_v4 = vunpack.i.h.bf16 %v18378_v0 }
 0x281   : > { %v11523_v40 = vpop.f32.mrb[41].mxu0 }
 0x282   : > { %v11524_v63 = vadd.f32 %v11523_v40, %v11522_v25  ;;  %v11525_v42 = vpop.f32.mrb[42].mxu0  ;;  %18366 = vst [vmem:[#allocation21_spill] sm:$0xff] %v15052_v19  ;;  %v15055_v47 = vadd.f32 %v15028_v37, %v2309_v24  ;;  %v1990_v11 = vmul.f32 %v18382_v4, %v14449_v3 }
 0x283   : > { %v11526_v9 = vpop.f32.mrb[43].mxu0 }
 0x284   : > { %18367 = vst [vmem:[#allocation22_spill] sm:$0xff] %v15055_v47  ;;  %v2160_v28 = vadd.f32 %v11524_v63, %v1985_v41  ;;  %v11527_v8 = vadd.f32 %v11526_v9, %v11525_v42  ;;  %v2407_v48 = vpack.c.bf16 %v15055_v47, %v15052_v19  ;;  %v18384_v42 = vld [vmem:[#allocation34_spill] sm:$0xff] }
 0x286   : > { %v2310_v23 = vadd.f32 %v18369_v34, %v2160_v28  ;;  %v2163_v27 = vadd.f32 %v11527_v8, %v1986_v56  ;;  %2593 = vmatmul.mubr.bf16.gmra.mrb[56].mxu1 %v2407_v48  ;;  %12023 = vmatmul.mubr.bf16.vlgmr.msra.gmra.mrb[76].mxu0 %v2407_v48  ;;  %v18385_v34 = vunpack.i.l.bf16 %v14394_v46 }
 0x287   : > { %2602 = vmatprep.mubr.bf16.mxu1 %v18350_v16 }
 0x288   : > { %v2311_v20 = vadd.f32 %v18370_v38, %v2163_v27  ;;  %v11528_v50 = vpop.f32.mrb[44].mxu0  ;;  %v15069_v21 = vadd.f32 %v15028_v37, %v2310_v23  ;;  %v1991_v23 = vmul.f32 %v18385_v34, %v14449_v3 }
 0x289   : > { %v11529_v60 = vpop.f32.mrb[45].mxu0 }
 0x28a   : > { %v11530_v49 = vadd.f32 %v11529_v60, %v11528_v50  ;;  %v11531_v36 = vpop.f32.mrb[46].mxu0  ;;  %18373 = vst [vmem:[#allocation23_spill] sm:$0xff] %v15069_v21  ;;  %v15072_v44 = vadd.f32 %v15028_v37, %v2311_v20 }
 0x28b   : > { %v11532_v32 = vpop.f32.mrb[47].mxu0 }
 0x28c   : > { %18374 = vst [vmem:[#allocation26_spill] sm:$0xff] %v15072_v44  ;;  %v2168_v10 = vadd.f32 %v11530_v49, %v1987_v18  ;;  %v11533_v57 = vadd.f32 %v11532_v32, %v11531_v36  ;;  %v2408_v2 = vpack.c.bf16 %v15072_v44, %v15069_v21  ;;  %v18389_v36 = vunpack.i.h.bf16 %v14394_v46  ;;  %v18394_v46 = vld [vmem:[#allocation36_spill] sm:$0xff] }
 0x28e   : > { %v2312_v29 = vadd.f32 %v18376_v26, %v2168_v10  ;;  %v2171_v12 = vadd.f32 %v11533_v57, %v1988_v13  ;;  %2603 = vmatmul.mubr.bf16.gmra.mrb[60].mxu1 %v2408_v2  ;;  %12026 = vmatprep.mubr.bf16.mxu0 %v2408_v2  ;;  %v1992_v32 = vmul.f32 %v18389_v36, %v14449_v3  ;;  %v18390_v57 = vld [vmem:[#allocation53_spill] sm:$0xff]  ;;  %v18391_v26 = vld [vmem:[#allocation56_spill] sm:$0xff]  ;;  %v18404_v36 = vld [vmem:[#allocation58_spill] sm:$0xff] }
 0x28f   : > { %2612 = vmatprep.mubr.bf16.mxu1 %v18350_v16 }
 0x290   : > { %v2313_v59 = vadd.f32 %v18377_v15, %v2171_v12  ;;  %v11534_v14 = vpop.f32.mrb[48].mxu0  ;;  %v15086_v43 = vadd.f32 %v15028_v37, %v2312_v29  ;;  %v18392_v12 = vld [vmem:[#allocation35_spill] sm:$0xff] }
 0x291   : > { %v11535_v39 = vpop.f32.mrb[49].mxu0 }
 0x292   : > { %v11536_v5 = vadd.f32 %v11535_v39, %v11534_v14  ;;  %v11537_v22 = vpop.f32.mrb[50].mxu0  ;;  %18380 = vst [vmem:[#allocation27_spill] sm:$0xff] %v15086_v43  ;;  %v15089_v52 = vadd.f32 %v15028_v37, %v2313_v59  ;;  %v18393_v14 = vld [vmem:[#allocation54_spill] sm:$0xff] }
 0x293   : > { %v11538_v6 = vpop.f32.mrb[51].mxu0 }
 0x294   : > { %18381 = vst [vmem:[#allocation28_spill] sm:$0xff] %v15089_v52  ;;  %v2176_v24 = vadd.f32 %v11536_v5, %v1989_v62  ;;  %v11539_v25 = vadd.f32 %v11538_v6, %v11537_v22  ;;  %v2409_v40 = vpack.c.bf16 %v15089_v52, %v15086_v43  ;;  %v18395_v6 = vunpack.i.l.bf16 %v14413_v53 }
 0x296   : > { %v2314_v35 = vadd.f32 %v18383_v30, %v2176_v24  ;;  %v2179_v41 = vadd.f32 %v11539_v25, %v1990_v11  ;;  %2613 = vmatmul.mubr.bf16.gmra.mrb[64].mxu1 %v2409_v40  ;;  %12027 = vmatmul.mubr.bf16.gmra.mrb[80].mxu0 %v2409_v40  ;;  %v1993_v4 = vmul.f32 %v18395_v6, %v14449_v3 }
 0x297   : > { %2622 = vmatprep.mubr.bf16.mxu1 %v18350_v16 }
 0x298   : > { %v11576_v63 = vpop.f32.mrb[32].mxu1  ;;  %v2315_v9 = vadd.f32 %v18384_v42, %v2179_v41  ;;  %v15103_v50 = vadd.f32 %v15028_v37, %v2314_v35  ;;  %v18397_v35 = vunpack.i.h.bf16 %v14413_v53 }
 0x299   : > { %v11577_v56 = vpop.f32.mrb[33].mxu1 }
 0x29a   : > { %v11578_v28 = vadd.f32 %v11577_v56, %v11576_v63  ;;  %v11579_v48 = vpop.f32.mrb[34].mxu1  ;;  %18386 = vst [vmem:[#allocation29_spill] sm:$0xff] %v15103_v50  ;;  %v15106_v60 = vadd.f32 %v15028_v37, %v2315_v9  ;;  %v1994_v41 = vmul.f32 %v18397_v35, %v14449_v3  ;;  %v18399_v56 = vld [vmem:[#allocation59_spill] sm:$0xff] }
 0x29b   : > { %v11580_v20 = vpop.f32.mrb[35].mxu1  ;;  %v18410_v35 = vld [vmem:[#allocation39_spill] sm:$0xff] }
 0x29c   : > { %v11540_v45 = vpop.f32.mrb[52].mxu0  ;;  %18387 = vst [vmem:[#allocation30_spill] sm:$0xff] %v15106_v60  ;;  %v2232_v33 = vadd.f32 %v11578_v28, %v18388_v1  ;;  %v11581_v18 = vadd.f32 %v11580_v20, %v11579_v48  ;;  %v2410_v10 = vpack.c.bf16 %v15106_v60, %v15103_v50  ;;  %v18402_v1 = vld [vmem:[#allocation60_spill] sm:$0xff] }
 0x29d   : > { %v11541_v8 = vpop.f32.mrb[53].mxu0 }
 0x29e   : > { %v11542_v27 = vadd.f32 %v11541_v8, %v11540_v45  ;;  %v11543_v38 = vpop.f32.mrb[54].mxu0  ;;  %v15115_v2 = vadd.f32 %v18390_v57, %v2232_v33  ;;  %v2235_v29 = vadd.f32 %v11581_v18, %v18391_v26  ;;  %2623 = vmatmul.mubr.bf16.gmra.mrb[68].mxu1 %v2410_v10  ;;  %12030 = vmatprep.mubr.bf16.mxu0 %v2410_v10  ;;  %v18403_v18 = vld [vmem:[#allocation38_spill] sm:$0xff]  ;;  %v18405_v26 = vunpack.i.l.bf16 %v14430_v61 }
 0x29f   : > { %v11544_v49 = vpop.f32.mrb[55].mxu0  ;;  %2632 = vmatprep.mubr.bf16.mxu1 %v18350_v16 }
 0x2a0   : > { %v2184_v58 = vadd.f32 %v11542_v27, %v1991_v23  ;;  %v11545_v13 = vadd.f32 %v11544_v49, %v11543_v38  ;;  %v15120_v39 = vadd.f32 %v18393_v14, %v2235_v29  ;;  %v18400_v23 = vld [vmem:[#allocation37_spill] sm:$0xff]  ;;  %v1995_v29 = vmul.f32 %v18405_v26, %v14449_v3  ;;  %v18418_v26 = vld [vmem:[#allocation67_spill] sm:$0xff] }
 0x2a1   : > { %v18401_v38 = vld [vmem:[#allocation57_spill] sm:$0xff] }
 0x2a2   : > { %v2316_v15 = vadd.f32 %v18392_v12, %v2184_v58  ;;  %v2187_v59 = vadd.f32 %v11545_v13, %v1992_v32  ;;  %v11582_v62 = vpop.f32.mrb[36].mxu1 }
 0x2a3   : > { %v11583_v22 = vpop.f32.mrb[37].mxu1 }
 0x2a4   : > { %v2317_v0 = vadd.f32 %v18394_v46, %v2187_v59  ;;  %v11546_v55 = vpop.f32.mrb[56].mxu0  ;;  %v11584_v24 = vadd.f32 %v11583_v22, %v11582_v62  ;;  %v11585_v40 = vpop.f32.mrb[38].mxu1  ;;  %v15134_v9 = vadd.f32 %v15028_v37, %v2316_v15 }
 0x2a5   : > { %v11547_v5 = vpop.f32.mrb[57].mxu0  ;;  %v11586_v42 = vpop.f32.mrb[39].mxu1 }
 0x2a6   : > { %v11548_v11 = vadd.f32 %v11547_v5, %v11546_v55  ;;  %v11549_v25 = vpop.f32.mrb[58].mxu0  ;;  %v15128_v30 = vadd.f32 %v15028_v37, %v2317_v0  ;;  %18398 = vst [vmem:[#allocation32_spill] sm:$0xff] %v15134_v9  ;;  %v2240_v28 = vadd.f32 %v11584_v24, %v18399_v56  ;;  %v11587_v48 = vadd.f32 %v11586_v42, %v11585_v40  ;;  %v18413_v56 = vld [vmem:[#allocation40_spill] sm:$0xff] }
 0x2a7   : > { %v11550_v63 = vpop.f32.mrb[59].mxu0  ;;  %v18407_v0 = vunpack.i.h.bf16 %v14430_v61 }
 0x2a8   : > { %18396 = vst [vmem:[#allocation31_spill] sm:$0xff] %v15128_v30  ;;  %v2192_v45 = vadd.f32 %v11548_v11, %v1993_v4  ;;  %v11551_v8 = vadd.f32 %v11550_v63, %v11549_v25  ;;  %v2411_v34 = vpack.c.bf16 %v15128_v30, %v15134_v9  ;;  %v15141_v20 = vadd.f32 %v18401_v38, %v2240_v28  ;;  %v18409_v4 = vld [vmem:[#allocation63_spill] sm:$0xff]  ;;  %v18411_v63 = vld [vmem:[#allocation61_spill] sm:$0xff] }
 0x2a9   : > { %v2243_v33 = vadd.f32 %v11587_v48, %v18402_v1  ;;  %v1996_v55 = vmul.f32 %v18407_v0, %v14449_v3  ;;  %v18412_v3 = vld [vmem:[#allocation64_spill] sm:$0xff] }
 0x2aa   : > { %v2318_v27 = vadd.f32 %v18400_v23, %v2192_v45  ;;  %v2195_v53 = vadd.f32 %v11551_v8, %v1994_v41  ;;  %2633 = vmatmul.mubr.bf16.gmra.mrb[72].mxu1 %v2411_v34  ;;  %12031 = vmatmul.mubr.bf16.gmra.mrb[84].mxu0 %v2411_v34  ;;  %v11588_v13 = vpop.f32.mrb[40].mxu1  ;;  %v18414_v8 = vld [vmem:[#allocation62_spill] sm:$0xff] }
 0x2ab   : > { %v15146_v32 = vadd.f32 %v18404_v36, %v2243_v33  ;;  %2642 = vmatprep.mubr.bf16.mxu1 %v18350_v16  ;;  %v11589_v57 = vpop.f32.mrb[41].mxu1 }
 0x2ac   : > { %v2319_v49 = vadd.f32 %v18403_v18, %v2195_v53  ;;  %v11552_v58 = vpop.f32.mrb[60].mxu0  ;;  %v11590_v15 = vadd.f32 %v11589_v57, %v11588_v13  ;;  %v11591_v14 = vpop.f32.mrb[42].mxu1  ;;  %v15159_v22 = vadd.f32 %v15028_v37, %v2318_v27 }
 0x2ad   : > { %v11553_v10 = vpop.f32.mrb[61].mxu0  ;;  %v11592_v5 = vpop.f32.mrb[43].mxu1 }
 0x2ae   : > { %v11554_v12 = vadd.f32 %v11553_v10, %v11552_v58  ;;  %v11555_v59 = vpop.f32.mrb[62].mxu0  ;;  %v15153_v46 = vadd.f32 %v15028_v37, %v2319_v49  ;;  %18408 = vst [vmem:[#allocation34_spill] sm:$0xff] %v15159_v22  ;;  %v2248_v11 = vadd.f32 %v11590_v15, %v18409_v4  ;;  %v11593_v25 = vadd.f32 %v11592_v5, %v11591_v14  ;;  %v18417_v10 = vld [vmem:[#allocation43_spill] sm:$0xff]  ;;  %v18419_v14 = vld [vmem:[#allocation41_spill] sm:$0xff]  ;;  %v18421_v5 = vld [vmem:[#allocation44_spill] sm:$0xff] }
 0x2af   : > { %v11556_v62 = vpop.f32.mrb[63].mxu0  ;;  %v18422_v4 = vld [vmem:[#allocation68_spill] sm:$0xff] }
 0x2b0   : > { %18406 = vst [vmem:[#allocation33_spill] sm:$0xff] %v15153_v46  ;;  %v2200_v6 = vadd.f32 %v11554_v12, %v1995_v29  ;;  %v11557_v24 = vadd.f32 %v11556_v62, %v11555_v59  ;;  %v2412_v40 = vpack.c.bf16 %v15153_v46, %v15159_v22  ;;  %v15166_v42 = vadd.f32 %v18411_v63, %v2248_v11 }
 0x2b1   : > { %v2251_v45 = vadd.f32 %v11593_v25, %v18412_v3 }
 0x2b2   : > { %v2320_v41 = vadd.f32 %v18410_v35, %v2200_v6  ;;  %v2203_v61 = vadd.f32 %v11557_v24, %v1996_v55  ;;  %2643 = vmatmul.mubr.bf16.gmra.mrb[76].mxu1 %v2412_v40  ;;  %12034 = vmatprep.mubr.bf16.mxu0 %v2412_v40  ;;  %v11594_v23 = vpop.f32.mrb[44].mxu1  ;;  %v18420_v55 = vld [vmem:[#allocation65_spill] sm:$0xff]  ;;  %v18423_v24 = vld [vmem:[#allocation42_spill] sm:$0xff] }
 0x2b3   : > { %v15171_v48 = vadd.f32 %v18414_v8, %v2251_v45  ;;  %2652 = vmatprep.mubr.bf16.mxu1 %v18350_v16  ;;  %v11595_v38 = vpop.f32.mrb[45].mxu1  ;;  %v18424_v40 = vld [vmem:[#allocation66_spill] sm:$0xff] }
 0x2b4   : > { %v2321_v28 = vadd.f32 %v18413_v56, %v2203_v61  ;;  %v11558_v34 = vpop.f32.mrb[64].mxu0  ;;  %v11596_v1 = vadd.f32 %v11595_v38, %v11594_v23  ;;  %v11597_v18 = vpop.f32.mrb[46].mxu1  ;;  %v15178_v13 = vadd.f32 %v15028_v37, %v2320_v41 }
 0x2b5   : > { %v11559_v27 = vpop.f32.mrb[65].mxu0  ;;  %v11598_v58 = vpop.f32.mrb[47].mxu1 }
 0x2b6   : > { %v11560_v53 = vadd.f32 %v11559_v27, %v11558_v34  ;;  %v11561_v33 = vpop.f32.mrb[66].mxu0  ;;  %v15175_v49 = vadd.f32 %v15028_v37, %v2321_v28  ;;  %18416 = vst [vmem:[#allocation53_spill] sm:$0xff] %v15178_v13  ;;  %v2256_v29 = vadd.f32 %v11596_v1, %v18418_v26  ;;  %v11599_v15 = vadd.f32 %v11598_v58, %v11597_v18 }
 0x2b7   : > { %v11562_v36 = vpop.f32.mrb[67].mxu0 }
 0x2b8   : > { %18415 = vst [vmem:[#allocation55_spill] sm:$0xff] %v15175_v49  ;;  %v2208_v57 = vadd.f32 %v11560_v53, %v18417_v10  ;;  %v11563_v12 = vadd.f32 %v11562_v36, %v11561_v33  ;;  %v2413_v59 = vpack.c.bf16 %v15175_v49, %v15178_v13  ;;  %v15186_v62 = vadd.f32 %v18420_v55, %v2256_v29  ;;  %v18427_v53 = vld [vmem:[#allocation47_spill] sm:$0xff]  ;;  %v18430_v29 = vld [vmem:[#allocation69_spill] sm:$0xff] }
 0x2b9   : > { %v2259_v11 = vadd.f32 %v11599_v15, %v18422_v4  ;;  %v18428_v33 = vld [vmem:[#allocation71_spill] sm:$0xff]  ;;  %v18431_v15 = vld [vmem:[#allocation48_spill] sm:$0xff] }
 0x2ba   : > { %v2322_v0 = vadd.f32 %v18419_v14, %v2208_v57  ;;  %v2211_v6 = vadd.f32 %v11563_v12, %v18421_v5  ;;  %2653 = vmatmul.mubr.bf16.gmra.mrb[80].mxu1 %v2413_v59  ;;  %12035 = vmatmul.mubr.bf16.gmra.mrb[88].mxu0 %v2413_v59  ;;  %v11600_v63 = vpop.f32.mrb[48].mxu1  ;;  %v18429_v57 = vld [vmem:[#allocation45_spill] sm:$0xff]  ;;  %v18432_v14 = vld [vmem:[#allocation72_spill] sm:$0xff] }
 0x2bb   : > { %v2335_v35 = vadd.f32 %v18424_v40, %v2259_v11  ;;  %2662 = vmatprep.mubr.bf16.mxu1 %v18350_v16  ;;  %v11601_v3 = vpop.f32.mrb[49].mxu1 }
 0x2bc   : > { %v2323_v25 = vadd.f32 %v18423_v24, %v2211_v6  ;;  %v11564_v41 = vpop.f32.mrb[68].mxu0  ;;  %v11602_v56 = vadd.f32 %v11601_v3, %v11600_v63  ;;  %v11603_v8 = vpop.f32.mrb[50].mxu1  ;;  %v15197_v38 = vadd.f32 %v15028_v37, %v2322_v0  ;;  %v18433_v0 = vld [vmem:[#allocation46_spill] sm:$0xff]  ;;  %v18437_v3 = vld [vmem:[#allocation51_spill] sm:$0xff] }
 0x2bd   : > { %v11565_v61 = vpop.f32.mrb[69].mxu0  ;;  %v11604_v27 = vpop.f32.mrb[51].mxu1  ;;  %v18434_v6 = vld [vmem:[#allocation70_spill] sm:$0xff] }
 0x2be   : > { %v11566_v45 = vadd.f32 %v11565_v61, %v11564_v41  ;;  %v11567_v28 = vpop.f32.mrb[70].mxu0  ;;  %v15194_v34 = vadd.f32 %v15028_v37, %v2323_v25  ;;  %18426 = vst [vmem:[#allocation35_spill] sm:$0xff] %v15197_v38  ;;  %v2264_v18 = vadd.f32 %v11602_v56, %v18428_v33  ;;  %v11605_v58 = vadd.f32 %v11604_v27, %v11603_v8  ;;  %v18438_v8 = vld [vmem:[#allocation49_spill] sm:$0xff]  ;;  %v18439_v27 = vld [vmem:[#allocation52_spill] sm:$0xff] }
 0x2bf   : > { %v11568_v23 = vpop.f32.mrb[71].mxu0 }
 0x2c0   : > { %18425 = vst [vmem:[#allocation56_spill] sm:$0xff] %v15194_v34  ;;  %v2216_v1 = vadd.f32 %v11566_v45, %v18427_v53  ;;  %v11569_v36 = vadd.f32 %v11568_v23, %v11567_v28  ;;  %v2414_v10 = vpack.c.bf16 %v15194_v34, %v15197_v38  ;;  %v2336_v12 = vadd.f32 %v18430_v29, %v2264_v18 }
 0x2c1   : > { %v2267_v55 = vadd.f32 %v11605_v58, %v18432_v14  ;;  %v15225_v18 = vadd.f32 %v15028_v37, %v15120_v39  ;;  %v15245_v39 = vadd.f32 %v15028_v37, %v15141_v20  ;;  %v15261_v20 = vadd.f32 %v15028_v37, %v15166_v42 }
 0x2c2   : > { %v2324_v26 = vadd.f32 %v18429_v57, %v2216_v1  ;;  %v2219_v59 = vadd.f32 %v11569_v36, %v18431_v15  ;;  %2663 = vmatmul.mubr.bf16.gmra.mrb[84].mxu1 %v2414_v10  ;;  %12038 = vmatprep.mubr.bf16.mxu0 %v2414_v10  ;;  %v18440_v1 = vld [vmem:[#allocation50_spill] sm:$0xff]  ;;  %v15235_v10 = vadd.f32 %v15028_v37, %v15146_v32 }
 0x2c3   : > { %v2337_v4 = vadd.f32 %v18434_v6, %v2267_v55  ;;  %2672 = vmatprep.mubr.bf16.mxu1 %v18350_v16  ;;  %18441 = vst [vmem:[#allocation59_spill] sm:$0xff] %v15225_v18  ;;  %v15239_v57 = vadd.f32 %v15028_v37, %v15115_v2  ;;  %18446 = vst [vmem:[#allocation58_spill] sm:$0xff] %v15245_v39  ;;  %v15254_v2 = vadd.f32 %v15028_v37, %v15171_v48 }
 0x2c4   : > { %v2325_v5 = vadd.f32 %v18433_v0, %v2219_v59  ;;  %v11570_v11 = vpop.f32.mrb[72].mxu0  ;;  %v15211_v41 = vadd.f32 %v15028_v37, %v2324_v26  ;;  %18444 = vst [vmem:[#allocation60_spill] sm:$0xff] %v15235_v10  ;;  %v2418_v15 = vpack.c.bf16 %v15235_v10, %v15245_v39  ;;  %v15257_v32 = vadd.f32 %v15028_v37, %v2335_v35 }
 0x2c5   : > { %v11571_v24 = vpop.f32.mrb[73].mxu0  ;;  %18445 = vst [vmem:[#allocation38_spill] sm:$0xff] %v15239_v57  ;;  %v2417_v29 = vpack.c.bf16 %v15225_v18, %v15239_v57  ;;  %18447 = vst [vmem:[#allocation63_spill] sm:$0xff] %v15254_v2  ;;  %v15265_v59 = vadd.f32 %v15028_v37, %v15186_v62  ;;  %v2419_v14 = vpack.c.bf16 %v15254_v2, %v15261_v20  ;;  %v2906_v0 = vsub.s32 5, %v18353_v51 }
 0x2c6   : > { %v11572_v25 = vadd.f32 %v11571_v24, %v11570_v11  ;;  %v11573_v40 = vpop.f32.mrb[74].mxu0  ;;  %18435 = vst [vmem:[#allocation54_spill] sm:$0xff] %v15211_v41  ;;  %v15214_v63 = vadd.f32 %v15028_v37, %v2325_v5  ;;  %18448 = vst [vmem:[#allocation39_spill] sm:$0xff] %v15257_v32  ;;  %v15273_v48 = vadd.f32 %v15028_v37, %v2337_v4 }
 0x2c7   : > { %v11574_v61 = vpop.f32.mrb[75].mxu0  ;;  %18449 = vst [vmem:[#allocation61_spill] sm:$0xff] %v15261_v20  ;;  %18450 = vst [vmem:[#allocation64_spill] sm:$0xff] %v15265_v59  ;;  %v2420_v55 = vpack.c.bf16 %v15257_v32, %v15265_v59  ;;  %v15276_v42 = vadd.f32 %v15028_v37, %v2336_v12 }
 0x2c8   : > { %18436 = vst [vmem:[#allocation36_spill] sm:$0xff] %v15214_v63  ;;  %v2224_v45 = vadd.f32 %v11572_v25, %v18437_v3  ;;  %v11575_v56 = vadd.f32 %v11574_v61, %v11573_v40  ;;  %v2415_v28 = vpack.c.bf16 %v15214_v63, %v15211_v41  ;;  %18451 = vst [vmem:[#allocation40_spill] sm:$0xff] %v15273_v48 }
 0x2c9   : > { %18452 = vst [vmem:[#allocation62_spill] sm:$0xff] %v15276_v42  ;;  %v2421_v62 = vpack.c.bf16 %v15273_v48, %v15276_v42 }
 0x2ca   : > { %v2326_v23 = vadd.f32 %v18438_v8, %v2224_v45  ;;  %v2227_v53 = vadd.f32 %v11575_v56, %v18439_v27  ;;  %12039 = vmatmul.mubr.bf16.gmra.mrb[92].mxu0 %v2415_v28  ;;  %2673 = vmatmul.mubr.bf16.gmra.mrb[88].mxu1 %v2415_v28 }
 0x2cb   : > { %2682 = vmatprep.mubr.bf16.mxu1 %v18350_v16 }
 0x2cc   : > { %v2327_v33 = vadd.f32 %v18440_v1, %v2227_v53  ;;  %v15228_v36 = vadd.f32 %v15028_v37, %v2326_v23 }
 0x2ce   : > { %18442 = vst [vmem:[#allocation37_spill] sm:$0xff] %v15228_v36  ;;  %v15231_v58 = vadd.f32 %v15028_v37, %v2327_v33  ;;  %v2942_v37 = vsub.s32 6, %v18353_v51 }
 0x2d0   : > { %18443 = vst [vmem:[#allocation57_spill] sm:$0xff] %v15231_v58  ;;  %v2416_v26 = vpack.c.bf16 %v15231_v58, %v15228_v36  ;;  %v15289_v35 = vrot.slane %v15025_v7, %v2942_v37 }
 0x2d2   : > { %12042 = vmatprep.mubr.bf16.mxu0 %v2416_v26  ;;  %2683 = vmatmul.mubr.bf16.gmra.mrb[92].mxu1 %v2416_v26 }
 0x2d3   : > { %12043 = vmatmul.mubr.bf16.gmra.mrb[96].mxu0 %v2417_v29  ;;  %2692 = vmatprep.mubr.bf16.mxu1 %v18350_v16 }
 0x2d4   : > { %12046 = vmatprep.mubr.bf16.mxu0 %v2418_v15 }
 0x2da   : > { %2693 = vmatmul.mubr.bf16.gmra.mrb[96].mxu1 %v2417_v29 }
 0x2db   : > { %12047 = vmatmul.mubr.bf16.gmra.mrb[100].mxu0 %v2419_v14  ;;  %2702 = vmatprep.mubr.bf16.mxu1 %v18350_v16 }
 0x2dc   : > { %12050 = vmatprep.mubr.bf16.mxu0 %v2420_v55 }
 0x2e2   : > { %2703 = vmatmul.mubr.bf16.gmra.mrb[100].mxu1 %v2418_v15 }
 0x2e3   : > { %12051 = vmatmul.mubr.bf16.gmra.mrb[104].mxu0 %v2421_v62  ;;  %2712 = vmatprep.mubr.bf16.mxu1 %v18350_v16 }
 0x2e4   : > { %12104 = vmatprep.mubr.msk.bf16.mxu0 %vm13882_vm0, %v18351_v17 }
 0x2ea   : > { %2713 = vmatmul.mubr.bf16.gmra.mrb[104].mxu1 %v2419_v14 }
 0x2eb   : > { %2722 = vmatprep.mubr.bf16.mxu1 %v18350_v16 }
 0x2f2   : > { %2723 = vmatmul.mubr.bf16.gmra.mrb[108].mxu1 %v2420_v55 }
 0x2f3   : > { %2732 = vmatprep.mubr.bf16.mxu1 %v18350_v16  ;;  %v15294_v16 = vrot.slane %v15025_v7, %v2906_v0 }
 0x2fa   : > { %2733 = vmatmul.mubr.bf16.gmra.mrb[112].mxu1 %v2421_v62 }
 0x2fb   : > { %12056 = vmatprep.mubr.msk.bf16.mxu1 %vm13882_vm0, %v18351_v17 }
 0x351   : > { %v2584_v12 = vpop.f32.mrb[52].mxu1 }
 0x352   : > { %v2586_v5 = vpop.f32.mrb[53].mxu1  ;;  %v2908_v61 = vadd.f32 %v15294_v16, %v2584_v12 }
 0x353   : > { %v2944_v6 = vadd.f32 %v15289_v35, %v2586_v5  ;;  %v2588_v4 = vpop.f32.mrb[54].mxu1 }
 0x354   : > { %v2590_v11 = vpop.f32.mrb[55].mxu1  ;;  %v15313_v1 = vpack.c.bf16 %v2908_v61, %v2908_v61  ;;  %v2909_v29 = vadd.f32 %v15294_v16, %v2588_v4 }
 0x355   : > { %v15296_v24 = vpack.c.bf16 %v2944_v6, %v2944_v6  ;;  %v2945_v25 = vadd.f32 %v15289_v35, %v2590_v11 }
 0x356   : > { %v15328_v12 = vpack.c.bf16 %v2909_v29, %v2909_v29 }
 0x357   : > { %v3113_v40 = vsel %vm3108_vm1, %v15296_v24, 0  ;;  %v15307_v7 = vpack.c.bf16 %v2945_v25, %v2945_v25 }
 0x358   : > { %12055 = vmatpush3.bf16.xpose.msra.mxu1 %v3113_v40  ;;  %18455 = vst [vmem:[#allocation41_spill] sm:$0xff] %v15328_v12 }
 0x359   : > { %v2594_v3 = vpop.f32.mrb[56].mxu1  ;;  %v15302_v45 = vpop.f32.mrb[76].mxu0  ;;  %12060 = vmatprep.subr.bf16.mxu1 %v18351_v17  ;;  %18453 = vst [vmem:[#allocation43_spill] sm:$0xff] %v15307_v7  ;;  %v3159_v26 = vsel %vm3108_vm1, %v15307_v7, 0 }
 0x35a   : > { %v2596_v56 = vpop.f32.mrb[57].mxu1  ;;  %v15305_v28 = vpop.f32.mrb[77].mxu0  ;;  %v2910_v6 = vadd.f32 %v15294_v16, %v2594_v3 }
 0x35b   : > { %v2598_v8 = vpop.f32.mrb[58].mxu1  ;;  %v15309_v23 = vpop.f32.mrb[78].mxu0  ;;  %v2946_v33 = vadd.f32 %v15289_v35, %v2596_v56 }
 0x35c   : > { %v2600_v27 = vpop.f32.mrb[59].mxu1  ;;  %v15311_v53 = vpop.f32.mrb[79].mxu0  ;;  %v15355_v3 = vpack.c.bf16 %v2910_v6, %v2910_v6 }
 0x35d   : > { %v15324_v55 = vpack.c.bf16 %v2946_v33, %v2946_v33  ;;  %v2947_v0 = vadd.f32 %v15289_v35, %v2600_v27 }
 0x35e   : > { %18457 = vst [vmem:[#allocation44_spill] sm:$0xff] %v15355_v3 }
 0x35f   : > { %12057 = vmatmul.mubr.msk.bf16.vlgmr.msra.gmra.mrb[116].mxu1 %vm3108_vm1, %v15313_v1  ;;  %18454 = vst [vmem:[#allocation67_spill] sm:$0xff] %v15324_v55  ;;  %v3205_v5 = vsel %vm3108_vm1, %v15324_v55, 0  ;;  %v15345_v61 = vpack.c.bf16 %v2947_v0, %v2947_v0  ;;  %v2911_v0 = vadd.f32 %v15294_v16, %v2598_v8 }
 0x360   : > { %12061 = vmatpush3.bf16.xpose.msra.mxu1 %v3159_v26  ;;  %12062 = vmatprep.mubr.msk.bf16.mxu1 %vm13882_vm0, %v18351_v17 }
 0x361   : > { %v2604_v15 = vpop.f32.mrb[60].mxu1  ;;  %12066 = vmatprep.subr.bf16.mxu1 %v18351_v17  ;;  %18456 = vst [vmem:[#allocation65_spill] sm:$0xff] %v15345_v61  ;;  %v15373_v10 = vpack.c.bf16 %v2911_v0, %v2911_v0 }
 0x362   : > { %v2606_v14 = vpop.f32.mrb[61].mxu1 }
 0x363   : > { %v15326_v62 = vpop.f32.mrb[62].mxu1  ;;  %v2948_v29 = vadd.f32 %v15289_v35, %v2606_v14  ;;  %18459 = vst [vmem:[#allocation42_spill] sm:$0xff] %v15373_v10 }
 0x364   : > { %v2610_v37 = vpop.f32.mrb[63].mxu1 }
 0x365   : > { %v15366_v6 = vpack.c.bf16 %v2948_v29, %v2948_v29  ;;  %v2949_v2 = vadd.f32 %v15289_v35, %v2610_v37 }
 0x367   : > { %12063 = vmatmul.mubr.msk.bf16.vlgmr.msra.gmra.mrb[120].mxu1 %vm3108_vm1, %v15328_v12  ;;  %18458 = vst [vmem:[#allocation68_spill] sm:$0xff] %v15366_v6  ;;  %v3297_v8 = vsel %vm3108_vm1, %v15366_v6, 0  ;;  %v15392_v39 = vpack.c.bf16 %v2949_v2, %v2949_v2 }
 0x368   : > { %12067 = vmatpush3.bf16.xpose.msra.mxu1 %v3205_v5  ;;  %12068 = vmatprep.mubr.msk.bf16.mxu1 %vm13882_vm0, %v18351_v17  ;;  %v3251_v5 = vsel %vm3108_vm1, %v15345_v61, 0 }
 0x369   : > { %v15338_v4 = vpop.f32.mrb[64].mxu1  ;;  %v15340_v11 = vpop.f32.mrb[80].mxu0  ;;  %12072 = vmatprep.subr.bf16.mxu1 %v18351_v17  ;;  %18461 = vst [vmem:[#allocation47_spill] sm:$0xff] %v15392_v39 }
 0x36a   : > { %v2616_v25 = vpop.f32.mrb[65].mxu1  ;;  %v15343_v40 = vpop.f32.mrb[81].mxu0 }
 0x36b   : > { %v15347_v56 = vpop.f32.mrb[66].mxu1  ;;  %v15349_v27 = vpop.f32.mrb[82].mxu0  ;;  %v2950_v2 = vadd.f32 %v15289_v35, %v2616_v25 }
 0x36c   : > { %v15351_v33 = vpop.f32.mrb[67].mxu1  ;;  %v15353_v26 = vpop.f32.mrb[83].mxu0 }
 0x36f   : > { %12069 = vmatmul.mubr.msk.bf16.vlgmr.msra.gmra.mrb[124].mxu1 %vm3108_vm1, %v15355_v3 }
 0x370   : > { %12073 = vmatpush3.bf16.xpose.msra.mxu1 %v3251_v5  ;;  %12074 = vmatprep.mubr.msk.bf16.mxu1 %vm13882_vm0, %v18351_v17 }
 0x371   : > { %v2624_v48 = vpop.f32.mrb[68].mxu1  ;;  %12078 = vmatprep.subr.bf16.mxu1 %v18351_v17 }
 0x372   : > { %v2626_v32 = vpop.f32.mrb[69].mxu1  ;;  %v2916_v0 = vadd.f32 %v15294_v16, %v2624_v48 }
 0x373   : > { %v2952_v14 = vadd.f32 %v15289_v35, %v2626_v32  ;;  %v15369_v42 = vpop.f32.mrb[70].mxu1  ;;  %v2912_v32 = vadd.f32 %v15294_v16, %v2604_v15 }
 0x374   : > { %v15371_v59 = vpop.f32.mrb[71].mxu1  ;;  %v15403_v18 = vpack.c.bf16 %v2916_v0, %v2916_v0  ;;  %v2913_v0 = vadd.f32 %v15294_v16, %v15326_v62 }
 0x375   : > { %v15375_v5 = vpack.c.bf16 %v2952_v14, %v2952_v14  ;;  %v2953_v44 = vadd.f32 %v15289_v35, %v15371_v59 }
 0x376   : > { %18463 = vst [vmem:[#allocation45_spill] sm:$0xff] %v15403_v18  ;;  %v15434_v46 = vpack.c.bf16 %v2913_v0, %v2913_v0 }
 0x377   : > { %18460 = vst [vmem:[#allocation66_spill] sm:$0xff] %v15375_v5  ;;  %12075 = vmatmul.mubr.msk.bf16.vlgmr.msra.gmra.mrb[128].mxu1 %vm3108_vm1, %v15373_v10  ;;  %v3481_v29 = vsel %vm3108_vm1, %v15375_v5, 0  ;;  %v15500_v52 = vpack.c.bf16 %v2953_v44, %v2953_v44 }
 0x378   : > { %12079 = vmatpush3.bf16.xpose.msra.mxu1 %v3297_v8  ;;  %12103 = vmatpush3.bf16.xpose.msra.mxu0 %v3481_v29  ;;  %v15401_v29 = vpack.c.bf16 %v2912_v32, %v2912_v32  ;;  %18466 = vst [vmem:[#allocation72_spill] sm:$0xff] %v15434_v46 }
 0x379   : > { %12080 = vmatprep.mubr.msk.bf16.mxu1 %vm13882_vm0, %v18351_v17  ;;  %12084 = vmatprep.subr.bf16.mxu1 %v18351_v17  ;;  %18473 = vst [vmem:[#allocation73_spill] sm:$0xff] %v15500_v52  ;;  %v3527_v44 = vsel %vm3108_vm1, %v15500_v52, 0 }
 0x37a   : > { %12114 = vmatprep.subr.bf16.mxu0 %v18351_v17  ;;  %18462 = vst [vmem:[#allocation71_spill] sm:$0xff] %v15401_v29 }
 0x37d   : > { %v2634_v37 = vpop.f32.mrb[72].mxu1  ;;  %v15389_v14 = vpop.f32.mrb[84].mxu0 }
 0x37e   : > { %v2636_v20 = vpop.f32.mrb[73].mxu1  ;;  %v15394_v58 = vpop.f32.mrb[85].mxu0  ;;  %v2918_v25 = vadd.f32 %v15294_v16, %v2634_v37  ;;  %v2951_v37 = vadd.f32 %v15289_v35, %v15351_v33 }
 0x37f   : > { %v2954_v8 = vadd.f32 %v15289_v35, %v2636_v20  ;;  %v15397_v15 = vpop.f32.mrb[74].mxu1  ;;  %v15399_v48 = vpop.f32.mrb[86].mxu0  ;;  %12081 = vmatmul.mubr.msk.bf16.vlgmr.msra.gmra.mrb[132].mxu1 %vm3108_vm1, %v15401_v29  ;;  %12105 = vmatmul.mubr.msk.bf16.vlgmr.msra.gmra.mrb[108].mxu0 %vm3108_vm1, %v15403_v18  ;;  %v3343_v20 = vsel %vm3108_vm1, %v15392_v39, 0 }
 0x380   : > { %v15405_v36 = vpop.f32.mrb[75].mxu1  ;;  %v15407_v57 = vpop.f32.mrb[87].mxu0  ;;  %12085 = vmatpush3.bf16.xpose.msra.mxu1 %v3343_v20  ;;  %12086 = vmatprep.mubr.msk.bf16.mxu1 %vm13882_vm0, %v18351_v17  ;;  %v15429_v20 = vpack.c.bf16 %v2950_v2, %v2950_v2 }
 0x381   : > { %v15409_v34 = vpack.c.bf16 %v2954_v8, %v2954_v8  ;;  %12116 = vmatprep.mubr.msk.bf16.mxu0 %vm13882_vm0, %v18351_v17  ;;  %12090 = vmatprep.subr.bf16.mxu1 %v18351_v17  ;;  %v2955_v54 = vadd.f32 %v15289_v35, %v15405_v36 }
 0x382   : > { %18465 = vst [vmem:[#allocation48_spill] sm:$0xff] %v15429_v20  ;;  %v3389_v2 = vsel %vm3108_vm1, %v15429_v20, 0 }
 0x383   : > { %18464 = vst [vmem:[#allocation69_spill] sm:$0xff] %v15409_v34  ;;  %v3573_v32 = vsel %vm3108_vm1, %v15409_v34, 0 }
 0x384   : > { %12115 = vmatpush3.bf16.xpose.msra.mxu0 %v3573_v32  ;;  %v15438_v32 = vpack.c.bf16 %v2918_v25, %v2918_v25 }
 0x385   : > { %v2644_v8 = vpop.f32.mrb[76].mxu1  ;;  %12126 = vmatprep.subr.bf16.mxu0 %v18351_v17 }
 0x386   : > { %v2646_v63 = vpop.f32.mrb[77].mxu1  ;;  %18467 = vst [vmem:[#allocation46_spill] sm:$0xff] %v15438_v32  ;;  %v2920_v33 = vadd.f32 %v15294_v16, %v2644_v8 }
 0x387   : > { %v2956_v38 = vadd.f32 %v15289_v35, %v2646_v63  ;;  %v15432_v41 = vpop.f32.mrb[78].mxu1  ;;  %12087 = vmatmul.mubr.msk.bf16.vlgmr.msra.gmra.mrb[136].mxu1 %vm3108_vm1, %v15434_v46 }
 0x388   : > { %v15436_v62 = vpop.f32.mrb[79].mxu1  ;;  %12091 = vmatpush3.bf16.xpose.msra.mxu1 %v3389_v2  ;;  %12092 = vmatprep.mubr.msk.bf16.mxu1 %vm13882_vm0, %v18351_v17  ;;  %v15462_v2 = vpack.c.bf16 %v2951_v37, %v2951_v37  ;;  %v15478_v9 = vpack.c.bf16 %v2920_v33, %v2920_v33  ;;  %v2915_v33 = vadd.f32 %v15294_v16, %v15347_v56 }
 0x389   : > { %v15440_v49 = vpack.c.bf16 %v2956_v38, %v2956_v38  ;;  %v2914_v38 = vadd.f32 %v15294_v16, %v15338_v4  ;;  %12096 = vmatprep.subr.bf16.mxu1 %v18351_v17 }
 0x38a   : > { %18469 = vst [vmem:[#allocation51_spill] sm:$0xff] %v15462_v2  ;;  %18471 = vst [vmem:[#allocation52_spill] sm:$0xff] %v15478_v9 }
 0x38b   : > { %18468 = vst [vmem:[#allocation70_spill] sm:$0xff] %v15440_v49  ;;  %12117 = vmatmul.mubr.msk.bf16.vlgmr.msra.gmra.mrb[112].mxu0 %vm3108_vm1, %v15438_v32  ;;  %v3665_v63 = vsel %vm3108_vm1, %v15440_v49, 0  ;;  %v15472_v60 = vpack.c.bf16 %v2914_v38, %v2914_v38 }
 0x38c   : > { %12127 = vmatpush3.bf16.xpose.msra.mxu0 %v3665_v63  ;;  %12128 = vmatprep.mubr.msk.bf16.mxu0 %vm13882_vm0, %v18351_v17 }
 0x38d   : > { %v2654_v0 = vpop.f32.mrb[80].mxu1  ;;  %v15457_v25 = vpop.f32.mrb[88].mxu0  ;;  %12138 = vmatprep.subr.bf16.mxu0 %v18351_v17  ;;  %18470 = vst [vmem:[#allocation49_spill] sm:$0xff] %v15472_v60 }
 0x38e   : > { %v2656_v22 = vpop.f32.mrb[81].mxu1  ;;  %v15464_v13 = vpop.f32.mrb[89].mxu0  ;;  %v2922_v59 = vadd.f32 %v15294_v16, %v2654_v0 }
 0x38f   : > { %v2958_v4 = vadd.f32 %v15289_v35, %v2656_v22  ;;  %v15468_v63 = vpop.f32.mrb[82].mxu1  ;;  %v15470_v8 = vpop.f32.mrb[90].mxu0  ;;  %12093 = vmatmul.mubr.msk.bf16.vlgmr.msra.gmra.mrb[140].mxu1 %vm3108_vm1, %v15472_v60  ;;  %v3435_v22 = vsel %vm3108_vm1, %v15462_v2, 0 }
 0x390   : > { %v15474_v30 = vpop.f32.mrb[83].mxu1  ;;  %v15476_v50 = vpop.f32.mrb[91].mxu0  ;;  %12097 = vmatpush3.bf16.xpose.msra.mxu1 %v3435_v22  ;;  %12098 = vmatprep.mubr.msk.bf16.mxu1 %vm13882_vm0, %v18351_v17  ;;  %v15510_v0 = vpack.c.bf16 %v2922_v59, %v2922_v59 }
 0x391   : > { %v15480_v37 = vpack.c.bf16 %v2958_v4, %v2958_v4  ;;  %12108 = vmatprep.subr.bf16.mxu1 %v18351_v17 }
 0x392   : > { %18475 = vst [vmem:[#allocation75_spill] sm:$0xff] %v15510_v0 }
 0x393   : > { %18472 = vst [vmem:[#allocation50_spill] sm:$0xff] %v15480_v37  ;;  %12129 = vmatmul.mubr.msk.bf16.vlgmr.msra.gmra.mrb[116].mxu0 %vm3108_vm1, %v15478_v9  ;;  %v3757_v38 = vsel %vm3108_vm1, %v15480_v37, 0 }
 0x394   : > { %12139 = vmatpush3.bf16.xpose.msra.mxu0 %v3757_v38  ;;  %12140 = vmatprep.mubr.msk.bf16.mxu0 %vm13882_vm0, %v18351_v17  ;;  %v15506_v38 = vpack.c.bf16 %v2915_v33, %v2915_v33 }
 0x395   : > { %v2664_v4 = vpop.f32.mrb[84].mxu1  ;;  %12150 = vmatprep.subr.bf16.mxu0 %v18351_v17 }
 0x396   : > { %v2666_v22 = vpop.f32.mrb[85].mxu1  ;;  %18474 = vst [vmem:[#allocation74_spill] sm:$0xff] %v15506_v38  ;;  %v2924_v36 = vadd.f32 %v15294_v16, %v2664_v4 }
 0x397   : > { %v2960_v21 = vadd.f32 %v15289_v35, %v2666_v22  ;;  %v15504_v56 = vpop.f32.mrb[86].mxu1  ;;  %12099 = vmatmul.mubr.msk.bf16.vlgmr.msra.gmra.mrb[144].mxu1 %vm3108_vm1, %v15506_v38 }
 0x398   : > { %v15508_v43 = vpop.f32.mrb[87].mxu1  ;;  %12109 = vmatpush3.bf16.xpose.msra.mxu1 %v3527_v44  ;;  %12110 = vmatprep.mubr.msk.bf16.mxu1 %vm13882_vm0, %v18351_v17  ;;  %v15536_v44 = vpack.c.bf16 %v2955_v54, %v2955_v54  ;;  %v15550_v9 = vpack.c.bf16 %v2924_v36, %v2924_v36  ;;  %v2957_v54 = vadd.f32 %v15289_v35, %v15436_v62 }
 0x399   : > { %v15512_v47 = vpack.c.bf16 %v2960_v21, %v2960_v21  ;;  %v2917_v21 = vadd.f32 %v15294_v16, %v15369_v42  ;;  %12120 = vmatprep.subr.bf16.mxu1 %v18351_v17  ;;  %v2919_v36 = vadd.f32 %v15294_v16, %v15397_v15 }
 0x39a   : > { %18478 = vst [vmem:[#allocation78_spill] sm:$0xff] %v15536_v44  ;;  %18482 = vst [vmem:[#allocation82_spill] sm:$0xff] %v15550_v9 }
 0x39b   : > { %18476 = vst [vmem:[#allocation76_spill] sm:$0xff] %v15512_v47  ;;  %12141 = vmatmul.mubr.msk.bf16.vlgmr.msra.gmra.mrb[120].mxu0 %vm3108_vm1, %v15510_v0  ;;  %v3849_v33 = vsel %vm3108_vm1, %v15512_v47, 0  ;;  %v15546_v0 = vpack.c.bf16 %v2917_v21, %v2917_v21  ;;  %v15584_v34 = vpack.c.bf16 %v2919_v36, %v2919_v36 }
 0x39c   : > { %12151 = vmatpush3.bf16.xpose.msra.mxu0 %v3849_v33  ;;  %12152 = vmatprep.mubr.msk.bf16.mxu0 %vm13882_vm0, %v18351_v17 }
 0x39d   : > { %v15526_v59 = vpop.f32.mrb[92].mxu0  ;;  %v2674_v22 = vpop.f32.mrb[88].mxu1  ;;  %12162 = vmatprep.subr.bf16.mxu0 %v18351_v17  ;;  %18481 = vst [vmem:[#allocation81_spill] sm:$0xff] %v15546_v0  ;;  %18488 = vst [vmem:[#allocation88_spill] sm:$0xff] %v15584_v34 }
 0x39e   : > { %18477 = vst [vmem:[#allocation77_spill] sm:$0xff] %v15526_v59  ;;  %v15531_v31 = vpop.f32.mrb[93].mxu0  ;;  %v2676_v19 = vpop.f32.mrb[89].mxu1  ;;  %v2926_v62 = vadd.f32 %v15294_v16, %v2674_v22 }
 0x39f   : > { %v15538_v42 = vpop.f32.mrb[94].mxu0  ;;  %v2962_v33 = vadd.f32 %v15289_v35, %v2676_v19  ;;  %v15542_v47 = vpop.f32.mrb[90].mxu1  ;;  %12111 = vmatmul.mubr.msk.bf16.vlgmr.msra.gmra.mrb[148].mxu1 %vm3108_vm1, %v15546_v0  ;;  %v3619_v19 = vsel %vm3108_vm1, %v15536_v44, 0  ;;  %v2959_v0 = vadd.f32 %v15289_v35, %v15474_v30 }
 0x3a0   : > { %18479 = vst [vmem:[#allocation79_spill] sm:$0xff] %v15538_v42  ;;  %v15544_v4 = vpop.f32.mrb[95].mxu0  ;;  %v15548_v37 = vpop.f32.mrb[91].mxu1  ;;  %12121 = vmatpush3.bf16.xpose.msra.mxu1 %v3619_v19  ;;  %12122 = vmatprep.mubr.msk.bf16.mxu1 %vm13882_vm0, %v18351_v17  ;;  %v15574_v19 = vpack.c.bf16 %v2957_v54, %v2957_v54  ;;  %v15590_v5 = vpack.c.bf16 %v2926_v62, %v2926_v62 }
 0x3a1   : > { %18480 = vst [vmem:[#allocation80_spill] sm:$0xff] %v15544_v4  ;;  %v15552_v49 = vpack.c.bf16 %v2962_v33, %v2962_v33  ;;  %12132 = vmatprep.subr.bf16.mxu1 %v18351_v17  ;;  %v2921_v62 = vadd.f32 %v15294_v16, %v15432_v41 }
 0x3a2   : > { %18485 = vst [vmem:[#allocation85_spill] sm:$0xff] %v15574_v19  ;;  %18490 = vst [vmem:[#allocation90_spill] sm:$0xff] %v15590_v5 }
 0x3a3   : > { %18483 = vst [vmem:[#allocation83_spill] sm:$0xff] %v15552_v49  ;;  %12153 = vmatmul.mubr.msk.bf16.vlgmr.msra.gmra.mrb[124].mxu0 %vm3108_vm1, %v15550_v9  ;;  %v3941_v21 = vsel %vm3108_vm1, %v15552_v49, 0 }
 0x3a4   : > { %12163 = vmatpush3.bf16.xpose.msra.mxu0 %v3941_v21  ;;  %12164 = vmatprep.mubr.msk.bf16.mxu0 %vm13882_vm0, %v18351_v17 }
 0x3a5   : > { %v2684_v33 = vpop.f32.mrb[92].mxu1  ;;  %12174 = vmatprep.subr.bf16.mxu0 %v18351_v17 }
 0x3a6   : > { %v15569_v32 = vpop.f32.mrb[96].mxu0  ;;  %v2686_v49 = vpop.f32.mrb[93].mxu1  ;;  %v2928_v30 = vadd.f32 %v15294_v16, %v2684_v33 }
 0x3a7   : > { %18484 = vst [vmem:[#allocation84_spill] sm:$0xff] %v15569_v32  ;;  %v15576_v9 = vpop.f32.mrb[97].mxu0  ;;  %v2964_v15 = vadd.f32 %v15289_v35, %v2686_v49  ;;  %v15580_v21 = vpop.f32.mrb[94].mxu1  ;;  %12123 = vmatmul.mubr.msk.bf16.vlgmr.msra.gmra.mrb[152].mxu1 %vm3108_vm1, %v15584_v34  ;;  %v3711_v49 = vsel %vm3108_vm1, %v15574_v19, 0  ;;  %v15624_v19 = vpack.c.bf16 %v2921_v62, %v2921_v62 }
 0x3a8   : > { %18486 = vst [vmem:[#allocation86_spill] sm:$0xff] %v15576_v9  ;;  %v15582_v22 = vpop.f32.mrb[98].mxu0  ;;  %v15586_v18 = vpop.f32.mrb[95].mxu1  ;;  %12133 = vmatpush3.bf16.xpose.msra.mxu1 %v3711_v49  ;;  %12134 = vmatprep.mubr.msk.bf16.mxu1 %vm13882_vm0, %v18351_v17  ;;  %v15614_v49 = vpack.c.bf16 %v2959_v0, %v2959_v0  ;;  %v15630_v52 = vpack.c.bf16 %v2928_v30, %v2928_v30 }
 0x3a9   : > { %18487 = vst [vmem:[#allocation87_spill] sm:$0xff] %v15582_v22  ;;  %v15588_v44 = vpop.f32.mrb[99].mxu0  ;;  %v15592_v54 = vpack.c.bf16 %v2964_v15, %v2964_v15  ;;  %12144 = vmatprep.subr.bf16.mxu1 %v18351_v17  ;;  %18496 = vst [vmem:[#allocation96_spill] sm:$0xff] %v15624_v19  ;;  %v2961_v22 = vadd.f32 %v15289_v35, %v15508_v43  ;;  %v2923_v30 = vadd.f32 %v15294_v16, %v15468_v63 }
 0x3aa   : > { %18489 = vst [vmem:[#allocation89_spill] sm:$0xff] %v15588_v44  ;;  %18493 = vst [vmem:[#allocation93_spill] sm:$0xff] %v15614_v49 }
 0x3ab   : > { %18491 = vst [vmem:[#allocation91_spill] sm:$0xff] %v15592_v54  ;;  %12165 = vmatmul.mubr.msk.bf16.vlgmr.msra.gmra.mrb[128].mxu0 %vm3108_vm1, %v15590_v5  ;;  %v4033_v36 = vsel %vm3108_vm1, %v15592_v54, 0  ;;  %18498 = vst [vmem:[#allocation98_spill] sm:$0xff] %v15630_v52 }
 0x3ac   : > { %12175 = vmatpush3.bf16.xpose.msra.mxu0 %v4033_v36  ;;  %12176 = vmatprep.mubr.msk.bf16.mxu0 %vm13882_vm0, %v18351_v17 }
 0x3ad   : > { %v2694_v15 = vpop.f32.mrb[96].mxu1  ;;  %12186 = vmatprep.subr.bf16.mxu0 %v18351_v17 }
 0x3ae   : > { %v15609_v34 = vpop.f32.mrb[100].mxu0  ;;  %v2696_v54 = vpop.f32.mrb[97].mxu1  ;;  %v2930_v43 = vadd.f32 %v15294_v16, %v2694_v15 }
 0x3af   : > { %18492 = vst [vmem:[#allocation92_spill] sm:$0xff] %v15609_v34  ;;  %v15616_v5 = vpop.f32.mrb[101].mxu0  ;;  %v2966_v41 = vadd.f32 %v15289_v35, %v2696_v54  ;;  %v15620_v36 = vpop.f32.mrb[98].mxu1  ;;  %12135 = vmatmul.mubr.msk.bf16.vlgmr.msra.gmra.mrb[156].mxu1 %vm3108_vm1, %v15624_v19  ;;  %v3803_v54 = vsel %vm3108_vm1, %v15614_v49, 0  ;;  %v15664_v49 = vpack.c.bf16 %v2923_v30, %v2923_v30 }
 0x3b0   : > { %18494 = vst [vmem:[#allocation94_spill] sm:$0xff] %v15616_v5  ;;  %v15622_v33 = vpop.f32.mrb[102].mxu0  ;;  %v15626_v34 = vpop.f32.mrb[99].mxu1  ;;  %12145 = vmatpush3.bf16.xpose.msra.mxu1 %v3803_v54  ;;  %12146 = vmatprep.mubr.msk.bf16.mxu1 %vm13882_vm0, %v18351_v17  ;;  %v15654_v54 = vpack.c.bf16 %v2961_v22, %v2961_v22 }
 0x3b1   : > { %18495 = vst [vmem:[#allocation95_spill] sm:$0xff] %v15622_v33  ;;  %v15628_v60 = vpop.f32.mrb[103].mxu0  ;;  %v15632_v0 = vpack.c.bf16 %v2966_v41, %v2966_v41  ;;  %12156 = vmatprep.subr.bf16.mxu1 %v18351_v17  ;;  %18504 = vst [vmem:[#allocation104_spill] sm:$0xff] %v15664_v49 }
 0x3b2   : > { %18497 = vst [vmem:[#allocation97_spill] sm:$0xff] %v15628_v60  ;;  %18501 = vst [vmem:[#allocation101_spill] sm:$0xff] %v15654_v54  ;;  %v15670_v60 = vpack.c.bf16 %v2930_v43, %v2930_v43  ;;  %v2925_v43 = vadd.f32 %v15294_v16, %v15504_v56 }
 0x3b3   : > { %18499 = vst [vmem:[#allocation99_spill] sm:$0xff] %v15632_v0  ;;  %12177 = vmatmul.mubr.msk.bf16.vlgmr.msra.gmra.mrb[132].mxu0 %vm3108_vm1, %v15630_v52  ;;  %v4125_v62 = vsel %vm3108_vm1, %v15632_v0, 0 }
 0x3b4   : > { %12187 = vmatpush3.bf16.xpose.msra.mxu0 %v4125_v62  ;;  %12188 = vmatprep.mubr.msk.bf16.mxu0 %vm13882_vm0, %v18351_v17  ;;  %18506 = vst [vmem:[#allocation106_spill] sm:$0xff] %v15670_v60 }
 0x3b5   : > { %v2704_v41 = vpop.f32.mrb[100].mxu1  ;;  %12198 = vmatprep.subr.bf16.mxu0 %v18351_v17 }
 0x3b6   : > { %v15649_v33 = vpop.f32.mrb[104].mxu0  ;;  %v2706_v0 = vpop.f32.mrb[101].mxu1 }
 0x3b7   : > { %18500 = vst [vmem:[#allocation100_spill] sm:$0xff] %v15649_v33  ;;  %v15656_v52 = vpop.f32.mrb[105].mxu0  ;;  %v2968_v63 = vadd.f32 %v15289_v35, %v2706_v0  ;;  %v15660_v62 = vpop.f32.mrb[102].mxu1  ;;  %12147 = vmatmul.mubr.msk.bf16.vlgmr.msra.gmra.mrb[160].mxu1 %vm3108_vm1, %v15664_v49  ;;  %v3895_v0 = vsel %vm3108_vm1, %v15654_v54, 0  ;;  %v2965_v54 = vadd.f32 %v15289_v35, %v15586_v18 }
 0x3b8   : > { %18502 = vst [vmem:[#allocation102_spill] sm:$0xff] %v15656_v52  ;;  %v15662_v15 = vpop.f32.mrb[106].mxu0  ;;  %v15666_v33 = vpop.f32.mrb[103].mxu1  ;;  %v2963_v52 = vadd.f32 %v15289_v35, %v15548_v37  ;;  %12157 = vmatpush3.bf16.xpose.msra.mxu1 %v3895_v0  ;;  %12158 = vmatprep.mubr.msk.bf16.mxu1 %vm13882_vm0, %v18351_v17  ;;  %v2932_v37 = vadd.f32 %v15294_v16, %v2704_v41 }
 0x3b9   : > { %18503 = vst [vmem:[#allocation103_spill] sm:$0xff] %v15662_v15  ;;  %v15668_v19 = vpop.f32.mrb[107].mxu0  ;;  %v15672_v22 = vpack.c.bf16 %v2968_v63, %v2968_v63  ;;  %12168 = vmatprep.subr.bf16.mxu1 %v18351_v17 }
 0x3ba   : > { %18505 = vst [vmem:[#allocation105_spill] sm:$0xff] %v15668_v19  ;;  %v15692_v15 = vpack.c.bf16 %v2963_v52, %v2963_v52  ;;  %v15702_v41 = vpack.c.bf16 %v2932_v37, %v2932_v37 }
 0x3bb   : > { %18507 = vst [vmem:[#allocation107_spill] sm:$0xff] %v15672_v22  ;;  %12189 = vmatmul.mubr.msk.bf16.vlgmr.msra.gmra.mrb[136].mxu0 %vm3108_vm1, %v15670_v60  ;;  %v4217_v30 = vsel %vm3108_vm1, %v15672_v22, 0 }
 0x3bc   : > { %12199 = vmatpush3.bf16.xpose.msra.mxu0 %v4217_v30  ;;  %12200 = vmatprep.mubr.msk.bf16.mxu0 %vm13882_vm0, %v18351_v17  ;;  %18508 = vst [vmem:[#allocation108_spill] sm:$0xff] %v15692_v15  ;;  %v15698_v30 = vpack.c.bf16 %v2925_v43, %v2925_v43  ;;  %18510 = vst [vmem:[#allocation110_spill] sm:$0xff] %v15702_v41  ;;  %v3987_v52 = vsel %vm3108_vm1, %v15692_v15, 0 }
 0x3bd   : > { %v2714_v63 = vpop.f32.mrb[104].mxu1  ;;  %12210 = vmatprep.subr.bf16.mxu0 %v18351_v17 }
 0x3be   : > { %v2716_v0 = vpop.f32.mrb[105].mxu1  ;;  %18509 = vst [vmem:[#allocation109_spill] sm:$0xff] %v15698_v30  ;;  %v2934_v18 = vadd.f32 %v15294_v16, %v2714_v63 }
 0x3bf   : > { %v2970_v19 = vadd.f32 %v15289_v35, %v2716_v0  ;;  %v15696_v56 = vpop.f32.mrb[106].mxu1  ;;  %12159 = vmatmul.mubr.msk.bf16.vlgmr.msra.gmra.mrb[164].mxu1 %vm3108_vm1, %v15698_v30  ;;  %v15724_v0 = vpack.c.bf16 %v2965_v54, %v2965_v54  ;;  %v2967_v30 = vadd.f32 %v15289_v35, %v15626_v34 }
 0x3c0   : > { %v15700_v22 = vpop.f32.mrb[107].mxu1  ;;  %12169 = vmatpush3.bf16.xpose.msra.mxu1 %v3987_v52  ;;  %12170 = vmatprep.mubr.msk.bf16.mxu1 %vm13882_vm0, %v18351_v17  ;;  %v15732_v15 = vpack.c.bf16 %v2934_v18, %v2934_v18 }
 0x3c1   : > { %v15704_v60 = vpack.c.bf16 %v2970_v19, %v2970_v19  ;;  %v2927_v19 = vadd.f32 %v15294_v16, %v15542_v47  ;;  %12180 = vmatprep.subr.bf16.mxu1 %v18351_v17  ;;  %18512 = vst [vmem:[#allocation112_spill] sm:$0xff] %v15724_v0  ;;  %v4079_v54 = vsel %vm3108_vm1, %v15724_v0, 0 }
 0x3c2   : > { %18514 = vst [vmem:[#allocation114_spill] sm:$0xff] %v15732_v15 }
 0x3c3   : > { %18511 = vst [vmem:[#allocation111_spill] sm:$0xff] %v15704_v60  ;;  %12201 = vmatmul.mubr.msk.bf16.vlgmr.msra.gmra.mrb[140].mxu0 %vm3108_vm1, %v15702_v41  ;;  %v4309_v43 = vsel %vm3108_vm1, %v15704_v60, 0 }
 0x3c4   : > { %12211 = vmatpush3.bf16.xpose.msra.mxu0 %v4309_v43  ;;  %12212 = vmatprep.mubr.msk.bf16.mxu0 %vm13882_vm0, %v18351_v17  ;;  %v15730_v43 = vpack.c.bf16 %v2927_v19, %v2927_v19 }
 0x3c5   : > { %v2724_v37 = vpop.f32.mrb[108].mxu1  ;;  %12222 = vmatprep.subr.bf16.mxu0 %v18351_v17 }
 0x3c6   : > { %v2726_v52 = vpop.f32.mrb[109].mxu1  ;;  %18513 = vst [vmem:[#allocation113_spill] sm:$0xff] %v15730_v43  ;;  %v2936_v34 = vadd.f32 %v15294_v16, %v2724_v37 }
 0x3c7   : > { %v2972_v60 = vadd.f32 %v15289_v35, %v2726_v52  ;;  %v15728_v47 = vpop.f32.mrb[110].mxu1  ;;  %12171 = vmatmul.mubr.msk.bf16.vlgmr.msra.gmra.mrb[168].mxu1 %vm3108_vm1, %v15730_v43  ;;  %v2978_v52 = vsub.s32 7, %v18353_v51  ;;  %v15755_v51 = vpack.c.bf16 %v2967_v30, %v2967_v30  ;;  %v2969_v30 = vadd.f32 %v15289_v35, %v15666_v33 }
 0x3c8   : > { %v2730_v41 = vpop.f32.mrb[111].mxu1  ;;  %12181 = vmatpush3.bf16.xpose.msra.mxu1 %v4079_v54  ;;  %12182 = vmatprep.mubr.msk.bf16.mxu1 %vm13882_vm0, %v18351_v17  ;;  %v15766_v43 = vpack.c.bf16 %v2936_v34, %v2936_v34 }
 0x3c9   : > { %v15734_v63 = vpack.c.bf16 %v2972_v60, %v2972_v60  ;;  %v2929_v60 = vadd.f32 %v15294_v16, %v15580_v21  ;;  %12192 = vmatprep.subr.bf16.mxu1 %v18351_v17  ;;  %18516 = vst [vmem:[#allocation116_spill] sm:$0xff] %v15755_v51  ;;  %v13653_v21 = vld [vmem:[%s18077_s8] sm:$0xff] }
 0x3ca   : > { %18518 = vst [vmem:[#allocation118_spill] sm:$0xff] %v15766_v43 }
 0x3cb   : > { %18515 = vst [vmem:[#allocation115_spill] sm:$0xff] %v15734_v63  ;;  %12213 = vmatmul.mubr.msk.bf16.vlgmr.msra.gmra.mrb[144].mxu0 %vm3108_vm1, %v15732_v15  ;;  %v4401_v19 = vsel %vm3108_vm1, %v15734_v63, 0  ;;  %v15764_v15 = vpack.c.bf16 %v2929_v60, %v2929_v60  ;;  %v2931_v60 = vadd.f32 %v15294_v16, %v15620_v36 }
 0x3cc   : > { %12223 = vmatpush3.bf16.xpose.msra.mxu0 %v4401_v19  ;;  %12224 = vmatprep.mubr.msk.bf16.mxu0 %vm13882_vm0, %v18351_v17  ;;  %v15761_v19 = vrot.slane %v13653_v21, %v2978_v52  ;;  %v4171_v52 = vsel %vm3108_vm1, %v15755_v51, 0 }
 0x3cd   : > { %v2734_v18 = vpop.f32.mrb[112].mxu1  ;;  %12234 = vmatprep.subr.bf16.mxu0 %v18351_v17  ;;  %18517 = vst [vmem:[#allocation117_spill] sm:$0xff] %v15764_v15  ;;  %v15795_v21 = vpack.c.bf16 %v2931_v60, %v2931_v60  ;;  %v2973_v60 = vadd.f32 %v15289_v35, %v2730_v41 }
 0x3ce   : > { %v2736_v54 = vpop.f32.mrb[113].mxu1  ;;  %v2938_v33 = vadd.f32 %v15294_v16, %v2734_v18 }
 0x3cf   : > { %v2974_v63 = vadd.f32 %v15289_v35, %v2736_v54  ;;  %v2738_v37 = vpop.f32.mrb[114].mxu1  ;;  %12183 = vmatmul.mubr.msk.bf16.vlgmr.msra.gmra.mrb[172].mxu1 %vm3108_vm1, %v15764_v15  ;;  %v2980_v54 = vadd.f32 %v15761_v19, %v15305_v28  ;;  %v15790_v28 = vpack.c.bf16 %v2969_v30, %v2969_v30  ;;  %18522 = vst [vmem:[#allocation122_spill] sm:$0xff] %v15795_v21 }
 0x3d0   : > { %v2740_v0 = vpop.f32.mrb[115].mxu1  ;;  %12193 = vmatpush3.bf16.xpose.msra.mxu1 %v4171_v52  ;;  %12194 = vmatprep.mubr.msk.bf16.mxu1 %vm13882_vm0, %v18351_v17  ;;  %v15797_v36 = vpack.c.bf16 %v2938_v33, %v2938_v33  ;;  %v2971_v52 = vadd.f32 %v15289_v35, %v15700_v22  ;;  %v2935_v33 = vadd.f32 %v15294_v16, %v15696_v56 }
 0x3d1   : > { %v15768_v49 = vpack.c.bf16 %v2974_v63, %v2974_v63  ;;  %12204 = vmatprep.subr.bf16.mxu1 %v18351_v17  ;;  %18520 = vst [vmem:[#allocation120_spill] sm:$0xff] %v15790_v28  ;;  %v15793_v34 = vpack.c.bf16 %v2980_v54, %v2980_v54  ;;  %v4263_v18 = vsel %vm3108_vm1, %v15790_v28, 0  ;;  %v2933_v54 = vadd.f32 %v15294_v16, %v15660_v62 }
 0x3d2   : > { %18523 = vst [vmem:[#allocation123_spill] sm:$0xff] %v15797_v36  ;;  %v15816_v22 = vpack.c.bf16 %v2971_v52, %v2971_v52  ;;  %v15831_v52 = vpack.c.bf16 %v2973_v60, %v2973_v60  ;;  %v2975_v41 = vadd.f32 %v15289_v35, %v2740_v0  ;;  %v2937_v56 = vadd.f32 %v15294_v16, %v15728_v47 }
 0x3d3   : > { %18519 = vst [vmem:[#allocation119_spill] sm:$0xff] %v15768_v49  ;;  %12225 = vmatmul.mubr.msk.bf16.vlgmr.msra.gmra.mrb[148].mxu0 %vm3108_vm1, %v15766_v43  ;;  %v4493_v63 = vsel %vm3108_vm1, %v15768_v49, 0  ;;  %18521 = vst [vmem:[#allocation121_spill] sm:$0xff] %v15793_v34  ;;  %v4971_v30 = vsel %vm4969_vm2, %v15793_v34, 0  ;;  %v2981_v35 = vadd.f32 %v15761_v19, %v15311_v53  ;;  %v2939_v47 = vadd.f32 %v15294_v16, %v2738_v37 }
 0x3d4   : > { %12235 = vmatpush3.bf16.xpose.msra.mxu0 %v4493_v63  ;;  %12236 = vmatprep.mubr.msk.bf16.mxu0 %vm13882_vm0, %v18351_v17  ;;  %18524 = vst [vmem:[#allocation124_spill] sm:$0xff] %v15816_v22  ;;  %v15819_v63 = vpack.c.bf16 %v2933_v54, %v2933_v54  ;;  %v4355_v62 = vsel %vm3108_vm1, %v15816_v22, 0  ;;  %18526 = vst [vmem:[#allocation126_spill] sm:$0xff] %v15831_v52  ;;  %v15845_v54 = vpack.c.bf16 %v2975_v41, %v2975_v41 }
 0x3d5   : > { %12246 = vmatprep.subr.bf16.mxu0 %v18351_v17  ;;  %v15847_v60 = vpack.c.bf16 %v2937_v56, %v2937_v56 }
 0x3d6   : > { %18525 = vst [vmem:[#allocation125_spill] sm:$0xff] %v15819_v63  ;;  %18528 = vst [vmem:[#allocation128_spill] sm:$0xff] %v15845_v54  ;;  %v4539_v0 = vsel %vm3108_vm1, %v15845_v54, 0 }
 0x3d7   : > { %12195 = vmatmul.mubr.msk.bf16.vlgmr.msra.gmra.mrb[176].mxu1 %vm3108_vm1, %v15795_v21  ;;  %18529 = vst [vmem:[#allocation129_spill] sm:$0xff] %v15847_v60 }
 0x3d8   : > { %12205 = vmatpush3.bf16.xpose.msra.mxu1 %v4263_v18  ;;  %12206 = vmatprep.mubr.msk.bf16.mxu1 %vm13882_vm0, %v18351_v17  ;;  %v15833_v18 = vpack.c.bf16 %v2935_v33, %v2935_v33  ;;  %v15861_v33 = vpack.c.bf16 %v2939_v47, %v2939_v47 }
 0x3d9   : > { %12216 = vmatprep.subr.bf16.mxu1 %v18351_v17 }
 0x3da   : > { %18527 = vst [vmem:[#allocation127_spill] sm:$0xff] %v15833_v18  ;;  %18531 = vst [vmem:[#allocation131_spill] sm:$0xff] %v15861_v33 }
 0x3db   : > { %12237 = vmatmul.mubr.msk.bf16.vlgmr.msra.gmra.mrb[152].mxu0 %vm3108_vm1, %v15797_v36 }
 0x3dc   : > { %12247 = vmatpush3.bf16.msra.mxu0 %v4971_v30  ;;  %12248 = vmatprep.mubr.msk.bf16.mxu0 %vm13882_vm0, %v18351_v17  ;;  %v4447_v30 = vsel %vm3108_vm1, %v15831_v52, 0 }
 0x3dd   : > { %12258 = vmatprep.subr.bf16.mxu0 %v18351_v17 }
 0x3df   : > { %12207 = vmatmul.mubr.msk.bf16.vlgmr.msra.gmra.mrb[180].mxu1 %vm3108_vm1, %v15819_v63 }
 0x3e0   : > { %12217 = vmatpush3.bf16.xpose.msra.mxu1 %v4355_v62  ;;  %12218 = vmatprep.mubr.msk.bf16.mxu1 %vm13882_vm0, %v18351_v17  ;;  %v15859_v62 = vpack.c.bf16 %v2981_v35, %v2981_v35 }
 0x3e1   : > { %12228 = vmatprep.subr.bf16.mxu1 %v18351_v17 }
 0x3e2   : > { %18530 = vst [vmem:[#allocation130_spill] sm:$0xff] %v15859_v62  ;;  %v5017_v53 = vsel %vm4969_vm2, %v15859_v62, 0 }
 0x3e7   : > { %12219 = vmatmul.mubr.msk.bf16.vlgmr.msra.gmra.mrb[184].mxu1 %vm3108_vm1, %v15833_v18 }
 0x3e8   : > { %12229 = vmatpush3.bf16.xpose.msra.mxu1 %v4447_v30  ;;  %12230 = vmatprep.mubr.msk.bf16.mxu1 %vm13882_vm0, %v18351_v17 }
 0x3e9   : > { %12240 = vmatprep.subr.bf16.mxu1 %v18351_v17 }
 0x3ef   : > { %12231 = vmatmul.mubr.msk.bf16.vlgmr.msra.gmra.mrb[188].mxu1 %vm3108_vm1, %v15847_v60 }
 0x3f0   : > { %12241 = vmatpush3.bf16.xpose.msra.mxu1 %v4539_v0  ;;  %12242 = vmatprep.mubr.msk.bf16.mxu1 %vm13882_vm0, %v18351_v17 }
 0x3f1   : > { %12252 = vmatprep.subr.bf16.mxu1 %v18351_v17 }
 0x3f7   : > { %12243 = vmatmul.mubr.msk.bf16.vlgmr.msra.gmra.mrb[192].mxu1 %vm3108_vm1, %v15861_v33 }
 0x3f8   : > { %12253 = vmatpush3.bf16.msra.mxu1 %v5017_v53  ;;  %12254 = vmatprep.mubr.msk.bf16.mxu1 %vm13882_vm0, %v18351_v17 }
 0x3f9   : > { %12264 = vmatprep.subr.bf16.mxu1 %v18351_v17 }
 0x432   : > { %v15870_v16 = vpop.f32.mrb[116].mxu1 }
 0x433   : > { %v12058_v37 = vpop.f32.mrb[117].mxu1  ;;  %v4582_v41 = vsel %vm4581_vm3, %v15870_v16, -inf }
 0x434   : > { %4583 = vmax.xlane.f32.xlu0 %v4582_v41  ;;  %v3152_v30 = vpop.f32.mrb[118].mxu1 }
 0x435   : > { %v12059_v56 = vpop.f32.mrb[119].mxu1 }
 0x43a   : > { %v15874_v35 = vpop.f32.mrb[120].mxu1 }
 0x43b   : > { %v12064_v0 = vpop.f32.mrb[121].mxu1  ;;  %v4585_v47 = vsel %vm4581_vm3, %v15874_v35, -inf }
 0x43c   : > { %4586 = vmax.xlane.f32.xlu1 %v4585_v47  ;;  %v3198_v53 = vpop.f32.mrb[122].mxu1 }
 0x43d   : > { %v12065_v62 = vpop.f32.mrb[123].mxu1 }
 0x442   : > { %v15878_v36 = vpop.f32.mrb[124].mxu1 }
 0x443   : > { %v12070_v34 = vpop.f32.mrb[125].mxu1  ;;  %v4588_v37 = vsel %vm4581_vm3, %v15878_v36, -inf }
 0x444   : > { %4589 = vmax.xlane.f32.xlu0 %v4588_v37  ;;  %v3244_v49 = vpop.f32.mrb[126].mxu1 }
 0x445   : > { %v12071_v41 = vpop.f32.mrb[127].mxu1 }
 0x44a   : > { %v15882_v30 = vpop.f32.mrb[128].mxu1 }
 0x44b   : > { %v12076_v56 = vpop.f32.mrb[129].mxu1  ;;  %v4591_v0 = vsel %vm4581_vm3, %v15882_v30, -inf }
 0x44c   : > { %4592 = vmax.xlane.f32.xlu0 %v4591_v0  ;;  %v3290_v33 = vpop.f32.mrb[130].mxu1 }
 0x44d   : > { %v12077_v47 = vpop.f32.mrb[131].mxu1 }
 0x452   : > { %v15886_v53 = vpop.f32.mrb[132].mxu1  ;;  %v15888_v62 = vpop.f32.mrb[108].mxu0 }
 0x453   : > { %v12082_v34 = vpop.f32.mrb[133].mxu1  ;;  %v12106_v43 = vpop.f32.mrb[109].mxu0  ;;  %v4594_v37 = vsel %vm4581_vm3, %v15886_v53, -inf }
 0x454   : > { %v3520_v49 = vpop.f32.mrb[110].mxu0  ;;  %4595 = vmax.xlane.f32.xlu1 %v4594_v37  ;;  %v3336_v41 = vpop.f32.mrb[134].mxu1 }
 0x455   : > { %v12083_v54 = vpop.f32.mrb[135].mxu1  ;;  %v12107_v56 = vpop.f32.mrb[111].mxu0 }
 0x45a   : > { %v15892_v60 = vpop.f32.mrb[136].mxu1 }
 0x45b   : > { %v12088_v33 = vpop.f32.mrb[137].mxu1  ;;  %v4597_v0 = vsel %vm4581_vm3, %v15892_v60, -inf }
 0x45c   : > { %4598 = vmax.xlane.f32.xlu0 %v4597_v0  ;;  %v3382_v34 = vpop.f32.mrb[138].mxu1  ;;  %v4606_v0 = vsel %vm4581_vm3, %v15888_v62, -inf }
 0x45d   : > { %v12089_v18 = vpop.f32.mrb[139].mxu1 }
 0x45e   : > { %v15894_v52 = vpop.f32.mrb[112].mxu0 }
 0x45f   : > { %v12118_v47 = vpop.f32.mrb[113].mxu0  ;;  %v4612_v34 = vsel %vm4581_vm3, %v15894_v52, -inf }
 0x460   : > { %v3612_v43 = vpop.f32.mrb[114].mxu0 }
 0x461   : > { %v12119_v22 = vpop.f32.mrb[115].mxu0 }
 0x462   : > { %v15898_v63 = vpop.f32.mrb[140].mxu1 }
 0x463   : > { %v12094_v54 = vpop.f32.mrb[141].mxu1  ;;  %v4600_v49 = vsel %vm4581_vm3, %v15898_v63, -inf }
 0x464   : > { %4601 = vmax.xlane.f32.xlu1 %v4600_v49  ;;  %v3428_v56 = vpop.f32.mrb[142].mxu1 }
 0x465   : > { %v12095_v28 = vpop.f32.mrb[143].mxu1 }
 0x466   : > { %v15900_v37 = vpop.f32.mrb[116].mxu0 }
 0x467   : > { %v12130_v41 = vpop.f32.mrb[117].mxu0  ;;  %v4618_v56 = vsel %vm4581_vm3, %v15900_v37, -inf }
 0x468   : > { %v3704_v33 = vpop.f32.mrb[118].mxu0  ;;  %4607 = vmax.xlane.f32.xlu1 %v4606_v0 }
 0x469   : > { %v12131_v21 = vpop.f32.mrb[119].mxu0 }
 0x46a   : > { %v15906_v18 = vpop.f32.mrb[144].mxu1 }
 0x46b   : > { %v12100_v47 = vpop.f32.mrb[145].mxu1  ;;  %v4603_v43 = vsel %vm4581_vm3, %v15906_v18, -inf }
 0x46c   : > { %4613 = vmax.xlane.f32.xlu1 %v4612_v34  ;;  %4604 = vmax.xlane.f32.xlu0 %v4603_v43  ;;  %v3474_v28 = vpop.f32.mrb[146].mxu1 }
 0x46d   : > { %v12101_v49 = vpop.f32.mrb[147].mxu1 }
 0x46e   : > { %v15908_v22 = vpop.f32.mrb[120].mxu0 }
 0x46f   : > { %v12142_v54 = vpop.f32.mrb[121].mxu0  ;;  %v4624_v51 = vsel %vm4581_vm3, %v15908_v22, -inf }
 0x470   : > { %v3796_v21 = vpop.f32.mrb[122].mxu0  ;;  %4619 = vmax.xlane.f32.xlu1 %v4618_v56 }
 0x471   : > { %v12143_v41 = vpop.f32.mrb[123].mxu0 }
 0x472   : > { %v15916_v33 = vpop.f32.mrb[148].mxu1 }
 0x473   : > { %v12112_v47 = vpop.f32.mrb[149].mxu1  ;;  %v4609_v34 = vsel %vm4581_vm3, %v15916_v33, -inf }
 0x474   : > { %4625 = vmax.xlane.f32.xlu1 %v4624_v51  ;;  %4610 = vmax.xlane.f32.xlu0 %v4609_v34  ;;  %v3566_v54 = vpop.f32.mrb[150].mxu1 }
 0x475   : > { %v12113_v21 = vpop.f32.mrb[151].mxu1 }
 0x476   : > { %v15918_v0 = vpop.f32.mrb[124].mxu0 }
 0x477   : > { %v12154_v43 = vpop.f32.mrb[125].mxu0  ;;  %v4630_v41 = vsel %vm4581_vm3, %v15918_v0, -inf }
 0x478   : > { %v3888_v28 = vpop.f32.mrb[126].mxu0  ;;  %4631 = vmax.xlane.f32.xlu1 %v4630_v41 }
 0x479   : > { %v12155_v49 = vpop.f32.mrb[127].mxu0 }
 0x47a   : > { %v15926_v56 = vpop.f32.mrb[152].mxu1 }
 0x47b   : > { %v12124_v15 = vpop.f32.mrb[153].mxu1  ;;  %v4615_v5 = vsel %vm4581_vm3, %v15926_v56, -inf }
 0x47c   : > { %4616 = vmax.xlane.f32.xlu0 %v4615_v5  ;;  %v3658_v34 = vpop.f32.mrb[154].mxu1 }
 0x47d   : > { %v12125_v54 = vpop.f32.mrb[155].mxu1 }
 0x47e   : > { %v15928_v47 = vpop.f32.mrb[128].mxu0 }
 0x47f   : > { %v12166_v20 = vpop.f32.mrb[129].mxu0  ;;  %v4636_v51 = vsel %vm4581_vm3, %v15928_v47, -inf }
 0x480   : > { %v3980_v43 = vpop.f32.mrb[130].mxu0  ;;  %4637 = vmax.xlane.f32.xlu1 %v4636_v51 }
 0x481   : > { %v12167_v28 = vpop.f32.mrb[131].mxu0 }
 0x482   : > { %v15934_v21 = vpop.f32.mrb[156].mxu1 }
 0x483   : > { %v12136_v41 = vpop.f32.mrb[157].mxu1  ;;  %v4621_v15 = vsel %vm4581_vm3, %v15934_v21, -inf }
 0x484   : > { %4622 = vmax.xlane.f32.xlu0 %v4621_v15  ;;  %v3750_v29 = vpop.f32.mrb[158].mxu1 }
 0x485   : > { %v12137_v34 = vpop.f32.mrb[159].mxu1 }
 0x486   : > { %v15936_v49 = vpop.f32.mrb[132].mxu0 }
 0x487   : > { %v12178_v38 = vpop.f32.mrb[133].mxu0  ;;  %v4642_v20 = vsel %vm4581_vm3, %v15936_v49, -inf }
 0x488   : > { %v4072_v5 = vpop.f32.mrb[134].mxu0  ;;  %4643 = vmax.xlane.f32.xlu1 %v4642_v20 }
 0x489   : > { %v12179_v51 = vpop.f32.mrb[135].mxu0 }
 0x48a   : > { %v15942_v43 = vpop.f32.mrb[160].mxu1 }
 0x48b   : > { %v12148_v28 = vpop.f32.mrb[161].mxu1  ;;  %v4627_v41 = vsel %vm4581_vm3, %v15942_v43, -inf }
 0x48c   : > { %4628 = vmax.xlane.f32.xlu0 %v4627_v41  ;;  %v3842_v44 = vpop.f32.mrb[162].mxu1 }
 0x48d   : > { %v12149_v29 = vpop.f32.mrb[163].mxu1 }
 0x48e   : > { %v15944_v54 = vpop.f32.mrb[136].mxu0 }
 0x48f   : > { %v12190_v2 = vpop.f32.mrb[137].mxu0  ;;  %v4648_v38 = vsel %vm4581_vm3, %v15944_v54, -inf }
 0x490   : > { %v4164_v15 = vpop.f32.mrb[138].mxu0  ;;  %4649 = vmax.xlane.f32.xlu1 %v4648_v38 }
 0x491   : > { %v12191_v20 = vpop.f32.mrb[139].mxu0 }
 0x492   : > { %v15950_v5 = vpop.f32.mrb[164].mxu1 }
 0x493   : > { %v12160_v51 = vpop.f32.mrb[165].mxu1  ;;  %v4633_v28 = vsel %vm4581_vm3, %v15950_v5, -inf }
 0x494   : > { %4634 = vmax.xlane.f32.xlu0 %v4633_v28  ;;  %v3934_v2 = vpop.f32.mrb[166].mxu1 }
 0x495   : > { %v12161_v46 = vpop.f32.mrb[167].mxu1 }
 0x496   : > { %v15952_v34 = vpop.f32.mrb[140].mxu0 }
 0x497   : > { %v12202_v32 = vpop.f32.mrb[141].mxu0 }
 0x498   : > { %v4256_v6 = vpop.f32.mrb[142].mxu0 }
 0x499   : > { %v12203_v3 = vpop.f32.mrb[143].mxu0 }
 0x49a   : > { %v15956_v41 = vpop.f32.mrb[168].mxu1 }
 0x49b   : > { %v12172_v38 = vpop.f32.mrb[169].mxu1  ;;  %v4639_v15 = vsel %vm4581_vm3, %v15956_v41, -inf }
 0x49c   : > { %4640 = vmax.xlane.f32.xlu0 %v4639_v15  ;;  %v4026_v20 = vpop.f32.mrb[170].mxu1 }
 0x49d   : > { %v12173_v39 = vpop.f32.mrb[171].mxu1 }
 0x49e   : > { %v15958_v44 = vpop.f32.mrb[144].mxu0 }
 0x49f   : > { %v12214_v29 = vpop.f32.mrb[145].mxu0 }
 0x4a0   : > { %v4348_v51 = vpop.f32.mrb[146].mxu0 }
 0x4a1   : > { %v12215_v42 = vpop.f32.mrb[147].mxu0 }
 0x4a2   : > { %v15962_v32 = vpop.f32.mrb[172].mxu1 }
 0x4a3   : > { %v12184_v46 = vpop.f32.mrb[173].mxu1  ;;  %v4645_v3 = vsel %vm4581_vm3, %v15962_v32, -inf }
 0x4a4   : > { %4646 = vmax.xlane.f32.xlu0 %v4645_v3  ;;  %v4118_v2 = vpop.f32.mrb[174].mxu1 }
 0x4a5   : > { %v12185_v9 = vpop.f32.mrb[175].mxu1 }
 0x4a6   : > { %v15964_v28 = vpop.f32.mrb[148].mxu0 }
 0x4a7   : > { %v12226_v6 = vpop.f32.mrb[149].mxu0 }
 0x4a8   : > { %v4440_v38 = vpop.f32.mrb[150].mxu0 }
 0x4a9   : > { %v12227_v55 = vpop.f32.mrb[151].mxu0 }
 0x4aa   : > { %v15968_v29 = vpop.f32.mrb[176].mxu1 }
 0x4ab   : > { %v12196_v39 = vpop.f32.mrb[177].mxu1  ;;  %v4651_v42 = vsel %vm4581_vm3, %v15968_v29, -inf }
 0x4ac   : > { %4652 = vmax.xlane.f32.xlu0 %v4651_v42  ;;  %v4210_v51 = vpop.f32.mrb[178].mxu1 }
 0x4ad   : > { %v12197_v10 = vpop.f32.mrb[179].mxu1 }
 0x4ae   : > { %v15970_v15 = vpop.f32.mrb[152].mxu0 }
 0x4af   : > { %v12238_v20 = vpop.f32.mrb[153].mxu0 }
 0x4b0   : > { %v4532_v46 = vpop.f32.mrb[154].mxu0 }
 0x4b1   : > { %v12239_v7 = vpop.f32.mrb[155].mxu0 }
 0x4b2   : > { %v15974_v6 = vpop.f32.mrb[180].mxu1 }
 0x4b3   : > { %v12208_v3 = vpop.f32.mrb[181].mxu1 }
 0x4b4   : > { %v4302_v2 = vpop.f32.mrb[182].mxu1 }
 0x4b5   : > { %v12209_v9 = vpop.f32.mrb[183].mxu1 }
 0x4ba   : > { %v15976_v55 = vpop.f32.mrb[184].mxu1 }
 0x4bb   : > { %v12220_v38 = vpop.f32.mrb[185].mxu1 }
 0x4bc   : > { %v4394_v61 = vpop.f32.mrb[186].mxu1 }
 0x4bd   : > { %v12221_v4 = vpop.f32.mrb[187].mxu1 }
 0x4c1   : > { %v4584_v39 = vpop.xlane.xlu0 %4583 }
 0x4c2   : > { %v4678_v59 = vsub.f32 %v15870_v16, %v4584_v39  ;;  %v15979_v12 = vpop.f32.mrb[188].mxu1 }
 0x4c3   : > { %v12232_v42 = vpop.f32.mrb[189].mxu1 }
 0x4c4   : > { %v4710_v20 = vmul.f32 1.442695, %v4678_v59  ;;  %v4486_v51 = vpop.f32.mrb[190].mxu1 }
 0x4c5   : > { %v12233_v10 = vpop.f32.mrb[191].mxu1 }
 0x4c6   : > { %13332 = vpow2.f32 %v4710_v20 }
 0x4c9   : > { %v4587_v7 = vpop.xlane.xlu1 %4586 }
 0x4ca   : > { %v4679_v46 = vsub.f32 %v15874_v35, %v4587_v7  ;;  %v15982_v3 = vpop.f32.mrb[192].mxu1  ;;  %v4654_v35 = vsel %vm4581_vm3, %v15952_v34, -inf }
 0x4cb   : > { %v12244_v2 = vpop.f32.mrb[193].mxu1 }
 0x4cc   : > { %v4712_v9 = vmul.f32 1.442695, %v4679_v46  ;;  %v4578_v38 = vpop.f32.mrb[194].mxu1 }
 0x4cd   : > { %v12245_v61 = vpop.f32.mrb[195].mxu1 }
 0x4ce   : > { %13334 = vpow2.f32 %v4712_v9 }
 0x4d0   : > { %v15984_v4 = vpop.eup %13332 }
 0x4d1   : > { %v4590_v16 = vpop.xlane.xlu0 %4589  ;;  %v4774_v39 = vsel %vm4581_vm3, %v15984_v4, 0.0 }
 0x4d2   : > { %v4680_v59 = vsub.f32 %v15878_v36, %v4590_v16  ;;  %4775 = vadd.xlane.f32.xlu1 %v4774_v39  ;;  %v4657_v36 = vsel %vm4581_vm3, %v15974_v6, -inf }
 0x4d4   : > { %v4714_v42 = vmul.f32 1.442695, %v4680_v59 }
 0x4d6   : > { %13336 = vpow2.f32 %v4714_v42  ;;  %4655 = vmax.xlane.f32.xlu1 %v4654_v35 }
 0x4d8   : > { %v15991_v20 = vpop.eup %13334 }
 0x4d9   : > { %v4593_v51 = vpop.xlane.xlu0 %4592  ;;  %v4777_v10 = vsel %vm4581_vm3, %v15991_v20, 0.0 }
 0x4da   : > { %v4681_v7 = vsub.f32 %v15882_v30, %v4593_v51  ;;  %4778 = vadd.xlane.f32.xlu0 %v4777_v10  ;;  %v4660_v30 = vsel %vm4581_vm3, %v15958_v44, -inf }
 0x4dc   : > { %v4716_v46 = vmul.f32 1.442695, %v4681_v7 }
 0x4de   : > { %13338 = vpow2.f32 %v4716_v46  ;;  %4658 = vmax.xlane.f32.xlu0 %v4657_v36 }
 0x4e0   : > { %v15998_v2 = vpop.eup %13336 }
 0x4e1   : > { %v4596_v9 = vpop.xlane.xlu1 %4595  ;;  %v4780_v38 = vsel %vm4581_vm3, %v15998_v2, 0.0 }
 0x4e2   : > { %v4682_v61 = vsub.f32 %v15886_v53, %v4596_v9  ;;  %4781 = vadd.xlane.f32.xlu1 %v4780_v38  ;;  %v4663_v53 = vsel %vm4581_vm3, %v15976_v55, -inf }
 0x4e4   : > { %v4718_v16 = vmul.f32 1.442695, %v4682_v61 }
 0x4e6   : > { %13340 = vpow2.f32 %v4718_v16  ;;  %4661 = vmax.xlane.f32.xlu1 %v4660_v30 }
 0x4e8   : > { %v16005_v39 = vpop.eup %13338 }
 0x4e9   : > { %v4599_v59 = vpop.xlane.xlu0 %4598  ;;  %v4783_v42 = vsel %vm4581_vm3, %v16005_v39, 0.0 }
 0x4ea   : > { %v4683_v35 = vsub.f32 %v15892_v60, %v4599_v59  ;;  %4784 = vadd.xlane.f32.xlu0 %v4783_v42  ;;  %v4666_v60 = vsel %vm4581_vm3, %v15964_v28, -inf }
 0x4ec   : > { %v4720_v51 = vmul.f32 1.442695, %v4683_v35 }
 0x4ee   : > { %13342 = vpow2.f32 %v4720_v51  ;;  %4664 = vmax.xlane.f32.xlu0 %v4663_v53 }
 0x4f0   : > { %v16012_v10 = vpop.eup %13340 }
 0x4f1   : > { %v4602_v7 = vpop.xlane.xlu1 %4601  ;;  %v4786_v46 = vsel %vm4581_vm3, %v16012_v10, 0.0 }
 0x4f2   : > { %v4684_v36 = vsub.f32 %v15898_v63, %v4602_v7  ;;  %4787 = vadd.xlane.f32.xlu1 %v4786_v46 }
 0x4f4   : > { %v4722_v9 = vmul.f32 1.442695, %v4684_v36 }
 0x4f5   : > { %v4608_v38 = vpop.xlane.xlu1 %4607 }
 0x4f6   : > { %13344 = vpow2.f32 %v4722_v9  ;;  %v4686_v61 = vsub.f32 %v15888_v62, %v4608_v38  ;;  %4667 = vmax.xlane.f32.xlu1 %v4666_v60  ;;  %v4669_v62 = vsel %vm4581_vm3, %v15979_v12, -inf }
 0x4f8   : > { %v16020_v16 = vpop.eup %13342  ;;  %v4726_v30 = vmul.f32 1.442695, %v4686_v61 }
 0x4f9   : > { %v4614_v59 = vpop.xlane.xlu1 %4613  ;;  %v4605_v42 = vpop.xlane.xlu0 %4604  ;;  %v4789_v35 = vsel %vm4581_vm3, %v16020_v16, 0.0 }
 0x4fa   : > { %v4688_v63 = vsub.f32 %v15894_v52, %v4614_v59  ;;  %v4685_v51 = vsub.f32 %v15906_v18, %v4605_v42  ;;  %4790 = vadd.xlane.f32.xlu0 %v4789_v35  ;;  %13346 = vpow2.f32 %v4726_v30  ;;  %v4672_v35 = vsel %vm4581_vm3, %v15970_v15, -inf }
 0x4fc   : > { %v4730_v53 = vmul.f32 1.442695, %v4688_v63  ;;  %v4724_v7 = vmul.f32 1.442695, %v4685_v51 }
 0x4fd   : > { %v4620_v46 = vpop.xlane.xlu1 %4619 }
 0x4fe   : > { %v4690_v36 = vsub.f32 %v15900_v37, %v4620_v46  ;;  %4670 = vmax.xlane.f32.xlu0 %v4669_v62  ;;  %13348 = vpow2.f32 %v4724_v7 }
 0x4ff   : > { %13350 = vpow2.f32 %v4730_v53 }
 0x500   : > { %v16029_v9 = vpop.eup %13344  ;;  %v4734_v38 = vmul.f32 1.442695, %v4690_v36 }
 0x501   : > { %v4626_v60 = vpop.xlane.xlu1 %4625  ;;  %v4611_v52 = vpop.xlane.xlu0 %4610  ;;  %v4792_v18 = vsel %vm4581_vm3, %v16029_v9, 0.0 }
 0x502   : > { %v4692_v61 = vsub.f32 %v15908_v22, %v4626_v60  ;;  %v4687_v30 = vsub.f32 %v15916_v33, %v4611_v52  ;;  %4793 = vadd.xlane.f32.xlu1 %v4792_v18  ;;  %13352 = vpow2.f32 %v4734_v38 }
 0x504   : > { %v4738_v59 = vmul.f32 1.442695, %v4692_v61  ;;  %v4728_v42 = vmul.f32 1.442695, %v4687_v30  ;;  %v16037_v63 = vpop.eup %13346 }
 0x505   : > { %v4632_v37 = vpop.xlane.xlu1 %4631  ;;  %v4798_v33 = vsel %vm4581_vm3, %v16037_v63, 0.0 }
 0x506   : > { %v4694_v51 = vsub.f32 %v15918_v0, %v4632_v37  ;;  %4673 = vmax.xlane.f32.xlu1 %v4672_v35  ;;  %13354 = vpow2.f32 %v4728_v42 }
 0x507   : > { %13356 = vpow2.f32 %v4738_v59 }
 0x508   : > { %v4742_v53 = vmul.f32 1.442695, %v4694_v51  ;;  %v16040_v7 = vpop.eup %13348 }
 0x509   : > { %v4617_v22 = vpop.xlane.xlu0 %4616  ;;  %v16044_v46 = vpop.eup %13350  ;;  %v4795_v38 = vsel %vm4581_vm3, %v16040_v7, 0.0 }
 0x50a   : > { %v4689_v36 = vsub.f32 %v15926_v56, %v4617_v22  ;;  %4799 = vadd.xlane.f32.xlu1 %v4798_v33  ;;  %4796 = vadd.xlane.f32.xlu0 %v4795_v38  ;;  %13358 = vpow2.f32 %v4742_v53  ;;  %v4804_v18 = vsel %vm4581_vm3, %v16044_v46, 0.0  ;;  %v4675_v56 = vsel %vm4581_vm3, %v15982_v3, -inf }
 0x50c   : > { %v4732_v60 = vmul.f32 1.442695, %v4689_v36  ;;  %v16052_v61 = vpop.eup %13352 }
 0x50d   : > { %v4638_v62 = vpop.xlane.xlu1 %4637 }
 0x50e   : > { %v4696_v0 = vsub.f32 %v15928_v47, %v4638_v62  ;;  %13360 = vpow2.f32 %v4732_v60  ;;  %4805 = vadd.xlane.f32.xlu1 %v4804_v18  ;;  %4676 = vmax.xlane.f32.xlu0 %v4675_v56  ;;  %v4810_v47 = vsel %vm4581_vm3, %v16052_v61, 0.0 }
 0x510   : > { %v4746_v52 = vmul.f32 1.442695, %v4696_v0  ;;  %v16056_v30 = vpop.eup %13354 }
 0x511   : > { %v4623_v59 = vpop.xlane.xlu0 %4622  ;;  %v16060_v42 = vpop.eup %13356  ;;  %v4801_v51 = vsel %vm4581_vm3, %v16056_v30, 0.0 }
 0x512   : > { %13362 = vpow2.f32 %v4746_v52  ;;  %v4691_v35 = vsub.f32 %v15934_v21, %v4623_v59  ;;  %4811 = vadd.xlane.f32.xlu1 %v4810_v47  ;;  %4802 = vadd.xlane.f32.xlu0 %v4801_v51  ;;  %v4816_v62 = vsel %vm4581_vm3, %v16060_v42, 0.0 }
 0x514   : > { %v4736_v22 = vmul.f32 1.442695, %v4691_v35  ;;  %v16068_v36 = vpop.eup %13358 }
 0x515   : > { %v4644_v37 = vpop.xlane.xlu1 %4643  ;;  %v4822_v0 = vsel %vm4581_vm3, %v16068_v36, 0.0 }
 0x516   : > { %v4698_v53 = vsub.f32 %v15936_v49, %v4644_v37  ;;  %13364 = vpow2.f32 %v4736_v22  ;;  %4817 = vadd.xlane.f32.xlu1 %v4816_v62 }
 0x518   : > { %v4750_v33 = vmul.f32 1.442695, %v4698_v53  ;;  %v16070_v38 = vpop.eup %13360 }
 0x519   : > { %v4629_v21 = vpop.xlane.xlu0 %4628  ;;  %v4807_v49 = vsel %vm4581_vm3, %v16070_v38, 0.0 }
 0x51a   : > { %13366 = vpow2.f32 %v4750_v33  ;;  %v4693_v18 = vsub.f32 %v15942_v43, %v4629_v21  ;;  %4823 = vadd.xlane.f32.xlu1 %v4822_v0  ;;  %4808 = vadd.xlane.f32.xlu0 %v4807_v49 }
 0x51c   : > { %v16076_v60 = vpop.eup %13362  ;;  %v4740_v59 = vmul.f32 1.442695, %v4693_v18 }
 0x51d   : > { %v4650_v52 = vpop.xlane.xlu1 %4649  ;;  %v4828_v37 = vsel %vm4581_vm3, %v16076_v60, 0.0 }
 0x51e   : > { %v4700_v56 = vsub.f32 %v15944_v54, %v4650_v52  ;;  %13368 = vpow2.f32 %v4740_v59  ;;  %4829 = vadd.xlane.f32.xlu1 %v4828_v37 }
 0x520   : > { %v4754_v47 = vmul.f32 1.442695, %v4700_v56  ;;  %v16082_v35 = vpop.eup %13364 }
 0x521   : > { %v4635_v53 = vpop.xlane.xlu0 %4634  ;;  %v4813_v43 = vsel %vm4581_vm3, %v16082_v35, 0.0 }
 0x522   : > { %13370 = vpow2.f32 %v4754_v47  ;;  %v4695_v22 = vsub.f32 %v15950_v5, %v4635_v53  ;;  %4814 = vadd.xlane.f32.xlu0 %v4813_v43 }
 0x524   : > { %v16084_v51 = vpop.eup %13366  ;;  %v4744_v33 = vmul.f32 1.442695, %v4695_v22 }
 0x525   : > { %v4834_v54 = vsel %vm4581_vm3, %v16084_v51, 0.0 }
 0x526   : > { %4835 = vadd.xlane.f32.xlu1 %v4834_v54  ;;  %13372 = vpow2.f32 %v4744_v33 }
 0x528   : > { %v16091_v62 = vpop.eup %13368 }
 0x529   : > { %v4641_v0 = vpop.xlane.xlu0 %4640  ;;  %v4819_v49 = vsel %vm4581_vm3, %v16091_v62, 0.0 }
 0x52a   : > { %v4697_v52 = vsub.f32 %v15956_v41, %v4641_v0  ;;  %4820 = vadd.xlane.f32.xlu0 %v4819_v49 }
 0x52c   : > { %v16093_v21 = vpop.eup %13370  ;;  %v4748_v18 = vmul.f32 1.442695, %v4697_v52 }
 0x52d   : > { %v4840_v5 = vsel %vm4581_vm3, %v16093_v21, 0.0 }
 0x52e   : > { %4841 = vadd.xlane.f32.xlu1 %v4840_v5  ;;  %13374 = vpow2.f32 %v4748_v18 }
 0x530   : > { %v16100_v56 = vpop.eup %13372 }
 0x531   : > { %v4647_v59 = vpop.xlane.xlu0 %4646  ;;  %v4825_v47 = vsel %vm4581_vm3, %v16100_v56, 0.0 }
 0x532   : > { %v4699_v37 = vsub.f32 %v15962_v32, %v4647_v59  ;;  %4826 = vadd.xlane.f32.xlu0 %v4825_v47  ;;  %v2982_v47 = vadd.f32 %v15302_v45, %v15761_v19  ;;  %v2983_v45 = vadd.f32 %v15309_v23, %v15761_v19 }
 0x534   : > { %v4752_v53 = vmul.f32 1.442695, %v4699_v37 }
 0x536   : > { %13376 = vpow2.f32 %v4752_v53 }
 0x538   : > { %v16105_v43 = vpop.eup %13374 }
 0x539   : > { %v4653_v41 = vpop.xlane.xlu0 %4652  ;;  %v4831_v22 = vsel %vm4581_vm3, %v16105_v43, 0.0 }
 0x53a   : > { %v4701_v54 = vsub.f32 %v15968_v29, %v4653_v41  ;;  %4832 = vadd.xlane.f32.xlu0 %v4831_v22  ;;  %v16121_v41 = vpack.c.bf16 %v2982_v47, %v2982_v47 }
 0x53c   : > { %v4756_v33 = vmul.f32 1.442695, %v4701_v54 }
 0x53e   : > { %13378 = vpow2.f32 %v4756_v33 }
 0x540   : > { %v16110_v0 = vpop.eup %13376 }
 0x541   : > { %v4837_v49 = vsel %vm4581_vm3, %v16110_v0, 0.0 }
 0x542   : > { %4838 = vadd.xlane.f32.xlu0 %v4837_v49 }
 0x548   : > { %v16114_v32 = vpop.eup %13378 }
 0x549   : > { %v4843_v52 = vsel %vm4581_vm3, %v16114_v32, 0.0 }
 0x54a   : > { %4844 = vadd.xlane.f32.xlu0 %v4843_v52 }
 0x55f   : > { %v4776_v5 = vpop.xlane.xlu1 %4775 }
 0x560   : > { %13380 = vrcp.f32 %v4776_v5 }
 0x563   : > { %v4656_v18 = vpop.xlane.xlu1 %4655 }
 0x564   : > { %v4702_v29 = vsub.f32 %v15952_v34, %v4656_v18  ;;  %v5063_v34 = vsel %vm4969_vm2, %v16121_v41, 0 }
 0x566   : > { %v4758_v59 = vmul.f32 1.442695, %v4702_v29 }
 0x567   : > { %v4779_v37 = vpop.xlane.xlu0 %4778 }
 0x568   : > { %13382 = vpow2.f32 %v4758_v59  ;;  %v16137_v59 = vpack.c.bf16 %v2983_v45, %v2983_v45 }
 0x569   : > { %13384 = vrcp.f32 %v4779_v37 }
 0x56a   : > { %v13381_v53 = vpop.eup %13380 }
 0x56b   : > { %v4659_v22 = vpop.xlane.xlu0 %4658  ;;  %v4871_v54 = vmul.f32 %v13381_v53, %v15984_v4 }
 0x56c   : > { %v4703_v33 = vsub.f32 %v15974_v6, %v4659_v22 }
 0x56d   : > { %v4934_v49 = vpack.c.bf16 %v4871_v54, %v4871_v54  ;;  %v2984_v54 = vadd.f32 %v15761_v19, %v15343_v40 }
 0x56e   : > { %v4760_v52 = vmul.f32 1.442695, %v4703_v33  ;;  %v5109_v33 = vsel %vm4969_vm2, %v16137_v59, 0 }
 0x56f   : > { %12249 = vmatmul.mubr.msk.bf16.vlgmr.msra.gmra.mrb[156].mxu0 %vm4581_vm3, %v4934_v49  ;;  %v4782_v5 = vpop.xlane.xlu1 %4781 }
 0x570   : > { %13386 = vpow2.f32 %v4760_v52  ;;  %12259 = vmatpush3.bf16.msra.mxu0 %v5063_v34  ;;  %12260 = vmatprep.mubr.msk.bf16.mxu0 %vm13882_vm0, %v18351_v17  ;;  %v16153_v52 = vpack.c.bf16 %v2984_v54, %v2984_v54 }
 0x571   : > { %13388 = vrcp.f32 %v4782_v5  ;;  %12270 = vmatprep.subr.bf16.mxu0 %v18351_v17 }
 0x572   : > { %v16133_v6 = vpop.eup %13382 }
 0x573   : > { %v13385_v4 = vpop.eup %13384  ;;  %v4662_v18 = vpop.xlane.xlu1 %4661  ;;  %v4846_v29 = vsel %vm4581_vm3, %v16133_v6, 0.0 }
 0x574   : > { %v4704_v47 = vsub.f32 %v15958_v44, %v4662_v18  ;;  %4847 = vadd.xlane.f32.xlu1 %v4846_v29  ;;  %v4873_v23 = vmul.f32 %v13385_v4, %v15991_v20  ;;  %v2985_v29 = vadd.f32 %v15761_v19, %v15353_v26 }
 0x576   : > { %v4762_v37 = vmul.f32 1.442695, %v4704_v47  ;;  %v4935_v53 = vpack.c.bf16 %v4873_v23, %v4873_v23  ;;  %v5155_v47 = vsel %vm4969_vm2, %v16153_v52, 0 }
 0x577   : > { %v4785_v22 = vpop.xlane.xlu0 %4784 }
 0x578   : > { %13390 = vpow2.f32 %v4762_v37  ;;  %12255 = vmatmul.mubr.msk.bf16.vlgmr.msra.gmra.mrb[196].mxu1 %vm4581_vm3, %v4935_v53  ;;  %v16169_v37 = vpack.c.bf16 %v2985_v29, %v2985_v29 }
 0x579   : > { %13392 = vrcp.f32 %v4785_v22  ;;  %12265 = vmatpush3.bf16.msra.mxu1 %v5109_v33  ;;  %12266 = vmatprep.mubr.msk.bf16.mxu1 %vm13882_vm0, %v18351_v17 }
 0x57a   : > { %v16148_v44 = vpop.eup %13386  ;;  %12276 = vmatprep.subr.bf16.mxu1 %v18351_v17 }
 0x57b   : > { %v13389_v20 = vpop.eup %13388  ;;  %v4665_v49 = vpop.xlane.xlu0 %4664  ;;  %v4849_v40 = vsel %vm4581_vm3, %v16148_v44, 0.0 }
 0x57c   : > { %v4705_v34 = vsub.f32 %v15976_v55, %v4665_v49  ;;  %4850 = vadd.xlane.f32.xlu0 %v4849_v40  ;;  %v4875_v5 = vmul.f32 %v13389_v20, %v15998_v2  ;;  %v2986_v49 = vadd.f32 %v15340_v11, %v15761_v19  ;;  %v5201_v40 = vsel %vm4969_vm2, %v16169_v37, 0 }
 0x57e   : > { %v4764_v45 = vmul.f32 1.442695, %v4705_v34  ;;  %v4936_v4 = vpack.c.bf16 %v4875_v5, %v4875_v5  ;;  %v16185_v5 = vpack.c.bf16 %v2986_v49, %v2986_v49 }
 0x57f   : > { %v4788_v18 = vpop.xlane.xlu1 %4787 }
 0x580   : > { %13394 = vpow2.f32 %v4764_v45  ;;  %12261 = vmatmul.mubr.msk.bf16.vlgmr.msra.gmra.mrb[160].mxu0 %vm4581_vm3, %v4936_v4 }
 0x581   : > { %12271 = vmatpush3.bf16.msra.mxu0 %v5155_v47  ;;  %13396 = vrcp.f32 %v4788_v18  ;;  %12272 = vmatprep.mubr.msk.bf16.mxu0 %vm13882_vm0, %v18351_v17 }
 0x582   : > { %v16164_v55 = vpop.eup %13390  ;;  %12282 = vmatprep.subr.bf16.mxu0 %v18351_v17 }
 0x583   : > { %v13393_v2 = vpop.eup %13392  ;;  %v4668_v23 = vpop.xlane.xlu1 %4667  ;;  %v4852_v26 = vsel %vm4581_vm3, %v16164_v55, 0.0 }
 0x584   : > { %v4706_v53 = vsub.f32 %v15964_v28, %v4668_v23  ;;  %4853 = vadd.xlane.f32.xlu1 %v4852_v26  ;;  %v4877_v22 = vmul.f32 %v13393_v2, %v16005_v39  ;;  %v2987_v2 = vadd.f32 %v15349_v27, %v15761_v19  ;;  %v5247_v23 = vsel %vm4969_vm2, %v16185_v5, 0 }
 0x586   : > { %v4766_v54 = vmul.f32 1.442695, %v4706_v53  ;;  %v4937_v33 = vpack.c.bf16 %v4877_v22, %v4877_v22  ;;  %v16201_v53 = vpack.c.bf16 %v2987_v2, %v2987_v2 }
 0x587   : > { %v4791_v20 = vpop.xlane.xlu0 %4790 }
 0x588   : > { %13398 = vpow2.f32 %v4766_v54  ;;  %12267 = vmatmul.mubr.msk.bf16.vlgmr.msra.gmra.mrb[200].mxu1 %vm4581_vm3, %v4937_v33 }
 0x589   : > { %13400 = vrcp.f32 %v4791_v20  ;;  %12277 = vmatpush3.bf16.msra.mxu1 %v5201_v40  ;;  %12278 = vmatprep.mubr.msk.bf16.mxu1 %vm13882_vm0, %v18351_v17  ;;  %v2988_v40 = vadd.f32 %v15761_v19, %v15394_v58 }
 0x58a   : > { %v16180_v28 = vpop.eup %13394  ;;  %12288 = vmatprep.subr.bf16.mxu1 %v18351_v17 }
 0x58b   : > { %v13397_v39 = vpop.eup %13396  ;;  %v4671_v34 = vpop.xlane.xlu0 %4670  ;;  %v4855_v11 = vsel %vm4581_vm3, %v16180_v28, 0.0 }
 0x58c   : > { %v4707_v45 = vsub.f32 %v15979_v12, %v4671_v34  ;;  %4856 = vadd.xlane.f32.xlu0 %v4855_v11  ;;  %v4879_v4 = vmul.f32 %v13397_v39, %v16012_v10  ;;  %v5293_v34 = vsel %vm4969_vm2, %v16201_v53, 0 }
 0x58e   : > { %v4768_v18 = vmul.f32 1.442695, %v4707_v45  ;;  %v4938_v29 = vpack.c.bf16 %v4879_v4, %v4879_v4  ;;  %v16217_v45 = vpack.c.bf16 %v2988_v40, %v2988_v40 }
 0x58f   : > { %v4794_v47 = vpop.xlane.xlu1 %4793 }
 0x590   : > { %13402 = vpow2.f32 %v4768_v18  ;;  %12273 = vmatmul.mubr.msk.bf16.vlgmr.msra.gmra.mrb[164].mxu0 %vm4581_vm3, %v4938_v29 }
 0x591   : > { %12283 = vmatpush3.bf16.msra.mxu0 %v5247_v23  ;;  %13404 = vrcp.f32 %v4794_v47  ;;  %12284 = vmatprep.mubr.msk.bf16.mxu0 %vm13882_vm0, %v18351_v17  ;;  %v2990_v23 = vadd.f32 %v15389_v14, %v15761_v19 }
 0x592   : > { %v16196_v12 = vpop.eup %13398  ;;  %12294 = vmatprep.subr.bf16.mxu0 %v18351_v17 }
 0x593   : > { %v13401_v10 = vpop.eup %13400  ;;  %v4674_v26 = vpop.xlane.xlu1 %4673  ;;  %v4858_v27 = vsel %vm4581_vm3, %v16196_v12, 0.0 }
 0x594   : > { %v4708_v22 = vsub.f32 %v15970_v15, %v4674_v26  ;;  %4859 = vadd.xlane.f32.xlu1 %v4858_v27  ;;  %v4881_v54 = vmul.f32 %v13401_v10, %v16020_v16  ;;  %v5339_v10 = vsel %vm4969_vm2, %v16217_v45, 0  ;;  %v2989_v27 = vadd.f32 %v15761_v19, %v15407_v57 }
 0x596   : > { %v4770_v33 = vmul.f32 1.442695, %v4708_v22  ;;  %v4939_v20 = vpack.c.bf16 %v4881_v54, %v4881_v54 }
 0x597   : > { %v4800_v49 = vpop.xlane.xlu1 %4799  ;;  %v4797_v39 = vpop.xlane.xlu0 %4796 }
 0x598   : > { %13406 = vpow2.f32 %v4770_v33  ;;  %12279 = vmatmul.mubr.msk.bf16.vlgmr.msra.gmra.mrb[204].mxu1 %vm4581_vm3, %v4939_v20  ;;  %v16235_v33 = vpack.c.bf16 %v2990_v23, %v2990_v23  ;;  %v16238_v20 = vpack.c.bf16 %v2989_v27, %v2989_v27 }
 0x599   : > { %13408 = vrcp.f32 %v4800_v49  ;;  %12289 = vmatpush3.bf16.msra.mxu1 %v5293_v34  ;;  %12290 = vmatprep.mubr.msk.bf16.mxu1 %vm13882_vm0, %v18351_v17 }
 0x59a   : > { %v16212_v15 = vpop.eup %13402  ;;  %13410 = vrcp.f32 %v4797_v39  ;;  %12300 = vmatprep.subr.bf16.mxu1 %v18351_v17 }
 0x59b   : > { %v13405_v16 = vpop.eup %13404  ;;  %v4806_v11 = vpop.xlane.xlu1 %4805  ;;  %v4861_v58 = vsel %vm4581_vm3, %v16212_v15, 0.0 }
 0x59c   : > { %v4677_v4 = vpop.xlane.xlu0 %4676  ;;  %4862 = vadd.xlane.f32.xlu0 %v4861_v58  ;;  %v4883_v18 = vmul.f32 %v13405_v16, %v16029_v9  ;;  %13412 = vrcp.f32 %v4806_v11  ;;  %v2992_v11 = vadd.f32 %v15761_v19, %v15464_v13  ;;  %v5431_v58 = vsel %vm4969_vm2, %v16235_v33, 0 }
 0x59d   : > { %v4709_v29 = vsub.f32 %v15982_v3, %v4677_v4 }
 0x59e   : > { %v4940_v47 = vpack.c.bf16 %v4883_v18, %v4883_v18 }
 0x59f   : > { %v4772_v2 = vmul.f32 1.442695, %v4709_v29  ;;  %v4812_v9 = vpop.xlane.xlu1 %4811  ;;  %v16259_v29 = vpack.c.bf16 %v2992_v11, %v2992_v11  ;;  %v2996_v11 = vadd.f32 %v15761_v19, %v15531_v31 }
 0x5a0   : > { %12285 = vmatmul.mubr.msk.bf16.vlgmr.msra.gmra.mrb[168].mxu0 %vm4581_vm3, %v4940_v47  ;;  %v4803_v26 = vpop.xlane.xlu0 %4802 }
 0x5a1   : > { %13414 = vpow2.f32 %v4772_v2  ;;  %12295 = vmatpush3.bf16.msra.mxu0 %v5339_v10  ;;  %12296 = vmatprep.mubr.msk.bf16.mxu0 %vm13882_vm0, %v18351_v17 }
 0x5a2   : > { %v16230_v3 = vpop.eup %13406  ;;  %13416 = vrcp.f32 %v4803_v26  ;;  %12306 = vmatprep.subr.bf16.mxu0 %v18351_v17 }
 0x5a3   : > { %v13409_v14 = vpop.eup %13408  ;;  %v4864_v22 = vsel %vm4581_vm3, %v16230_v3, 0.0  ;;  %13418 = vrcp.f32 %v4812_v9  ;;  %v4818_v4 = vpop.xlane.xlu1 %4817  ;;  %v2994_v9 = vadd.f32 %v15457_v25, %v15761_v19 }
 0x5a4   : > { %v13411_v54 = vpop.eup %13410  ;;  %4865 = vadd.xlane.f32.xlu1 %v4864_v22  ;;  %v4887_v57 = vmul.f32 %v13409_v14, %v16037_v63  ;;  %v2991_v63 = vadd.f32 %v15399_v48, %v15761_v19  ;;  %v5523_v14 = vsel %vm4969_vm2, %v16259_v29, 0  ;;  %v2993_v22 = vadd.f32 %v15761_v19, %v15476_v50 }
 0x5a5   : > { %v4885_v49 = vmul.f32 %v13411_v54, %v16040_v7  ;;  %v5385_v7 = vsel %vm4969_vm2, %v16238_v20, 0  ;;  %v16283_v50 = vpack.c.bf16 %v2994_v9, %v2994_v9 }
 0x5a6   : > { %v4942_v40 = vpack.c.bf16 %v4887_v57, %v4887_v57  ;;  %v13413_v39 = vpop.eup %13412  ;;  %v16264_v2 = vpack.c.bf16 %v2991_v63, %v2991_v63 }
 0x5a7   : > { %v4941_v34 = vpack.c.bf16 %v4885_v49, %v4885_v49  ;;  %v4809_v16 = vpop.xlane.xlu0 %4808  ;;  %v4891_v13 = vmul.f32 %v13413_v39, %v16044_v46  ;;  %v4824_v54 = vpop.xlane.xlu1 %4823 }
 0x5a8   : > { %12297 = vmatmul.mubr.msk.bf16.vlgmr.msra.gmra.mrb[172].mxu0 %vm4581_vm3, %v4942_v40  ;;  %13420 = vrcp.f32 %v4809_v16  ;;  %v16287_v40 = vpack.c.bf16 %v2993_v22, %v2993_v22 }
 0x5a9   : > { %12307 = vmatpush3.bf16.msra.mxu0 %v5431_v58  ;;  %12291 = vmatmul.mubr.msk.bf16.vlgmr.msra.gmra.mrb[208].mxu1 %vm4581_vm3, %v4941_v34  ;;  %13422 = vrcp.f32 %v4818_v4  ;;  %v4944_v23 = vpack.c.bf16 %v4891_v13, %v4891_v13  ;;  %v5615_v58 = vsel %vm4969_vm2, %v16283_v50, 0  ;;  %v16309_v4 = vpack.c.bf16 %v2996_v11, %v2996_v11 }
 0x5aa   : > { %12301 = vmatpush3.bf16.msra.mxu1 %v5385_v7  ;;  %12302 = vmatprep.mubr.msk.bf16.mxu1 %vm13882_vm0, %v18351_v17 }
 0x5ab   : > { %v16254_v18 = vpop.eup %13414  ;;  %12308 = vmatprep.mubr.msk.bf16.mxu0 %vm13882_vm0, %v18351_v17  ;;  %12312 = vmatprep.subr.bf16.mxu1 %v18351_v17  ;;  %v4830_v7 = vpop.xlane.xlu1 %4829 }
 0x5ac   : > { %v13417_v48 = vpop.eup %13416  ;;  %v4867_v47 = vsel %vm4581_vm3, %v16254_v18, 0.0  ;;  %12318 = vmatprep.subr.bf16.mxu0 %v18351_v17 }
 0x5ad   : > { %4868 = vadd.xlane.f32.xlu0 %v4867_v47  ;;  %v4889_v46 = vmul.f32 %v13417_v48, %v16056_v30  ;;  %v13419_v10 = vpop.eup %13418  ;;  %v5477_v30 = vsel %vm4969_vm2, %v16264_v2, 0 }
 0x5ae   : > { %v4895_v25 = vmul.f32 %v13419_v10, %v16052_v61 }
 0x5af   : > { %v4943_v26 = vpack.c.bf16 %v4889_v46, %v4889_v46  ;;  %v4815_v27 = vpop.xlane.xlu0 %4814 }
 0x5b0   : > { %12309 = vmatmul.mubr.msk.bf16.vlgmr.msra.gmra.mrb[176].mxu0 %vm4581_vm3, %v4944_v23  ;;  %13424 = vrcp.f32 %v4815_v27  ;;  %v4946_v61 = vpack.c.bf16 %v4895_v25, %v4895_v25  ;;  %v18533_v23 = vld [vmem:[#allocation77_spill] sm:$0xff]  ;;  %v18536_v25 = vld [vmem:[#allocation43_spill] sm:$0xff] }
 0x5b1   : > { %12319 = vmatpush3.bf16.msra.mxu0 %v5523_v14  ;;  %12303 = vmatmul.mubr.msk.bf16.vlgmr.msra.gmra.mrb[212].mxu1 %vm4581_vm3, %v4943_v26  ;;  %13426 = vrcp.f32 %v4824_v54  ;;  %v2998_v10 = vadd.f32 %v18533_v23, %v15761_v19  ;;  %v18534_v26 = vld [vmem:[#allocation80_spill] sm:$0xff] }
 0x5b2   : > { %12313 = vmatpush3.bf16.msra.mxu1 %v5477_v30  ;;  %12314 = vmatprep.mubr.msk.bf16.mxu1 %vm13882_vm0, %v18351_v17  ;;  %v13421_v57 = vpop.eup %13420  ;;  %v2997_v27 = vadd.f32 %v15761_v19, %v18534_v26  ;;  %v18535_v30 = vld [vmem:[#allocation65_spill] sm:$0xff] }
 0x5b3   : > { %12320 = vmatprep.mubr.msk.bf16.mxu0 %vm13882_vm0, %v18351_v17  ;;  %12324 = vmatprep.subr.bf16.mxu1 %v18351_v17  ;;  %v4893_v49 = vmul.f32 %v13421_v57, %v16070_v38  ;;  %v13423_v34 = vpop.eup %13422  ;;  %v2995_v38 = vadd.f32 %v15470_v8, %v15761_v19  ;;  %v4836_v22 = vpop.xlane.xlu1 %4835 }
 0x5b4   : > { %12330 = vmatprep.subr.bf16.mxu0 %v18351_v17  ;;  %v4899_v31 = vmul.f32 %v13423_v34, %v16060_v42  ;;  %v18532_v42 = vld [vmem:[#allocation41_spill] sm:$0xff] }
 0x5b5   : > { %6443 = vrot.lane.b32.xlu1 %v15296_v24, %s13883_s4  ;;  %v4945_v39 = vpack.c.bf16 %v4893_v49, %v4893_v49  ;;  %v5569_v24 = vsel %vm4969_vm2, %v16287_v40, 0  ;;  %v16313_v13 = vpack.c.bf16 %v2995_v38, %v2995_v38  ;;  %v16335_v49 = vpack.c.bf16 %v2998_v10, %v2998_v10 }
 0x5b6   : > { %v4948_v48 = vpack.c.bf16 %v4899_v31, %v4899_v31 }
 0x5b7   : > { %v4821_v16 = vpop.xlane.xlu0 %4820  ;;  %v5661_v9 = vsel %vm4969_vm2, %v16313_v13, 0 }
 0x5b8   : > { %12321 = vmatmul.mubr.msk.bf16.vlgmr.msra.gmra.mrb[180].mxu0 %vm4581_vm3, %v4946_v61  ;;  %13428 = vrcp.f32 %v4821_v16  ;;  %v16340_v61 = vpack.c.bf16 %v2997_v27, %v2997_v27 }
 0x5b9   : > { %12331 = vmatpush3.bf16.msra.mxu0 %v5615_v58  ;;  %12315 = vmatmul.mubr.msk.bf16.vlgmr.msra.gmra.mrb[216].mxu1 %vm4581_vm3, %v4945_v39  ;;  %13430 = vrcp.f32 %v4830_v7  ;;  %v18537_v39 = vld [vmem:[#allocation42_spill] sm:$0xff] }
 0x5ba   : > { %v13425_v63 = vpop.eup %13424  ;;  %12325 = vmatpush3.bf16.msra.mxu1 %v5569_v24  ;;  %6440 = vrot.lane.b32.xlu1 %v15313_v1, %s13883_s4  ;;  %v18539_v58 = vld [vmem:[#allocation86_spill] sm:$0xff]  ;;  %v5799_v24 = vsel %vm4969_vm2, %v16335_v49, 0  ;;  %v5753_v31 = vsel %vm4969_vm2, %v16340_v61, 0 }
 0x5bb   : > { %12326 = vmatprep.mubr.msk.bf16.mxu1 %vm13882_vm0, %v18351_v17  ;;  %12332 = vmatprep.mubr.msk.bf16.mxu0 %vm13882_vm0, %v18351_v17  ;;  %v4897_v8 = vmul.f32 %v13425_v63, %v16082_v35  ;;  %v13427_v47 = vpop.eup %13426  ;;  %v5707_v35 = vsel %vm4969_vm2, %v16309_v4, 0  ;;  %v3000_v38 = vadd.f32 %v15761_v19, %v18539_v58  ;;  %v18540_v63 = vld [vmem:[#allocation79_spill] sm:$0xff] }
 0x5bc   : > { %12336 = vmatprep.subr.bf16.mxu1 %v18351_v17  ;;  %12342 = vmatprep.subr.bf16.mxu0 %v18351_v17  ;;  %v4903_v54 = vmul.f32 %v13427_v47, %v16068_v36  ;;  %v2999_v7 = vadd.f32 %v18540_v63, %v15761_v19  ;;  %v18542_v47 = vld [vmem:[#allocation44_spill] sm:$0xff] }
 0x5bd   : > { %v4947_v1 = vpack.c.bf16 %v4897_v8, %v4897_v8  ;;  %v16365_v23 = vpack.c.bf16 %v3000_v38, %v3000_v38  ;;  %v18549_v38 = vld [vmem:[#allocation74_spill] sm:$0xff] }
 0x5be   : > { %6492 = vrot.lane.b32.xlu1 %v18532_v42, %s13883_s4  ;;  %v4950_v34 = vpack.c.bf16 %v4903_v54, %v4903_v54  ;;  %v18541_v42 = vld [vmem:[#allocation47_spill] sm:$0xff]  ;;  %v16370_v10 = vpack.c.bf16 %v2999_v7, %v2999_v7  ;;  %v18546_v54 = vld [vmem:[#allocation89_spill] sm:$0xff]  ;;  %v18550_v7 = vld [vmem:[#allocation48_spill] sm:$0xff] }
 0x5bf   : > { %v4827_v46 = vpop.xlane.xlu0 %4826 }
 0x5c0   : > { %12333 = vmatmul.mubr.msk.bf16.vlgmr.msra.gmra.mrb[184].mxu0 %vm4581_vm3, %v4948_v48  ;;  %13432 = vrcp.f32 %v4827_v46 }
 0x5c1   : > { %12327 = vmatmul.mubr.msk.bf16.vlgmr.msra.gmra.mrb[220].mxu1 %vm4581_vm3, %v4947_v1  ;;  %12343 = vmatpush3.bf16.msra.mxu0 %v5707_v35  ;;  %13434 = vrcp.f32 %v4836_v22  ;;  %v4842_v1 = vpop.xlane.xlu1 %4841  ;;  %v18543_v35 = vld [vmem:[#allocation72_spill] sm:$0xff] }
 0x5c2   : > { %v13429_v14 = vpop.eup %13428  ;;  %12337 = vmatpush3.bf16.msra.mxu1 %v5661_v9  ;;  %6599 = vrot.lane.b32.xlu1 %v18535_v30, %s13883_s4  ;;  %v5891_v30 = vsel %vm4969_vm2, %v16365_v23, 0 }
 0x5c3   : > { %6495 = vrot.lane.b32.xlu0 %v18536_v25, %s13883_s4  ;;  %12344 = vmatprep.mubr.msk.bf16.mxu0 %vm13882_vm0, %v18351_v17  ;;  %v4901_v57 = vmul.f32 %v13429_v14, %v16091_v62  ;;  %v13431_v16 = vpop.eup %13430  ;;  %v18538_v62 = vld [vmem:[#allocation67_spill] sm:$0xff]  ;;  %v18545_v14 = vld [vmem:[#allocation84_spill] sm:$0xff]  ;;  %v3001_v25 = vadd.f32 %v15761_v19, %v18546_v54  ;;  %v18557_v54 = vld [vmem:[#allocation97_spill] sm:$0xff] }
 0x5c4   : > { %12354 = vmatprep.subr.bf16.mxu0 %v18351_v17  ;;  %12338 = vmatprep.mubr.msk.bf16.mxu1 %vm13882_vm0, %v18351_v17  ;;  %v4907_v48 = vmul.f32 %v13431_v16, %v16076_v60  ;;  %v3002_v22 = vadd.f32 %v18545_v14, %v15761_v19  ;;  %v18548_v16 = vld [vmem:[#allocation71_spill] sm:$0xff]  ;;  %v18555_v14 = vld [vmem:[#allocation81_spill] sm:$0xff] }
 0x5c5   : > { %12348 = vmatprep.subr.bf16.mxu1 %v18351_v17  ;;  %v4949_v36 = vpack.c.bf16 %v4901_v57, %v4901_v57  ;;  %v5845_v57 = vsel %vm4969_vm2, %v16370_v10, 0  ;;  %v16400_v58 = vpack.c.bf16 %v3001_v25, %v3001_v25  ;;  %v3005_v25 = vadd.f32 %v15761_v19, %v18557_v54 }
 0x5c6   : > { %6596 = vrot.lane.b32.xlu1 %v18537_v39, %s13883_s4  ;;  %v4952_v26 = vpack.c.bf16 %v4907_v48, %v4907_v48  ;;  %v18547_v39 = vld [vmem:[#allocation51_spill] sm:$0xff] }
 0x5c7   : > { %6547 = vrot.lane.b32.xlu0 %v18538_v62, %s13883_s4  ;;  %v4833_v11 = vpop.xlane.xlu0 %4832 }
 0x5c8   : > { %12345 = vmatmul.mubr.msk.bf16.vlgmr.msra.gmra.mrb[188].mxu0 %vm4581_vm3, %v4950_v34  ;;  %13436 = vrcp.f32 %v4833_v11  ;;  %v16395_v11 = vpack.c.bf16 %v3002_v22, %v3002_v22 }
 0x5c9   : > { %12339 = vmatmul.mubr.msk.bf16.vlgmr.msra.gmra.mrb[224].mxu1 %vm4581_vm3, %v4949_v36  ;;  %12355 = vmatpush3.bf16.msra.mxu0 %v5799_v24  ;;  %13438 = vrcp.f32 %v4842_v1 }
 0x5ca   : > { %v13433_v8 = vpop.eup %13432  ;;  %12349 = vmatpush3.bf16.msra.mxu1 %v5753_v31  ;;  %6703 = vrot.lane.b32.xlu1 %v18541_v42, %s13883_s4  ;;  %v18551_v31 = vld [vmem:[#allocation94_spill] sm:$0xff]  ;;  %v5983_v1 = vsel %vm4969_vm2, %v16395_v11, 0  ;;  %v18552_v42 = vld [vmem:[#allocation87_spill] sm:$0xff] }
 0x5cb   : > { %6544 = vrot.lane.b32.xlu0 %v18542_v47, %s13883_s4  ;;  %12356 = vmatprep.mubr.msk.bf16.mxu0 %vm13882_vm0, %v18351_v17  ;;  %v4905_v46 = vmul.f32 %v13433_v8, %v16100_v56  ;;  %v13435_v27 = vpop.eup %13434  ;;  %v18544_v56 = vld [vmem:[#allocation68_spill] sm:$0xff]  ;;  %v3004_v8 = vadd.f32 %v15761_v19, %v18551_v31  ;;  %v3003_v48 = vadd.f32 %v18552_v42, %v15761_v19  ;;  %v5937_v47 = vsel %vm4969_vm2, %v16400_v58, 0  ;;  %v18565_v31 = vld [vmem:[#allocation70_spill] sm:$0xff] }
 0x5cc   : > { %12366 = vmatprep.subr.bf16.mxu0 %v18351_v17  ;;  %12350 = vmatprep.mubr.msk.bf16.mxu1 %vm13882_vm0, %v18351_v17  ;;  %v4911_v34 = vmul.f32 %v13435_v27, %v16084_v51  ;;  %v18568_v42 = vld [vmem:[#allocation104_spill] sm:$0xff] }
 0x5cd   : > { %12360 = vmatprep.subr.bf16.mxu1 %v18351_v17  ;;  %v4951_v60 = vpack.c.bf16 %v4905_v46, %v4905_v46 }
 0x5ce   : > { %6700 = vrot.lane.b32.xlu1 %v18543_v35, %s13883_s4  ;;  %v4954_v24 = vpack.c.bf16 %v4911_v34, %v4911_v34  ;;  %v18559_v34 = vld [vmem:[#allocation45_spill] sm:$0xff] }
 0x5cf   : > { %6651 = vrot.lane.b32.xlu0 %v18544_v56, %s13883_s4  ;;  %v4839_v9 = vpop.xlane.xlu0 %4838  ;;  %v16425_v56 = vpack.c.bf16 %v3004_v8, %v3004_v8  ;;  %v18566_v8 = vld [vmem:[#allocation93_spill] sm:$0xff] }
 0x5d0   : > { %12357 = vmatmul.mubr.msk.bf16.vlgmr.msra.gmra.mrb[192].mxu0 %vm4581_vm3, %v4952_v26  ;;  %13440 = vrcp.f32 %v4839_v9  ;;  %v18554_v26 = vld [vmem:[#allocation49_spill] sm:$0xff]  ;;  %v16430_v9 = vpack.c.bf16 %v3003_v48, %v3003_v48  ;;  %v18569_v48 = vld [vmem:[#allocation50_spill] sm:$0xff] }
 0x5d1   : > { %12351 = vmatmul.mubr.msk.bf16.vlgmr.msra.gmra.mrb[228].mxu1 %vm4581_vm3, %v4951_v60  ;;  %12367 = vmatpush3.bf16.msra.mxu0 %v5891_v30  ;;  %v18553_v60 = vld [vmem:[#allocation73_spill] sm:$0xff]  ;;  %v18556_v30 = vld [vmem:[#allocation66_spill] sm:$0xff] }
 0x5d2   : > { %v13437_v36 = vpop.eup %13436  ;;  %12361 = vmatpush3.bf16.msra.mxu1 %v5845_v57  ;;  %6807 = vrot.lane.b32.xlu1 %v18547_v39, %s13883_s4  ;;  %v6029_v57 = vsel %vm4969_vm2, %v16430_v9, 0  ;;  %v18558_v39 = vld [vmem:[#allocation78_spill] sm:$0xff] }
 0x5d3   : > { %6648 = vrot.lane.b32.xlu0 %v18548_v16, %s13883_s4  ;;  %12368 = vmatprep.mubr.msk.bf16.mxu0 %vm13882_vm0, %v18351_v17  ;;  %v4909_v62 = vmul.f32 %v13437_v36, %v16105_v43  ;;  %v13439_v63 = vpop.eup %13438 }
 0x5d4   : > { %12378 = vmatprep.subr.bf16.mxu0 %v18351_v17  ;;  %12362 = vmatprep.mubr.msk.bf16.mxu1 %vm13882_vm0, %v18351_v17  ;;  %v4915_v35 = vmul.f32 %v13439_v63, %v16093_v21  ;;  %v18562_v63 = vld [vmem:[#allocation85_spill] sm:$0xff] }
 0x5d5   : > { %12372 = vmatprep.subr.bf16.mxu1 %v18351_v17  ;;  %v4953_v51 = vpack.c.bf16 %v4909_v62, %v4909_v62  ;;  %v16455_v62 = vpack.c.bf16 %v3005_v25, %v3005_v25  ;;  %v18579_v25 = vld [vmem:[#allocation112_spill] sm:$0xff] }
 0x5d6   : > { %6804 = vrot.lane.b32.xlu1 %v18549_v38, %s13883_s4  ;;  %v4956_v22 = vpack.c.bf16 %v4915_v35, %v4915_v35  ;;  %v18560_v38 = vld [vmem:[#allocation88_spill] sm:$0xff] }
 0x5d7   : > { %6755 = vrot.lane.b32.xlu0 %v18550_v7, %s13883_s4  ;;  %v4845_v43 = vpop.xlane.xlu0 %4844  ;;  %v18563_v7 = vld [vmem:[#allocation46_spill] sm:$0xff]  ;;  %v18573_v35 = vld [vmem:[#allocation76_spill] sm:$0xff] }
 0x5d8   : > { %12369 = vmatmul.mubr.msk.bf16.vlgmr.msra.gmra.mrb[196].mxu0 %vm4581_vm3, %v4954_v24  ;;  %13442 = vrcp.f32 %v4845_v43  ;;  %v18561_v24 = vld [vmem:[#allocation69_spill] sm:$0xff]  ;;  %v18564_v43 = vld [vmem:[#allocation96_spill] sm:$0xff] }
 0x5d9   : > { %12363 = vmatmul.mubr.msk.bf16.vlgmr.msra.gmra.mrb[232].mxu1 %vm4581_vm3, %v4953_v51  ;;  %12379 = vmatpush3.bf16.msra.mxu0 %v5983_v1  ;;  %v18567_v1 = vld [vmem:[#allocation52_spill] sm:$0xff] }
 0x5da   : > { %v13441_v46 = vpop.eup %13440  ;;  %12373 = vmatpush3.bf16.msra.mxu1 %v5937_v47  ;;  %6911 = vrot.lane.b32.xlu1 %v18553_v60, %s13883_s4  ;;  %v18570_v47 = vld [vmem:[#allocation101_spill] sm:$0xff] }
 0x5db   : > { %6752 = vrot.lane.b32.xlu0 %v18554_v26, %s13883_s4  ;;  %12380 = vmatprep.mubr.msk.bf16.mxu0 %vm13882_vm0, %v18351_v17  ;;  %v4913_v27 = vmul.f32 %v13441_v46, %v16110_v0  ;;  %v6075_v0 = vsel %vm4969_vm2, %v16425_v56, 0  ;;  %v18571_v46 = vld [vmem:[#allocation75_spill] sm:$0xff]  ;;  %v18572_v60 = vld [vmem:[#allocation109_spill] sm:$0xff] }
 0x5dc   : > { %12390 = vmatprep.subr.bf16.mxu0 %v18351_v17  ;;  %12374 = vmatprep.mubr.msk.bf16.mxu1 %vm13882_vm0, %v18351_v17 }
 0x5dd   : > { %12384 = vmatprep.subr.bf16.mxu1 %v18351_v17  ;;  %v4955_v21 = vpack.c.bf16 %v4913_v27, %v4913_v27  ;;  %v18574_v27 = vld [vmem:[#allocation108_spill] sm:$0xff] }
 0x5de   : > { %6908 = vrot.lane.b32.xlu1 %v18555_v14, %s13883_s4  ;;  %v18576_v14 = vld [vmem:[#allocation113_spill] sm:$0xff] }
 0x5df   : > { %6859 = vrot.lane.b32.xlu0 %v18556_v30, %s13883_s4  ;;  %v18578_v30 = vld [vmem:[#allocation92_spill] sm:$0xff] }
 0x5e0   : > { %12381 = vmatmul.mubr.msk.bf16.vlgmr.msra.gmra.mrb[200].mxu0 %vm4581_vm3, %v4956_v22  ;;  %v18577_v22 = vld [vmem:[#allocation83_spill] sm:$0xff] }
 0x5e1   : > { %12375 = vmatmul.mubr.msk.bf16.vlgmr.msra.gmra.mrb[236].mxu1 %vm4581_vm3, %v4955_v21  ;;  %12391 = vmatpush3.bf16.msra.mxu0 %v6075_v0  ;;  %v18575_v21 = vld [vmem:[#allocation82_spill] sm:$0xff]  ;;  %v3006_v0 = vadd.f32 %v18578_v30, %v15761_v19  ;;  %v18591_v30 = vld [vmem:[#allocation125_spill] sm:$0xff] }
 0x5e2   : > { %v13443_v36 = vpop.eup %13442  ;;  %12385 = vmatpush3.bf16.msra.mxu1 %v6029_v57  ;;  %7015 = vrot.lane.b32.xlu1 %v18558_v39, %s13883_s4  ;;  %v18580_v57 = vld [vmem:[#allocation90_spill] sm:$0xff] }
 0x5e3   : > { %6856 = vrot.lane.b32.xlu0 %v18559_v34, %s13883_s4  ;;  %12386 = vmatprep.mubr.msk.bf16.mxu1 %vm13882_vm0, %v18351_v17  ;;  %v4917_v16 = vmul.f32 %v13443_v36, %v16114_v32  ;;  %v6121_v32 = vsel %vm4969_vm2, %v16455_v62, 0  ;;  %v16506_v39 = vpack.c.bf16 %v3006_v0, %v3006_v0  ;;  %v18592_v0 = vld [vmem:[#allocation107_spill] sm:$0xff] }
 0x5e4   : > { %12396 = vmatprep.subr.bf16.mxu1 %v18351_v17  ;;  %12392 = vmatprep.mubr.msk.bf16.mxu0 %vm13882_vm0, %v18351_v17 }
 0x5e5   : > { %v4957_v51 = vpack.c.bf16 %v4917_v16, %v4917_v16  ;;  %12402 = vmatprep.subr.bf16.mxu0 %v18351_v17  ;;  %v18581_v16 = vld [vmem:[#allocation117_spill] sm:$0xff] }
 0x5e6   : > { %7012 = vrot.lane.b32.xlu1 %v18560_v38, %s13883_s4 }
 0x5e7   : > { %6963 = vrot.lane.b32.xlu0 %v18561_v24, %s13883_s4  ;;  %v18583_v24 = vld [vmem:[#allocation95_spill] sm:$0xff] }
 0x5e9   : > { %12387 = vmatmul.mubr.msk.bf16.vlgmr.msra.gmra.mrb[240].mxu1 %vm4581_vm3, %v4957_v51  ;;  %v18582_v51 = vld [vmem:[#allocation91_spill] sm:$0xff] }
 0x5ea   : > { %12397 = vmatpush3.bf16.msra.mxu1 %v6121_v32  ;;  %7119 = vrot.lane.b32.xlu1 %v18562_v63, %s13883_s4  ;;  %v3007_v32 = vadd.f32 %v18583_v24, %v15761_v19  ;;  %v6167_v63 = vsel %vm4969_vm2, %v16506_v39, 0 }
 0x5eb   : > { %6960 = vrot.lane.b32.xlu0 %v18563_v7, %s13883_s4  ;;  %12398 = vmatprep.mubr.msk.bf16.mxu1 %vm13882_vm0, %v18351_v17 }
 0x5ec   : > { %12408 = vmatprep.subr.bf16.mxu1 %v18351_v17 }
 0x5ee   : > { %7116 = vrot.lane.b32.xlu1 %v18564_v43, %s13883_s4  ;;  %v18584_v43 = vld [vmem:[#allocation116_spill] sm:$0xff] }
 0x5ef   : > { %7067 = vrot.lane.b32.xlu0 %v18565_v31, %s13883_s4 }
 0x5f2   : > { %7223 = vrot.lane.b32.xlu1 %v18566_v8, %s13883_s4  ;;  %v16525_v8 = vpack.c.bf16 %v3007_v32, %v3007_v32  ;;  %v18596_v32 = vld [vmem:[#allocation127_spill] sm:$0xff] }
 0x5f3   : > { %7064 = vrot.lane.b32.xlu0 %v18567_v1, %s13883_s4 }
 0x5f6   : > { %7220 = vrot.lane.b32.xlu1 %v18568_v42, %s13883_s4  ;;  %v18586_v42 = vld [vmem:[#allocation122_spill] sm:$0xff] }
 0x5f7   : > { %7171 = vrot.lane.b32.xlu0 %v18569_v48, %s13883_s4  ;;  %v18587_v48 = vld [vmem:[#allocation99_spill] sm:$0xff] }
 0x5fa   : > { %7327 = vrot.lane.b32.xlu1 %v18570_v47, %s13883_s4 }
 0x5fb   : > { %7168 = vrot.lane.b32.xlu0 %v18571_v46, %s13883_s4  ;;  %v18588_v46 = vld [vmem:[#allocation102_spill] sm:$0xff] }
 0x5fe   : > { %7324 = vrot.lane.b32.xlu1 %v18572_v60, %s13883_s4  ;;  %v3008_v60 = vadd.f32 %v15761_v19, %v18588_v46 }
 0x5ff   : > { %7275 = vrot.lane.b32.xlu0 %v18573_v35, %s13883_s4  ;;  %v6213_v35 = vsel %vm4969_vm2, %v16525_v8, 0 }
 0x601   : > { %v4848_v26 = vpop.xlane.xlu1 %4847 }
 0x602   : > { %7431 = vrot.lane.b32.xlu1 %v18574_v27, %s13883_s4  ;;  %13444 = vrcp.f32 %v4848_v26  ;;  %v18589_v27 = vld [vmem:[#allocation120_spill] sm:$0xff] }
 0x603   : > { %7272 = vrot.lane.b32.xlu0 %v18575_v21, %s13883_s4 }
 0x606   : > { %7428 = vrot.lane.b32.xlu1 %v18576_v14, %s13883_s4  ;;  %v16544_v14 = vpack.c.bf16 %v3008_v60, %v3008_v60  ;;  %v18601_v60 = vld [vmem:[#allocation129_spill] sm:$0xff] }
 0x607   : > { %7379 = vrot.lane.b32.xlu0 %v18577_v22, %s13883_s4 }
 0x609   : > { %v4851_v54 = vpop.xlane.xlu0 %4850 }
 0x60a   : > { %7535 = vrot.lane.b32.xlu1 %v18579_v25, %s13883_s4  ;;  %13446 = vrcp.f32 %v4851_v54  ;;  %v18593_v25 = vld [vmem:[#allocation105_spill] sm:$0xff] }
 0x60b   : > { %7376 = vrot.lane.b32.xlu0 %v18580_v57, %s13883_s4  ;;  %v3009_v57 = vadd.f32 %v15761_v19, %v18593_v25 }
 0x60c   : > { %v13445_v36 = vpop.eup %13444 }
 0x60d   : > { %v4919_v34 = vmul.f32 %v13445_v36, %v16133_v6  ;;  %v18585_v6 = vld [vmem:[#allocation98_spill] sm:$0xff]  ;;  %v6259_v36 = vsel %vm4969_vm2, %v16544_v14, 0 }
 0x60e   : > { %7532 = vrot.lane.b32.xlu1 %v18581_v16, %s13883_s4  ;;  %v18594_v16 = vld [vmem:[#allocation124_spill] sm:$0xff] }
 0x60f   : > { %7483 = vrot.lane.b32.xlu0 %v18582_v51, %s13883_s4  ;;  %v4958_v38 = vpack.c.bf16 %v4919_v34, %v4919_v34 }
 0x611   : > { %12393 = vmatmul.mubr.msk.bf16.vlgmr.msra.gmra.mrb[204].mxu0 %vm4581_vm3, %v4958_v38  ;;  %v4854_v7 = vpop.xlane.xlu1 %4853  ;;  %v16563_v38 = vpack.c.bf16 %v3009_v57, %v3009_v57  ;;  %v18606_v57 = vld [vmem:[#allocation131_spill] sm:$0xff] }
 0x612   : > { %7639 = vrot.lane.b32.xlu1 %v18584_v43, %s13883_s4  ;;  %12403 = vmatpush3.bf16.msra.mxu0 %v6167_v63  ;;  %13448 = vrcp.f32 %v4854_v7  ;;  %v18597_v63 = vld [vmem:[#allocation111_spill] sm:$0xff]  ;;  %v18598_v43 = vld [vmem:[#allocation100_spill] sm:$0xff] }
 0x613   : > { %7480 = vrot.lane.b32.xlu0 %v18585_v6, %s13883_s4  ;;  %12404 = vmatprep.mubr.msk.bf16.mxu0 %vm13882_vm0, %v18351_v17  ;;  %v3010_v6 = vadd.f32 %v18598_v43, %v15761_v19 }
 0x614   : > { %v13447_v31 = vpop.eup %13446  ;;  %12414 = vmatprep.subr.bf16.mxu0 %v18351_v17 }
 0x615   : > { %v4921_v1 = vmul.f32 %v13447_v31, %v16148_v44  ;;  %v18590_v44 = vld [vmem:[#allocation106_spill] sm:$0xff]  ;;  %v6305_v31 = vsel %vm4969_vm2, %v16563_v38, 0 }
 0x616   : > { %7636 = vrot.lane.b32.xlu1 %v18586_v42, %s13883_s4  ;;  %v18599_v42 = vld [vmem:[#allocation126_spill] sm:$0xff] }
 0x617   : > { %7587 = vrot.lane.b32.xlu0 %v18587_v48, %s13883_s4  ;;  %v4959_v47 = vpack.c.bf16 %v4921_v1, %v4921_v1 }
 0x619   : > { %12399 = vmatmul.mubr.msk.bf16.vlgmr.msra.gmra.mrb[244].mxu1 %vm4581_vm3, %v4959_v47  ;;  %v4857_v26 = vpop.xlane.xlu0 %4856  ;;  %v16582_v47 = vpack.c.bf16 %v3010_v6, %v3010_v6  ;;  %v18610_v6 = vld [vmem:[#allocation130_spill] sm:$0xff] }
 0x61a   : > { %7743 = vrot.lane.b32.xlu1 %v18589_v27, %s13883_s4  ;;  %12409 = vmatpush3.bf16.msra.mxu1 %v6213_v35  ;;  %13450 = vrcp.f32 %v4857_v26  ;;  %v18602_v35 = vld [vmem:[#allocation115_spill] sm:$0xff] }
 0x61b   : > { %7584 = vrot.lane.b32.xlu0 %v18590_v44, %s13883_s4  ;;  %12410 = vmatprep.mubr.msk.bf16.mxu1 %vm13882_vm0, %v18351_v17  ;;  %v18603_v27 = vld [vmem:[#allocation103_spill] sm:$0xff] }
 0x61c   : > { %v13449_v21 = vpop.eup %13448  ;;  %12420 = vmatprep.subr.bf16.mxu1 %v18351_v17  ;;  %v3011_v44 = vadd.f32 %v18603_v27, %v15761_v19 }
 0x61d   : > { %v4923_v22 = vmul.f32 %v13449_v21, %v16164_v55  ;;  %v18595_v55 = vld [vmem:[#allocation110_spill] sm:$0xff]  ;;  %v6351_v21 = vsel %vm4969_vm2, %v16582_v47, 0 }
 0x61e   : > { %7740 = vrot.lane.b32.xlu1 %v18591_v30, %s13883_s4  ;;  %v18605_v30 = vld [vmem:[#allocation118_spill] sm:$0xff]  ;;  %v16601_v19 = vpack.c.bf16 %v3011_v44, %v3011_v44 }
 0x61f   : > { %7691 = vrot.lane.b32.xlu0 %v18592_v0, %s13883_s4  ;;  %v4960_v54 = vpack.c.bf16 %v4923_v22, %v4923_v22 }
 0x621   : > { %12405 = vmatmul.mubr.msk.bf16.vlgmr.msra.gmra.mrb[208].mxu0 %vm4581_vm3, %v4960_v54  ;;  %v4860_v34 = vpop.xlane.xlu1 %4859 }
 0x622   : > { %7847 = vrot.lane.b32.xlu1 %v18594_v16, %s13883_s4  ;;  %12415 = vmatpush3.bf16.msra.mxu0 %v6259_v36  ;;  %13452 = vrcp.f32 %v4860_v34  ;;  %v18607_v36 = vld [vmem:[#allocation119_spill] sm:$0xff] }
 0x623   : > { %7688 = vrot.lane.b32.xlu0 %v18595_v55, %s13883_s4  ;;  %12416 = vmatprep.mubr.msk.bf16.mxu0 %vm13882_vm0, %v18351_v17  ;;  %v6397_v55 = vsel %vm4969_vm2, %v16601_v19, 0 }
 0x624   : > { %v13451_v51 = vpop.eup %13450  ;;  %12426 = vmatprep.subr.bf16.mxu0 %v18351_v17 }
 0x625   : > { %v4925_v24 = vmul.f32 %v13451_v51, %v16180_v28  ;;  %v18600_v28 = vld [vmem:[#allocation114_spill] sm:$0xff]  ;;  %v18608_v51 = vld [vmem:[#allocation121_spill] sm:$0xff] }
 0x626   : > { %7844 = vrot.lane.b32.xlu1 %v18596_v32, %s13883_s4 }
 0x627   : > { %7795 = vrot.lane.b32.xlu0 %v18597_v63, %s13883_s4  ;;  %v4961_v7 = vpack.c.bf16 %v4925_v24, %v4925_v24 }
 0x629   : > { %12411 = vmatmul.mubr.msk.bf16.vlgmr.msra.gmra.mrb[248].mxu1 %vm4581_vm3, %v4961_v7  ;;  %v4863_v1 = vpop.xlane.xlu0 %4862 }
 0x62a   : > { %7951 = vrot.lane.b32.xlu1 %v18599_v42, %s13883_s4  ;;  %12421 = vmatpush3.bf16.msra.mxu1 %v6305_v31  ;;  %13454 = vrcp.f32 %v4863_v1 }
 0x62b   : > { %7792 = vrot.lane.b32.xlu0 %v18600_v28, %s13883_s4  ;;  %12422 = vmatprep.mubr.msk.bf16.mxu1 %vm13882_vm0, %v18351_v17 }
 0x62c   : > { %v13453_v48 = vpop.eup %13452  ;;  %12432 = vmatprep.subr.bf16.mxu1 %v18351_v17 }
 0x62d   : > { %v4927_v46 = vmul.f32 %v13453_v48, %v16196_v12  ;;  %v18604_v12 = vld [vmem:[#allocation128_spill] sm:$0xff] }
 0x62e   : > { %7948 = vrot.lane.b32.xlu1 %v18601_v60, %s13883_s4 }
 0x62f   : > { %7899 = vrot.lane.b32.xlu0 %v18602_v35, %s13883_s4  ;;  %v4962_v26 = vpack.c.bf16 %v4927_v46, %v4927_v46 }
 0x631   : > { %12417 = vmatmul.mubr.msk.bf16.vlgmr.msra.gmra.mrb[212].mxu0 %vm4581_vm3, %v4962_v26  ;;  %v4866_v22 = vpop.xlane.xlu1 %4865 }
 0x632   : > { %12427 = vmatpush3.bf16.msra.mxu0 %v6351_v21  ;;  %13456 = vrcp.f32 %v4866_v22  ;;  %8055 = vrot.lane.b32.xlu1 %v18604_v12, %s13883_s4 }
 0x633   : > { %7896 = vrot.lane.b32.xlu0 %v18605_v30, %s13883_s4  ;;  %12428 = vmatprep.mubr.msk.bf16.mxu0 %vm13882_vm0, %v18351_v17 }
 0x634   : > { %v13455_v0 = vpop.eup %13454  ;;  %12438 = vmatprep.subr.bf16.mxu0 %v18351_v17 }
 0x635   : > { %v6444_v54 = vpop.permute.xlu1 %6443  ;;  %v4929_v25 = vmul.f32 %v13455_v0, %v16212_v15  ;;  %v18609_v15 = vld [vmem:[#allocation123_spill] sm:$0xff] }
 0x636   : > { %8052 = vrot.lane.b32.xlu1 %v18606_v57, %s13883_s4  ;;  %v6449_v1 = vsel %vm3108_vm1, %v6444_v54, 0 }
 0x637   : > { %8003 = vrot.lane.b32.xlu0 %v18607_v36, %s13883_s4  ;;  %v4963_v34 = vpack.c.bf16 %v4929_v25, %v4929_v25 }
 0x639   : > { %v6441_v16 = vpop.permute.xlu1 %6440  ;;  %12423 = vmatmul.mubr.msk.bf16.vlgmr.msra.gmra.mrb[252].mxu1 %vm4581_vm3, %v4963_v34 }
 0x63a   : > { %8488 = vrot.lane.b32.xlu1 %v18608_v51, %s13883_s4  ;;  %12433 = vmatpush3.bf16.msra.mxu1 %v6397_v55  ;;  %v4869_v24 = vpop.xlane.xlu0 %4868 }
 0x63b   : > { %13458 = vrcp.f32 %v4869_v24  ;;  %8000 = vrot.lane.b32.xlu0 %v18609_v15, %s13883_s4  ;;  %12434 = vmatprep.mubr.msk.bf16.mxu1 %vm13882_vm0, %v18351_v17 }
 0x63c   : > { %v13457_v32 = vpop.eup %13456  ;;  %12444 = vmatprep.subr.bf16.mxu1 %v18351_v17 }
 0x63d   : > { %v6493_v63 = vpop.permute.xlu1 %6492  ;;  %v4931_v7 = vmul.f32 %v13457_v32, %v16230_v3 }
 0x63e   : > { %8586 = vrot.lane.b32.xlu1 %v16121_v41, %s13883_s4  ;;  %v6496_v43 = vpop.permute.xlu0 %6495 }
 0x63f   : > { %8537 = vrot.lane.b32.xlu0 %v18610_v6, %s13883_s4  ;;  %v4964_v31 = vpack.c.bf16 %v4931_v7, %v4931_v7  ;;  %v6501_v44 = vsel %vm3108_vm1, %v6496_v43, 0 }
 0x641   : > { %12429 = vmatmul.mubr.msk.bf16.vlgmr.msra.gmra.mrb[216].mxu0 %vm4581_vm3, %v4964_v31  ;;  %v6600_v42 = vpop.permute.xlu1 %6599 }
 0x642   : > { %12439 = vmatpush3.bf16.xpose.msra.mxu0 %v6449_v1  ;;  %8684 = vrot.lane.b32.xlu1 %v16153_v52, %s13883_s4  ;;  %v6548_v28 = vpop.permute.xlu0 %6547  ;;  %v16627_v48 = vpop.f32.mrb[156].mxu0  ;;  %v6605_v0 = vsel %vm3108_vm1, %v6600_v42, 0 }
 0x643   : > { %18611 = vst [vmem:[#allocation41_spill] sm:$0xff] %v16627_v48  ;;  %8635 = vrot.lane.b32.xlu0 %v16137_v59, %s13883_s4  ;;  %v12250_v41 = vpop.f32.mrb[157].mxu0  ;;  %12440 = vmatprep.mubr.msk.bf16.mxu0 %vm13882_vm0, %v18351_v17  ;;  %v6553_v21 = vsel %vm3108_vm1, %v6548_v28, 0 }
 0x644   : > { %v5010_v3 = vpop.f32.mrb[158].mxu0  ;;  %12450 = vmatprep.subr.bf16.mxu0 %v18351_v17 }
 0x645   : > { %v13459_v46 = vpop.eup %13458  ;;  %v12251_v60 = vpop.f32.mrb[159].mxu0 }
 0x646   : > { %v6597_v35 = vpop.permute.xlu1 %6596  ;;  %v4933_v26 = vmul.f32 %v13459_v46, %v16254_v18  ;;  %8782 = vrot.lane.b32.xlu1 %v16185_v5, %s13883_s4  ;;  %v6545_v52 = vpop.permute.xlu0 %6544 }
 0x647   : > { %8733 = vrot.lane.b32.xlu0 %v16169_v37, %s13883_s4 }
 0x648   : > { %v4965_v59 = vpack.c.bf16 %v4933_v26, %v4933_v26 }
 0x649   : > { %12441 = vmatmul.mubr.msk.bf16.vlgmr.msra.gmra.mrb[220].mxu0 %vm3108_vm1, %v6441_v16 }
 0x64a   : > { %v6704_v27 = vpop.permute.xlu1 %6703  ;;  %8880 = vrot.lane.b32.xlu1 %v16217_v45, %s13883_s4  ;;  %12435 = vmatmul.mubr.msk.bf16.vlgmr.msra.gmra.mrb[0].mxu1 %vm4581_vm3, %v4965_v59  ;;  %v6652_v18 = vpop.permute.xlu0 %6651 }
 0x64b   : > { %12445 = vmatpush3.bf16.xpose.msra.mxu1 %v6501_v44  ;;  %12451 = vmatpush3.bf16.xpose.msra.mxu0 %v6553_v21  ;;  %v16645_v5 = vpop.f32.mrb[196].mxu1  ;;  %v6657_v25 = vsel %vm3108_vm1, %v6652_v18, 0  ;;  %v6709_v16 = vsel %vm3108_vm1, %v6704_v27, 0 }
 0x64c   : > { %18612 = vst [vmem:[#allocation77_spill] sm:$0xff] %v16645_v5  ;;  %8831 = vrot.lane.b32.xlu0 %v16201_v53, %s13883_s4  ;;  %v12256_v37 = vpop.f32.mrb[197].mxu1  ;;  %12446 = vmatprep.mubr.msk.bf16.mxu1 %vm13882_vm0, %v18351_v17 }
 0x64d   : > { %v5056_v22 = vpop.f32.mrb[198].mxu1  ;;  %12452 = vmatprep.mubr.msk.bf16.mxu0 %vm13882_vm0, %v18351_v17  ;;  %12456 = vmatprep.subr.bf16.mxu1 %v18351_v17 }
 0x64e   : > { %v6701_v12 = vpop.permute.xlu1 %6700  ;;  %8978 = vrot.lane.b32.xlu1 %v16235_v33, %s13883_s4  ;;  %v6649_v45 = vpop.permute.xlu0 %6648  ;;  %12462 = vmatprep.subr.bf16.mxu0 %v18351_v17 }
 0x64f   : > { %v12257_v30 = vpop.f32.mrb[199].mxu1 }
 0x650   : > { %8929 = vrot.lane.b32.xlu0 %v16238_v20, %s13883_s4 }
 0x652   : > { %v6808_v53 = vpop.permute.xlu1 %6807  ;;  %9076 = vrot.lane.b32.xlu1 %v16259_v29, %s13883_s4  ;;  %12447 = vmatmul.mubr.msk.bf16.vlgmr.msra.gmra.mrb[4].mxu1 %vm3108_vm1, %v6493_v63  ;;  %v6756_v54 = vpop.permute.xlu0 %6755 }
 0x653   : > { %12453 = vmatmul.mubr.msk.bf16.vlgmr.msra.gmra.mrb[224].mxu0 %vm3108_vm1, %v6545_v52  ;;  %12457 = vmatpush3.bf16.xpose.msra.mxu1 %v6605_v0  ;;  %v16665_v33 = vpop.f32.mrb[160].mxu0  ;;  %v6761_v51 = vsel %vm3108_vm1, %v6756_v54, 0  ;;  %v6813_v63 = vsel %vm3108_vm1, %v6808_v53, 0 }
 0x654   : > { %18613 = vst [vmem:[#allocation80_spill] sm:$0xff] %v16665_v33  ;;  %12463 = vmatpush3.bf16.xpose.msra.mxu0 %v6657_v25  ;;  %9027 = vrot.lane.b32.xlu0 %v16264_v2, %s13883_s4  ;;  %v12262_v20 = vpop.f32.mrb[161].mxu0 }
 0x655   : > { %v5102_v57 = vpop.f32.mrb[162].mxu0  ;;  %12458 = vmatprep.mubr.msk.bf16.mxu1 %vm13882_vm0, %v18351_v17  ;;  %12464 = vmatprep.mubr.msk.bf16.mxu0 %vm13882_vm0, %v18351_v17 }
 0x656   : > { %v6805_v36 = vpop.permute.xlu1 %6804  ;;  %v12263_v29 = vpop.f32.mrb[163].mxu0  ;;  %9174 = vrot.lane.b32.xlu1 %v16283_v50, %s13883_s4  ;;  %12468 = vmatprep.subr.bf16.mxu1 %v18351_v17 }
 0x657   : > { %v6753_v34 = vpop.permute.xlu0 %6752  ;;  %12474 = vmatprep.subr.bf16.mxu0 %v18351_v17 }
 0x658   : > { %9125 = vrot.lane.b32.xlu0 %v16287_v40, %s13883_s4 }
 0x65a   : > { %v6912_v2 = vpop.permute.xlu1 %6911  ;;  %9272 = vrot.lane.b32.xlu1 %v16309_v4, %s13883_s4  ;;  %12459 = vmatmul.mubr.msk.bf16.vlgmr.msra.gmra.mrb[8].mxu1 %vm3108_vm1, %v6597_v35 }
 0x65b   : > { %v6860_v55 = vpop.permute.xlu0 %6859  ;;  %12465 = vmatmul.mubr.msk.bf16.vlgmr.msra.gmra.mrb[228].mxu0 %vm3108_vm1, %v6649_v45  ;;  %12469 = vmatpush3.bf16.xpose.msra.mxu1 %v6709_v16  ;;  %v16685_v50 = vpop.f32.mrb[200].mxu1  ;;  %v6917_v42 = vsel %vm3108_vm1, %v6912_v2, 0 }
 0x65c   : > { %18614 = vst [vmem:[#allocation65_spill] sm:$0xff] %v16685_v50  ;;  %12475 = vmatpush3.bf16.xpose.msra.mxu0 %v6761_v51  ;;  %9223 = vrot.lane.b32.xlu0 %v16313_v13, %s13883_s4  ;;  %v12268_v40 = vpop.f32.mrb[201].mxu1 }
 0x65d   : > { %v5148_v24 = vpop.f32.mrb[202].mxu1  ;;  %12470 = vmatprep.mubr.msk.bf16.mxu1 %vm13882_vm0, %v18351_v17  ;;  %12476 = vmatprep.mubr.msk.bf16.mxu0 %vm13882_vm0, %v18351_v17 }
 0x65e   : > { %v6909_v15 = vpop.permute.xlu1 %6908  ;;  %9370 = vrot.lane.b32.xlu1 %v16335_v49, %s13883_s4  ;;  %v12269_v32 = vpop.f32.mrb[203].mxu1  ;;  %12480 = vmatprep.subr.bf16.mxu1 %v18351_v17  ;;  %v6865_v49 = vsel %vm3108_vm1, %v6860_v55, 0 }
 0x65f   : > { %v6857_v4 = vpop.permute.xlu0 %6856  ;;  %12486 = vmatprep.subr.bf16.mxu0 %v18351_v17 }
 0x660   : > { %9321 = vrot.lane.b32.xlu0 %v16340_v61, %s13883_s4 }
 0x662   : > { %v7016_v13 = vpop.permute.xlu1 %7015  ;;  %9468 = vrot.lane.b32.xlu1 %v16365_v23, %s13883_s4  ;;  %12471 = vmatmul.mubr.msk.bf16.vlgmr.msra.gmra.mrb[12].mxu1 %vm3108_vm1, %v6701_v12 }
 0x663   : > { %v6964_v7 = vpop.permute.xlu0 %6963  ;;  %12477 = vmatmul.mubr.msk.bf16.vlgmr.msra.gmra.mrb[232].mxu0 %vm3108_vm1, %v6753_v34  ;;  %12481 = vmatpush3.bf16.xpose.msra.mxu1 %v6813_v63  ;;  %v16705_v43 = vpop.f32.mrb[164].mxu0  ;;  %v7021_v26 = vsel %vm3108_vm1, %v7016_v13, 0 }
 0x664   : > { %18615 = vst [vmem:[#allocation43_spill] sm:$0xff] %v16705_v43  ;;  %12487 = vmatpush3.bf16.xpose.msra.mxu0 %v6865_v49  ;;  %9419 = vrot.lane.b32.xlu0 %v16370_v10, %s13883_s4  ;;  %v12274_v61 = vpop.f32.mrb[165].mxu0  ;;  %v6969_v41 = vsel %vm3108_vm1, %v6964_v7, 0 }
 0x665   : > { %v5194_v6 = vpop.f32.mrb[166].mxu0  ;;  %12482 = vmatprep.mubr.msk.bf16.mxu1 %vm13882_vm0, %v18351_v17  ;;  %12488 = vmatprep.mubr.msk.bf16.mxu0 %vm13882_vm0, %v18351_v17 }
 0x666   : > { %v7013_v31 = vpop.permute.xlu1 %7012  ;;  %v12275_v23 = vpop.f32.mrb[167].mxu0  ;;  %9566 = vrot.lane.b32.xlu1 %v16395_v11, %s13883_s4  ;;  %12492 = vmatprep.subr.bf16.mxu1 %v18351_v17 }
 0x667   : > { %v6961_v1 = vpop.permute.xlu0 %6960  ;;  %12498 = vmatprep.subr.bf16.mxu0 %v18351_v17 }
 0x668   : > { %9517 = vrot.lane.b32.xlu0 %v16400_v58, %s13883_s4 }
 0x66a   : > { %v7120_v10 = vpop.permute.xlu1 %7119  ;;  %9664 = vrot.lane.b32.xlu1 %v16425_v56, %s13883_s4  ;;  %12483 = vmatmul.mubr.msk.bf16.vlgmr.msra.gmra.mrb[16].mxu1 %vm3108_vm1, %v6805_v36 }
 0x66b   : > { %v7068_v28 = vpop.permute.xlu0 %7067  ;;  %12489 = vmatmul.mubr.msk.bf16.vlgmr.msra.gmra.mrb[236].mxu0 %vm3108_vm1, %v6857_v4  ;;  %12493 = vmatpush3.bf16.xpose.msra.mxu1 %v6917_v42  ;;  %v16725_v11 = vpop.f32.mrb[204].mxu1  ;;  %v7125_v12 = vsel %vm3108_vm1, %v7120_v10, 0 }
 0x66c   : > { %18616 = vst [vmem:[#allocation42_spill] sm:$0xff] %v16725_v11  ;;  %12499 = vmatpush3.bf16.xpose.msra.mxu0 %v6969_v41  ;;  %9615 = vrot.lane.b32.xlu0 %v16430_v9, %s13883_s4  ;;  %v12280_v58 = vpop.f32.mrb[205].mxu1  ;;  %v7073_v52 = vsel %vm3108_vm1, %v7068_v28, 0 }
 0x66d   : > { %v5240_v3 = vpop.f32.mrb[206].mxu1  ;;  %12494 = vmatprep.mubr.msk.bf16.mxu1 %vm13882_vm0, %v18351_v17  ;;  %12500 = vmatprep.mubr.msk.bf16.mxu0 %vm13882_vm0, %v18351_v17 }
 0x66e   : > { %v7117_v46 = vpop.permute.xlu1 %7116  ;;  %v12281_v60 = vpop.f32.mrb[207].mxu1  ;;  %12504 = vmatprep.subr.bf16.mxu1 %v18351_v17  ;;  %12510 = vmatprep.subr.bf16.mxu0 %v18351_v17 }
 0x66f   : > { %v7065_v56 = vpop.permute.xlu0 %7064 }
 0x672   : > { %v7224_v35 = vpop.permute.xlu1 %7223  ;;  %12495 = vmatmul.mubr.msk.bf16.vlgmr.msra.gmra.mrb[20].mxu1 %vm3108_vm1, %v6909_v15 }
 0x673   : > { %v7172_v9 = vpop.permute.xlu0 %7171  ;;  %12501 = vmatmul.mubr.msk.bf16.vlgmr.msra.gmra.mrb[240].mxu0 %vm3108_vm1, %v6961_v1  ;;  %12505 = vmatpush3.bf16.xpose.msra.mxu1 %v7021_v26  ;;  %v16739_v59 = vpop.f32.mrb[168].mxu0  ;;  %v7229_v16 = vsel %vm3108_vm1, %v7224_v35, 0 }
 0x674   : > { %18617 = vst [vmem:[#allocation67_spill] sm:$0xff] %v16739_v59  ;;  %12511 = vmatpush3.bf16.xpose.msra.mxu0 %v7073_v52  ;;  %v12286_v27 = vpop.f32.mrb[169].mxu0  ;;  %12506 = vmatprep.mubr.msk.bf16.mxu1 %vm13882_vm0, %v18351_v17  ;;  %v7177_v30 = vsel %vm3108_vm1, %v7172_v9, 0 }
 0x675   : > { %v5286_v44 = vpop.f32.mrb[170].mxu0  ;;  %12512 = vmatprep.mubr.msk.bf16.mxu0 %vm13882_vm0, %v18351_v17  ;;  %12516 = vmatprep.subr.bf16.mxu1 %v18351_v17 }
 0x676   : > { %v7221_v21 = vpop.permute.xlu1 %7220  ;;  %v12287_v18 = vpop.f32.mrb[171].mxu0  ;;  %12522 = vmatprep.subr.bf16.mxu0 %v18351_v17 }
 0x677   : > { %v7169_v37 = vpop.permute.xlu0 %7168 }
 0x67a   : > { %v7328_v22 = vpop.permute.xlu1 %7327  ;;  %12507 = vmatmul.mubr.msk.bf16.vlgmr.msra.gmra.mrb[24].mxu1 %vm3108_vm1, %v7013_v31 }
 0x67b   : > { %v7276_v45 = vpop.permute.xlu0 %7275  ;;  %12513 = vmatmul.mubr.msk.bf16.vlgmr.msra.gmra.mrb[244].mxu0 %vm3108_vm1, %v7065_v56  ;;  %12517 = vmatpush3.bf16.xpose.msra.mxu1 %v7125_v12  ;;  %v16751_v53 = vpop.f32.mrb[172].mxu0  ;;  %v7333_v31 = vsel %vm3108_vm1, %v7328_v22, 0 }
 0x67c   : > { %18618 = vst [vmem:[#allocation86_spill] sm:$0xff] %v16751_v53  ;;  %12523 = vmatpush3.bf16.xpose.msra.mxu0 %v7177_v30  ;;  %v16753_v0 = vpop.f32.mrb[208].mxu1  ;;  %v12298_v54 = vpop.f32.mrb[173].mxu0  ;;  %12518 = vmatprep.mubr.msk.bf16.mxu1 %vm13882_vm0, %v18351_v17  ;;  %v7281_v55 = vsel %vm3108_vm1, %v7276_v45, 0 }
 0x67d   : > { %18619 = vst [vmem:[#allocation79_spill] sm:$0xff] %v16753_v0  ;;  %v12292_v25 = vpop.f32.mrb[209].mxu1  ;;  %v5378_v20 = vpop.f32.mrb[174].mxu0  ;;  %12524 = vmatprep.mubr.msk.bf16.mxu0 %vm13882_vm0, %v18351_v17  ;;  %12528 = vmatprep.subr.bf16.mxu1 %v18351_v17 }
 0x67e   : > { %v5332_v57 = vpop.f32.mrb[210].mxu1  ;;  %v12299_v36 = vpop.f32.mrb[175].mxu0  ;;  %12534 = vmatprep.subr.bf16.mxu0 %v18351_v17 }
 0x67f   : > { %v7325_v29 = vpop.permute.xlu1 %7324  ;;  %v7273_v34 = vpop.permute.xlu0 %7272 }
 0x680   : > { %v12293_v2 = vpop.f32.mrb[211].mxu1 }
 0x682   : > { %12519 = vmatmul.mubr.msk.bf16.vlgmr.msra.gmra.mrb[28].mxu1 %vm3108_vm1, %v7117_v46 }
 0x683   : > { %v7432_v51 = vpop.permute.xlu1 %7431  ;;  %12525 = vmatmul.mubr.msk.bf16.vlgmr.msra.gmra.mrb[248].mxu0 %vm3108_vm1, %v7169_v37  ;;  %12529 = vmatpush3.bf16.xpose.msra.mxu1 %v7229_v16  ;;  %v7380_v40 = vpop.permute.xlu0 %7379 }
 0x684   : > { %12535 = vmatpush3.bf16.xpose.msra.mxu0 %v7281_v55  ;;  %v16765_v24 = vpop.f32.mrb[212].mxu1  ;;  %v16767_v15 = vpop.f32.mrb[176].mxu0  ;;  %12530 = vmatprep.mubr.msk.bf16.mxu1 %vm13882_vm0, %v18351_v17  ;;  %v7385_v23 = vsel %vm3108_vm1, %v7380_v40, 0  ;;  %v7437_v9 = vsel %vm3108_vm1, %v7432_v51, 0 }
 0x685   : > { %18620 = vst [vmem:[#allocation47_spill] sm:$0xff] %v16765_v24  ;;  %18621 = vst [vmem:[#allocation44_spill] sm:$0xff] %v16767_v15  ;;  %v12304_v4 = vpop.f32.mrb[213].mxu1  ;;  %v12310_v32 = vpop.f32.mrb[177].mxu0  ;;  %12536 = vmatprep.mubr.msk.bf16.mxu0 %vm13882_vm0, %v18351_v17  ;;  %12540 = vmatprep.subr.bf16.mxu1 %v18351_v17 }
 0x686   : > { %v5424_v13 = vpop.f32.mrb[214].mxu1  ;;  %v5470_v63 = vpop.f32.mrb[178].mxu0  ;;  %12546 = vmatprep.subr.bf16.mxu0 %v18351_v17 }
 0x687   : > { %v12311_v7 = vpop.f32.mrb[179].mxu0  ;;  %v7429_v49 = vpop.permute.xlu1 %7428 }
 0x688   : > { %v7377_v61 = vpop.permute.xlu0 %7376  ;;  %v12305_v6 = vpop.f32.mrb[215].mxu1 }
 0x68a   : > { %12531 = vmatmul.mubr.msk.bf16.vlgmr.msra.gmra.mrb[32].mxu1 %vm3108_vm1, %v7221_v21 }
 0x68b   : > { %v7536_v1 = vpop.permute.xlu1 %7535  ;;  %12537 = vmatmul.mubr.msk.bf16.vlgmr.msra.gmra.mrb[252].mxu0 %vm3108_vm1, %v7273_v34  ;;  %12541 = vmatpush3.bf16.xpose.msra.mxu1 %v7333_v31  ;;  %v16779_v10 = vpop.f32.mrb[180].mxu0 }
 0x68c   : > { %18622 = vst [vmem:[#allocation72_spill] sm:$0xff] %v16779_v10  ;;  %12547 = vmatpush3.bf16.xpose.msra.mxu0 %v7385_v23  ;;  %v7484_v42 = vpop.permute.xlu0 %7483  ;;  %v16781_v28 = vpop.f32.mrb[216].mxu1  ;;  %12542 = vmatprep.mubr.msk.bf16.mxu1 %vm13882_vm0, %v18351_v17  ;;  %v7541_v57 = vsel %vm3108_vm1, %v7536_v1, 0 }
 0x68d   : > { %18623 = vst [vmem:[#allocation68_spill] sm:$0xff] %v16781_v28  ;;  %v12316_v41 = vpop.f32.mrb[217].mxu1  ;;  %v12322_v58 = vpop.f32.mrb[181].mxu0  ;;  %12548 = vmatprep.mubr.msk.bf16.mxu0 %vm13882_vm0, %v18351_v17  ;;  %12552 = vmatprep.subr.bf16.mxu1 %v18351_v17  ;;  %v7489_v52 = vsel %vm3108_vm1, %v7484_v42, 0 }
 0x68e   : > { %v5516_v3 = vpop.f32.mrb[218].mxu1  ;;  %v5562_v46 = vpop.f32.mrb[182].mxu0  ;;  %12558 = vmatprep.subr.bf16.mxu0 %v18351_v17 }
 0x68f   : > { %v12323_v56 = vpop.f32.mrb[183].mxu0  ;;  %v7533_v60 = vpop.permute.xlu1 %7532 }
 0x690   : > { %v7481_v35 = vpop.permute.xlu0 %7480  ;;  %v12317_v26 = vpop.f32.mrb[219].mxu1 }
 0x692   : > { %12543 = vmatmul.mubr.msk.bf16.vlgmr.msra.gmra.mrb[36].mxu1 %vm3108_vm1, %v7325_v29 }
 0x693   : > { %v7640_v27 = vpop.permute.xlu1 %7639  ;;  %12549 = vmatmul.mubr.msk.bf16.vlgmr.msra.gmra.mrb[0].mxu0 %vm3108_vm1, %v7377_v61  ;;  %12553 = vmatpush3.bf16.xpose.msra.mxu1 %v7437_v9  ;;  %v16793_v44 = vpop.f32.mrb[184].mxu0 }
 0x694   : > { %18624 = vst [vmem:[#allocation84_spill] sm:$0xff] %v16793_v44  ;;  %12559 = vmatpush3.bf16.xpose.msra.mxu0 %v7489_v52  ;;  %v7588_v21 = vpop.permute.xlu0 %7587  ;;  %v16795_v18 = vpop.f32.mrb[220].mxu1  ;;  %12554 = vmatprep.mubr.msk.bf16.mxu1 %vm13882_vm0, %v18351_v17 }
 0x695   : > { %18625 = vst [vmem:[#allocation89_spill] sm:$0xff] %v16795_v18  ;;  %v12328_v37 = vpop.f32.mrb[221].mxu1  ;;  %v12334_v22 = vpop.f32.mrb[185].mxu0  ;;  %12560 = vmatprep.mubr.msk.bf16.mxu0 %vm13882_vm0, %v18351_v17  ;;  %12564 = vmatprep.subr.bf16.mxu1 %v18351_v17  ;;  %v7593_v36 = vsel %vm3108_vm1, %v7588_v21, 0 }
 0x696   : > { %v5608_v12 = vpop.f32.mrb[222].mxu1  ;;  %v5654_v45 = vpop.f32.mrb[186].mxu0  ;;  %12570 = vmatprep.subr.bf16.mxu0 %v18351_v17 }
 0x697   : > { %v12335_v30 = vpop.f32.mrb[187].mxu0  ;;  %v7637_v54 = vpop.permute.xlu1 %7636 }
 0x698   : > { %v7585_v25 = vpop.permute.xlu0 %7584  ;;  %v12329_v20 = vpop.f32.mrb[223].mxu1 }
 0x69a   : > { %12555 = vmatmul.mubr.msk.bf16.vlgmr.msra.gmra.mrb[40].mxu1 %vm3108_vm1, %v7429_v49  ;;  %v7645_v49 = vsel %vm3108_vm1, %v7640_v27, 0 }
 0x69b   : > { %v7744_v29 = vpop.permute.xlu1 %7743  ;;  %12561 = vmatmul.mubr.msk.bf16.vlgmr.msra.gmra.mrb[4].mxu0 %vm3108_vm1, %v7481_v35  ;;  %12565 = vmatpush3.bf16.xpose.msra.mxu1 %v7541_v57  ;;  %v16807_v34 = vpop.f32.mrb[188].mxu0 }
 0x69c   : > { %18626 = vst [vmem:[#allocation51_spill] sm:$0xff] %v16807_v34  ;;  %12571 = vmatpush3.bf16.xpose.msra.mxu0 %v7593_v36  ;;  %v7692_v2 = vpop.permute.xlu0 %7691  ;;  %v16809_v16 = vpop.f32.mrb[224].mxu1  ;;  %12566 = vmatprep.mubr.msk.bf16.mxu1 %vm13882_vm0, %v18351_v17  ;;  %v7749_v26 = vsel %vm3108_vm1, %v7744_v29, 0 }
 0x69d   : > { %18627 = vst [vmem:[#allocation71_spill] sm:$0xff] %v16809_v16  ;;  %v12340_v55 = vpop.f32.mrb[225].mxu1  ;;  %v12346_v51 = vpop.f32.mrb[189].mxu0  ;;  %12572 = vmatprep.mubr.msk.bf16.mxu0 %vm13882_vm0, %v18351_v17  ;;  %12576 = vmatprep.subr.bf16.mxu1 %v18351_v17  ;;  %v7697_v61 = vsel %vm3108_vm1, %v7692_v2, 0 }
 0x69e   : > { %v5700_v40 = vpop.f32.mrb[226].mxu1  ;;  %v5746_v4 = vpop.f32.mrb[190].mxu0  ;;  %12582 = vmatprep.subr.bf16.mxu0 %v18351_v17 }
 0x69f   : > { %v12347_v32 = vpop.f32.mrb[191].mxu0  ;;  %v7741_v13 = vpop.permute.xlu1 %7740 }
 0x6a0   : > { %v7689_v63 = vpop.permute.xlu0 %7688  ;;  %v12341_v7 = vpop.f32.mrb[227].mxu1 }
 0x6a2   : > { %12567 = vmatmul.mubr.msk.bf16.vlgmr.msra.gmra.mrb[44].mxu1 %vm3108_vm1, %v7533_v60 }
 0x6a3   : > { %v7848_v6 = vpop.permute.xlu1 %7847  ;;  %12573 = vmatmul.mubr.msk.bf16.vlgmr.msra.gmra.mrb[8].mxu0 %vm3108_vm1, %v7585_v25  ;;  %12577 = vmatpush3.bf16.xpose.msra.mxu1 %v7645_v49  ;;  %v16821_v31 = vpop.f32.mrb[192].mxu0 }
 0x6a4   : > { %18628 = vst [vmem:[#allocation74_spill] sm:$0xff] %v16821_v31  ;;  %12583 = vmatpush3.bf16.xpose.msra.mxu0 %v7697_v61  ;;  %v7796_v23 = vpop.permute.xlu0 %7795  ;;  %v16823_v1 = vpop.f32.mrb[228].mxu1  ;;  %12578 = vmatprep.mubr.msk.bf16.mxu1 %vm13882_vm0, %v18351_v17  ;;  %v7853_v57 = vsel %vm3108_vm1, %v7848_v6, 0 }
 0x6a5   : > { %18629 = vst [vmem:[#allocation48_spill] sm:$0xff] %v16823_v1  ;;  %v12352_v42 = vpop.f32.mrb[229].mxu1  ;;  %v12358_v41 = vpop.f32.mrb[193].mxu0  ;;  %12584 = vmatprep.mubr.msk.bf16.mxu0 %vm13882_vm0, %v18351_v17  ;;  %12588 = vmatprep.subr.bf16.mxu1 %v18351_v17  ;;  %v7801_v9 = vsel %vm3108_vm1, %v7796_v23, 0 }
 0x6a6   : > { %v5792_v58 = vpop.f32.mrb[230].mxu1  ;;  %v5838_v3 = vpop.f32.mrb[194].mxu0  ;;  %12594 = vmatprep.subr.bf16.mxu0 %v18351_v17 }
 0x6a7   : > { %v12359_v46 = vpop.f32.mrb[195].mxu0  ;;  %v7845_v56 = vpop.permute.xlu1 %7844 }
 0x6a8   : > { %v7793_v60 = vpop.permute.xlu0 %7792  ;;  %v12353_v35 = vpop.f32.mrb[231].mxu1 }
 0x6aa   : > { %12579 = vmatmul.mubr.msk.bf16.vlgmr.msra.gmra.mrb[48].mxu1 %vm3108_vm1, %v7637_v54 }
 0x6ab   : > { %v7952_v52 = vpop.permute.xlu1 %7951  ;;  %12585 = vmatmul.mubr.msk.bf16.vlgmr.msra.gmra.mrb[12].mxu0 %vm3108_vm1, %v7689_v63  ;;  %12589 = vmatpush3.bf16.xpose.msra.mxu1 %v7749_v26  ;;  %v16835_v27 = vpop.f32.mrb[196].mxu0 }
 0x6ac   : > { %18630 = vst [vmem:[#allocation94_spill] sm:$0xff] %v16835_v27  ;;  %12595 = vmatpush3.bf16.xpose.msra.mxu0 %v7801_v9  ;;  %v7900_v21 = vpop.permute.xlu0 %7899  ;;  %v16837_v37 = vpop.f32.mrb[232].mxu1  ;;  %12590 = vmatprep.mubr.msk.bf16.mxu1 %vm13882_vm0, %v18351_v17  ;;  %v7957_v61 = vsel %vm3108_vm1, %v7952_v52, 0 }
 0x6ad   : > { %18631 = vst [vmem:[#allocation87_spill] sm:$0xff] %v16837_v37  ;;  %v12364_v22 = vpop.f32.mrb[233].mxu1  ;;  %v12370_v12 = vpop.f32.mrb[197].mxu0  ;;  %12596 = vmatprep.mubr.msk.bf16.mxu0 %vm13882_vm0, %v18351_v17  ;;  %12600 = vmatprep.subr.bf16.mxu1 %v18351_v17  ;;  %v7905_v29 = vsel %vm3108_vm1, %v7900_v21, 0 }
 0x6ae   : > { %v5884_v45 = vpop.f32.mrb[234].mxu1  ;;  %v5930_v30 = vpop.f32.mrb[198].mxu0  ;;  %12606 = vmatprep.subr.bf16.mxu0 %v18351_v17 }
 0x6af   : > { %v12371_v54 = vpop.f32.mrb[199].mxu0  ;;  %v7949_v25 = vpop.permute.xlu1 %7948 }
 0x6b0   : > { %v12365_v20 = vpop.f32.mrb[235].mxu1  ;;  %v7897_v36 = vpop.permute.xlu0 %7896 }
 0x6b2   : > { %12591 = vmatmul.mubr.msk.bf16.vlgmr.msra.gmra.mrb[52].mxu1 %vm3108_vm1, %v7741_v13 }
 0x6b3   : > { %12597 = vmatmul.mubr.msk.bf16.vlgmr.msra.gmra.mrb[16].mxu0 %vm3108_vm1, %v7793_v60  ;;  %12601 = vmatpush3.bf16.xpose.msra.mxu1 %v7853_v57  ;;  %v16849_v2 = vpop.f32.mrb[200].mxu0  ;;  %v8056_v55 = vpop.permute.xlu1 %8055 }
 0x6b4   : > { %18632 = vst [vmem:[#allocation73_spill] sm:$0xff] %v16849_v2  ;;  %12607 = vmatpush3.bf16.xpose.msra.mxu0 %v7905_v29  ;;  %v16851_v51 = vpop.f32.mrb[236].mxu1  ;;  %12602 = vmatprep.mubr.msk.bf16.mxu1 %vm13882_vm0, %v18351_v17  ;;  %v12382_v4 = vpop.f32.mrb[201].mxu0  ;;  %v8061_v60 = vsel %vm3108_vm1, %v8056_v55, 0 }
 0x6b5   : > { %18633 = vst [vmem:[#allocation49_spill] sm:$0xff] %v16851_v51  ;;  %v12376_v40 = vpop.f32.mrb[237].mxu1  ;;  %12608 = vmatprep.mubr.msk.bf16.mxu0 %vm13882_vm0, %v18351_v17  ;;  %12612 = vmatprep.subr.bf16.mxu1 %v18351_v17  ;;  %v6022_v13 = vpop.f32.mrb[202].mxu0 }
 0x6b6   : > { %v5976_v32 = vpop.f32.mrb[238].mxu1  ;;  %12618 = vmatprep.subr.bf16.mxu0 %v18351_v17  ;;  %v12383_v63 = vpop.f32.mrb[203].mxu0 }
 0x6b7   : > { %v8004_v7 = vpop.permute.xlu0 %8003  ;;  %v12377_v49 = vpop.f32.mrb[239].mxu1 }
 0x6b8   : > { %v8053_v6 = vpop.permute.xlu1 %8052  ;;  %v8009_v23 = vsel %vm3108_vm1, %v8004_v7, 0 }
 0x6ba   : > { %12603 = vmatmul.mubr.msk.bf16.vlgmr.msra.gmra.mrb[56].mxu1 %vm3108_vm1, %v7845_v56 }
 0x6bb   : > { %12609 = vmatmul.mubr.msk.bf16.vlgmr.msra.gmra.mrb[20].mxu0 %vm3108_vm1, %v7897_v36  ;;  %12613 = vmatpush3.bf16.xpose.msra.mxu1 %v7957_v61  ;;  %v8001_v56 = vpop.permute.xlu0 %8000 }
 0x6bc   : > { %12619 = vmatpush3.bf16.xpose.msra.mxu0 %v8009_v23  ;;  %v16863_v42 = vpop.f32.mrb[240].mxu1  ;;  %12614 = vmatprep.mubr.msk.bf16.mxu1 %vm13882_vm0, %v18351_v17  ;;  %v8489_v46 = vpop.permute.xlu1 %8488 }
 0x6bd   : > { %18634 = vst [vmem:[#allocation81_spill] sm:$0xff] %v16863_v42  ;;  %v12388_v41 = vpop.f32.mrb[241].mxu1  ;;  %12620 = vmatprep.mubr.msk.bf16.mxu0 %vm13882_vm0, %v18351_v17  ;;  %12624 = vmatprep.subr.bf16.mxu1 %v18351_v17  ;;  %v8494_v35 = vsel %vm4969_vm2, %v8489_v46, 0 }
 0x6be   : > { %v6068_v58 = vpop.f32.mrb[242].mxu1  ;;  %12630 = vmatprep.subr.bf16.mxu0 %v18351_v17 }
 0x6bf   : > { %v12389_v3 = vpop.f32.mrb[243].mxu1  ;;  %v8538_v26 = vpop.permute.xlu0 %8537 }
 0x6c0   : > { %v8543_v9 = vsel %vm4969_vm2, %v8538_v26, 0 }
 0x6c2   : > { %12615 = vmatmul.mubr.msk.bf16.vlgmr.msra.gmra.mrb[60].mxu1 %vm3108_vm1, %v7949_v25 }
 0x6c3   : > { %12621 = vmatmul.mubr.msk.bf16.vlgmr.msra.gmra.mrb[24].mxu0 %vm3108_vm1, %v8001_v56  ;;  %12625 = vmatpush3.bf16.xpose.msra.mxu1 %v8061_v60 }
 0x6c4   : > { %12631 = vmatpush3.bf16.msra.mxu0 %v8494_v35  ;;  %12626 = vmatprep.mubr.msk.bf16.mxu1 %vm13882_vm0, %v18351_v17 }
 0x6c5   : > { %12636 = vmatprep.subr.bf16.mxu1 %v18351_v17  ;;  %12632 = vmatprep.mubr.msk.bf16.mxu0 %vm13882_vm0, %v18351_v17 }
 0x6c6   : > { %12642 = vmatprep.subr.bf16.mxu0 %v18351_v17 }
 0x6ca   : > { %12627 = vmatmul.mubr.msk.bf16.vlgmr.msra.gmra.mrb[64].mxu1 %vm3108_vm1, %v8053_v6 }
 0x6cb   : > { %12637 = vmatpush3.bf16.msra.mxu1 %v8543_v9  ;;  %12638 = vmatprep.mubr.msk.bf16.mxu1 %vm13882_vm0, %v18351_v17 }
 0x6cc   : > { %12648 = vmatprep.subr.bf16.mxu1 %v18351_v17 }
 0x6e4   : > { %v16886_v52 = vpop.f32.mrb[204].mxu0 }
 0x6e5   : > { %18635 = vst [vmem:[#allocation66_spill] sm:$0xff] %v16886_v52  ;;  %v12394_v21 = vpop.f32.mrb[205].mxu0 }
 0x6e6   : > { %v6114_v22 = vpop.f32.mrb[206].mxu0 }
 0x6e7   : > { %v12395_v12 = vpop.f32.mrb[207].mxu0 }
 0x6ec   : > { %v16888_v45 = vpop.f32.mrb[244].mxu1 }
 0x6ed   : > { %18636 = vst [vmem:[#allocation97_spill] sm:$0xff] %v16888_v45  ;;  %v12400_v30 = vpop.f32.mrb[245].mxu1 }
 0x6ee   : > { %v6160_v54 = vpop.f32.mrb[246].mxu1 }
 0x6ef   : > { %v12401_v25 = vpop.f32.mrb[247].mxu1 }
 0x6f4   : > { %v16890_v20 = vpop.f32.mrb[208].mxu0 }
 0x6f5   : > { %18637 = vst [vmem:[#allocation78_spill] sm:$0xff] %v16890_v20  ;;  %v12406_v57 = vpop.f32.mrb[209].mxu0 }
 0x6f6   : > { %v6206_v36 = vpop.f32.mrb[210].mxu0 }
 0x6f7   : > { %v12407_v29 = vpop.f32.mrb[211].mxu0 }
 0x6fc   : > { %v16892_v55 = vpop.f32.mrb[248].mxu1 }
 0x6fd   : > { %18638 = vst [vmem:[#allocation45_spill] sm:$0xff] %v16892_v55  ;;  %v12412_v40 = vpop.f32.mrb[249].mxu1 }
 0x6fe   : > { %v6252_v4 = vpop.f32.mrb[250].mxu1 }
 0x6ff   : > { %v12413_v32 = vpop.f32.mrb[251].mxu1 }
 0x704   : > { %v16894_v13 = vpop.f32.mrb[212].mxu0 }
 0x705   : > { %18639 = vst [vmem:[#allocation88_spill] sm:$0xff] %v16894_v13  ;;  %v12418_v63 = vpop.f32.mrb[213].mxu0 }
 0x706   : > { %v6298_v7 = vpop.f32.mrb[214].mxu0 }
 0x707   : > { %v12419_v49 = vpop.f32.mrb[215].mxu0 }
 0x70c   : > { %v16896_v61 = vpop.f32.mrb[252].mxu1 }
 0x70d   : > { %18640 = vst [vmem:[#allocation69_spill] sm:$0xff] %v16896_v61  ;;  %v12424_v6 = vpop.f32.mrb[253].mxu1 }
 0x70e   : > { %v6344_v23 = vpop.f32.mrb[254].mxu1 }
 0x70f   : > { %v12425_v41 = vpop.f32.mrb[255].mxu1 }
 0x714   : > { %v16898_v58 = vpop.f32.mrb[216].mxu0 }
 0x715   : > { %18641 = vst [vmem:[#allocation85_spill] sm:$0xff] %v16898_v58  ;;  %v12430_v3 = vpop.f32.mrb[217].mxu0 }
 0x716   : > { %v6390_v46 = vpop.f32.mrb[218].mxu0 }
 0x717   : > { %v12431_v56 = vpop.f32.mrb[219].mxu0 }
 0x71c   : > { %v16900_v60 = vpop.f32.mrb[220].mxu0 }
 0x71d   : > { %v16902_v35 = vpop.f32.mrb[0].mxu1  ;;  %v12442_v26 = vpop.f32.mrb[221].mxu0  ;;  %v8103_v9 = vsel %vm4581_vm3, %v16900_v60, -inf }
 0x71e   : > { %18642 = vst [vmem:[#allocation46_spill] sm:$0xff] %v16902_v35  ;;  %v12436_v21 = vpop.f32.mrb[1].mxu1  ;;  %v6488_v22 = vpop.f32.mrb[222].mxu0  ;;  %8104 = vmax.xlane.f32.xlu0 %v8103_v9 }
 0x71f   : > { %v6436_v12 = vpop.f32.mrb[2].mxu1  ;;  %v12443_v30 = vpop.f32.mrb[223].mxu0 }
 0x720   : > { %v12437_v54 = vpop.f32.mrb[3].mxu1 }
 0x725   : > { %v16906_v25 = vpop.f32.mrb[4].mxu1 }
 0x726   : > { %v16908_v57 = vpop.f32.mrb[224].mxu0  ;;  %v12448_v36 = vpop.f32.mrb[5].mxu1  ;;  %v8106_v29 = vsel %vm4581_vm3, %v16906_v25, -inf }
 0x727   : > { %v12454_v40 = vpop.f32.mrb[225].mxu0  ;;  %v8109_v4 = vsel %vm4581_vm3, %v16908_v57, -inf  ;;  %8107 = vmax.xlane.f32.xlu1 %v8106_v29  ;;  %v6540_v32 = vpop.f32.mrb[6].mxu1 }
 0x728   : > { %8110 = vmax.xlane.f32.xlu0 %v8109_v4  ;;  %v6592_v63 = vpop.f32.mrb[226].mxu0  ;;  %v12449_v7 = vpop.f32.mrb[7].mxu1 }
 0x729   : > { %v12455_v49 = vpop.f32.mrb[227].mxu0 }
 0x72d   : > { %v16914_v6 = vpop.f32.mrb[8].mxu1 }
 0x72e   : > { %v16916_v23 = vpop.f32.mrb[228].mxu0  ;;  %v12460_v41 = vpop.f32.mrb[9].mxu1  ;;  %v8112_v3 = vsel %vm4581_vm3, %v16914_v6, -inf }
 0x72f   : > { %v12466_v46 = vpop.f32.mrb[229].mxu0  ;;  %v8115_v56 = vsel %vm4581_vm3, %v16916_v23, -inf  ;;  %8113 = vmax.xlane.f32.xlu0 %v8112_v3  ;;  %v6644_v26 = vpop.f32.mrb[10].mxu1 }
 0x730   : > { %v6696_v9 = vpop.f32.mrb[230].mxu0  ;;  %8116 = vmax.xlane.f32.xlu1 %v8115_v56  ;;  %v12461_v21 = vpop.f32.mrb[11].mxu1 }
 0x731   : > { %v12467_v22 = vpop.f32.mrb[231].mxu0 }
 0x735   : > { %v16922_v12 = vpop.f32.mrb[12].mxu1 }
 0x736   : > { %v16924_v30 = vpop.f32.mrb[232].mxu0  ;;  %v12472_v54 = vpop.f32.mrb[13].mxu1  ;;  %v8118_v36 = vsel %vm4581_vm3, %v16922_v12, -inf }
 0x737   : > { %v12478_v29 = vpop.f32.mrb[233].mxu0  ;;  %v8121_v40 = vsel %vm4581_vm3, %v16924_v30, -inf  ;;  %8119 = vmax.xlane.f32.xlu0 %v8118_v36  ;;  %v6748_v4 = vpop.f32.mrb[14].mxu1 }
 0x738   : > { %v6800_v32 = vpop.f32.mrb[234].mxu0  ;;  %8122 = vmax.xlane.f32.xlu1 %v8121_v40  ;;  %v12473_v63 = vpop.f32.mrb[15].mxu1 }
 0x739   : > { %v12479_v7 = vpop.f32.mrb[235].mxu0 }
 0x73d   : > { %v16930_v49 = vpop.f32.mrb[16].mxu1 }
 0x73e   : > { %v16932_v41 = vpop.f32.mrb[236].mxu0  ;;  %v12484_v3 = vpop.f32.mrb[17].mxu1  ;;  %v8124_v46 = vsel %vm4581_vm3, %v16930_v49, -inf }
 0x73f   : > { %v12490_v56 = vpop.f32.mrb[237].mxu0  ;;  %v8127_v26 = vsel %vm4581_vm3, %v16932_v41, -inf  ;;  %8125 = vmax.xlane.f32.xlu0 %v8124_v46  ;;  %v6852_v9 = vpop.f32.mrb[18].mxu1 }
 0x740   : > { %v6904_v21 = vpop.f32.mrb[238].mxu0  ;;  %8128 = vmax.xlane.f32.xlu1 %v8127_v26  ;;  %v12485_v22 = vpop.f32.mrb[19].mxu1 }
 0x741   : > { %v12491_v54 = vpop.f32.mrb[239].mxu0 }
 0x745   : > { %v16938_v36 = vpop.f32.mrb[20].mxu1 }
 0x746   : > { %v16940_v29 = vpop.f32.mrb[240].mxu0  ;;  %v12496_v40 = vpop.f32.mrb[21].mxu1  ;;  %v8130_v4 = vsel %vm4581_vm3, %v16938_v36, -inf }
 0x747   : > { %v12502_v32 = vpop.f32.mrb[241].mxu0  ;;  %v8133_v63 = vsel %vm4581_vm3, %v16940_v29, -inf  ;;  %8131 = vmax.xlane.f32.xlu0 %v8130_v4  ;;  %v6956_v7 = vpop.f32.mrb[22].mxu1 }
 0x748   : > { %v7008_v3 = vpop.f32.mrb[242].mxu0  ;;  %8134 = vmax.xlane.f32.xlu1 %v8133_v63  ;;  %v12497_v46 = vpop.f32.mrb[23].mxu1 }
 0x749   : > { %v12503_v56 = vpop.f32.mrb[243].mxu0 }
 0x74d   : > { %v16946_v26 = vpop.f32.mrb[24].mxu1 }
 0x74e   : > { %v16948_v9 = vpop.f32.mrb[244].mxu0  ;;  %v12508_v21 = vpop.f32.mrb[25].mxu1  ;;  %v8136_v22 = vsel %vm4581_vm3, %v16946_v26, -inf }
 0x74f   : > { %v12514_v54 = vpop.f32.mrb[245].mxu0  ;;  %v8139_v40 = vsel %vm4581_vm3, %v16948_v9, -inf  ;;  %8137 = vmax.xlane.f32.xlu0 %v8136_v22  ;;  %v7060_v32 = vpop.f32.mrb[26].mxu1 }
 0x750   : > { %v7112_v4 = vpop.f32.mrb[246].mxu0  ;;  %8140 = vmax.xlane.f32.xlu1 %v8139_v40  ;;  %v12509_v7 = vpop.f32.mrb[27].mxu1 }
 0x751   : > { %v12515_v63 = vpop.f32.mrb[247].mxu0  ;;  %v16962_v4 = vpop.permute.xlu1 %8586 }
 0x752   : > { %v16964_v7 = vpop.permute.xlu0 %8635 }
 0x755   : > { %v16954_v3 = vpop.f32.mrb[28].mxu1 }
 0x756   : > { %v16956_v46 = vpop.f32.mrb[248].mxu0  ;;  %v12520_v56 = vpop.f32.mrb[29].mxu1  ;;  %v8142_v21 = vsel %vm4581_vm3, %v16954_v3, -inf }
 0x757   : > { %v12526_v58 = vpop.f32.mrb[249].mxu0  ;;  %v8145_v54 = vsel %vm4581_vm3, %v16956_v46, -inf  ;;  %8143 = vmax.xlane.f32.xlu0 %v8142_v21  ;;  %v7164_v35 = vpop.f32.mrb[30].mxu1 }
 0x758   : > { %v7216_v22 = vpop.f32.mrb[250].mxu0  ;;  %8146 = vmax.xlane.f32.xlu1 %v8145_v54  ;;  %v12521_v32 = vpop.f32.mrb[31].mxu1 }
 0x759   : > { %v12527_v40 = vpop.f32.mrb[251].mxu0  ;;  %v16976_v20 = vpop.permute.xlu0 %8733 }
 0x75a   : > { %v16974_v40 = vpop.permute.xlu1 %8684 }
 0x75d   : > { %v16966_v63 = vpop.f32.mrb[32].mxu1  ;;  %v16988_v2 = vpop.permute.xlu0 %8831 }
 0x75e   : > { %v16968_v56 = vpop.f32.mrb[252].mxu0  ;;  %v12532_v61 = vpop.f32.mrb[33].mxu1  ;;  %v8148_v58 = vsel %vm4581_vm3, %v16966_v63, -inf }
 0x75f   : > { %v12538_v13 = vpop.f32.mrb[253].mxu0  ;;  %v8151_v35 = vsel %vm4581_vm3, %v16968_v56, -inf  ;;  %8149 = vmax.xlane.f32.xlu0 %v8148_v58  ;;  %v7268_v21 = vpop.f32.mrb[34].mxu1 }
 0x760   : > { %v7320_v54 = vpop.f32.mrb[254].mxu0  ;;  %8152 = vmax.xlane.f32.xlu1 %v8151_v35  ;;  %v12533_v22 = vpop.f32.mrb[35].mxu1 }
 0x761   : > { %v12539_v32 = vpop.f32.mrb[255].mxu0  ;;  %v17000_v31 = vpop.permute.xlu0 %8929 }
 0x762   : > { %v16986_v32 = vpop.permute.xlu1 %8782 }
 0x765   : > { %v16978_v55 = vpop.f32.mrb[36].mxu1  ;;  %v17012_v44 = vpop.permute.xlu0 %9027 }
 0x766   : > { %v16980_v61 = vpop.f32.mrb[0].mxu0  ;;  %v12544_v45 = vpop.f32.mrb[37].mxu1  ;;  %v8154_v13 = vsel %vm4581_vm3, %v16978_v55, -inf }
 0x767   : > { %v12550_v52 = vpop.f32.mrb[1].mxu0  ;;  %v8157_v58 = vsel %vm4581_vm3, %v16980_v61, -inf  ;;  %8155 = vmax.xlane.f32.xlu0 %v8154_v13  ;;  %v7372_v35 = vpop.f32.mrb[38].mxu1 }
 0x768   : > { %v7424_v21 = vpop.f32.mrb[2].mxu0  ;;  %8158 = vmax.xlane.f32.xlu1 %v8157_v58  ;;  %v12545_v54 = vpop.f32.mrb[39].mxu1 }
 0x769   : > { %v12551_v22 = vpop.f32.mrb[3].mxu0  ;;  %v17024_v15 = vpop.permute.xlu0 %9125 }
 0x76a   : > { %v16998_v22 = vpop.permute.xlu1 %8880  ;;  %18643 = vst [vmem:[#allocation96_spill] sm:$0xff] %v17024_v15 }
 0x76d   : > { %v16990_v42 = vpop.f32.mrb[40].mxu1  ;;  %v17036_v59 = vpop.permute.xlu0 %9223 }
 0x76e   : > { %v16992_v45 = vpop.f32.mrb[4].mxu0  ;;  %v12556_v51 = vpop.f32.mrb[41].mxu1  ;;  %v8160_v52 = vsel %vm4581_vm3, %v16990_v42, -inf  ;;  %18645 = vst [vmem:[#allocation93_spill] sm:$0xff] %v17036_v59 }
 0x76f   : > { %v12562_v27 = vpop.f32.mrb[5].mxu0  ;;  %v8163_v13 = vsel %vm4581_vm3, %v16992_v45, -inf  ;;  %8161 = vmax.xlane.f32.xlu0 %v8160_v52  ;;  %v7476_v58 = vpop.f32.mrb[42].mxu1 }
 0x770   : > { %v7528_v35 = vpop.f32.mrb[6].mxu0  ;;  %8164 = vmax.xlane.f32.xlu1 %v8163_v13  ;;  %v12557_v21 = vpop.f32.mrb[43].mxu1 }
 0x771   : > { %v12563_v54 = vpop.f32.mrb[7].mxu0  ;;  %v17048_v33 = vpop.permute.xlu0 %9321 }
 0x772   : > { %v17010_v54 = vpop.permute.xlu1 %8978  ;;  %18647 = vst [vmem:[#allocation104_spill] sm:$0xff] %v17048_v33 }
 0x775   : > { %v17002_v37 = vpop.f32.mrb[44].mxu1 }
 0x776   : > { %v17004_v51 = vpop.f32.mrb[8].mxu0  ;;  %v12568_v1 = vpop.f32.mrb[45].mxu1  ;;  %v8166_v27 = vsel %vm4581_vm3, %v17002_v37, -inf }
 0x777   : > { %v12574_v34 = vpop.f32.mrb[9].mxu0  ;;  %v8169_v52 = vsel %vm4581_vm3, %v17004_v51, -inf  ;;  %8167 = vmax.xlane.f32.xlu0 %v8166_v27  ;;  %v7580_v13 = vpop.f32.mrb[46].mxu1 }
 0x778   : > { %v7632_v58 = vpop.f32.mrb[10].mxu0  ;;  %8170 = vmax.xlane.f32.xlu1 %v8169_v52  ;;  %v12569_v35 = vpop.f32.mrb[47].mxu1 }
 0x779   : > { %v12575_v21 = vpop.f32.mrb[11].mxu0 }
 0x77a   : > { %v17022_v21 = vpop.permute.xlu1 %9076 }
 0x77d   : > { %v17014_v16 = vpop.f32.mrb[48].mxu1 }
 0x77e   : > { %v17016_v1 = vpop.f32.mrb[12].mxu0  ;;  %v12580_v18 = vpop.f32.mrb[49].mxu1  ;;  %v8172_v34 = vsel %vm4581_vm3, %v17014_v16, -inf }
 0x77f   : > { %v12586_v10 = vpop.f32.mrb[13].mxu0  ;;  %v8175_v27 = vsel %vm4581_vm3, %v17016_v1, -inf  ;;  %8173 = vmax.xlane.f32.xlu0 %v8172_v34  ;;  %v7684_v52 = vpop.f32.mrb[50].mxu1 }
 0x780   : > { %v7736_v13 = vpop.f32.mrb[14].mxu0  ;;  %8176 = vmax.xlane.f32.xlu1 %v8175_v27  ;;  %v12581_v58 = vpop.f32.mrb[51].mxu1 }
 0x781   : > { %v12587_v35 = vpop.f32.mrb[15].mxu0 }
 0x782   : > { %v17034_v35 = vpop.permute.xlu1 %9174 }
 0x783   : > { %18644 = vst [vmem:[#allocation70_spill] sm:$0xff] %v17034_v35 }
 0x785   : > { %v17026_v28 = vpop.f32.mrb[52].mxu1 }
 0x786   : > { %v17028_v18 = vpop.f32.mrb[16].mxu0  ;;  %v12592_v24 = vpop.f32.mrb[53].mxu1  ;;  %v8178_v10 = vsel %vm4581_vm3, %v17026_v28, -inf }
 0x787   : > { %v12598_v53 = vpop.f32.mrb[17].mxu0  ;;  %v8181_v34 = vsel %vm4581_vm3, %v17028_v18, -inf  ;;  %8179 = vmax.xlane.f32.xlu0 %v8178_v10  ;;  %v7788_v27 = vpop.f32.mrb[54].mxu1 }
 0x788   : > { %v7840_v52 = vpop.f32.mrb[18].mxu0  ;;  %8182 = vmax.xlane.f32.xlu1 %v8181_v34  ;;  %v12593_v13 = vpop.f32.mrb[55].mxu1 }
 0x789   : > { %v12599_v58 = vpop.f32.mrb[19].mxu0 }
 0x78a   : > { %v17046_v58 = vpop.permute.xlu1 %9272 }
 0x78b   : > { %18646 = vst [vmem:[#allocation52_spill] sm:$0xff] %v17046_v58 }
 0x78d   : > { %v17038_v0 = vpop.f32.mrb[56].mxu1 }
 0x78e   : > { %v17040_v24 = vpop.f32.mrb[20].mxu0  ;;  %v12604_v11 = vpop.f32.mrb[57].mxu1  ;;  %v8184_v53 = vsel %vm4581_vm3, %v17038_v0, -inf }
 0x78f   : > { %v12610_v43 = vpop.f32.mrb[21].mxu0  ;;  %v8187_v10 = vsel %vm4581_vm3, %v17040_v24, -inf  ;;  %8185 = vmax.xlane.f32.xlu0 %v8184_v53  ;;  %v7892_v34 = vpop.f32.mrb[58].mxu1 }
 0x790   : > { %v7944_v27 = vpop.f32.mrb[22].mxu0  ;;  %8188 = vmax.xlane.f32.xlu1 %v8187_v10  ;;  %v12605_v52 = vpop.f32.mrb[59].mxu1 }
 0x791   : > { %v12611_v13 = vpop.f32.mrb[23].mxu0  ;;  %v17062_v58 = vpop.permute.xlu1 %9370 }
 0x792   : > { %v17058_v13 = vpop.permute.xlu0 %9419  ;;  %18649 = vst [vmem:[#allocation101_spill] sm:$0xff] %v17062_v58 }
 0x793   : > { %18648 = vst [vmem:[#allocation50_spill] sm:$0xff] %v17058_v13 }
 0x795   : > { %v17050_v50 = vpop.f32.mrb[60].mxu1 }
 0x796   : > { %v17052_v11 = vpop.f32.mrb[24].mxu0  ;;  %v12616_v5 = vpop.f32.mrb[61].mxu1  ;;  %v8190_v43 = vsel %vm4581_vm3, %v17050_v50, -inf }
 0x797   : > { %v12622_v48 = vpop.f32.mrb[25].mxu0  ;;  %v8193_v53 = vsel %vm4581_vm3, %v17052_v11, -inf  ;;  %8191 = vmax.xlane.f32.xlu0 %v8190_v43  ;;  %v7996_v10 = vpop.f32.mrb[62].mxu1 }
 0x798   : > { %v8048_v34 = vpop.f32.mrb[26].mxu0  ;;  %8194 = vmax.xlane.f32.xlu1 %v8193_v53  ;;  %v12617_v27 = vpop.f32.mrb[63].mxu1 }
 0x799   : > { %v12623_v52 = vpop.f32.mrb[27].mxu0  ;;  %v17066_v15 = vpop.permute.xlu0 %9517 }
 0x79a   : > { %18650 = vst [vmem:[#allocation75_spill] sm:$0xff] %v17066_v15  ;;  %v17068_v43 = vpop.permute.xlu1 %9468 }
 0x79b   : > { %18651 = vst [vmem:[#allocation109_spill] sm:$0xff] %v17068_v43 }
 0x79d   : > { %v17060_v33 = vpop.f32.mrb[64].mxu1  ;;  %v17070_v53 = vpop.permute.xlu0 %9615 }
 0x79e   : > { %v12628_v5 = vpop.f32.mrb[65].mxu1  ;;  %v8196_v59 = vsel %vm4581_vm3, %v17060_v33, -inf  ;;  %18652 = vst [vmem:[#allocation76_spill] sm:$0xff] %v17070_v53  ;;  %v17072_v10 = vpop.permute.xlu1 %9566 }
 0x79f   : > { %8197 = vmax.xlane.f32.xlu0 %v8196_v59  ;;  %v8100_v48 = vpop.f32.mrb[66].mxu1 }
 0x7a0   : > { %v12629_v35 = vpop.f32.mrb[67].mxu1 }
 0x7a2   : > { %v17075_v13 = vpop.permute.xlu1 %9664 }
 0x7a3   : > { %18653 = vst [vmem:[#allocation108_spill] sm:$0xff] %v17075_v13 }
 0x7ab   : > { %v8105_v34 = vpop.xlane.xlu0 %8104 }
 0x7ac   : > { %v8199_v27 = vsub.f32 %v16900_v60, %v8105_v34 }
 0x7ae   : > { %v8231_v52 = vmul.f32 1.442695, %v8199_v27 }
 0x7b0   : > { %13460 = vpow2.f32 %v8231_v52 }
 0x7b4   : > { %v8108_v5 = vpop.xlane.xlu1 %8107 }
 0x7b5   : > { %v8111_v58 = vpop.xlane.xlu0 %8110  ;;  %v8200_v59 = vsub.f32 %v16906_v25, %v8108_v5 }
 0x7b6   : > { %v8201_v35 = vsub.f32 %v16908_v57, %v8111_v58 }
 0x7b7   : > { %v8233_v48 = vmul.f32 1.442695, %v8200_v59 }
 0x7b8   : > { %v8235_v15 = vmul.f32 1.442695, %v8201_v35 }
 0x7b9   : > { %13462 = vpow2.f32 %v8233_v48 }
 0x7ba   : > { %v17079_v43 = vpop.eup %13460  ;;  %13464 = vpow2.f32 %v8235_v15 }
 0x7bb   : > { %v8295_v53 = vsel %vm4581_vm3, %v17079_v43, 0.0 }
 0x7bc   : > { %v8114_v60 = vpop.xlane.xlu0 %8113  ;;  %8296 = vadd.xlane.f32.xlu1 %v8295_v53 }
 0x7bd   : > { %v8202_v34 = vsub.f32 %v16914_v6, %v8114_v60  ;;  %v8117_v6 = vpop.xlane.xlu1 %8116 }
 0x7be   : > { %v8203_v5 = vsub.f32 %v16916_v23, %v8117_v6 }
 0x7bf   : > { %v8237_v27 = vmul.f32 1.442695, %v8202_v34 }
 0x7c0   : > { %v8239_v60 = vmul.f32 1.442695, %v8203_v5 }
 0x7c1   : > { %13466 = vpow2.f32 %v8237_v27 }
 0x7c2   : > { %13468 = vpow2.f32 %v8239_v60 }
 0x7c3   : > { %v17084_v52 = vpop.eup %13462 }
 0x7c4   : > { %v17086_v25 = vpop.eup %13464  ;;  %v8298_v57 = vsel %vm4581_vm3, %v17084_v52, 0.0  ;;  %v8120_v59 = vpop.xlane.xlu0 %8119 }
 0x7c5   : > { %v8301_v58 = vsel %vm4581_vm3, %v17086_v25, 0.0  ;;  %8299 = vadd.xlane.f32.xlu0 %v8298_v57  ;;  %v8123_v35 = vpop.xlane.xlu1 %8122  ;;  %v8204_v48 = vsub.f32 %v16922_v12, %v8120_v59 }
 0x7c6   : > { %8302 = vadd.xlane.f32.xlu1 %v8301_v58  ;;  %v8205_v34 = vsub.f32 %v16924_v30, %v8123_v35 }
 0x7c7   : > { %v8241_v58 = vmul.f32 1.442695, %v8204_v48 }
 0x7c9   : > { %13470 = vpow2.f32 %v8241_v58 }
 0x7cb   : > { %v17092_v15 = vpop.eup %13466 }
 0x7cc   : > { %v8304_v53 = vsel %vm4581_vm3, %v17092_v15, 0.0  ;;  %v8126_v27 = vpop.xlane.xlu0 %8125 }
 0x7cd   : > { %8305 = vadd.xlane.f32.xlu0 %v8304_v53  ;;  %v8129_v57 = vpop.xlane.xlu1 %8128 }
 0x7ce   : > { %v8207_v53 = vsub.f32 %v16932_v41, %v8129_v57 }
 0x7d0   : > { %v8247_v12 = vmul.f32 1.442695, %v8207_v53 }
 0x7d5   : > { %v8135_v13 = vpop.xlane.xlu1 %8134 }
 0x7d6   : > { %v8209_v5 = vsub.f32 %v16940_v29, %v8135_v13 }
 0x7d7   : > { %9762 = vrot.lane.b32.xlu1 %v16506_v39, %s13883_s4  ;;  %v8206_v39 = vsub.f32 %v16930_v49, %v8126_v27  ;;  %v17111_v27 = vpop.eup %13468 }
 0x7d8   : > { %v8251_v48 = vmul.f32 1.442695, %v8209_v5 }
 0x7d9   : > { %v8245_v23 = vmul.f32 1.442695, %v8206_v39  ;;  %v17115_v39 = vpop.eup %13470 }
 0x7db   : > { %9811 = vrot.lane.b32.xlu1 %v16525_v8, %s13883_s4  ;;  %v8243_v8 = vmul.f32 1.442695, %v8205_v34 }
 0x7dd   : > { %13472 = vpow2.f32 %v8243_v8  ;;  %v8141_v59 = vpop.xlane.xlu1 %8140  ;;  %v8307_v8 = vsel %vm4581_vm3, %v17111_v27, 0.0 }
 0x7de   : > { %13474 = vpow2.f32 %v8245_v23  ;;  %v8211_v41 = vsub.f32 %v16948_v9, %v8141_v59 }
 0x7df   : > { %13476 = vpow2.f32 %v8247_v12 }
 0x7e0   : > { %v8255_v29 = vmul.f32 1.442695, %v8211_v41 }
 0x7e3   : > { %9713 = vrot.lane.b32.xlu0 %v16455_v62, %s13883_s4  ;;  %v8132_v62 = vpop.xlane.xlu0 %8131 }
 0x7e4   : > { %v8208_v6 = vsub.f32 %v16938_v36, %v8132_v62 }
 0x7e5   : > { %v8147_v34 = vpop.xlane.xlu1 %8146 }
 0x7e6   : > { %v8249_v35 = vmul.f32 1.442695, %v8208_v6  ;;  %v8213_v13 = vsub.f32 %v16956_v46, %v8147_v34  ;;  %v8310_v46 = vsel %vm4581_vm3, %v17115_v39, 0.0 }
 0x7e7   : > { %v8138_v30 = vpop.xlane.xlu0 %8137  ;;  %v17119_v9 = vpop.eup %13472 }
 0x7e8   : > { %v8210_v49 = vsub.f32 %v16946_v26, %v8138_v30  ;;  %13478 = vpow2.f32 %v8249_v35  ;;  %v17125_v12 = vpop.eup %13474  ;;  %v8313_v30 = vsel %vm4581_vm3, %v17119_v9, 0.0 }
 0x7e9   : > { %13480 = vpow2.f32 %v8251_v48  ;;  %v17129_v59 = vpop.eup %13476  ;;  %v8316_v41 = vsel %vm4581_vm3, %v17125_v12, 0.0 }
 0x7ea   : > { %v8253_v36 = vmul.f32 1.442695, %v8210_v49 }
 0x7eb   : > { %v8144_v60 = vpop.xlane.xlu0 %8143 }
 0x7ec   : > { %v8212_v57 = vsub.f32 %v16954_v3, %v8144_v60  ;;  %13482 = vpow2.f32 %v8253_v36  ;;  %v8259_v3 = vmul.f32 1.442695, %v8213_v13  ;;  %v8319_v36 = vsel %vm4581_vm3, %v17129_v59, 0.0 }
 0x7ed   : > { %v8153_v26 = vpop.xlane.xlu1 %8152  ;;  %13484 = vpow2.f32 %v8255_v29 }
 0x7ee   : > { %v8257_v53 = vmul.f32 1.442695, %v8212_v57  ;;  %v8215_v23 = vsub.f32 %v16968_v56, %v8153_v26 }
 0x7ef   : > { %v8150_v58 = vpop.xlane.xlu0 %8149 }
 0x7f0   : > { %v8214_v62 = vsub.f32 %v16966_v63, %v8150_v58  ;;  %13486 = vpow2.f32 %v8257_v53  ;;  %v8263_v56 = vmul.f32 1.442695, %v8215_v23 }
 0x7f1   : > { %13488 = vpow2.f32 %v8259_v3 }
 0x7f2   : > { %v8261_v63 = vmul.f32 1.442695, %v8214_v62  ;;  %v17135_v60 = vpop.eup %13478 }
 0x7f3   : > { %v17139_v57 = vpop.eup %13480  ;;  %v8322_v26 = vsel %vm4581_vm3, %v17135_v60, 0.0 }
 0x7f4   : > { %v8156_v6 = vpop.xlane.xlu0 %8155  ;;  %13490 = vpow2.f32 %v8261_v63  ;;  %v8325_v62 = vsel %vm4581_vm3, %v17139_v57, 0.0 }
 0x7f5   : > { %v8159_v5 = vpop.xlane.xlu1 %8158  ;;  %v8216_v35 = vsub.f32 %v16978_v55, %v8156_v6  ;;  %13492 = vpow2.f32 %v8263_v56 }
 0x7f6   : > { %v8217_v49 = vsub.f32 %v16980_v61, %v8159_v5 }
 0x7f7   : > { %v8265_v55 = vmul.f32 1.442695, %v8216_v35 }
 0x7f8   : > { %v8267_v61 = vmul.f32 1.442695, %v8217_v49 }
 0x7f9   : > { %13494 = vpow2.f32 %v8265_v55 }
 0x7fa   : > { %13496 = vpow2.f32 %v8267_v61 }
 0x7fc   : > { %v8162_v48 = vpop.xlane.xlu0 %8161 }
 0x7fd   : > { %v8165_v34 = vpop.xlane.xlu1 %8164  ;;  %v8218_v29 = vsub.f32 %v16990_v42, %v8162_v48 }
 0x7fe   : > { %v8219_v13 = vsub.f32 %v16992_v45, %v8165_v34 }
 0x7ff   : > { %8308 = vadd.xlane.f32.xlu1 %v8307_v8  ;;  %v17145_v8 = vpop.eup %13482  ;;  %v8269_v42 = vmul.f32 1.442695, %v8218_v29 }
 0x800   : > { %v17149_v3 = vpop.eup %13484  ;;  %v8271_v45 = vmul.f32 1.442695, %v8219_v13  ;;  %v8328_v5 = vsel %vm4581_vm3, %v17145_v8, 0.0 }
 0x801   : > { %v8331_v35 = vsel %vm4581_vm3, %v17149_v3, 0.0  ;;  %13498 = vpow2.f32 %v8269_v42 }
 0x802   : > { %8311 = vadd.xlane.f32.xlu0 %v8310_v46  ;;  %13500 = vpow2.f32 %v8271_v45 }
 0x803   : > { %8314 = vadd.xlane.f32.xlu1 %v8313_v30  ;;  %v17155_v30 = vpop.eup %13486 }
 0x804   : > { %v8168_v58 = vpop.xlane.xlu0 %8167  ;;  %v17159_v56 = vpop.eup %13488 }
 0x805   : > { %v8171_v53 = vpop.xlane.xlu1 %8170  ;;  %v8220_v23 = vsub.f32 %v17002_v37, %v8168_v58  ;;  %v17165_v34 = vpop.eup %13490 }
 0x806   : > { %8317 = vadd.xlane.f32.xlu0 %v8316_v41  ;;  %v8221_v6 = vsub.f32 %v17004_v51, %v8171_v53  ;;  %v8334_v41 = vsel %vm4581_vm3, %v17155_v30, 0.0  ;;  %v17169_v55 = vpop.eup %13492  ;;  %v8340_v58 = vsel %vm4581_vm3, %v17165_v34, 0.0 }
 0x807   : > { %8320 = vadd.xlane.f32.xlu1 %v8319_v36  ;;  %v8273_v37 = vmul.f32 1.442695, %v8220_v23  ;;  %v8337_v36 = vsel %vm4581_vm3, %v17159_v56, 0.0 }
 0x808   : > { %v8275_v51 = vmul.f32 1.442695, %v8221_v6 }
 0x809   : > { %13502 = vpow2.f32 %v8273_v37 }
 0x80a   : > { %8323 = vadd.xlane.f32.xlu0 %v8322_v26  ;;  %13504 = vpow2.f32 %v8275_v51  ;;  %v17174_v26 = vpop.eup %13494 }
 0x80b   : > { %8326 = vadd.xlane.f32.xlu1 %v8325_v62  ;;  %v8343_v62 = vsel %vm4581_vm3, %v17169_v55, 0.0  ;;  %v17179_v42 = vpop.eup %13496 }
 0x80c   : > { %v8174_v46 = vpop.xlane.xlu0 %8173  ;;  %v17183_v6 = vpop.eup %13498 }
 0x80d   : > { %v8177_v63 = vpop.xlane.xlu1 %8176  ;;  %v8222_v49 = vsub.f32 %v17014_v16, %v8174_v46  ;;  %v8349_v46 = vsel %vm4581_vm3, %v17179_v42, 0.0 }
 0x80e   : > { %8329 = vadd.xlane.f32.xlu0 %v8328_v5  ;;  %v8223_v48 = vsub.f32 %v17016_v1, %v8177_v63 }
 0x80f   : > { %8332 = vadd.xlane.f32.xlu1 %v8331_v35  ;;  %v8277_v29 = vmul.f32 1.442695, %v8222_v49  ;;  %v8352_v35 = vsel %vm4581_vm3, %v17183_v6, 0.0 }
 0x810   : > { %v8279_v16 = vmul.f32 1.442695, %v8223_v48 }
 0x811   : > { %13506 = vpow2.f32 %v8277_v29 }
 0x812   : > { %8335 = vadd.xlane.f32.xlu0 %v8334_v41  ;;  %13508 = vpow2.f32 %v8279_v16 }
 0x813   : > { %8338 = vadd.xlane.f32.xlu1 %v8337_v36 }
 0x814   : > { %v8180_v61 = vpop.xlane.xlu0 %8179 }
 0x815   : > { %v8183_v13 = vpop.xlane.xlu1 %8182  ;;  %v8224_v1 = vsub.f32 %v17026_v28, %v8180_v61  ;;  %v8346_v28 = vsel %vm4581_vm3, %v17174_v26, 0.0 }
 0x816   : > { %v8225_v53 = vsub.f32 %v17028_v18, %v8183_v13  ;;  %8341 = vadd.xlane.f32.xlu0 %v8340_v58  ;;  %v17187_v18 = vpop.eup %13500 }
 0x817   : > { %8344 = vadd.xlane.f32.xlu1 %v8343_v62  ;;  %v8281_v23 = vmul.f32 1.442695, %v8224_v1  ;;  %v17192_v37 = vpop.eup %13502  ;;  %v8355_v49 = vsel %vm4581_vm3, %v17187_v18, 0.0 }
 0x818   : > { %v8283_v45 = vmul.f32 1.442695, %v8225_v53  ;;  %v17196_v51 = vpop.eup %13504  ;;  %v8358_v41 = vsel %vm4581_vm3, %v17192_v37, 0.0 }
 0x819   : > { %13510 = vpow2.f32 %v8281_v23 }
 0x81a   : > { %8347 = vadd.xlane.f32.xlu0 %v8346_v28  ;;  %13512 = vpow2.f32 %v8283_v45 }
 0x81b   : > { %8350 = vadd.xlane.f32.xlu1 %v8349_v46  ;;  %v17200_v36 = vpop.eup %13506 }
 0x81c   : > { %v8186_v5 = vpop.xlane.xlu0 %8185  ;;  %v17204_v29 = vpop.eup %13508  ;;  %v8364_v61 = vsel %vm4581_vm3, %v17200_v36, 0.0 }
 0x81d   : > { %v8226_v63 = vsub.f32 %v17038_v0, %v8186_v5  ;;  %v8361_v0 = vsel %vm4581_vm3, %v17196_v51, 0.0  ;;  %v8367_v13 = vsel %vm4581_vm3, %v17204_v29, 0.0  ;;  %v8189_v45 = vpop.xlane.xlu1 %8188 }
 0x81e   : > { %8353 = vadd.xlane.f32.xlu0 %v8352_v35  ;;  %v8227_v5 = vsub.f32 %v17040_v24, %v8189_v45 }
 0x81f   : > { %v8285_v48 = vmul.f32 1.442695, %v8226_v63  ;;  %8356 = vadd.xlane.f32.xlu1 %v8355_v49 }
 0x820   : > { %v8287_v35 = vmul.f32 1.442695, %v8227_v5 }
 0x821   : > { %13514 = vpow2.f32 %v8285_v48 }
 0x822   : > { %8359 = vadd.xlane.f32.xlu0 %v8358_v41 }
 0x823   : > { %8362 = vadd.xlane.f32.xlu1 %v8361_v0  ;;  %v17208_v16 = vpop.eup %13510 }
 0x824   : > { %v17212_v1 = vpop.eup %13512  ;;  %v8370_v58 = vsel %vm4581_vm3, %v17208_v16, 0.0  ;;  %v8192_v63 = vpop.xlane.xlu0 %8191 }
 0x825   : > { %v8373_v53 = vsel %vm4581_vm3, %v17212_v1, 0.0  ;;  %v8195_v28 = vpop.xlane.xlu1 %8194  ;;  %v8228_v41 = vsub.f32 %v17050_v50, %v8192_v63 }
 0x826   : > { %8365 = vadd.xlane.f32.xlu0 %v8364_v61  ;;  %v8229_v49 = vsub.f32 %v17052_v11, %v8195_v28  ;;  %v8592_v11 = vsel %vm4969_vm2, %v16962_v4, 0 }
 0x827   : > { %8368 = vadd.xlane.f32.xlu1 %v8367_v13  ;;  %v8289_v13 = vmul.f32 1.442695, %v8228_v41 }
 0x828   : > { %v8291_v0 = vmul.f32 1.442695, %v8229_v49 }
 0x82a   : > { %8371 = vadd.xlane.f32.xlu0 %v8370_v58 }
 0x82b   : > { %v17218_v62 = vpop.eup %13514  ;;  %8374 = vadd.xlane.f32.xlu1 %v8373_v53 }
 0x82c   : > { %v8376_v23 = vsel %vm4581_vm3, %v17218_v62, 0.0  ;;  %v8198_v48 = vpop.xlane.xlu0 %8197 }
 0x82e   : > { %8377 = vadd.xlane.f32.xlu0 %v8376_v23 }
 0x83c   : > { %9909 = vrot.lane.b32.xlu1 %v16563_v38, %s13883_s4  ;;  %v8230_v38 = vsub.f32 %v17060_v33, %v8198_v48  ;;  %v8641_v48 = vsel %vm4969_vm2, %v16964_v7, 0 }
 0x83e   : > { %v8293_v53 = vmul.f32 1.442695, %v8230_v38 }
 0x844   : > { %9860 = vrot.lane.b32.xlu0 %v16544_v14, %s13883_s4 }
 0x849   : > { %v8297_v46 = vpop.xlane.xlu1 %8296 }
 0x84a   : > { %13516 = vrcp.f32 %v8297_v46 }
 0x84b   : > { %13518 = vpow2.f32 %v8287_v35 }
 0x852   : > { %v8300_v61 = vpop.xlane.xlu0 %8299 }
 0x853   : > { %v8303_v58 = vpop.xlane.xlu1 %8302  ;;  %13520 = vrcp.f32 %v8300_v61 }
 0x854   : > { %v13517_v14 = vpop.eup %13516  ;;  %13522 = vrcp.f32 %v8303_v58 }
 0x855   : > { %v8392_v24 = vmul.f32 %v13517_v14, %v17079_v43  ;;  %13524 = vpow2.f32 %v8291_v0  ;;  %v17237_v50 = vpop.eup %13518 }
 0x856   : > { %13526 = vpow2.f32 %v8289_v13  ;;  %v8379_v4 = vsel %vm4581_vm3, %v17237_v50, 0.0  ;;  %v8739_v13 = vsel %vm4969_vm2, %v16976_v20, 0 }
 0x857   : > { %v8455_v23 = vpack.c.bf16 %v8392_v24, %v8392_v24  ;;  %13528 = vpow2.f32 %v8293_v53 }
 0x859   : > { %12633 = vmatmul.mubr.msk.bf16.vlgmr.msra.gmra.mrb[28].mxu0 %vm4581_vm3, %v8455_v23 }
 0x85a   : > { %12643 = vmatpush3.bf16.msra.mxu0 %v8592_v11  ;;  %v8306_v33 = vpop.xlane.xlu0 %8305  ;;  %12644 = vmatprep.mubr.msk.bf16.mxu0 %vm13882_vm0, %v18351_v17 }
 0x85b   : > { %13530 = vrcp.f32 %v8306_v33  ;;  %12654 = vmatprep.subr.bf16.mxu0 %v18351_v17 }
 0x85d   : > { %v13521_v43 = vpop.eup %13520 }
 0x85e   : > { %v13523_v45 = vpop.eup %13522  ;;  %v8394_v28 = vmul.f32 %v13521_v43, %v17084_v52  ;;  %v8690_v52 = vsel %vm4969_vm2, %v16974_v40, 0  ;;  %v17282_v14 = vpop.permute.xlu0 %9713 }
 0x85f   : > { %v8396_v46 = vmul.f32 %v13523_v45, %v17086_v25  ;;  %v17243_v5 = vpop.eup %13524 }
 0x860   : > { %v8456_v63 = vpack.c.bf16 %v8394_v28, %v8394_v28  ;;  %8380 = vadd.xlane.f32.xlu1 %v8379_v4  ;;  %v17245_v35 = vpop.eup %13526  ;;  %v8385_v25 = vsel %vm4581_vm3, %v17243_v5, 0.0  ;;  %v8788_v4 = vsel %vm4969_vm2, %v16986_v32, 0 }
 0x861   : > { %v8457_v49 = vpack.c.bf16 %v8396_v46, %v8396_v46  ;;  %v17255_v41 = vpop.eup %13528  ;;  %v8382_v0 = vsel %vm4581_vm3, %v17245_v35, 0.0 }
 0x862   : > { %12639 = vmatmul.mubr.msk.bf16.vlgmr.msra.gmra.mrb[68].mxu1 %vm4581_vm3, %v8456_v63  ;;  %v8388_v61 = vsel %vm4581_vm3, %v17255_v41, 0.0 }
 0x863   : > { %12645 = vmatmul.mubr.msk.bf16.vlgmr.msra.gmra.mrb[32].mxu0 %vm4581_vm3, %v8457_v49  ;;  %12649 = vmatpush3.bf16.msra.mxu1 %v8641_v48 }
 0x864   : > { %12655 = vmatpush3.bf16.msra.mxu0 %v8690_v52  ;;  %8386 = vadd.xlane.f32.xlu1 %v8385_v25 }
 0x865   : > { %v13531_v38 = vpop.eup %13530  ;;  %8383 = vadd.xlane.f32.xlu0 %v8382_v0  ;;  %12650 = vmatprep.mubr.msk.bf16.mxu1 %vm13882_vm0, %v18351_v17  ;;  %v8886_v0 = vsel %vm4969_vm2, %v16998_v22, 0 }
 0x866   : > { %v8398_v7 = vmul.f32 %v13531_v38, %v17092_v15  ;;  %12660 = vmatprep.subr.bf16.mxu1 %v18351_v17  ;;  %12656 = vmatprep.mubr.msk.bf16.mxu0 %vm13882_vm0, %v18351_v17  ;;  %v17278_v15 = vpop.permute.xlu1 %9762 }
 0x867   : > { %12666 = vmatprep.subr.bf16.mxu0 %v18351_v17 }
 0x868   : > { %v8458_v40 = vpack.c.bf16 %v8398_v7, %v8398_v7 }
 0x869   : > { %8389 = vadd.xlane.f32.xlu0 %v8388_v61 }
 0x86a   : > { %12651 = vmatmul.mubr.msk.bf16.vlgmr.msra.gmra.mrb[72].mxu1 %vm4581_vm3, %v8458_v40  ;;  %v17280_v58 = vpop.permute.xlu1 %9811  ;;  %v8935_v40 = vsel %vm4969_vm2, %v17000_v31, 0 }
 0x86b   : > { %12661 = vmatpush3.bf16.msra.mxu1 %v8739_v13  ;;  %12662 = vmatprep.mubr.msk.bf16.mxu1 %vm13882_vm0, %v18351_v17 }
 0x86c   : > { %12672 = vmatprep.subr.bf16.mxu1 %v18351_v17 }
 0x875   : > { %10007 = vrot.lane.b32.xlu1 %v16601_v19, %s13883_s4 }
 0x87f   : > { %9958 = vrot.lane.b32.xlu0 %v16582_v47, %s13883_s4 }
 0x88c   : > { %v8309_v20 = vpop.xlane.xlu1 %8308 }
 0x88d   : > { %13532 = vrcp.f32 %v8309_v20  ;;  %v8984_v20 = vsel %vm4969_vm2, %v17010_v54, 0 }
 0x88f   : > { %v8312_v24 = vpop.xlane.xlu0 %8311 }
 0x890   : > { %v8315_v53 = vpop.xlane.xlu1 %8314  ;;  %13534 = vrcp.f32 %v8312_v24 }
 0x891   : > { %13536 = vrcp.f32 %v8315_v53 }
 0x893   : > { %v8318_v23 = vpop.xlane.xlu0 %8317 }
 0x894   : > { %13538 = vrcp.f32 %v8318_v23  ;;  %v8321_v11 = vpop.xlane.xlu1 %8320  ;;  %v9033_v23 = vsel %vm4969_vm2, %v17012_v44, 0 }
 0x895   : > { %13540 = vrcp.f32 %v8321_v11 }
 0x897   : > { %v13533_v33 = vpop.eup %13532  ;;  %v8324_v47 = vpop.xlane.xlu0 %8323 }
 0x898   : > { %v8400_v19 = vmul.f32 %v13533_v33, %v17111_v27  ;;  %13542 = vrcp.f32 %v8324_v47  ;;  %v8327_v48 = vpop.xlane.xlu1 %8326 }
 0x899   : > { %13544 = vrcp.f32 %v8327_v48 }
 0x89a   : > { %v13535_v43 = vpop.eup %13534  ;;  %v8459_v45 = vpack.c.bf16 %v8400_v19, %v8400_v19  ;;  %v9082_v19 = vsel %vm4969_vm2, %v17022_v21, 0 }
 0x89b   : > { %v13537_v28 = vpop.eup %13536  ;;  %v8402_v46 = vmul.f32 %v13535_v43, %v17115_v39  ;;  %v8837_v39 = vsel %vm4969_vm2, %v16988_v2, 0  ;;  %v8330_v52 = vpop.xlane.xlu0 %8329 }
 0x89c   : > { %12657 = vmatmul.mubr.msk.bf16.vlgmr.msra.gmra.mrb[36].mxu0 %vm4581_vm3, %v8459_v45  ;;  %v8404_v27 = vmul.f32 %v13537_v28, %v17119_v9  ;;  %13546 = vrcp.f32 %v8330_v52  ;;  %v8333_v7 = vpop.xlane.xlu1 %8332  ;;  %v18654_v45 = vld [vmem:[#allocation96_spill] sm:$0xff] }
 0x89d   : > { %v8460_v63 = vpack.c.bf16 %v8402_v46, %v8402_v46  ;;  %12667 = vmatpush3.bf16.msra.mxu0 %v8788_v4  ;;  %12668 = vmatprep.mubr.msk.bf16.mxu0 %vm13882_vm0, %v18351_v17  ;;  %13548 = vrcp.f32 %v8333_v7  ;;  %v9131_v28 = vsel %vm4969_vm2, %v18654_v45, 0 }
 0x89e   : > { %v13539_v49 = vpop.eup %13538  ;;  %12678 = vmatprep.subr.bf16.mxu0 %v18351_v17  ;;  %v8461_v25 = vpack.c.bf16 %v8404_v27, %v8404_v27 }
 0x89f   : > { %12663 = vmatmul.mubr.msk.bf16.vlgmr.msra.gmra.mrb[76].mxu1 %vm4581_vm3, %v8460_v63  ;;  %v8406_v32 = vmul.f32 %v13539_v49, %v17125_v12  ;;  %v13541_v9 = vpop.eup %13540  ;;  %v8336_v61 = vpop.xlane.xlu0 %8335  ;;  %v18655_v63 = vld [vmem:[#allocation70_spill] sm:$0xff] }
 0x8a0   : > { %12673 = vmatpush3.bf16.msra.mxu1 %v8837_v39  ;;  %12674 = vmatprep.mubr.msk.bf16.mxu1 %vm13882_vm0, %v18351_v17  ;;  %v8408_v12 = vmul.f32 %v13541_v9, %v17129_v59  ;;  %13550 = vrcp.f32 %v8336_v61  ;;  %v8339_v53 = vpop.xlane.xlu1 %8338  ;;  %v9180_v49 = vsel %vm4969_vm2, %v18655_v63, 0  ;;  %v9572_v63 = vsel %vm4969_vm2, %v17072_v10, 0 }
 0x8a1   : > { %12684 = vmatprep.subr.bf16.mxu1 %v18351_v17  ;;  %v8462_v2 = vpack.c.bf16 %v8406_v32, %v8406_v32  ;;  %13552 = vrcp.f32 %v8339_v53  ;;  %v18656_v32 = vld [vmem:[#allocation93_spill] sm:$0xff] }
 0x8a2   : > { %v13543_v38 = vpop.eup %13542  ;;  %v8463_v13 = vpack.c.bf16 %v8408_v12, %v8408_v12  ;;  %v9229_v52 = vsel %vm4969_vm2, %v18656_v32, 0 }
 0x8a3   : > { %v8410_v22 = vmul.f32 %v13543_v38, %v17135_v60  ;;  %v13545_v59 = vpop.eup %13544  ;;  %v8342_v11 = vpop.xlane.xlu0 %8341 }
 0x8a4   : > { %12669 = vmatmul.mubr.msk.bf16.vlgmr.msra.gmra.mrb[40].mxu0 %vm4581_vm3, %v8461_v25  ;;  %v8412_v60 = vmul.f32 %v13545_v59, %v17139_v57  ;;  %13554 = vrcp.f32 %v8342_v11  ;;  %v8345_v43 = vpop.xlane.xlu1 %8344 }
 0x8a5   : > { %12679 = vmatpush3.bf16.msra.mxu0 %v8886_v0  ;;  %12680 = vmatprep.mubr.msk.bf16.mxu0 %vm13882_vm0, %v18351_v17  ;;  %v8464_v31 = vpack.c.bf16 %v8410_v22, %v8410_v22  ;;  %13556 = vrcp.f32 %v8345_v43  ;;  %v18658_v22 = vld [vmem:[#allocation104_spill] sm:$0xff] }
 0x8a6   : > { %12690 = vmatprep.subr.bf16.mxu0 %v18351_v17  ;;  %v13547_v24 = vpop.eup %13546  ;;  %v8465_v33 = vpack.c.bf16 %v8412_v60, %v8412_v60  ;;  %v9327_v61 = vsel %vm4969_vm2, %v18658_v22, 0 }
 0x8a7   : > { %12675 = vmatmul.mubr.msk.bf16.vlgmr.msra.gmra.mrb[80].mxu1 %vm4581_vm3, %v8462_v2  ;;  %v8414_v54 = vmul.f32 %v13547_v24, %v17145_v8  ;;  %v13549_v57 = vpop.eup %13548  ;;  %v8348_v46 = vpop.xlane.xlu0 %8347  ;;  %v18657_v2 = vld [vmem:[#allocation52_spill] sm:$0xff] }
 0x8a8   : > { %12685 = vmatpush3.bf16.msra.mxu1 %v8935_v40  ;;  %12686 = vmatprep.mubr.msk.bf16.mxu1 %vm13882_vm0, %v18351_v17  ;;  %v8416_v8 = vmul.f32 %v13549_v57, %v17149_v3  ;;  %13558 = vrcp.f32 %v8348_v46  ;;  %v8351_v39 = vpop.xlane.xlu1 %8350  ;;  %v9278_v38 = vsel %vm4969_vm2, %v18657_v2, 0  ;;  %v9719_v2 = vsel %vm4969_vm2, %v17282_v14, 0 }
 0x8a9   : > { %12696 = vmatprep.subr.bf16.mxu1 %v18351_v17  ;;  %v8466_v44 = vpack.c.bf16 %v8414_v54, %v8414_v54  ;;  %13560 = vrcp.f32 %v8351_v39  ;;  %v18660_v54 = vld [vmem:[#allocation50_spill] sm:$0xff] }
 0x8aa   : > { %v13551_v47 = vpop.eup %13550  ;;  %v8467_v4 = vpack.c.bf16 %v8416_v8, %v8416_v8  ;;  %v9425_v11 = vsel %vm4969_vm2, %v18660_v54, 0 }
 0x8ab   : > { %v8418_v21 = vmul.f32 %v13551_v47, %v17155_v30  ;;  %v13553_v3 = vpop.eup %13552  ;;  %v8354_v9 = vpop.xlane.xlu0 %8353 }
 0x8ac   : > { %12681 = vmatmul.mubr.msk.bf16.vlgmr.msra.gmra.mrb[44].mxu0 %vm4581_vm3, %v8463_v13  ;;  %v8420_v30 = vmul.f32 %v13553_v3, %v17159_v56  ;;  %13562 = vrcp.f32 %v8354_v9  ;;  %v8357_v40 = vpop.xlane.xlu1 %8356 }
 0x8ad   : > { %12691 = vmatpush3.bf16.msra.mxu0 %v8984_v20  ;;  %12692 = vmatprep.mubr.msk.bf16.mxu0 %vm13882_vm0, %v18351_v17  ;;  %v8468_v27 = vpack.c.bf16 %v8418_v21, %v8418_v21  ;;  %13564 = vrcp.f32 %v8357_v40 }
 0x8ae   : > { %12702 = vmatprep.subr.bf16.mxu0 %v18351_v17  ;;  %v13555_v48 = vpop.eup %13554  ;;  %v8469_v0 = vpack.c.bf16 %v8420_v30, %v8420_v30  ;;  %v18663_v30 = vld [vmem:[#allocation76_spill] sm:$0xff] }
 0x8af   : > { %12687 = vmatmul.mubr.msk.bf16.vlgmr.msra.gmra.mrb[84].mxu1 %vm4581_vm3, %v8464_v31  ;;  %v8422_v25 = vmul.f32 %v13555_v48, %v17165_v34  ;;  %v13557_v56 = vpop.eup %13556  ;;  %v8360_v59 = vpop.xlane.xlu0 %8359  ;;  %v18659_v31 = vld [vmem:[#allocation101_spill] sm:$0xff]  ;;  %v9621_v39 = vsel %vm4969_vm2, %v18663_v30, 0 }
 0x8b0   : > { %12697 = vmatpush3.bf16.msra.mxu1 %v9033_v23  ;;  %12698 = vmatprep.mubr.msk.bf16.mxu1 %vm13882_vm0, %v18351_v17  ;;  %v8424_v34 = vmul.f32 %v13557_v56, %v17169_v55  ;;  %v9376_v24 = vsel %vm4969_vm2, %v18659_v31, 0  ;;  %13566 = vrcp.f32 %v8360_v59  ;;  %v8363_v23 = vpop.xlane.xlu1 %8362 }
 0x8b1   : > { %12708 = vmatprep.subr.bf16.mxu1 %v18351_v17  ;;  %v8470_v12 = vpack.c.bf16 %v8422_v25, %v8422_v25  ;;  %13568 = vrcp.f32 %v8363_v23  ;;  %v18664_v25 = vld [vmem:[#allocation108_spill] sm:$0xff] }
 0x8b2   : > { %v13559_v7 = vpop.eup %13558  ;;  %v8471_v20 = vpack.c.bf16 %v8424_v34, %v8424_v34  ;;  %v9670_v9 = vsel %vm4969_vm2, %v18664_v25, 0 }
 0x8b3   : > { %v8426_v13 = vmul.f32 %v13559_v7, %v17174_v26  ;;  %v13561_v55 = vpop.eup %13560  ;;  %v8366_v57 = vpop.xlane.xlu0 %8365 }
 0x8b4   : > { %12693 = vmatmul.mubr.msk.bf16.vlgmr.msra.gmra.mrb[48].mxu0 %vm4581_vm3, %v8465_v33  ;;  %v8428_v26 = vmul.f32 %v13561_v55, %v17179_v42  ;;  %13570 = vrcp.f32 %v8366_v57  ;;  %v8369_v45 = vpop.xlane.xlu1 %8368 }
 0x8b5   : > { %12703 = vmatpush3.bf16.msra.mxu0 %v9082_v19  ;;  %12704 = vmatprep.mubr.msk.bf16.mxu0 %vm13882_vm0, %v18351_v17  ;;  %v8472_v60 = vpack.c.bf16 %v8426_v13, %v8426_v13  ;;  %13572 = vrcp.f32 %v8369_v45  ;;  %v9817_v13 = vsel %vm4969_vm2, %v17280_v58, 0  ;;  %v13327_v45 = vld [vmem:[#allocation10 + $0x18] sm:$0xff]  }
 0x8b6   : > { %12714 = vmatprep.subr.bf16.mxu0 %v18351_v17  ;;  %v13563_v53 = vpop.eup %13562  ;;  %v8473_v19 = vpack.c.bf16 %v8428_v26, %v8428_v26 }
 0x8b7   : > { %12699 = vmatmul.mubr.msk.bf16.vlgmr.msra.gmra.mrb[88].mxu1 %vm4581_vm3, %v8466_v44  ;;  %v8430_v33 = vmul.f32 %v13563_v53, %v17183_v6  ;;  %v13565_v42 = vpop.eup %13564  ;;  %v18661_v44 = vld [vmem:[#allocation109_spill] sm:$0xff] }
 0x8b8   : > { %12709 = vmatpush3.bf16.msra.mxu1 %v9131_v28  ;;  %12710 = vmatprep.mubr.msk.bf16.mxu1 %vm13882_vm0, %v18351_v17  ;;  %v9474_v47 = vsel %vm4969_vm2, %v18661_v44, 0  ;;  %v8432_v6 = vmul.f32 %v13565_v42, %v17187_v18  ;;  %v18662_v28 = vld [vmem:[#allocation75_spill] sm:$0xff]  ;;  %v8375_v48 = vpop.xlane.xlu1 %8374 }
 0x8b9   : > { %12720 = vmatprep.subr.bf16.mxu1 %v18351_v17  ;;  %v8474_v8 = vpack.c.bf16 %v8430_v33, %v8430_v33  ;;  %v9523_v21 = vsel %vm4969_vm2, %v18662_v28, 0 }
 0x8ba   : > { %v13567_v43 = vpop.eup %13566  ;;  %v8475_v3 = vpack.c.bf16 %v8432_v6, %v8432_v6  ;;  %v13326_v6 = vld [vmem:[#allocation10 + $0x10] sm:$0xff]  }
 0x8bb   : > { %v8434_v46 = vmul.f32 %v13567_v43, %v17192_v37  ;;  %v13569_v18 = vpop.eup %13568  ;;  %v13325_v43 = vld [vmem:[#allocation10 + $0x8] sm:$0xff]  }
 0x8bc   : > { %12705 = vmatmul.mubr.msk.bf16.vlgmr.msra.gmra.mrb[52].mxu0 %vm4581_vm3, %v8467_v4  ;;  %v8372_v4 = vpop.xlane.xlu0 %8371  ;;  %v8436_v37 = vmul.f32 %v13569_v18, %v17196_v51 }
 0x8bd   : > { %12715 = vmatpush3.bf16.msra.mxu0 %v9180_v49  ;;  %12716 = vmatprep.mubr.msk.bf16.mxu0 %vm13882_vm0, %v18351_v17  ;;  %13574 = vrcp.f32 %v8372_v4  ;;  %v8476_v49 = vpack.c.bf16 %v8434_v46, %v8434_v46 }
 0x8be   : > { %12726 = vmatprep.subr.bf16.mxu0 %v18351_v17  ;;  %13576 = vrcp.f32 %v8375_v48 }
 0x8bf   : > { %12711 = vmatmul.mubr.msk.bf16.vlgmr.msra.gmra.mrb[92].mxu1 %vm4581_vm3, %v8468_v27  ;;  %v13571_v27 = vpop.eup %13570 }
 0x8c0   : > { %12721 = vmatpush3.bf16.msra.mxu1 %v9229_v52  ;;  %12722 = vmatprep.mubr.msk.bf16.mxu1 %vm13882_vm0, %v18351_v17  ;;  %v8438_v10 = vmul.f32 %v13571_v27, %v17200_v36  ;;  %v8378_v32 = vpop.xlane.xlu0 %8377  ;;  %v8477_v52 = vpack.c.bf16 %v8436_v37, %v8436_v37  ;;  %v13573_v51 = vpop.eup %13572 }
 0x8c1   : > { %12732 = vmatprep.subr.bf16.mxu1 %v18351_v17  ;;  %13578 = vrcp.f32 %v8378_v32  ;;  %v8440_v36 = vmul.f32 %v13573_v51, %v17204_v29  ;;  %v9768_v29 = vsel %vm4969_vm2, %v17278_v15, 0 }
 0x8c3   : > { %v8479_v7 = vpack.c.bf16 %v8440_v36, %v8440_v36 }
 0x8c4   : > { %12717 = vmatmul.mubr.msk.bf16.vlgmr.msra.gmra.mrb[56].mxu0 %vm4581_vm3, %v8469_v0  ;;  %v8478_v0 = vpack.c.bf16 %v8438_v10, %v8438_v10 }
 0x8c5   : > { %12727 = vmatpush3.bf16.msra.mxu0 %v9278_v38  ;;  %12728 = vmatprep.mubr.msk.bf16.mxu0 %vm13882_vm0, %v18351_v17 }
 0x8c6   : > { %12738 = vmatprep.subr.bf16.mxu0 %v18351_v17 }
 0x8c7   : > { %12723 = vmatmul.mubr.msk.bf16.vlgmr.msra.gmra.mrb[96].mxu1 %vm4581_vm3, %v8470_v12  ;;  %v13575_v56 = vpop.eup %13574  ;;  %v9910_v12 = vpop.permute.xlu1 %9909 }
 0x8c8   : > { %12733 = vmatpush3.bf16.msra.mxu1 %v9327_v61  ;;  %12734 = vmatprep.mubr.msk.bf16.mxu1 %vm13882_vm0, %v18351_v17  ;;  %v8442_v38 = vmul.f32 %v13575_v56, %v17208_v16  ;;  %v13577_v34 = vpop.eup %13576  ;;  %v9861_v16 = vpop.permute.xlu0 %9860 }
 0x8c9   : > { %12744 = vmatprep.subr.bf16.mxu1 %v18351_v17  ;;  %v8444_v61 = vmul.f32 %v13577_v34, %v17212_v1  ;;  %v9866_v55 = vsel %vm4969_vm2, %v9861_v16, 0 }
 0x8ca   : > { %v8480_v40 = vpack.c.bf16 %v8442_v38, %v8442_v38 }
 0x8cb   : > { %v13579_v22 = vpop.eup %13578 }
 0x8cc   : > { %12729 = vmatmul.mubr.msk.bf16.vlgmr.msra.gmra.mrb[60].mxu0 %vm4581_vm3, %v8471_v20  ;;  %v8446_v15 = vmul.f32 %v13579_v22, %v17218_v62  ;;  %v8481_v20 = vpack.c.bf16 %v8444_v61, %v8444_v61  ;;  %v9915_v62 = vsel %vm4969_vm2, %v9910_v12, 0 }
 0x8cd   : > { %12739 = vmatpush3.bf16.msra.mxu0 %v9376_v24  ;;  %12740 = vmatprep.mubr.msk.bf16.mxu0 %vm13882_vm0, %v18351_v17 }
 0x8ce   : > { %12750 = vmatprep.subr.bf16.mxu0 %v18351_v17  ;;  %v8482_v58 = vpack.c.bf16 %v8446_v15, %v8446_v15 }
 0x8cf   : > { %12735 = vmatmul.mubr.msk.bf16.vlgmr.msra.gmra.mrb[100].mxu1 %vm4581_vm3, %v8472_v60 }
 0x8d0   : > { %12745 = vmatpush3.bf16.msra.mxu1 %v9425_v11  ;;  %12746 = vmatprep.mubr.msk.bf16.mxu1 %vm13882_vm0, %v18351_v17 }
 0x8d1   : > { %12756 = vmatprep.subr.bf16.mxu1 %v18351_v17 }
 0x8d4   : > { %12741 = vmatmul.mubr.msk.bf16.vlgmr.msra.gmra.mrb[64].mxu0 %vm4581_vm3, %v8473_v19 }
 0x8d5   : > { %12751 = vmatpush3.bf16.msra.mxu0 %v9474_v47  ;;  %12752 = vmatprep.mubr.msk.bf16.mxu0 %vm13882_vm0, %v18351_v17 }
 0x8d6   : > { %12762 = vmatprep.subr.bf16.mxu0 %v18351_v17 }
 0x8d7   : > { %12747 = vmatmul.mubr.msk.bf16.vlgmr.msra.gmra.mrb[104].mxu1 %vm4581_vm3, %v8474_v8 }
 0x8d8   : > { %12757 = vmatpush3.bf16.msra.mxu1 %v9523_v21  ;;  %12758 = vmatprep.mubr.msk.bf16.mxu1 %vm13882_vm0, %v18351_v17  ;;  %v13329_v21 = vld [vmem:[#allocation10 + $0x28] sm:$0xff]  }
 0x8d9   : > { %12768 = vmatprep.subr.bf16.mxu1 %v18351_v17 }
 0x8dc   : > { %12753 = vmatmul.mubr.msk.bf16.vlgmr.msra.gmra.mrb[68].mxu0 %vm4581_vm3, %v8475_v3  ;;  %v13330_v3 = vld [vmem:[#allocation10 + $0x30] sm:$0xff]  }
 0x8dd   : > { %12763 = vmatpush3.bf16.msra.mxu0 %v9572_v63  ;;  %12764 = vmatprep.mubr.msk.bf16.mxu0 %vm13882_vm0, %v18351_v17  ;;  %v13331_v63 = vld [vmem:[#allocation10 + $0x38] sm:$0xff]  }
 0x8de   : > { %12774 = vmatprep.subr.bf16.mxu0 %v18351_v17 }
 0x8df   : > { %12759 = vmatmul.mubr.msk.bf16.vlgmr.msra.gmra.mrb[108].mxu1 %vm4581_vm3, %v8476_v49 }
 0x8e0   : > { %12769 = vmatpush3.bf16.msra.mxu1 %v9621_v39  ;;  %12770 = vmatprep.mubr.msk.bf16.mxu1 %vm13882_vm0, %v18351_v17 }
 0x8e1   : > { %12780 = vmatprep.subr.bf16.mxu1 %v18351_v17 }
 0x8e4   : > { %12765 = vmatmul.mubr.msk.bf16.vlgmr.msra.gmra.mrb[72].mxu0 %vm4581_vm3, %v8477_v52 }
 0x8e5   : > { %12775 = vmatpush3.bf16.msra.mxu0 %v9670_v9  ;;  %12776 = vmatprep.mubr.msk.bf16.mxu0 %vm13882_vm0, %v18351_v17 }
 0x8e6   : > { %12786 = vmatprep.subr.bf16.mxu0 %v18351_v17 }
 0x8e7   : > { %12771 = vmatmul.mubr.msk.bf16.vlgmr.msra.gmra.mrb[112].mxu1 %vm4581_vm3, %v8478_v0 }
 0x8e8   : > { %12781 = vmatpush3.bf16.msra.mxu1 %v9719_v2  ;;  %12782 = vmatprep.mubr.msk.bf16.mxu1 %vm13882_vm0, %v18351_v17 }
 0x8e9   : > { %12792 = vmatprep.subr.bf16.mxu1 %v18351_v17 }
 0x8ec   : > { %12777 = vmatmul.mubr.msk.bf16.vlgmr.msra.gmra.mrb[76].mxu0 %vm4581_vm3, %v8479_v7 }
 0x8ed   : > { %12787 = vmatpush3.bf16.msra.mxu0 %v9768_v29  ;;  %v8381_v14 = vpop.xlane.xlu1 %8380  ;;  %12788 = vmatprep.mubr.msk.bf16.mxu0 %vm13882_vm0, %v18351_v17 }
 0x8ee   : > { %13580 = vrcp.f32 %v8381_v14  ;;  %12798 = vmatprep.subr.bf16.mxu0 %v18351_v17 }
 0x8ef   : > { %12783 = vmatmul.mubr.msk.bf16.vlgmr.msra.gmra.mrb[116].mxu1 %vm4581_vm3, %v8480_v40 }
 0x8f0   : > { %12793 = vmatpush3.bf16.msra.mxu1 %v9817_v13  ;;  %12794 = vmatprep.mubr.msk.bf16.mxu1 %vm13882_vm0, %v18351_v17 }
 0x8f1   : > { %v8387_v59 = vpop.xlane.xlu1 %8386  ;;  %12804 = vmatprep.subr.bf16.mxu1 %v18351_v17 }
 0x8f2   : > { %13582 = vrcp.f32 %v8387_v59  ;;  %v8384_v1 = vpop.xlane.xlu0 %8383 }
 0x8f3   : > { %13584 = vrcp.f32 %v8384_v1 }
 0x8f4   : > { %12789 = vmatmul.mubr.msk.bf16.vlgmr.msra.gmra.mrb[80].mxu0 %vm4581_vm3, %v8481_v20 }
 0x8f5   : > { %12799 = vmatpush3.bf16.msra.mxu0 %v9866_v55  ;;  %12800 = vmatprep.mubr.msk.bf16.mxu0 %vm13882_vm0, %v18351_v17  ;;  %v10008_v19 = vpop.permute.xlu1 %10007 }
 0x8f6   : > { %v8390_v31 = vpop.xlane.xlu0 %8389  ;;  %12810 = vmatprep.subr.bf16.mxu0 %v18351_v17  ;;  %v10013_v44 = vsel %vm4969_vm2, %v10008_v19, 0 }
 0x8f7   : > { %13586 = vrcp.f32 %v8390_v31  ;;  %12795 = vmatmul.mubr.msk.bf16.vlgmr.msra.gmra.mrb[120].mxu1 %vm4581_vm3, %v8482_v58 }
 0x8f8   : > { %v13581_v24 = vpop.eup %13580  ;;  %12805 = vmatpush3.bf16.msra.mxu1 %v9915_v62  ;;  %12806 = vmatprep.mubr.msk.bf16.mxu1 %vm13882_vm0, %v18351_v17 }
 0x8f9   : > { %v8448_v60 = vmul.f32 %v13581_v24, %v17237_v50  ;;  %12816 = vmatprep.subr.bf16.mxu1 %v18351_v17 }
 0x8fa   : > { %v9959_v53 = vpop.permute.xlu0 %9958 }
 0x8fb   : > { %v8483_v26 = vpack.c.bf16 %v8448_v60, %v8448_v60  ;;  %v9964_v11 = vsel %vm4969_vm2, %v9959_v53, 0 }
 0x8fc   : > { %v13583_v23 = vpop.eup %13582 }
 0x8fd   : > { %v13585_v54 = vpop.eup %13584  ;;  %12801 = vmatmul.mubr.msk.bf16.vlgmr.msra.gmra.mrb[84].mxu0 %vm4581_vm3, %v8483_v26  ;;  %v8452_v57 = vmul.f32 %v13583_v23, %v17243_v5  ;;  %v13324_v5 = vld [vmem:[#allocation10] sm:$0xff]  }
 0x8fe   : > { %v8450_v33 = vmul.f32 %v13585_v54, %v17245_v35  ;;  %12811 = vmatpush3.bf16.msra.mxu0 %v9964_v11  ;;  %12812 = vmatprep.mubr.msk.bf16.mxu0 %vm13882_vm0, %v18351_v17 }
 0x8ff   : > { %v8485_v47 = vpack.c.bf16 %v8452_v57, %v8452_v57  ;;  %12822 = vmatprep.subr.bf16.mxu0 %v13324_v5 }
 0x900   : > { %v8484_v50 = vpack.c.bf16 %v8450_v33, %v8450_v33 }
 0x901   : > { %v13587_v42 = vpop.eup %13586 }
 0x902   : > { %12807 = vmatmul.mubr.msk.bf16.vlgmr.msra.gmra.mrb[124].mxu1 %vm4581_vm3, %v8484_v50  ;;  %v8454_v35 = vmul.f32 %v13587_v42, %v17255_v41 }
 0x903   : > { %12817 = vmatpush3.bf16.msra.mxu1 %v10013_v44  ;;  %12818 = vmatprep.mubr.msk.bf16.mxu1 %vm13882_vm0, %v18351_v17  ;;  %v13328_v17 = vld [vmem:[#allocation10 + $0x20] sm:$0xff]  }
 0x904   : > { %v8486_v8 = vpack.c.bf16 %v8454_v35, %v8454_v35 }
 0x905   : > { %12813 = vmatmul.mubr.msk.bf16.vlgmr.msra.gmra.mrb[88].mxu0 %vm4581_vm3, %v8485_v47 }
 0x906   : > { %12823 = vmatpush3.bf16.msra.mxu0 %v13324_v5 }
 0x907   : > { %12824 = vmatprep.subr.bf16.mxu0 %v13325_v43 }
 0x90a   : > { %12819 = vmatmul.mubr.msk.bf16.vlgmr.msra.gmra.mrb[128].mxu1 %vm4581_vm3, %v8486_v8  ;;  %12825 = vmatpush3.bf16.msra.mxu0 %v13325_v43 }
 0x90b   : > { %12826 = vmatprep.subr.bf16.mxu0 %v13326_v6 }
 0x90e   : > { %12827 = vmatpush3.bf16.msra.mxu0 %v13326_v6 }
 0x90f   : > { %12828 = vmatprep.subr.bf16.mxu0 %v13327_v45 }
 0x912   : > { %12829 = vmatpush3.bf16.msra.mxu0 %v13327_v45 }
 0x913   : > { %12830 = vmatprep.subr.bf16.mxu0 %v13328_v17 }
 0x916   : > { %12831 = vmatpush3.bf16.msra.mxu0 %v13328_v17 }
 0x917   : > { %12832 = vmatprep.subr.bf16.mxu0 %v13329_v21 }
 0x91a   : > { %12833 = vmatpush3.bf16.msra.mxu0 %v13329_v21 }
 0x91b   : > { %12834 = vmatprep.subr.bf16.mxu0 %v13330_v3 }
 0x91e   : > { %12835 = vmatpush3.bf16.msra.mxu0 %v13330_v3 }
 0x91f   : > { %12836 = vmatprep.subr.bf16.mxu0 %v13331_v63 }
 0x922   : > { %12837 = vmatpush3.bf16.msra.mxu0 %v13331_v63 }
 0x92c   : > { %v8530_v41 = vpop.f32.mrb[28].mxu0 }
 0x92d   : > { %v12634_v28 = vpop.f32.mrb[29].mxu0 }
 0x92e   : > { %v8533_v46 = vpop.f32.mrb[30].mxu0 }
 0x92f   : > { %v12635_v4 = vpop.f32.mrb[31].mxu0 }
 0x935   : > { %v8579_v18 = vpop.f32.mrb[68].mxu1 }
 0x936   : > { %v13148_v49 = vpack.i.bf16 %v8579_v18, %v8530_v41  ;;  %v8628_v27 = vpop.f32.mrb[32].mxu0  ;;  %v12640_v37 = vpop.f32.mrb[69].mxu1 }
 0x937   : > { %v12646_v48 = vpop.f32.mrb[33].mxu0  ;;  %v8582_v30 = vpop.f32.mrb[70].mxu1 }
 0x938   : > { %v8631_v39 = vpop.f32.mrb[34].mxu0  ;;  %13149 = vrot.lane.b32.xlu0 %v13148_v49, %s13883_s4  ;;  %v12641_v10 = vpop.f32.mrb[71].mxu1 }
 0x939   : > { %v12647_v32 = vpop.f32.mrb[35].mxu0 }
 0x93d   : > { %v8677_v52 = vpop.f32.mrb[72].mxu1 }
 0x93e   : > { %v13153_v51 = vpack.i.bf16 %v8677_v52, %v8628_v27  ;;  %v12652_v25 = vpop.f32.mrb[73].mxu1 }
 0x93f   : > { %v8680_v9 = vpop.f32.mrb[74].mxu1 }
 0x940   : > { %13154 = vrot.lane.b32.xlu1 %v13153_v51, %s13883_s4  ;;  %v12653_v0 = vpop.f32.mrb[75].mxu1 }
 0x96f   : > { %v8726_v56 = vpop.f32.mrb[36].mxu0 }
 0x970   : > { %v12658_v36 = vpop.f32.mrb[37].mxu0 }
 0x971   : > { %v8729_v2 = vpop.f32.mrb[38].mxu0 }
 0x972   : > { %v12659_v38 = vpop.f32.mrb[39].mxu0  ;;  %v8775_v12 = vpop.f32.mrb[76].mxu1 }
 0x973   : > { %v13158_v7 = vpack.i.bf16 %v8775_v12, %v8726_v56  ;;  %v12664_v34 = vpop.f32.mrb[77].mxu1 }
 0x974   : > { %v8778_v29 = vpop.f32.mrb[78].mxu1 }
 0x975   : > { %13159 = vrot.lane.b32.xlu0 %v13158_v7, %s13883_s4  ;;  %v12665_v40 = vpop.f32.mrb[79].mxu1 }
 0x977   : > { %v8824_v14 = vpop.f32.mrb[40].mxu0 }
 0x978   : > { %v12670_v22 = vpop.f32.mrb[41].mxu0 }
 0x979   : > { %v8827_v61 = vpop.f32.mrb[42].mxu0  ;;  %v18665_v22 = vld [vmem:[#allocation41_spill] sm:$0xff] }
 0x97a   : > { %v12671_v16 = vpop.f32.mrb[43].mxu0  ;;  %v8873_v13 = vpop.f32.mrb[80].mxu1 }
 0x97b   : > { %v13163_v15 = vpack.i.bf16 %v8873_v13, %v8824_v14  ;;  %v12676_v59 = vpop.f32.mrb[81].mxu1  ;;  %v18666_v16 = vld [vmem:[#allocation77_spill] sm:$0xff] }
 0x97c   : > { %v8876_v20 = vpop.f32.mrb[82].mxu1 }
 0x97d   : > { %13164 = vrot.lane.b32.xlu1 %v13163_v15, %s13883_s4  ;;  %v12677_v1 = vpop.f32.mrb[83].mxu1 }
 0x97f   : > { %v8922_v55 = vpop.f32.mrb[44].mxu0 }
 0x980   : > { %v12682_v58 = vpop.f32.mrb[45].mxu0 }
 0x981   : > { %v8925_v31 = vpop.f32.mrb[46].mxu0 }
 0x982   : > { %v12683_v62 = vpop.f32.mrb[47].mxu0  ;;  %v8971_v24 = vpop.f32.mrb[84].mxu1 }
 0x983   : > { %v13168_v60 = vpack.i.bf16 %v8971_v24, %v8922_v55  ;;  %v12688_v53 = vpop.f32.mrb[85].mxu1 }
 0x984   : > { %v8974_v26 = vpop.f32.mrb[86].mxu1 }
 0x985   : > { %13169 = vrot.lane.b32.xlu0 %v13168_v60, %s13883_s4  ;;  %v12689_v23 = vpop.f32.mrb[87].mxu1 }
 0x986   : > { %v18667_v23 = vld [vmem:[#allocation65_spill] sm:$0xff] }
 0x987   : > { %v9020_v54 = vpop.f32.mrb[48].mxu0 }
 0x988   : > { %v12694_v11 = vpop.f32.mrb[49].mxu0 }
 0x989   : > { %v9023_v33 = vpop.f32.mrb[50].mxu0  ;;  %v18668_v11 = vld [vmem:[#allocation80_spill] sm:$0xff] }
 0x98a   : > { %v12695_v57 = vpop.f32.mrb[51].mxu0  ;;  %v9069_v19 = vpop.f32.mrb[88].mxu1 }
 0x98b   : > { %v13173_v50 = vpack.i.bf16 %v9069_v19, %v9020_v54  ;;  %v12700_v42 = vpop.f32.mrb[89].mxu1 }
 0x98c   : > { %v9072_v44 = vpop.f32.mrb[90].mxu1 }
 0x98d   : > { %13174 = vrot.lane.b32.xlu1 %v13173_v50, %s13883_s4  ;;  %v12701_v47 = vpop.f32.mrb[91].mxu1 }
 0x98f   : > { %v9118_v35 = vpop.f32.mrb[52].mxu0 }
 0x990   : > { %v12706_v8 = vpop.f32.mrb[53].mxu0 }
 0x991   : > { %v9121_v5 = vpop.f32.mrb[54].mxu0 }
 0x992   : > { %v12707_v43 = vpop.f32.mrb[55].mxu0  ;;  %v9167_v6 = vpop.f32.mrb[92].mxu1 }
 0x993   : > { %v13178_v45 = vpack.i.bf16 %v9167_v6, %v9118_v35  ;;  %v12712_v17 = vpop.f32.mrb[93].mxu1 }
 0x994   : > { %v9170_v41 = vpop.f32.mrb[94].mxu1 }
 0x995   : > { %13179 = vrot.lane.b32.xlu0 %v13178_v45, %s13883_s4  ;;  %v12713_v28 = vpop.f32.mrb[95].mxu1 }
 0x997   : > { %v9216_v21 = vpop.f32.mrb[56].mxu0 }
 0x998   : > { %v12718_v46 = vpop.f32.mrb[57].mxu0 }
 0x999   : > { %v9219_v4 = vpop.f32.mrb[58].mxu0 }
 0x99a   : > { %v12719_v3 = vpop.f32.mrb[59].mxu0  ;;  %v9265_v18 = vpop.f32.mrb[96].mxu1 }
 0x99b   : > { %v13183_v63 = vpack.i.bf16 %v9265_v18, %v9216_v21  ;;  %v12724_v49 = vpop.f32.mrb[97].mxu1 }
 0x99c   : > { %v9268_v27 = vpop.f32.mrb[98].mxu1 }
 0x99d   : > { %13184 = vrot.lane.b32.xlu1 %v13183_v63, %s13883_s4  ;;  %v12725_v37 = vpop.f32.mrb[99].mxu1 }
 0x99f   : > { %v9314_v48 = vpop.f32.mrb[60].mxu0 }
 0x9a0   : > { %v12730_v30 = vpop.f32.mrb[61].mxu0 }
 0x9a1   : > { %v9317_v39 = vpop.f32.mrb[62].mxu0 }
 0x9a2   : > { %v12731_v10 = vpop.f32.mrb[63].mxu0  ;;  %v9363_v32 = vpop.f32.mrb[100].mxu1 }
 0x9a3   : > { %v13188_v52 = vpack.i.bf16 %v9363_v32, %v9314_v48  ;;  %v12736_v51 = vpop.f32.mrb[101].mxu1 }
 0x9a4   : > { %v9366_v25 = vpop.f32.mrb[102].mxu1 }
 0x9a5   : > { %13189 = vrot.lane.b32.xlu0 %v13188_v52, %s13883_s4  ;;  %v12737_v9 = vpop.f32.mrb[103].mxu1 }
 0x9a7   : > { %v9412_v0 = vpop.f32.mrb[64].mxu0 }
 0x9a8   : > { %v12742_v56 = vpop.f32.mrb[65].mxu0 }
 0x9a9   : > { %v9415_v36 = vpop.f32.mrb[66].mxu0 }
 0x9aa   : > { %v12743_v2 = vpop.f32.mrb[67].mxu0  ;;  %v13150_v38 = vpop.permute.xlu0 %13149 }
 0x9ab   : > { %v13152_v12 = vunpack.i.h.bf16 %v13150_v38  ;;  %v13151_v7 = vunpack.i.l.bf16 %v13150_v38  ;;  %v9461_v34 = vpop.f32.mrb[104].mxu1 }
 0x9ac   : > { %v13193_v29 = vpack.i.bf16 %v9461_v34, %v9412_v0  ;;  %v12748_v40 = vpop.f32.mrb[105].mxu1 }
 0x9ad   : > { %v9464_v14 = vpop.f32.mrb[106].mxu1  ;;  %v10183_v61 = vsel %vm3108_vm1, %v18665_v22, %v13151_v7  ;;  %v10184_v13 = vsel %vm3108_vm1, %v18666_v16, %v13152_v12 }
 0x9ae   : > { %13194 = vrot.lane.b32.xlu1 %v13193_v29, %s13883_s4  ;;  %v12749_v15 = vpop.f32.mrb[107].mxu1  ;;  %v10231_v59 = vpack.c.bf16 %v10184_v13, %v10183_v61 }
 0x9af   : > { %v9510_v20 = vpop.f32.mrb[68].mxu0 }
 0x9b0   : > { %v12754_v1 = vpop.f32.mrb[69].mxu0  ;;  %12838 = vmatprep.mubr.bf16.mxu0 %v10231_v59 }
 0x9b1   : > { %v9513_v55 = vpop.f32.mrb[70].mxu0  ;;  %v18669_v1 = vld [vmem:[#allocation43_spill] sm:$0xff] }
 0x9b2   : > { %v12755_v58 = vpop.f32.mrb[71].mxu0  ;;  %v13155_v31 = vpop.permute.xlu1 %13154 }
 0x9b3   : > { %v13157_v62 = vunpack.i.h.bf16 %v13155_v31  ;;  %v13156_v24 = vunpack.i.l.bf16 %v13155_v31  ;;  %v9559_v60 = vpop.f32.mrb[108].mxu1  ;;  %v18670_v58 = vld [vmem:[#allocation42_spill] sm:$0xff] }
 0x9b4   : > { %v13198_v53 = vpack.i.bf16 %v9559_v60, %v9510_v20  ;;  %v12760_v26 = vpop.f32.mrb[109].mxu1 }
 0x9b5   : > { %v10186_v54 = vsel %vm3108_vm1, %v18667_v23, %v13157_v62  ;;  %v10185_v33 = vsel %vm3108_vm1, %v18668_v11, %v13156_v24  ;;  %v9562_v57 = vpop.f32.mrb[110].mxu1  ;;  %v18671_v26 = vld [vmem:[#allocation79_spill] sm:$0xff] }
 0x9b6   : > { %v10232_v19 = vpack.c.bf16 %v10186_v54, %v10185_v33  ;;  %13199 = vrot.lane.b32.xlu0 %v13198_v53, %s13883_s4  ;;  %v12761_v50 = vpop.f32.mrb[111].mxu1  ;;  %v18672_v54 = vld [vmem:[#allocation67_spill] sm:$0xff] }
 0x9b7   : > { %v9608_v42 = vpop.f32.mrb[72].mxu0 }
 0x9b8   : > { %v12766_v44 = vpop.f32.mrb[73].mxu0  ;;  %12839 = vmatmul.mubr.bf16.vlgmr.msra.gmra.mrb[92].mxu0 %v10232_v19 }
 0x9b9   : > { %v9611_v47 = vpop.f32.mrb[74].mxu0 }
 0x9ba   : > { %v12767_v35 = vpop.f32.mrb[75].mxu0  ;;  %v9657_v8 = vpop.f32.mrb[112].mxu1  ;;  %v18674_v47 = vld [vmem:[#allocation47_spill] sm:$0xff] }
 0x9bb   : > { %v13203_v5 = vpack.i.bf16 %v9657_v8, %v9608_v42  ;;  %v12772_v43 = vpop.f32.mrb[113].mxu1  ;;  %v18673_v42 = vld [vmem:[#allocation86_spill] sm:$0xff] }
 0x9bc   : > { %v9660_v6 = vpop.f32.mrb[114].mxu1 }
 0x9bd   : > { %13204 = vrot.lane.b32.xlu1 %v13203_v5, %s13883_s4  ;;  %v12773_v45 = vpop.f32.mrb[115].mxu1 }
 0x9be   : > { %v18675_v45 = vld [vmem:[#allocation68_spill] sm:$0xff] }
 0x9bf   : > { %v9706_v17 = vpop.f32.mrb[76].mxu0 }
 0x9c0   : > { %v12778_v41 = vpop.f32.mrb[77].mxu0 }
 0x9c1   : > { %v9709_v28 = vpop.f32.mrb[78].mxu0  ;;  %v18676_v41 = vld [vmem:[#allocation44_spill] sm:$0xff] }
 0x9c2   : > { %v12779_v21 = vpop.f32.mrb[79].mxu0  ;;  %v9755_v46 = vpop.f32.mrb[116].mxu1 }
 0x9c3   : > { %v13208_v4 = vpack.i.bf16 %v9755_v46, %v9706_v17  ;;  %v12784_v3 = vpop.f32.mrb[117].mxu1 }
 0x9c4   : > { %v9758_v18 = vpop.f32.mrb[118].mxu1 }
 0x9c5   : > { %13209 = vrot.lane.b32.xlu0 %v13208_v4, %s13883_s4  ;;  %v12785_v63 = vpop.f32.mrb[119].mxu1  ;;  %v18677_v18 = vld [vmem:[#allocation72_spill] sm:$0xff] }
 0x9c7   : > { %v9804_v49 = vpop.f32.mrb[80].mxu0 }
 0x9c8   : > { %v12790_v27 = vpop.f32.mrb[81].mxu0 }
 0x9c9   : > { %v9807_v37 = vpop.f32.mrb[82].mxu0 }
 0x9ca   : > { %v12791_v48 = vpop.f32.mrb[83].mxu0  ;;  %v9853_v30 = vpop.f32.mrb[120].mxu1 }
 0x9cb   : > { %v13213_v39 = vpack.i.bf16 %v9853_v30, %v9804_v49  ;;  %v12796_v10 = vpop.f32.mrb[121].mxu1  ;;  %v18678_v49 = vld [vmem:[#allocation89_spill] sm:$0xff] }
 0x9cc   : > { %v9856_v32 = vpop.f32.mrb[122].mxu1  ;;  %v18679_v10 = vld [vmem:[#allocation71_spill] sm:$0xff] }
 0x9cd   : > { %13214 = vrot.lane.b32.xlu1 %v13213_v39, %s13883_s4  ;;  %v12797_v52 = vpop.f32.mrb[123].mxu1 }
 0x9ce   : > { %v18680_v52 = vld [vmem:[#allocation84_spill] sm:$0xff] }
 0x9d0   : > { %v9902_v51 = vpop.f32.mrb[84].mxu0 }
 0x9d1   : > { %v12802_v25 = vpop.f32.mrb[85].mxu0 }
 0x9d2   : > { %v9905_v9 = vpop.f32.mrb[86].mxu0 }
 0x9d3   : > { %v12803_v0 = vpop.f32.mrb[87].mxu0 }
 0x9d5   : > { %v9951_v56 = vpop.f32.mrb[124].mxu1 }
 0x9d6   : > { %v13218_v36 = vpack.i.bf16 %v9951_v56, %v9902_v51  ;;  %v12808_v2 = vpop.f32.mrb[125].mxu1 }
 0x9d7   : > { %v9954_v38 = vpop.f32.mrb[126].mxu1 }
 0x9d8   : > { %13219 = vrot.lane.b32.xlu0 %v13218_v36, %s13883_s4  ;;  %v12809_v12 = vpop.f32.mrb[127].mxu1  ;;  %v10000_v7 = vpop.f32.mrb[88].mxu0  ;;  %v18681_v36 = vld [vmem:[#allocation51_spill] sm:$0xff]  ;;  %v18682_v38 = vld [vmem:[#allocation48_spill] sm:$0xff] }
 0x9d9   : > { %v12814_v34 = vpop.f32.mrb[89].mxu0 }
 0x9da   : > { %v10003_v29 = vpop.f32.mrb[90].mxu0 }
 0x9db   : > { %v12815_v40 = vpop.f32.mrb[91].mxu0 }
 0x9dd   : > { %v10049_v14 = vpop.f32.mrb[128].mxu1 }
 0x9de   : > { %v13223_v22 = vpack.i.bf16 %v10049_v14, %v10000_v7  ;;  %v12820_v61 = vpop.f32.mrb[129].mxu1  ;;  %v18683_v14 = vld [vmem:[#allocation87_spill] sm:$0xff] }
 0x9df   : > { %v10052_v16 = vpop.f32.mrb[130].mxu1  ;;  %v18684_v61 = vld [vmem:[#allocation74_spill] sm:$0xff] }
 0x9e0   : > { %13224 = vrot.lane.b32.xlu1 %v13223_v22, %s13883_s4  ;;  %v12821_v13 = vpop.f32.mrb[131].mxu1 }
 0x9e7   : > { %v13160_v15 = vpop.permute.xlu0 %13159 }
 0x9e8   : > { %v13162_v59 = vunpack.i.h.bf16 %v13160_v15  ;;  %v13161_v20 = vunpack.i.l.bf16 %v13160_v15 }
 0x9ea   : > { %v10187_v55 = vsel %vm3108_vm1, %v18669_v1, %v13161_v20  ;;  %v10188_v31 = vsel %vm3108_vm1, %v18670_v58, %v13162_v59  ;;  %v18685_v1 = vld [vmem:[#allocation94_spill] sm:$0xff]  ;;  %v18686_v58 = vld [vmem:[#allocation49_spill] sm:$0xff] }
 0x9eb   : > { %v10233_v62 = vpack.c.bf16 %v10188_v31, %v10187_v55 }
 0x9ed   : > { %12842 = vmatprep.mubr.bf16.mxu0 %v10233_v62 }
 0x9ef   : > { %v13165_v24 = vpop.permute.xlu1 %13164 }
 0x9f0   : > { %v13167_v60 = vunpack.i.h.bf16 %v13165_v24  ;;  %v13166_v53 = vunpack.i.l.bf16 %v13165_v24 }
 0x9f2   : > { %v10190_v23 = vsel %vm3108_vm1, %v18671_v26, %v13167_v60  ;;  %v10189_v11 = vsel %vm3108_vm1, %v18672_v54, %v13166_v53  ;;  %v18687_v26 = vld [vmem:[#allocation81_spill] sm:$0xff] }
 0x9f3   : > { %v10234_v33 = vpack.c.bf16 %v10190_v23, %v10189_v11  ;;  %v18688_v54 = vld [vmem:[#allocation73_spill] sm:$0xff] }
 0x9f5   : > { %12843 = vmatmul.mubr.bf16.gmra.mrb[96].mxu0 %v10234_v33 }
 0x9f7   : > { %v13170_v57 = vpop.permute.xlu0 %13169 }
 0x9f8   : > { %v13172_v19 = vunpack.i.h.bf16 %v13170_v57  ;;  %v13171_v50 = vunpack.i.l.bf16 %v13170_v57 }
 0x9fa   : > { %v10191_v44 = vsel %vm3108_vm1, %v18673_v42, %v13171_v50  ;;  %v10192_v35 = vsel %vm3108_vm1, %v18674_v47, %v13172_v19  ;;  %v18689_v42 = vld [vmem:[#allocation66_spill] sm:$0xff]  ;;  %v18690_v47 = vld [vmem:[#allocation97_spill] sm:$0xff] }
 0x9fb   : > { %v10235_v8 = vpack.c.bf16 %v10192_v35, %v10191_v44 }
 0x9fd   : > { %12846 = vmatprep.mubr.bf16.mxu0 %v10235_v8 }
 0x9ff   : > { %v13175_v5 = vpop.permute.xlu1 %13174 }
 0xa00   : > { %v13177_v43 = vunpack.i.h.bf16 %v13175_v5  ;;  %v13176_v6 = vunpack.i.l.bf16 %v13175_v5 }
 0xa02   : > { %v10194_v17 = vsel %vm3108_vm1, %v18675_v45, %v13177_v43  ;;  %v10193_v28 = vsel %vm3108_vm1, %v18676_v41, %v13176_v6  ;;  %v18691_v45 = vld [vmem:[#allocation45_spill] sm:$0xff]  ;;  %v18692_v41 = vld [vmem:[#allocation78_spill] sm:$0xff] }
 0xa03   : > { %v10236_v21 = vpack.c.bf16 %v10194_v17, %v10193_v28 }
 0xa05   : > { %12847 = vmatmul.mubr.bf16.gmra.mrb[100].mxu0 %v10236_v21 }
 0xa07   : > { %v13180_v46 = vpop.permute.xlu0 %13179 }
 0xa08   : > { %v13182_v4 = vunpack.i.h.bf16 %v13180_v46  ;;  %v13181_v3 = vunpack.i.l.bf16 %v13180_v46 }
 0xa0a   : > { %v10195_v63 = vsel %vm3108_vm1, %v18677_v18, %v13181_v3  ;;  %v10196_v27 = vsel %vm3108_vm1, %v18678_v49, %v13182_v4  ;;  %v18693_v18 = vld [vmem:[#allocation88_spill] sm:$0xff]  ;;  %v18694_v49 = vld [vmem:[#allocation69_spill] sm:$0xff] }
 0xa0b   : > { %v10237_v37 = vpack.c.bf16 %v10196_v27, %v10195_v63 }
 0xa0d   : > { %12850 = vmatprep.mubr.bf16.mxu0 %v10237_v37 }
 0xa0f   : > { %v13185_v48 = vpop.permute.xlu1 %13184 }
 0xa10   : > { %v13187_v30 = vunpack.i.h.bf16 %v13185_v48  ;;  %v13186_v39 = vunpack.i.l.bf16 %v13185_v48 }
 0xa12   : > { %v10198_v32 = vsel %vm3108_vm1, %v18679_v10, %v13187_v30  ;;  %v10197_v51 = vsel %vm3108_vm1, %v18680_v52, %v13186_v39  ;;  %v18695_v10 = vld [vmem:[#allocation46_spill] sm:$0xff]  ;;  %v18696_v52 = vld [vmem:[#allocation85_spill] sm:$0xff] }
 0xa13   : > { %v10238_v25 = vpack.c.bf16 %v10198_v32, %v10197_v51 }
 0xa15   : > { %12851 = vmatmul.mubr.bf16.gmra.mrb[104].mxu0 %v10238_v25 }
 0xa17   : > { %v13190_v9 = vpop.permute.xlu0 %13189 }
 0xa18   : > { %v13192_v0 = vunpack.i.h.bf16 %v13190_v9  ;;  %v13191_v56 = vunpack.i.l.bf16 %v13190_v9  ;;  %v17547_v9 = vld [vmem:[%s18077_s8 + $0x8] sm:$0xf] }
 0xa1a   : > { %v10199_v2 = vsel %vm3108_vm1, %v18681_v36, %v13191_v56  ;;  %v10200_v12 = vsel %vm3108_vm1, %v18682_v38, %v13192_v0  ;;  %v18697_v0 = vld [vmem:[#allocation20_spill] sm:$0xff]  ;;  %v18699_v38 = vld [vmem:[#allocation21_spill] sm:$0xff] }
 0xa1b   : > { %v10239_v7 = vpack.c.bf16 %v10200_v12, %v10199_v2  ;;  %v18698_v56 = vsub.s32 0, %v18697_v0 }
 0xa1d   : > { %12854 = vmatprep.mubr.bf16.mxu0 %v10239_v7  ;;  %v17552_v36 = vrot.slane %v17547_v9, %v18698_v56  ;;  %v18714_v56 = vld [vmem:[#allocation33_spill] sm:$0xff] }
 0xa20   : > { %v13195_v34 = vpop.permute.xlu1 %13194 }
 0xa21   : > { %v13197_v29 = vunpack.i.h.bf16 %v13195_v34  ;;  %v13196_v40 = vunpack.i.l.bf16 %v13195_v34 }
 0xa23   : > { %v10202_v22 = vsel %vm3108_vm1, %v18683_v14, %v13197_v29  ;;  %v10201_v16 = vsel %vm3108_vm1, %v18684_v61, %v13196_v40  ;;  %v18700_v40 = vld [vmem:[#allocation24_spill] sm:$0xff]  ;;  %v18701_v61 = vld [vmem:[#allocation25_spill] sm:$0xff] }
 0xa24   : > { %v10240_v13 = vpack.c.bf16 %v10202_v22, %v10201_v16 }
 0xa26   : > { %12855 = vmatmul.mubr.bf16.gmra.mrb[108].mxu0 %v10240_v13 }
 0xa28   : > { %v13200_v15 = vpop.permute.xlu0 %13199 }
 0xa29   : > { %v13202_v59 = vunpack.i.h.bf16 %v13200_v15  ;;  %v13201_v20 = vunpack.i.l.bf16 %v13200_v15 }
 0xa2b   : > { %v10203_v55 = vsel %vm3108_vm1, %v18685_v1, %v13201_v20  ;;  %v10204_v31 = vsel %vm3108_vm1, %v18686_v58, %v13202_v59  ;;  %v18702_v59 = vld [vmem:[#allocation22_spill] sm:$0xff]  ;;  %v18703_v58 = vld [vmem:[#allocation27_spill] sm:$0xff] }
 0xa2c   : > { %v10241_v62 = vpack.c.bf16 %v10204_v31, %v10203_v55 }
 0xa2e   : > { %12858 = vmatprep.mubr.bf16.mxu0 %v10241_v62 }
 0xa2f   : > { %v13205_v24 = vpop.permute.xlu1 %13204 }
 0xa30   : > { %v13207_v60 = vunpack.i.h.bf16 %v13205_v24  ;;  %v13206_v53 = vunpack.i.l.bf16 %v13205_v24 }
 0xa32   : > { %v10206_v23 = vsel %vm3108_vm1, %v18687_v26, %v13207_v60  ;;  %v10205_v11 = vsel %vm3108_vm1, %v18688_v54, %v13206_v53  ;;  %v18704_v53 = vld [vmem:[#allocation23_spill] sm:$0xff] }
 0xa33   : > { %v10242_v33 = vpack.c.bf16 %v10206_v23, %v10205_v11  ;;  %v18705_v23 = vld [vmem:[#allocation28_spill] sm:$0xff] }
 0xa35   : > { %12859 = vmatmul.mubr.bf16.gmra.mrb[112].mxu0 %v10242_v33 }
 0xa37   : > { %v13210_v57 = vpop.permute.xlu0 %13209 }
 0xa38   : > { %v13212_v19 = vunpack.i.h.bf16 %v13210_v57  ;;  %v13211_v50 = vunpack.i.l.bf16 %v13210_v57  ;;  %v18706_v57 = vld [vmem:[#allocation26_spill] sm:$0xff] }
 0xa3a   : > { %v10207_v44 = vsel %vm3108_vm1, %v18689_v42, %v13211_v50  ;;  %v10208_v35 = vsel %vm3108_vm1, %v18690_v47, %v13212_v19  ;;  %v18707_v47 = vld [vmem:[#allocation32_spill] sm:$0xff] }
 0xa3b   : > { %v10243_v8 = vpack.c.bf16 %v10208_v35, %v10207_v44 }
 0xa3d   : > { %12862 = vmatprep.mubr.bf16.mxu0 %v10243_v8 }
 0xa3f   : > { %v13215_v5 = vpop.permute.xlu1 %13214 }
 0xa40   : > { %v13217_v43 = vunpack.i.h.bf16 %v13215_v5  ;;  %v13216_v6 = vunpack.i.l.bf16 %v13215_v5 }
 0xa42   : > { %v10210_v17 = vsel %vm3108_vm1, %v18691_v45, %v13217_v43  ;;  %v10209_v28 = vsel %vm3108_vm1, %v18692_v41, %v13216_v6  ;;  %v18708_v6 = vld [vmem:[#allocation29_spill] sm:$0xff] }
 0xa43   : > { %v10244_v21 = vpack.c.bf16 %v10210_v17, %v10209_v28  ;;  %v18709_v17 = vld [vmem:[#allocation31_spill] sm:$0xff] }
 0xa45   : > { %12863 = vmatmul.mubr.bf16.gmra.mrb[116].mxu0 %v10244_v21 }
 0xa4a   : > { %v13220_v46 = vpop.permute.xlu0 %13219 }
 0xa4b   : > { %v13222_v4 = vunpack.i.h.bf16 %v13220_v46  ;;  %v13221_v3 = vunpack.i.l.bf16 %v13220_v46  ;;  %v18710_v46 = vld [vmem:[#allocation30_spill] sm:$0xff] }
 0xa4d   : > { %v10211_v63 = vsel %vm3108_vm1, %v18693_v18, %v13221_v3  ;;  %v10212_v27 = vsel %vm3108_vm1, %v18694_v49, %v13222_v4  ;;  %v18711_v49 = vld [vmem:[#allocation53_spill] sm:$0xff] }
 0xa4e   : > { %v10245_v37 = vpack.c.bf16 %v10212_v27, %v10211_v63 }
 0xa50   : > { %12866 = vmatprep.mubr.bf16.mxu0 %v10245_v37 }
 0xa52   : > { %v13225_v48 = vpop.permute.xlu1 %13224 }
 0xa53   : > { %v13227_v30 = vunpack.i.h.bf16 %v13225_v48  ;;  %v13226_v39 = vunpack.i.l.bf16 %v13225_v48 }
 0xa55   : > { %v10214_v32 = vsel %vm3108_vm1, %v18695_v10, %v13227_v30  ;;  %v10213_v51 = vsel %vm3108_vm1, %v18696_v52, %v13226_v39  ;;  %v18712_v39 = vld [vmem:[#allocation34_spill] sm:$0xff] }
 0xa56   : > { %v10246_v25 = vpack.c.bf16 %v10214_v32, %v10213_v51  ;;  %v18713_v32 = vld [vmem:[#allocation55_spill] sm:$0xff] }
 0xa58   : > { %12867 = vmatmul.mubr.bf16.gmra.mrb[120].mxu0 %v10246_v25 }
 0xa8b   : > { %v12840_v2 = vpop.f32.mrb[92].mxu0 }
 0xa8c   : > { %v10458_v12 = vadd.f32 %v12840_v2, %v18699_v38  ;;  %v10329_v7 = vpop.f32.mrb[93].mxu0 }
 0xa8d   : > { %v12841_v34 = vpop.f32.mrb[94].mxu0  ;;  %v10456_v14 = vadd.f32 %v10329_v7, %v18700_v40 }
 0xa8e   : > { %v17556_v29 = vadd.f32 %v17552_v36, %v10458_v12  ;;  %v10332_v22 = vpop.f32.mrb[95].mxu0  ;;  %v10459_v20 = vadd.f32 %v12841_v34, %v18702_v59  ;;  %v18715_v34 = vld [vmem:[#allocation54_spill] sm:$0xff] }
 0xa8f   : > { %v10457_v16 = vadd.f32 %v10332_v22, %v18701_v61  ;;  %v17565_v15 = vadd.f32 %v17552_v36, %v10456_v14 }
 0xa90   : > { %10528 = vadd.xlane.f32.xlu0 %v17556_v29  ;;  %v17571_v1 = vadd.f32 %v17552_v36, %v10459_v20  ;;  %v18717_v20 = vld [vmem:[#allocation36_spill] sm:$0xff] }
 0xa91   : > { %v17562_v13 = vadd.f32 %v17552_v36, %v10457_v16  ;;  %v18716_v16 = vld [vmem:[#allocation35_spill] sm:$0xff] }
 0xa93   : > { %10526 = vadd.xlane.f32.xlu1 %v17562_v13 }
 0xa94   : > { %10524 = vadd.xlane.f32.xlu0 %v17565_v15 }
 0xa98   : > { %10530 = vadd.xlane.f32.xlu0 %v17571_v1 }
 0xac8   : > { %v12844_v55 = vpop.f32.mrb[96].mxu0 }
 0xac9   : > { %v10462_v31 = vadd.f32 %v12844_v55, %v18703_v58  ;;  %v10345_v62 = vpop.f32.mrb[97].mxu0 }
 0xaca   : > { %v12845_v24 = vpop.f32.mrb[98].mxu0  ;;  %v10460_v26 = vadd.f32 %v10345_v62, %v18704_v53  ;;  %v18718_v62 = vld [vmem:[#allocation56_spill] sm:$0xff] }
 0xacb   : > { %v17576_v60 = vadd.f32 %v17552_v36, %v10462_v31  ;;  %v10463_v54 = vadd.f32 %v12845_v24, %v18705_v23  ;;  %v10348_v11 = vpop.f32.mrb[99].mxu0 }
 0xacc   : > { %v10461_v19 = vadd.f32 %v10348_v11, %v18706_v57  ;;  %v17586_v50 = vadd.f32 %v17552_v36, %v10460_v26 }
 0xacd   : > { %v17581_v33 = vadd.f32 %v17552_v36, %v10463_v54  ;;  %10536 = vadd.xlane.f32.xlu1 %v17576_v60  ;;  %v18719_v54 = vld [vmem:[#allocation38_spill] sm:$0xff] }
 0xace   : > { %v17590_v42 = vadd.f32 %v17552_v36, %v10461_v19 }
 0xacf   : > { %10538 = vadd.xlane.f32.xlu0 %v17581_v33 }
 0xad1   : > { %10532 = vadd.xlane.f32.xlu1 %v17586_v50 }
 0xad3   : > { %10534 = vadd.xlane.f32.xlu0 %v17590_v42 }
 0xad8   : > { %v12848_v44 = vpop.f32.mrb[100].mxu0 }
 0xad9   : > { %v10466_v35 = vadd.f32 %v12848_v44, %v18707_v47  ;;  %v10361_v8 = vpop.f32.mrb[101].mxu0  ;;  %v18720_v47 = vld [vmem:[#allocation37_spill] sm:$0xff] }
 0xada   : > { %v12849_v5 = vpop.f32.mrb[102].mxu0  ;;  %v10464_v45 = vadd.f32 %v10361_v8, %v18708_v6  ;;  %v18721_v8 = vld [vmem:[#allocation59_spill] sm:$0xff] }
 0xadb   : > { %v17596_v43 = vadd.f32 %v17552_v36, %v10466_v35  ;;  %v10467_v41 = vadd.f32 %v12849_v5, %v18709_v17  ;;  %v10364_v28 = vpop.f32.mrb[103].mxu0  ;;  %v18722_v17 = vld [vmem:[#allocation57_spill] sm:$0xff] }
 0xadc   : > { %v10465_v4 = vadd.f32 %v10364_v28, %v18710_v46  ;;  %v17606_v3 = vadd.f32 %v17552_v36, %v10464_v45 }
 0xadd   : > { %v17601_v21 = vadd.f32 %v17552_v36, %v10467_v41  ;;  %10544 = vadd.xlane.f32.xlu1 %v17596_v43 }
 0xade   : > { %v17610_v18 = vadd.f32 %v17552_v36, %v10465_v4 }
 0xadf   : > { %10546 = vadd.xlane.f32.xlu0 %v17601_v21 }
 0xae1   : > { %10540 = vadd.xlane.f32.xlu1 %v17606_v3 }
 0xae3   : > { %10542 = vadd.xlane.f32.xlu0 %v17610_v18 }
 0xae8   : > { %v12852_v63 = vpop.f32.mrb[104].mxu0 }
 0xae9   : > { %v10470_v27 = vadd.f32 %v12852_v63, %v18711_v49  ;;  %v10377_v37 = vpop.f32.mrb[105].mxu0  ;;  %v18723_v63 = vld [vmem:[#allocation61_spill] sm:$0xff] }
 0xaea   : > { %v12853_v48 = vpop.f32.mrb[106].mxu0  ;;  %v10468_v10 = vadd.f32 %v10377_v37, %v18712_v39  ;;  %v18724_v39 = vld [vmem:[#allocation58_spill] sm:$0xff] }
 0xaeb   : > { %v17616_v30 = vadd.f32 %v17552_v36, %v10470_v27  ;;  %v10471_v52 = vadd.f32 %v12853_v48, %v18713_v32  ;;  %v10380_v51 = vpop.f32.mrb[107].mxu0  ;;  %v18725_v32 = vld [vmem:[#allocation63_spill] sm:$0xff] }
 0xaec   : > { %v10469_v2 = vadd.f32 %v10380_v51, %v18714_v56  ;;  %v17626_v38 = vadd.f32 %v17552_v36, %v10468_v10 }
 0xaed   : > { %v17621_v25 = vadd.f32 %v17552_v36, %v10471_v52  ;;  %10552 = vadd.xlane.f32.xlu1 %v17616_v30 }
 0xaee   : > { %v17630_v12 = vadd.f32 %v17552_v36, %v10469_v2  ;;  %v18726_v2 = vld [vmem:[#allocation60_spill] sm:$0xff] }
 0xaef   : > { %10554 = vadd.xlane.f32.xlu0 %v17621_v25 }
 0xaf1   : > { %10548 = vadd.xlane.f32.xlu1 %v17626_v38 }
 0xaf3   : > { %10550 = vadd.xlane.f32.xlu0 %v17630_v12 }
 0xaf9   : > { %v12856_v7 = vpop.f32.mrb[108].mxu0 }
 0xafa   : > { %v10474_v40 = vadd.f32 %v12856_v7, %v18715_v34  ;;  %v10393_v14 = vpop.f32.mrb[109].mxu0 }
 0xafb   : > { %v12857_v22 = vpop.f32.mrb[110].mxu0  ;;  %v10472_v59 = vadd.f32 %v10393_v14, %v18716_v16 }
 0xafc   : > { %v17636_v61 = vadd.f32 %v17552_v36, %v10474_v40  ;;  %v10475_v55 = vadd.f32 %v12857_v22, %v18717_v20  ;;  %v10396_v58 = vpop.f32.mrb[111].mxu0  ;;  %v18727_v20 = vld [vmem:[#allocation64_spill] sm:$0xff] }
 0xafd   : > { %v10473_v24 = vadd.f32 %v10396_v58, %v18718_v62  ;;  %v17646_v53 = vadd.f32 %v17552_v36, %v10472_v59 }
 0xafe   : > { %v17641_v31 = vadd.f32 %v17552_v36, %v10475_v55  ;;  %10560 = vadd.xlane.f32.xlu1 %v17636_v61 }
 0xaff   : > { %v17650_v26 = vadd.f32 %v17552_v36, %v10473_v24 }
 0xb00   : > { %10562 = vadd.xlane.f32.xlu0 %v17641_v31 }
 0xb02   : > { %10556 = vadd.xlane.f32.xlu1 %v17646_v53 }
 0xb04   : > { %10558 = vadd.xlane.f32.xlu0 %v17650_v26 }
 0xb08   : > { %v12860_v23 = vpop.f32.mrb[112].mxu0 }
 0xb09   : > { %v10478_v11 = vadd.f32 %v12860_v23, %v18719_v54  ;;  %v10409_v57 = vpop.f32.mrb[113].mxu0  ;;  %v18728_v54 = vld [vmem:[#allocation62_spill] sm:$0xff] }
 0xb0a   : > { %v12861_v19 = vpop.f32.mrb[114].mxu0  ;;  %v10476_v35 = vadd.f32 %v10409_v57, %v18720_v47 }
 0xb0b   : > { %v17656_v44 = vadd.f32 %v17552_v36, %v10478_v11  ;;  %v10479_v5 = vadd.f32 %v12861_v19, %v18721_v8  ;;  %v10412_v6 = vpop.f32.mrb[115].mxu0  ;;  %v18729_v19 = vld [vmem:[#allocation39_spill] sm:$0xff]  ;;  %v18730_v8 = vld [vmem:[#allocation40_spill] sm:$0xff] }
 0xb0c   : > { %v10477_v41 = vadd.f32 %v10412_v6, %v18722_v17  ;;  %v17666_v28 = vadd.f32 %v17552_v36, %v10476_v35 }
 0xb0d   : > { %v17661_v45 = vadd.f32 %v17552_v36, %v10479_v5  ;;  %10568 = vadd.xlane.f32.xlu1 %v17656_v44 }
 0xb0e   : > { %v17670_v46 = vadd.f32 %v17552_v36, %v10477_v41 }
 0xb0f   : > { %10570 = vadd.xlane.f32.xlu0 %v17661_v45 }
 0xb11   : > { %10564 = vadd.xlane.f32.xlu1 %v17666_v28 }
 0xb13   : > { %10566 = vadd.xlane.f32.xlu0 %v17670_v46 }
 0xb18   : > { %v12864_v4 = vpop.f32.mrb[116].mxu0 }
 0xb19   : > { %v10482_v49 = vadd.f32 %v12864_v4, %v18723_v63  ;;  %v10425_v27 = vpop.f32.mrb[117].mxu0 }
 0xb1a   : > { %v12865_v37 = vpop.f32.mrb[118].mxu0  ;;  %v10480_v10 = vadd.f32 %v10425_v27, %v18724_v39 }
 0xb1b   : > { %v17676_v48 = vadd.f32 %v17552_v36, %v10482_v49  ;;  %v10483_v52 = vadd.f32 %v12865_v37, %v18725_v32  ;;  %v10428_v51 = vpop.f32.mrb[119].mxu0 }
 0xb1c   : > { %v10481_v7 = vadd.f32 %v10428_v51, %v18726_v2  ;;  %v17686_v34 = vadd.f32 %v17552_v36, %v10480_v10 }
 0xb1d   : > { %v17681_v56 = vadd.f32 %v17552_v36, %v10483_v52  ;;  %10576 = vadd.xlane.f32.xlu1 %v17676_v48  ;;  %v10529_v14 = vpop.xlane.xlu0 %10528 }
 0xb1e   : > { %v17690_v40 = vadd.f32 %v17552_v36, %v10481_v7  ;;  %v10591_v23 = vmul.f32 0.0078125, %v10529_v14 }
 0xb1f   : > { %10578 = vadd.xlane.f32.xlu0 %v17681_v56 }
 0xb20   : > { %v10527_v17 = vpop.xlane.xlu1 %10526  ;;  %v17706_v41 = vsub.f32 %v17556_v29, %v10591_v23 }
 0xb21   : > { %10572 = vadd.xlane.f32.xlu1 %v17686_v34  ;;  %v10525_v22 = vpop.xlane.xlu0 %10524  ;;  %v10590_v49 = vmul.f32 0.0078125, %v10527_v17 }
 0xb22   : > { %v10589_v4 = vmul.f32 0.0078125, %v10525_v22  ;;  %v10655_v29 = vmul.f32 %v17706_v41, %v17706_v41 }
 0xb23   : > { %10574 = vadd.xlane.f32.xlu0 %v17690_v40  ;;  %v17726_v10 = vsub.f32 %v17562_v13, %v10590_v49 }
 0xb24   : > { %v17720_v39 = vsub.f32 %v17565_v15, %v10589_v4 }
 0xb25   : > { %v10531_v62 = vpop.xlane.xlu0 %10530  ;;  %v10654_v15 = vmul.f32 %v17726_v10, %v17726_v10 }
 0xb26   : > { %v10592_v35 = vmul.f32 0.0078125, %v10531_v62 }
 0xb28   : > { %v17713_v27 = vsub.f32 %v17571_v1, %v10592_v35 }
 0xb2a   : > { %v10656_v1 = vmul.f32 %v17713_v27, %v17713_v27 }
 0xb2b   : > { %v12868_v16 = vpop.f32.mrb[120].mxu0 }
 0xb2c   : > { %v10441_v59 = vpop.f32.mrb[121].mxu0  ;;  %v10486_v11 = vadd.f32 %v12868_v16, %v18728_v54 }
 0xb2d   : > { %v10484_v55 = vadd.f32 %v10441_v59, %v18727_v20  ;;  %v12869_v58 = vpop.f32.mrb[122].mxu0 }
 0xb2e   : > { %v10444_v24 = vpop.f32.mrb[123].mxu0  ;;  %v10487_v5 = vadd.f32 %v12869_v58, %v18730_v8  ;;  %v17709_v63 = vadd.f32 %v17552_v36, %v10486_v11 }
 0xb2f   : > { %v17697_v57 = vadd.f32 %v17552_v36, %v10484_v55  ;;  %v10485_v47 = vadd.f32 %v10444_v24, %v18729_v19 }
 0xb30   : > { %v17716_v37 = vadd.f32 %v17552_v36, %v10487_v5 }
 0xb31   : > { %v17702_v6 = vadd.f32 %v17552_v36, %v10485_v47  ;;  %10580 = vadd.xlane.f32.xlu1 %v17697_v57  ;;  %v10653_v36 = vmul.f32 %v17720_v39, %v17720_v39 }
 0xb33   : > { %10582 = vadd.xlane.f32.xlu0 %v17702_v6 }
 0xb35   : > { %10584 = vadd.xlane.f32.xlu1 %v17709_v63 }
 0xb37   : > { %10586 = vadd.xlane.f32.xlu0 %v17716_v37 }
 0xb39   : > { %10689 = vadd.xlane.f32.xlu1 %v10655_v29 }
 0xb3b   : > { %10691 = vadd.xlane.f32.xlu0 %v10656_v1 }
 0xb3d   : > { %10685 = vadd.xlane.f32.xlu1 %v10653_v36 }
 0xb3f   : > { %10687 = vadd.xlane.f32.xlu0 %v10654_v15 }
 0xb5a   : > { %v10537_v32 = vpop.xlane.xlu1 %10536 }
 0xb5b   : > { %v10595_v52 = vmul.f32 0.0078125, %v10537_v32 }
 0xb5c   : > { %v10539_v51 = vpop.xlane.xlu0 %10538 }
 0xb5d   : > { %v17735_v2 = vsub.f32 %v17576_v60, %v10595_v52  ;;  %v10596_v13 = vmul.f32 0.0078125, %v10539_v51 }
 0xb5e   : > { %v10533_v7 = vpop.xlane.xlu1 %10532 }
 0xb5f   : > { %v17738_v14 = vsub.f32 %v17581_v33, %v10596_v13  ;;  %v10593_v22 = vmul.f32 0.0078125, %v10533_v7  ;;  %v10659_v16 = vmul.f32 %v17735_v2, %v17735_v2 }
 0xb60   : > { %v10535_v59 = vpop.xlane.xlu0 %10534 }
 0xb61   : > { %v17743_v20 = vsub.f32 %v17586_v50, %v10593_v22  ;;  %v10594_v55 = vmul.f32 0.0078125, %v10535_v59  ;;  %10697 = vadd.xlane.f32.xlu1 %v10659_v16  ;;  %v10660_v58 = vmul.f32 %v17738_v14, %v17738_v14 }
 0xb63   : > { %v17748_v60 = vsub.f32 %v17590_v42, %v10594_v55  ;;  %10699 = vadd.xlane.f32.xlu0 %v10660_v58  ;;  %v10657_v33 = vmul.f32 %v17743_v20, %v17743_v20 }
 0xb65   : > { %10693 = vadd.xlane.f32.xlu1 %v10657_v33  ;;  %v10658_v62 = vmul.f32 %v17748_v60, %v17748_v60 }
 0xb67   : > { %10695 = vadd.xlane.f32.xlu0 %v10658_v62 }
 0xb6a   : > { %v10545_v24 = vpop.xlane.xlu1 %10544 }
 0xb6b   : > { %v10599_v50 = vmul.f32 0.0078125, %v10545_v24 }
 0xb6c   : > { %v10547_v23 = vpop.xlane.xlu0 %10546 }
 0xb6d   : > { %v17755_v54 = vsub.f32 %v17596_v43, %v10599_v50  ;;  %v10600_v11 = vmul.f32 0.0078125, %v10547_v23 }
 0xb6e   : > { %v10541_v19 = vpop.xlane.xlu1 %10540 }
 0xb6f   : > { %v17758_v42 = vsub.f32 %v17601_v21, %v10600_v11  ;;  %v10597_v47 = vmul.f32 0.0078125, %v10541_v19  ;;  %v10663_v35 = vmul.f32 %v17755_v54, %v17755_v54 }
 0xb70   : > { %v10543_v8 = vpop.xlane.xlu0 %10542 }
 0xb71   : > { %v17763_v5 = vsub.f32 %v17606_v3, %v10597_v47  ;;  %v10598_v17 = vmul.f32 0.0078125, %v10543_v8  ;;  %10705 = vadd.xlane.f32.xlu1 %v10663_v35  ;;  %v10664_v4 = vmul.f32 %v17758_v42, %v17758_v42 }
 0xb73   : > { %v17768_v43 = vsub.f32 %v17610_v18, %v10598_v17  ;;  %10707 = vadd.xlane.f32.xlu0 %v10664_v4  ;;  %v10661_v21 = vmul.f32 %v17763_v5, %v17763_v5 }
 0xb75   : > { %10701 = vadd.xlane.f32.xlu1 %v10661_v21  ;;  %v10662_v49 = vmul.f32 %v17768_v43, %v17768_v43 }
 0xb77   : > { %10703 = vadd.xlane.f32.xlu0 %v10662_v49 }
 0xb7a   : > { %v10553_v29 = vpop.xlane.xlu1 %10552 }
 0xb7b   : > { %v10603_v3 = vmul.f32 0.0078125, %v10553_v29 }
 0xb7c   : > { %v10555_v1 = vpop.xlane.xlu0 %10554 }
 0xb7d   : > { %v17775_v36 = vsub.f32 %v17616_v30, %v10603_v3  ;;  %v10604_v15 = vmul.f32 0.0078125, %v10555_v1 }
 0xb7e   : > { %v10549_v32 = vpop.xlane.xlu1 %10548 }
 0xb7f   : > { %v17778_v18 = vsub.f32 %v17621_v25, %v10604_v15  ;;  %v10601_v52 = vmul.f32 0.0078125, %v10549_v32  ;;  %v10667_v51 = vmul.f32 %v17775_v36, %v17775_v36 }
 0xb80   : > { %v10551_v13 = vpop.xlane.xlu0 %10550 }
 0xb81   : > { %v17783_v7 = vsub.f32 %v17626_v38, %v10601_v52  ;;  %v10602_v22 = vmul.f32 0.0078125, %v10551_v13  ;;  %10713 = vadd.xlane.f32.xlu1 %v10667_v51  ;;  %v10668_v16 = vmul.f32 %v17778_v18, %v17778_v18 }
 0xb83   : > { %v17788_v30 = vsub.f32 %v17630_v12, %v10602_v22  ;;  %10715 = vadd.xlane.f32.xlu0 %v10668_v16  ;;  %v10665_v25 = vmul.f32 %v17783_v7, %v17783_v7 }
 0xb85   : > { %10709 = vadd.xlane.f32.xlu1 %v10665_v25  ;;  %v10666_v59 = vmul.f32 %v17788_v30, %v17788_v30 }
 0xb87   : > { %10711 = vadd.xlane.f32.xlu0 %v10666_v59 }
 0xb8b   : > { %v10561_v55 = vpop.xlane.xlu1 %10560 }
 0xb8c   : > { %v10607_v38 = vmul.f32 0.0078125, %v10561_v55 }
 0xb8d   : > { %v10563_v58 = vpop.xlane.xlu0 %10562 }
 0xb8e   : > { %v17795_v33 = vsub.f32 %v17636_v61, %v10607_v38  ;;  %v10608_v62 = vmul.f32 0.0078125, %v10563_v58 }
 0xb8f   : > { %v10557_v24 = vpop.xlane.xlu1 %10556 }
 0xb90   : > { %v17798_v12 = vsub.f32 %v17641_v31, %v10608_v62  ;;  %v10605_v50 = vmul.f32 0.0078125, %v10557_v24  ;;  %v10671_v23 = vmul.f32 %v17795_v33, %v17795_v33 }
 0xb91   : > { %v10559_v11 = vpop.xlane.xlu0 %10558 }
 0xb92   : > { %v17803_v19 = vsub.f32 %v17646_v53, %v10605_v50  ;;  %v10606_v47 = vmul.f32 0.0078125, %v10559_v11  ;;  %10721 = vadd.xlane.f32.xlu1 %v10671_v23  ;;  %v10672_v35 = vmul.f32 %v17798_v12, %v17798_v12 }
 0xb94   : > { %v17808_v61 = vsub.f32 %v17650_v26, %v10606_v47  ;;  %10723 = vadd.xlane.f32.xlu0 %v10672_v35  ;;  %v10669_v31 = vmul.f32 %v17803_v19, %v17803_v19 }
 0xb96   : > { %10717 = vadd.xlane.f32.xlu1 %v10669_v31  ;;  %v10670_v8 = vmul.f32 %v17808_v61, %v17808_v61 }
 0xb98   : > { %10719 = vadd.xlane.f32.xlu0 %v10670_v8 }
 0xb9a   : > { %v10569_v17 = vpop.xlane.xlu1 %10568 }
 0xb9b   : > { %v10611_v53 = vmul.f32 0.0078125, %v10569_v17 }
 0xb9c   : > { %v10571_v4 = vpop.xlane.xlu0 %10570 }
 0xb9d   : > { %v17815_v21 = vsub.f32 %v17656_v44, %v10611_v53  ;;  %v10612_v49 = vmul.f32 0.0078125, %v10571_v4 }
 0xb9e   : > { %v10565_v29 = vpop.xlane.xlu1 %10564 }
 0xb9f   : > { %v17818_v26 = vsub.f32 %v17661_v45, %v10612_v49  ;;  %v10609_v3 = vmul.f32 0.0078125, %v10565_v29  ;;  %v10675_v1 = vmul.f32 %v17815_v21, %v17815_v21 }
 0xba0   : > { %v10567_v15 = vpop.xlane.xlu0 %10566 }
 0xba1   : > { %v17823_v32 = vsub.f32 %v17666_v28, %v10609_v3  ;;  %v10610_v52 = vmul.f32 0.0078125, %v10567_v15  ;;  %10729 = vadd.xlane.f32.xlu1 %v10675_v1  ;;  %v10676_v51 = vmul.f32 %v17818_v26, %v17818_v26 }
 0xba3   : > { %v17828_v44 = vsub.f32 %v17670_v46, %v10610_v52  ;;  %10731 = vadd.xlane.f32.xlu0 %v10676_v51  ;;  %v10673_v45 = vmul.f32 %v17823_v32, %v17823_v32 }
 0xba5   : > { %10725 = vadd.xlane.f32.xlu1 %v10673_v45  ;;  %v10674_v13 = vmul.f32 %v17828_v44, %v17828_v44 }
 0xba7   : > { %10727 = vadd.xlane.f32.xlu0 %v10674_v13 }
 0xbaa   : > { %v10577_v22 = vpop.xlane.xlu1 %10576 }
 0xbab   : > { %v10615_v28 = vmul.f32 0.0078125, %v10577_v22 }
 0xbac   : > { %v10579_v16 = vpop.xlane.xlu0 %10578 }
 0xbad   : > { %v17835_v25 = vsub.f32 %v17676_v48, %v10615_v28  ;;  %v10616_v59 = vmul.f32 0.0078125, %v10579_v16 }
 0xbae   : > { %v10573_v55 = vpop.xlane.xlu1 %10572 }
 0xbaf   : > { %v17838_v46 = vsub.f32 %v17681_v56, %v10616_v59  ;;  %v10613_v38 = vmul.f32 0.0078125, %v10573_v55  ;;  %v10679_v58 = vmul.f32 %v17835_v25, %v17835_v25 }
 0xbb0   : > { %v10575_v62 = vpop.xlane.xlu0 %10574 }
 0xbb1   : > { %v17843_v24 = vsub.f32 %v17686_v34, %v10613_v38  ;;  %v10614_v50 = vmul.f32 0.0078125, %v10575_v62  ;;  %10737 = vadd.xlane.f32.xlu1 %v10679_v58  ;;  %v10680_v23 = vmul.f32 %v17838_v46, %v17838_v46  ;;  %v18731_v58 = vsub.s32 1, %v18697_v0 }
 0xbb3   : > { %v17848_v48 = vsub.f32 %v17690_v40, %v10614_v50  ;;  %10739 = vadd.xlane.f32.xlu0 %v10680_v23  ;;  %v10677_v56 = vmul.f32 %v17843_v24, %v17843_v24  ;;  %v17878_v62 = vrot.slane %v17547_v9, %v18731_v58  ;;  %v18732_v23 = vsub.s32 2, %v18697_v0 }
 0xbb5   : > { %10733 = vadd.xlane.f32.xlu1 %v10677_v56  ;;  %v10678_v11 = vmul.f32 %v17848_v48, %v17848_v48  ;;  %v17885_v56 = vrot.slane %v17547_v9, %v18732_v23 }
 0xbb7   : > { %10735 = vadd.xlane.f32.xlu0 %v10678_v11 }
 0xbbe   : > { %v10581_v47 = vpop.xlane.xlu1 %10580 }
 0xbbf   : > { %v10617_v34 = vmul.f32 0.0078125, %v10581_v47 }
 0xbc0   : > { %v10583_v35 = vpop.xlane.xlu0 %10582 }
 0xbc1   : > { %v17855_v31 = vsub.f32 %v17697_v57, %v10617_v34  ;;  %v10618_v8 = vmul.f32 0.0078125, %v10583_v35 }
 0xbc2   : > { %v10585_v17 = vpop.xlane.xlu1 %10584 }
 0xbc3   : > { %v17858_v40 = vsub.f32 %v17702_v6, %v10618_v8  ;;  %v10619_v53 = vmul.f32 0.0078125, %v10585_v17  ;;  %v10681_v4 = vmul.f32 %v17855_v31, %v17855_v31 }
 0xbc4   : > { %v10587_v49 = vpop.xlane.xlu0 %10586 }
 0xbc5   : > { %v17863_v29 = vsub.f32 %v17709_v63, %v10619_v53  ;;  %v10620_v3 = vmul.f32 0.0078125, %v10587_v49  ;;  %10741 = vadd.xlane.f32.xlu1 %v10681_v4  ;;  %v10682_v1 = vmul.f32 %v17858_v40, %v17858_v40 }
 0xbc6   : > { %v10690_v57 = vpop.xlane.xlu1 %10689 }
 0xbc7   : > { %v17868_v15 = vsub.f32 %v17716_v37, %v10620_v3  ;;  %v10751_v52 = vmul.f32 0.0078125, %v10690_v57  ;;  %10743 = vadd.xlane.f32.xlu0 %v10682_v1  ;;  %v10683_v6 = vmul.f32 %v17863_v29, %v17863_v29 }
 0xbc8   : > { %v10692_v51 = vpop.xlane.xlu0 %10691 }
 0xbc9   : > { %v10783_v45 = vadd.f32 1e-05, %v10751_v52  ;;  %v10752_v13 = vmul.f32 0.0078125, %v10692_v51  ;;  %10745 = vadd.xlane.f32.xlu1 %v10683_v6  ;;  %v10684_v63 = vmul.f32 %v17868_v15, %v17868_v15 }
 0xbca   : > { %v10686_v22 = vpop.xlane.xlu1 %10685 }
 0xbcb   : > { %13588 = vrsqrt.f32 %v10783_v45  ;;  %v10784_v28 = vadd.f32 1e-05, %v10752_v13  ;;  %v10749_v16 = vmul.f32 0.0078125, %v10686_v22  ;;  %10747 = vadd.xlane.f32.xlu0 %v10684_v63 }
 0xbcc   : > { %v10688_v37 = vpop.xlane.xlu0 %10687 }
 0xbcd   : > { %13590 = vrsqrt.f32 %v10784_v28  ;;  %v10781_v59 = vadd.f32 1e-05, %v10749_v16  ;;  %v10750_v55 = vmul.f32 0.0078125, %v10688_v37 }
 0xbcf   : > { %13592 = vrsqrt.f32 %v10781_v59  ;;  %v10782_v38 = vadd.f32 1e-05, %v10750_v55 }
 0xbd1   : > { %13594 = vrsqrt.f32 %v10782_v38 }
 0xbd5   : > { %v13589_v50 = vpop.eup %13588 }
 0xbd6   : > { %v10847_v11 = vmul.f32 %v13589_v50, %v17706_v41 }
 0xbd7   : > { %v13591_v47 = vpop.eup %13590 }
 0xbd8   : > { %v10883_v34 = vmul.f32 %v17878_v62, %v10847_v11  ;;  %v10848_v35 = vmul.f32 %v13591_v47, %v17713_v27 }
 0xbd9   : > { %v13593_v8 = vpop.eup %13592 }
 0xbda   : > { %v10919_v17 = vadd.f32 %v17885_v56, %v10883_v34  ;;  %v10884_v53 = vmul.f32 %v17878_v62, %v10848_v35  ;;  %v10845_v4 = vmul.f32 %v13593_v8, %v17720_v39 }
 0xbdb   : > { %v13595_v49 = vpop.eup %13594 }
 0xbdc   : > { %10951 = vst [vmem:[%s17893_s22 + $0x10] sm:$0xff] %v10919_v17  ;;  %v10920_v9 = vadd.f32 %v17885_v56, %v10884_v53  ;;  %v10881_v0 = vmul.f32 %v17878_v62, %v10845_v4  ;;  %v10846_v41 = vmul.f32 %v13595_v49, %v17726_v10 }
 0xbde   : > { %10952 = vst [vmem:[%s17893_s22 + $0x18] sm:$0xff] %v10920_v9  ;;  %v10917_v27 = vadd.f32 %v17885_v56, %v10881_v0  ;;  %v10882_v3 = vmul.f32 %v17878_v62, %v10846_v41 }
 0xbe0   : > { %10949 = vst [vmem:[%s17893_s22] sm:$0xff] %v10917_v27  ;;  %v10918_v39 = vadd.f32 %v17885_v56, %v10882_v3 }
 0xbe2   : > { %10950 = vst [vmem:[%s17893_s22 + $0x8] sm:$0xff] %v10918_v39 }
 0xbee   : > { %v10698_v1 = vpop.xlane.xlu1 %10697 }
 0xbef   : > { %v10755_v57 = vmul.f32 0.0078125, %v10698_v1 }
 0xbf0   : > { %v10700_v52 = vpop.xlane.xlu0 %10699 }
 0xbf1   : > { %v10787_v6 = vadd.f32 1e-05, %v10755_v57  ;;  %v10756_v51 = vmul.f32 0.0078125, %v10700_v52 }
 0xbf2   : > { %v10694_v45 = vpop.xlane.xlu1 %10693 }
 0xbf3   : > { %13596 = vrsqrt.f32 %v10787_v6  ;;  %v10788_v13 = vadd.f32 1e-05, %v10756_v51  ;;  %v10753_v63 = vmul.f32 0.0078125, %v10694_v45 }
 0xbf4   : > { %v10696_v22 = vpop.xlane.xlu0 %10695 }
 0xbf5   : > { %13598 = vrsqrt.f32 %v10788_v13  ;;  %v10785_v10 = vadd.f32 1e-05, %v10753_v63  ;;  %v10754_v28 = vmul.f32 0.0078125, %v10696_v22 }
 0xbf7   : > { %13600 = vrsqrt.f32 %v10785_v10  ;;  %v10786_v16 = vadd.f32 1e-05, %v10754_v28 }
 0xbf9   : > { %13602 = vrsqrt.f32 %v10786_v16 }
 0xbfd   : > { %v13597_v37 = vpop.eup %13596 }
 0xbfe   : > { %v10851_v59 = vmul.f32 %v13597_v37, %v17735_v2  ;;  %v10706_v55 = vpop.xlane.xlu1 %10705 }
 0xbff   : > { %v13599_v38 = vpop.eup %13598  ;;  %v10759_v58 = vmul.f32 0.0078125, %v10706_v55 }
 0xc00   : > { %v10887_v50 = vmul.f32 %v17878_v62, %v10851_v59  ;;  %v10852_v23 = vmul.f32 %v13599_v38, %v17738_v14  ;;  %v10708_v11 = vpop.xlane.xlu0 %10707 }
 0xc01   : > { %v13601_v47 = vpop.eup %13600  ;;  %v10791_v34 = vadd.f32 1e-05, %v10759_v58  ;;  %v10760_v35 = vmul.f32 0.0078125, %v10708_v11 }
 0xc02   : > { %v10923_v8 = vadd.f32 %v17885_v56, %v10887_v50  ;;  %v10888_v17 = vmul.f32 %v17878_v62, %v10852_v23  ;;  %v10849_v53 = vmul.f32 %v13601_v47, %v17743_v20  ;;  %v10702_v2 = vpop.xlane.xlu1 %10701 }
 0xc03   : > { %v13603_v4 = vpop.eup %13602  ;;  %13604 = vrsqrt.f32 %v10791_v34  ;;  %v10792_v49 = vadd.f32 1e-05, %v10760_v35  ;;  %v10757_v9 = vmul.f32 0.0078125, %v10702_v2 }
 0xc04   : > { %10955 = vst [vmem:[%s17893_s22 + $0x30] sm:$0xff] %v10923_v8  ;;  %v10924_v14 = vadd.f32 %v17885_v56, %v10888_v17  ;;  %v10885_v0 = vmul.f32 %v17878_v62, %v10849_v53  ;;  %v10850_v41 = vmul.f32 %v13603_v4, %v17748_v60  ;;  %v10704_v27 = vpop.xlane.xlu0 %10703 }
 0xc05   : > { %13606 = vrsqrt.f32 %v10792_v49  ;;  %v10789_v3 = vadd.f32 1e-05, %v10757_v9  ;;  %v10758_v39 = vmul.f32 0.0078125, %v10704_v27 }
 0xc06   : > { %10956 = vst [vmem:[%s17893_s22 + $0x38] sm:$0xff] %v10924_v14  ;;  %v10921_v20 = vadd.f32 %v17885_v56, %v10885_v0  ;;  %v10886_v1 = vmul.f32 %v17878_v62, %v10850_v41 }
 0xc07   : > { %13608 = vrsqrt.f32 %v10789_v3  ;;  %v10790_v57 = vadd.f32 1e-05, %v10758_v39 }
 0xc08   : > { %10953 = vst [vmem:[%s17893_s22 + $0x20] sm:$0xff] %v10921_v20  ;;  %v10922_v52 = vadd.f32 %v17885_v56, %v10886_v1 }
 0xc09   : > { %13610 = vrsqrt.f32 %v10790_v57 }
 0xc0a   : > { %10954 = vst [vmem:[%s17893_s22 + $0x28] sm:$0xff] %v10922_v52 }
 0xc0d   : > { %v13605_v6 = vpop.eup %13604 }
 0xc0e   : > { %v10855_v51 = vmul.f32 %v13605_v6, %v17755_v54  ;;  %v10714_v60 = vpop.xlane.xlu1 %10713 }
 0xc0f   : > { %v13607_v45 = vpop.eup %13606  ;;  %v10763_v13 = vmul.f32 0.0078125, %v10714_v60 }
 0xc10   : > { %v10891_v63 = vmul.f32 %v17878_v62, %v10855_v51  ;;  %v10856_v22 = vmul.f32 %v13607_v45, %v17758_v42  ;;  %v10716_v10 = vpop.xlane.xlu0 %10715 }
 0xc11   : > { %v13609_v28 = vpop.eup %13608  ;;  %v10795_v16 = vadd.f32 1e-05, %v10763_v13  ;;  %v10764_v37 = vmul.f32 0.0078125, %v10716_v10 }
 0xc12   : > { %v10927_v59 = vadd.f32 %v17885_v56, %v10891_v63  ;;  %v10892_v55 = vmul.f32 %v17878_v62, %v10856_v22  ;;  %v10853_v38 = vmul.f32 %v13609_v28, %v17763_v5  ;;  %v10710_v54 = vpop.xlane.xlu1 %10709 }
 0xc13   : > { %v13611_v58 = vpop.eup %13610  ;;  %13612 = vrsqrt.f32 %v10795_v16  ;;  %v10796_v50 = vadd.f32 1e-05, %v10764_v37  ;;  %v10761_v23 = vmul.f32 0.0078125, %v10710_v54 }
 0xc14   : > { %10959 = vst [vmem:[%s17893_s22 + $0x50] sm:$0xff] %v10927_v59  ;;  %v10928_v42 = vadd.f32 %v17885_v56, %v10892_v55  ;;  %v10889_v11 = vmul.f32 %v17878_v62, %v10853_v38  ;;  %v10854_v47 = vmul.f32 %v13611_v58, %v17768_v43  ;;  %v10712_v34 = vpop.xlane.xlu0 %10711 }
 0xc15   : > { %13614 = vrsqrt.f32 %v10796_v50  ;;  %v10793_v35 = vadd.f32 1e-05, %v10761_v23  ;;  %v10762_v8 = vmul.f32 0.0078125, %v10712_v34 }
 0xc16   : > { %10960 = vst [vmem:[%s17893_s22 + $0x58] sm:$0xff] %v10928_v42  ;;  %v10925_v5 = vadd.f32 %v17885_v56, %v10889_v11  ;;  %v10890_v17 = vmul.f32 %v17878_v62, %v10854_v47 }
 0xc17   : > { %13616 = vrsqrt.f32 %v10793_v35  ;;  %v10794_v53 = vadd.f32 1e-05, %v10762_v8 }
 0xc18   : > { %10957 = vst [vmem:[%s17893_s22 + $0x40] sm:$0xff] %v10925_v5  ;;  %v10926_v2 = vadd.f32 %v17885_v56, %v10890_v17 }
 0xc19   : > { %13618 = vrsqrt.f32 %v10794_v53 }
 0xc1a   : > { %10958 = vst [vmem:[%s17893_s22 + $0x48] sm:$0xff] %v10926_v2 }
 0xc1d   : > { %v13613_v4 = vpop.eup %13612 }
 0xc1e   : > { %v10859_v43 = vmul.f32 %v13613_v4, %v17775_v36 }
 0xc1f   : > { %v13615_v49 = vpop.eup %13614  ;;  %v10722_v9 = vpop.xlane.xlu1 %10721 }
 0xc20   : > { %v10895_v14 = vmul.f32 %v17878_v62, %v10859_v43  ;;  %v10860_v0 = vmul.f32 %v13615_v49, %v17778_v18  ;;  %v10767_v41 = vmul.f32 0.0078125, %v10722_v9 }
 0xc21   : > { %v13617_v27 = vpop.eup %13616  ;;  %v10724_v3 = vpop.xlane.xlu0 %10723 }
 0xc22   : > { %v10931_v39 = vadd.f32 %v17885_v56, %v10895_v14  ;;  %v10896_v20 = vmul.f32 %v17878_v62, %v10860_v0  ;;  %v10857_v1 = vmul.f32 %v13617_v27, %v17783_v7  ;;  %v10799_v57 = vadd.f32 1e-05, %v10767_v41 }
 0xc23   : > { %v13619_v52 = vpop.eup %13618  ;;  %v10768_v6 = vmul.f32 0.0078125, %v10724_v3  ;;  %v10718_v36 = vpop.xlane.xlu1 %10717 }
 0xc24   : > { %10963 = vst [vmem:[%s17893_s22 + $0x70] sm:$0xff] %v10931_v39  ;;  %v10932_v51 = vadd.f32 %v17885_v56, %v10896_v20  ;;  %v10893_v18 = vmul.f32 %v17878_v62, %v10857_v1  ;;  %v10858_v60 = vmul.f32 %v13619_v52, %v17788_v30  ;;  %13620 = vrsqrt.f32 %v10799_v57 }
 0xc25   : > { %v10800_v45 = vadd.f32 1e-05, %v10768_v6  ;;  %v10765_v13 = vmul.f32 0.0078125, %v10718_v36  ;;  %v10720_v63 = vpop.xlane.xlu0 %10719 }
 0xc26   : > { %10964 = vst [vmem:[%s17893_s22 + $0x78] sm:$0xff] %v10932_v51  ;;  %v10929_v7 = vadd.f32 %v17885_v56, %v10893_v18  ;;  %v10894_v22 = vmul.f32 %v17878_v62, %v10858_v60  ;;  %v10766_v10 = vmul.f32 0.0078125, %v10720_v63 }
 0xc27   : > { %13622 = vrsqrt.f32 %v10800_v45  ;;  %v10797_v28 = vadd.f32 1e-05, %v10765_v13 }
 0xc28   : > { %10961 = vst [vmem:[%s17893_s22 + $0x60] sm:$0xff] %v10929_v7  ;;  %v10930_v16 = vadd.f32 %v17885_v56, %v10894_v22  ;;  %v10798_v37 = vadd.f32 1e-05, %v10766_v10 }
 0xc29   : > { %13624 = vrsqrt.f32 %v10797_v28 }
 0xc2a   : > { %10962 = vst [vmem:[%s17893_s22 + $0x68] sm:$0xff] %v10930_v16  ;;  %13626 = vrsqrt.f32 %v10798_v37 }
 0xc2e   : > { %v13621_v30 = vpop.eup %13620  ;;  %v10730_v59 = vpop.xlane.xlu1 %10729 }
 0xc2f   : > { %v10863_v55 = vmul.f32 %v13621_v30, %v17795_v33  ;;  %v10771_v38 = vmul.f32 0.0078125, %v10730_v59 }
 0xc30   : > { %v10732_v54 = vpop.xlane.xlu0 %10731 }
 0xc31   : > { %v13623_v58 = vpop.eup %13622  ;;  %v10899_v50 = vmul.f32 %v17878_v62, %v10863_v55  ;;  %v10803_v23 = vadd.f32 1e-05, %v10771_v38  ;;  %v10772_v42 = vmul.f32 0.0078125, %v10732_v54 }
 0xc32   : > { %v10864_v11 = vmul.f32 %v13623_v58, %v17798_v12  ;;  %v10726_v47 = vpop.xlane.xlu1 %10725 }
 0xc33   : > { %v13625_v34 = vpop.eup %13624  ;;  %v10935_v35 = vadd.f32 %v17885_v56, %v10899_v50  ;;  %13628 = vrsqrt.f32 %v10803_v23  ;;  %v10804_v8 = vadd.f32 1e-05, %v10772_v42  ;;  %v10769_v5 = vmul.f32 0.0078125, %v10726_v47 }
 0xc34   : > { %v13627_v17 = vpop.eup %13626  ;;  %v10900_v33 = vmul.f32 %v17878_v62, %v10864_v11  ;;  %v10861_v53 = vmul.f32 %v13625_v34, %v17803_v19  ;;  %v10728_v2 = vpop.xlane.xlu0 %10727 }
 0xc35   : > { %10967 = vst [vmem:[%s17893_s22 + $0x90] sm:$0xff] %v10935_v35  ;;  %v10862_v4 = vmul.f32 %v13627_v17, %v17808_v61  ;;  %13630 = vrsqrt.f32 %v10804_v8  ;;  %v10801_v12 = vadd.f32 1e-05, %v10769_v5  ;;  %v10770_v43 = vmul.f32 0.0078125, %v10728_v2 }
 0xc36   : > { %v10936_v49 = vadd.f32 %v17885_v56, %v10900_v33  ;;  %v10897_v9 = vmul.f32 %v17878_v62, %v10861_v53 }
 0xc37   : > { %v10898_v14 = vmul.f32 %v17878_v62, %v10862_v4  ;;  %13632 = vrsqrt.f32 %v10801_v12  ;;  %v10802_v0 = vadd.f32 1e-05, %v10770_v43 }
 0xc38   : > { %10968 = vst [vmem:[%s17893_s22 + $0x98] sm:$0xff] %v10936_v49  ;;  %v10933_v19 = vadd.f32 %v17885_v56, %v10897_v9 }
 0xc39   : > { %v10934_v41 = vadd.f32 %v17885_v56, %v10898_v14  ;;  %13634 = vrsqrt.f32 %v10802_v0 }
 0xc3a   : > { %10965 = vst [vmem:[%s17893_s22 + $0x80] sm:$0xff] %v10933_v19 }
 0xc3b   : > { %10966 = vst [vmem:[%s17893_s22 + $0x88] sm:$0xff] %v10934_v41 }
 0xc3d   : > { %v13629_v61 = vpop.eup %13628 }
 0xc3e   : > { %v10867_v27 = vmul.f32 %v13629_v61, %v17815_v21  ;;  %v10738_v3 = vpop.xlane.xlu1 %10737 }
 0xc3f   : > { %v13631_v39 = vpop.eup %13630  ;;  %v10775_v20 = vmul.f32 0.0078125, %v10738_v3 }
 0xc40   : > { %v10903_v1 = vmul.f32 %v17878_v62, %v10867_v27  ;;  %v10868_v57 = vmul.f32 %v13631_v39, %v17818_v26  ;;  %v10740_v52 = vpop.xlane.xlu0 %10739 }
 0xc41   : > { %v13633_v6 = vpop.eup %13632  ;;  %v10807_v36 = vadd.f32 1e-05, %v10775_v20  ;;  %v10776_v51 = vmul.f32 0.0078125, %v10740_v52 }
 0xc42   : > { %v10939_v18 = vadd.f32 %v17885_v56, %v10903_v1  ;;  %v10904_v60 = vmul.f32 %v17878_v62, %v10868_v57  ;;  %v10865_v45 = vmul.f32 %v13633_v6, %v17823_v32  ;;  %v10734_v21 = vpop.xlane.xlu1 %10733 }
 0xc43   : > { %v13635_v13 = vpop.eup %13634  ;;  %13636 = vrsqrt.f32 %v10807_v36  ;;  %v10808_v63 = vadd.f32 1e-05, %v10776_v51  ;;  %v10773_v7 = vmul.f32 0.0078125, %v10734_v21 }
 0xc44   : > { %10971 = vst [vmem:[%s17893_s22 + $0xb0] sm:$0xff] %v10939_v18  ;;  %v10940_v26 = vadd.f32 %v17885_v56, %v10904_v60  ;;  %v10901_v22 = vmul.f32 %v17878_v62, %v10865_v45  ;;  %v10866_v10 = vmul.f32 %v13635_v13, %v17828_v44  ;;  %v10736_v28 = vpop.xlane.xlu0 %10735 }
 0xc45   : > { %13638 = vrsqrt.f32 %v10808_v63  ;;  %v10805_v16 = vadd.f32 1e-05, %v10773_v7  ;;  %v10774_v37 = vmul.f32 0.0078125, %v10736_v28 }
 0xc46   : > { %10972 = vst [vmem:[%s17893_s22 + $0xb8] sm:$0xff] %v10940_v26  ;;  %v10937_v32 = vadd.f32 %v17885_v56, %v10901_v22  ;;  %v10902_v30 = vmul.f32 %v17878_v62, %v10866_v10 }
 0xc47   : > { %13640 = vrsqrt.f32 %v10805_v16  ;;  %v10806_v59 = vadd.f32 1e-05, %v10774_v37 }
 0xc48   : > { %10969 = vst [vmem:[%s17893_s22 + $0xa0] sm:$0xff] %v10937_v32  ;;  %v10938_v55 = vadd.f32 %v17885_v56, %v10902_v30 }
 0xc49   : > { %13642 = vrsqrt.f32 %v10806_v59 }
 0xc4a   : > { %10970 = vst [vmem:[%s17893_s22 + $0xa8] sm:$0xff] %v10938_v55 }
 0xc4d   : > { %v13637_v38 = vpop.eup %13636 }
 0xc4e   : > { %v10871_v44 = vmul.f32 %v13637_v38, %v17835_v25 }
 0xc4f   : > { %v13639_v54 = vpop.eup %13638 }
 0xc50   : > { %v10907_v58 = vmul.f32 %v17878_v62, %v10871_v44  ;;  %v10872_v50 = vmul.f32 %v13639_v54, %v17838_v46 }
 0xc51   : > { %v13641_v23 = vpop.eup %13640 }
 0xc52   : > { %v10943_v42 = vadd.f32 %v17885_v56, %v10907_v58  ;;  %v10908_v11 = vmul.f32 %v17878_v62, %v10872_v50  ;;  %v10869_v47 = vmul.f32 %v13641_v23, %v17843_v24  ;;  %v10742_v34 = vpop.xlane.xlu1 %10741 }
 0xc53   : > { %v13643_v35 = vpop.eup %13642  ;;  %v10777_v8 = vmul.f32 0.0078125, %v10742_v34 }
 0xc54   : > { %10975 = vst [vmem:[%s17893_s22 + $0xd0] sm:$0xff] %v10943_v42  ;;  %v10944_v25 = vadd.f32 %v17885_v56, %v10908_v11  ;;  %v10905_v5 = vmul.f32 %v17878_v62, %v10869_v47  ;;  %v10870_v17 = vmul.f32 %v13643_v35, %v17848_v48  ;;  %v10744_v33 = vpop.xlane.xlu0 %10743 }
 0xc55   : > { %v10809_v46 = vadd.f32 1e-05, %v10777_v8  ;;  %v10778_v53 = vmul.f32 0.0078125, %v10744_v33 }
 0xc56   : > { %10976 = vst [vmem:[%s17893_s22 + $0xd8] sm:$0xff] %v10944_v25  ;;  %v10941_v2 = vadd.f32 %v17885_v56, %v10905_v5  ;;  %v10906_v24 = vmul.f32 %v17878_v62, %v10870_v17  ;;  %v10746_v4 = vpop.xlane.xlu1 %10745 }
 0xc57   : > { %13644 = vrsqrt.f32 %v10809_v46  ;;  %v10810_v12 = vadd.f32 1e-05, %v10778_v53  ;;  %v10779_v43 = vmul.f32 0.0078125, %v10746_v4 }
 0xc58   : > { %10973 = vst [vmem:[%s17893_s22 + $0xc0] sm:$0xff] %v10941_v2  ;;  %v10942_v49 = vadd.f32 %v17885_v56, %v10906_v24  ;;  %v10748_v9 = vpop.xlane.xlu0 %10747 }
 0xc59   : > { %13646 = vrsqrt.f32 %v10810_v12  ;;  %v10811_v14 = vadd.f32 1e-05, %v10779_v43  ;;  %v10780_v48 = vmul.f32 0.0078125, %v10748_v9 }
 0xc5a   : > { %10974 = vst [vmem:[%s17893_s22 + $0xc8] sm:$0xff] %v10942_v49 }
 0xc5b   : > { %13648 = vrsqrt.f32 %v10811_v14  ;;  %v10812_v0 = vadd.f32 1e-05, %v10780_v48 }
 0xc5d   : > { %13650 = vrsqrt.f32 %v10812_v0 }
 0xc61   : > { %v13645_v19 = vpop.eup %13644 }
 0xc62   : > { %v10873_v41 = vmul.f32 %v13645_v19, %v17855_v31 }
 0xc63   : > { %v13647_v61 = vpop.eup %13646 }
 0xc64   : > { %v10909_v27 = vmul.f32 %v17878_v62, %v10873_v41  ;;  %v10874_v3 = vmul.f32 %v13647_v61, %v17858_v40 }
 0xc65   : > { %v13649_v39 = vpop.eup %13648 }
 0xc66   : > { %v10945_v20 = vadd.f32 %v17885_v56, %v10909_v27  ;;  %v10910_v1 = vmul.f32 %v17878_v62, %v10874_v3  ;;  %v10875_v57 = vmul.f32 %v13649_v39, %v17863_v29 }
 0xc67   : > { %v13651_v52 = vpop.eup %13650 }
 0xc68   : > { %10977 = vst [vmem:[%s17893_s22 + $0xe0] sm:$0xff] %v10945_v20  ;;  %v10946_v6 = vadd.f32 %v17885_v56, %v10910_v1  ;;  %v10911_v31 = vmul.f32 %v17878_v62, %v10875_v57  ;;  %v10876_v36 = vmul.f32 %v13651_v52, %v17868_v15 }
 0xc6a   : > { %10978 = vst [vmem:[%s17893_s22 + $0xe8] sm:$0xff] %v10946_v6  ;;  %v10947_v40 = vadd.f32 %v17885_v56, %v10911_v31  ;;  %v10912_v51 = vmul.f32 %v17878_v62, %v10876_v36 }
 0xc6c   : > { %10979 = vst [vmem:[%s17893_s22 + $0xf0] sm:$0xff] %v10947_v40  ;;  %v10948_v29 = vadd.f32 %v17885_v56, %v10912_v51 }
 0xc6e   : > { %10980 = vst [vmem:[%s17893_s22 + $0xf8] sm:$0xff] %v10948_v29 }
 0xc6f   : > { %13808 = shalt.err (!%p13805_p0)
}
 0xc70   : > { %s13809_s24 = scalar_lea.hbm %s18019_s16, 4096  ;;  %s13813_s14 = scalar_lea.hbm %s18078_s9, 8192 }
 0xc71   : > { %p13810_p6 = scmp.ne.s32.totalorder %s18019_s16, %s13809_s24  ;;  %p13814_p13 = scmp.lt.u32.totalorder %s18019_s16, %s18078_s9 }
 0xc72   : > { %p13815_p12 = scmp.lt.u32.totalorder %s13813_s14, %s13809_s24  ;;  %p13817_p2 = scmp.lt.u32.totalorder %s13809_s24, %s18019_s16 }
 0xc73   : > { %p13811_p9 = pnand %p13810_p6, %p18733_p3 }
 0xc74   : > { %p13816_p1 = por %p13815_p12, %p13814_p13 }
 0xc75   : > { %p13812_p10 = pneg %p13811_p9 }
 0xc76   : > { %p13818_p4 = por %p13817_p2, %p13816_p1 }
 0xc78   : > { %p13819_p7 = pnand %p13818_p4, %p13812_p10 }
 0xc7a   : > { %13822 = shalt.err (!%p13819_p7)
}
 0xc7b   : > { %s13885_s29 = smov 128   ;;  %s13886_s22 = smov 8  }
 0xc7c   : > { %12906 = dma.vmem_to_hbm [thread:$0]  (%p18733_p3), %s18021_s23, 4096, %s18019_s16, %s18028_s13, %s13885_s29, %s13885_s29, %s13886_s22  }
 0xc7d PF: > { %s18734_s27 = sld [smem:[#allocation19_spill]]  ;;  %p12938_p8 = scmp.ge.s32.totalorder %s13869_s12, 2 }
 0xc7e   : > { %s11010_s18 = sand.u32 1, %s13857_s30  }
 0xc7f   : > { %s11011_s26 = scalar_lea.sflag [#allocation4], %s11010_s18 }
 0xc83   : > { %p18735_p11 = scmp.ne.s32.totalorder %s18734_s27, 0 }
 0xc85   : > { %p12925_p5 = pnand %p12938_p8, %p18735_p11 }
 0xc87   : > { %13852 = dma.done.wait (!%p12925_p5), %s11011_s26, 4096  }
 0xc88   : > { %13854 = vsyncadd (!%p12925_p5), %s11011_s26, 4294963200  ;;  %s18736_s12 = sld [smem:[#allocation17_spill]]  ;;  %s18737_s25 = sld [smem:[#allocation16_spill]] }
 0xc89   : > { %s18738_s11 = sld [smem:[#allocation18_spill]]  ;;  %s18739_s30 = smov %s13861_s10 }
 0xc8e   : > { %p22_p0 = scmp.ge.s32.totalorder %s18736_s12, 4   ;;  %s18740_s10 = smov %s18737_s25 }
 0xc90   :  { %24 = sbr.rel (!%p22_p0) target bundleno = 8 (0x8), region = 118 }
 0xc97   :  { %11016 = vsyncpa [#allocation3], 1 }
 0xc98   :  { %11018 = vsyncpa [#allocation3 + $0x1], 1 }
 0xc99   :  { %11019 = vsyncpa [#allocation6], 1 }
 0xc9a   :  { %11020 = vsyncpa [#allocation9], 1 }
 0xc9b   :  { %11021 = vsyncpa [#allocation4], 1 }
 0xc9c   :  { %11023 = vsyncpa [#allocation4 + $0x1], 1 }

</bundles_post_ra>
